<compile_context>
chip_gen: v5e
topology: v5e:2x2
jax: 0.10.0
libtpu: 0.0.40
codegen_flags: <defaults>
</compile_context>

<pallas_src>
import functools

import numpy as np
import jax
import jax.numpy as jnp
from jax import lax
from jax.experimental import pallas as pl
from jax.experimental.pallas import tpu as pltpu


# ----------------------------- configuration -------------------------------
SR = 8000
N_FFT = 64
HOP = 16
CHANNELS = 2
FC_DIM = 8
NUM_BAND_SEQ = 2
BANDS = [1000, 2000]
NUM_SUBBANDS = [2, 2, 1]


def _quantize_hz2bins(sr, n_fft, bands, num_subbands):
    assert len(bands) + 1 == len(num_subbands)
    bands = [0] + bands + [int(sr / 2)]
    bands = np.array(bands) * n_fft / sr
    freq_bins = []
    for i in range(len(num_subbands)):
        start_freq = int(bands[i])
        end_freq = int(bands[i + 1])
        num_bands = num_subbands[i]
        interval = (end_freq - start_freq) / num_bands
        for n in range(num_bands):
            freq_bins.append(int(start_freq + interval * n))
    freq_bins.append(int(n_fft / 2) + 1)
    return freq_bins


BINS = np.array(_quantize_hz2bins(SR, N_FFT, BANDS, NUM_SUBBANDS))
INTERVALS = (BINS[1:] - BINS[:-1]).tolist()
K_SUB = len(INTERVALS)                 # number of sub-bands
N_FEAT = CHANNELS * FC_DIM             # fc_dim * channels (LSTM feature size)
HID = N_FEAT                           # LSTM hidden size
F_BINS = N_FFT // 2 + 1
assert sum(INTERVALS) == F_BINS

C_RI = 2 * CHANNELS                    # (c, ri) packed width per freq bin
D_SPEC = F_BINS * C_RI                 # 132 = total spectral feature width
HID4 = 4 * N_FEAT                      # mask-est hidden width per band
EPS = 1e-5
UNROLL_MAX_T = 64                      # unroll the LSTM recurrence below this

# per-band column ranges inside the packed (f, c, ri) spectral rows
SPLIT_SEGS = [(int(BINS[i]) * C_RI, int(BINS[i + 1]) * C_RI)
              for i in range(K_SUB)]
# per-band column ranges inside the packed (k, n) feature rows
MASK_IN_SEGS = [(i * N_FEAT, (i + 1) * N_FEAT) for i in range(K_SUB)]

_COMPILER_PARAMS = pltpu.CompilerParams(
    dimension_semantics=("parallel",),
    vmem_limit_bytes=32 * 1024 * 1024,
)


def _row_block(m, cap=512):
    """Row-block size: whole array when small, (8,*)-aligned tiles otherwise."""
    return m if m <= cap else cap


# ----------------------------- Pallas kernels ------------------------------
def _seg_ln(x, segs, eps):
    """Per-segment (static column ranges) zero-mean / unit-var normalization.
    LayerNorm gamma/beta are folded into the following Linear's weights."""
    outs = []
    for lo, hi in segs:
        seg = x[:, lo:hi]
        mean = jnp.mean(seg, axis=1, keepdims=True)
        d = seg - mean
        var = jnp.mean(d * d, axis=1, keepdims=True)
        outs.append(d * lax.rsqrt(var + eps))
    return outs


def _bandsplit_kernel(x_ref, w_ref, b_ref, o_ref, *, segs, eps):
    # x: (bm, 132) packed (f, c, ri) rows; w: block-diagonal (132, K*N).
    x = x_ref[...]
    xn = _seg_ln(x, segs, eps)
    y = b_ref[...]
    for (lo, hi), xs in zip(segs, xn):
        y = y + jnp.dot(xs, w_ref[lo:hi, :], preferred_element_type=jnp.float32)
    o_ref[...] = y


def _maskest_kernel(x_ref, w1_ref, b1_ref, w2_ref, b2_ref, o_ref, *, segs, eps):
    # x: (bm, K*N); w1: block-diag (K*N, K*4N); w2: block-diag (K*4N, 132).
    x = x_ref[...]
    xn = _seg_ln(x, segs, eps)
    h = b1_ref[...]
    for (lo, hi), xs in zip(segs, xn):
        h = h + jnp.dot(xs, w1_ref[lo:hi, :], preferred_element_type=jnp.float32)
    h = jnp.tanh(h)
    o_ref[...] = (jnp.dot(h, w2_ref[...], preferred_element_type=jnp.float32)
                  + b2_ref[...])


def _cmul_kernel(mr_ref, mi_ref, sr_ref, si_ref, er_ref, ei_ref, mag_ref):
    mr, mi = mr_ref[...], mi_ref[...]
    sr, si = sr_ref[...], si_ref[...]
    er_ref[...] = mr * sr - mi * si
    ei_ref[...] = mr * si + mi * sr
    mag_ref[...] = jnp.sqrt(mr * mr + mi * mi)


def _bilstm_block_kernel(z_ref, gng_ref, gnb_ref, wih_ref, bih_ref,
                         whhf_ref, whhr_ref, fcw_ref, fcb_ref, o_ref,
                         gx_sc, hf_sc, hr_sc,
                         *, gn_axes, hid, eps, unroll):
    """Fused GroupNorm + bidirectional LSTM + Linear + residual.

    z_ref / o_ref: (S, 1, A, N) sequence-major block (one batch element).
    The LSTM runs over axis 0 (length S) with batch A; GroupNorm statistics
    are taken over `gn_axes` (per sub-band channel).  Gates are pre-permuted
    to (i, f, o | g).  Residual: o = fc([h_fwd, h_rev]) + z.

    Structure:
      1. one (S*A, N) x (N, 8H) input-projection matmul (fwd || rev gates),
      2. per-step (A, H) x (H, 4H) recurrent matmuls only,
      3. one (S*A, 2H) x (2H, N) fc matmul + bias + residual, one block store.
    """
    S = z_ref.shape[0]
    A = z_ref.shape[2]
    N = z_ref.shape[3]
    H = hid

    # ---- GroupNorm (per sub-band channel), gamma/beta applied here ----
    z4 = z_ref[...]                                     # (S, 1, A, N)
    s = z4
    for ax in gn_axes:
        s = jnp.sum(s, axis=ax, keepdims=True)
    cnt = 1.0
    for ax in gn_axes:
        cnt = cnt * z4.shape[ax]
    mean = s / cnt
    d = z4 - mean
    v = d * d
    for ax in gn_axes:
        v = jnp.sum(v, axis=ax, keepdims=True)
    xg = d * lax.rsqrt(v / cnt + eps) * gng_ref[...] + gnb_ref[...]

    # ---- input projection for every timestep & both directions at once ----
    xg2 = xg.reshape(S * A, N)
    gx_all = (jnp.dot(xg2, wih_ref[...], preferred_element_type=jnp.float32)
              + bih_ref[...])                           # (S*A, 8H)
    gx_sc[...] = gx_all.reshape(S, A, 8 * H)

    whhf = whhf_ref[...]                                # (H, 4H)
    whhr = whhr_ref[...]                                # (H, 4H)

    def cell(gates, c_prev):
        ifo = jax.nn.sigmoid(gates[:, :3 * H])          # one contiguous sigmoid
        g = jnp.tanh(gates[:, 3 * H:])
        i = ifo[:, 0 * H:1 * H]
        f = ifo[:, 1 * H:2 * H]
        o = ifo[:, 2 * H:3 * H]
        c = f * c_prev + i * g
        h = o * jnp.tanh(c)
        return h, c

    def fwd_step(t, carry):
        h, c = carry
        gates = gx_sc[t][:, 0:4 * H] + jnp.dot(
            h, whhf, preferred_element_type=jnp.float32)
        h, c = cell(gates, c)
        hf_sc[t] = h
        return h, c

    def rev_step(s_, carry):
        h, c = carry
        t = S - 1 - s_
        gates = gx_sc[t][:, 4 * H:8 * H] + jnp.dot(
            h, whhr, preferred_element_type=jnp.float32)
        h, c = cell(gates, c)
        hr_sc[t] = h
        return h, c

    zero = jnp.zeros((A, H), jnp.float32)
    if unroll:
        carry = (zero, zero)
        for t in range(S):
            carry = fwd_step(t, carry)
        carry = (zero, zero)
        for s_ in range(S):
            carry = rev_step(s_, carry)
    else:
        lax.fori_loop(0, S, fwd_step, (zero, zero))
        lax.fori_loop(0, S, rev_step, (zero, zero))

    # ---- epilogue: fc([h_fwd, h_rev]) + bias + residual, one contraction ----
    hcat = jnp.concatenate([hf_sc[...], hr_sc[...]], axis=-1)   # (S, A, 2H)
    y = (jnp.dot(hcat.reshape(S * A, 2 * H), fcw_ref[...],
                 preferred_element_type=jnp.float32)
         + fcb_ref[...] + z4.reshape(S * A, N))
    o_ref[...] = y.reshape(S, 1, A, N)


# ------------------------------ kernel wrappers ------------------------------
def bandsplit_apply(x, w, b):
    M, D = x.shape
    out = w.shape[1]
    bm = _row_block(M)
    return pl.pallas_call(
        functools.partial(_bandsplit_kernel, segs=SPLIT_SEGS, eps=EPS),
        grid=(pl.cdiv(M, bm),),
        in_specs=[pl.BlockSpec((bm, D), lambda i: (i, 0)),
                  pl.BlockSpec((D, out), lambda i: (0, 0)),
                  pl.BlockSpec((1, out), lambda i: (0, 0))],
        out_specs=pl.BlockSpec((bm, out), lambda i: (i, 0)),
        out_shape=jax.ShapeDtypeStruct((M, out), jnp.float32),
        compiler_params=_COMPILER_PARAMS,
    )(x, w, b)


def maskest_apply(x, w1, b1, w2, b2):
    M, D = x.shape
    hid_all = w1.shape[1]
    out = w2.shape[1]
    bm = _row_block(M)
    return pl.pallas_call(
        functools.partial(_maskest_kernel, segs=MASK_IN_SEGS, eps=EPS),
        grid=(pl.cdiv(M, bm),),
        in_specs=[pl.BlockSpec((bm, D), lambda i: (i, 0)),
                  pl.BlockSpec((D, hid_all), lambda i: (0, 0)),
                  pl.BlockSpec((1, hid_all), lambda i: (0, 0)),
                  pl.BlockSpec((hid_all, out), lambda i: (0, 0)),
                  pl.BlockSpec((1, out), lambda i: (0, 0))],
        out_specs=pl.BlockSpec((bm, out), lambda i: (i, 0)),
        out_shape=jax.ShapeDtypeStruct((M, out), jnp.float32),
        compiler_params=_COMPILER_PARAMS,
    )(x, w1, b1, w2, b2)


def complex_mask_apply(mask, spec_c):
    # mask: (BC, F, T, 2) f32; spec_c: (BC, F, T) complex64.  Lane-dense
    # elementwise kernel on (BC, F*T).
    BC, F_, T, _ = mask.shape
    L = F_ * T
    mr = mask[..., 0].reshape(BC, L)
    mi = mask[..., 1].reshape(BC, L)
    sr = jnp.real(spec_c).reshape(BC, L)
    si = jnp.imag(spec_c).reshape(BC, L)
    bm = _row_block(BC)
    spec2 = pl.BlockSpec((bm, L), lambda i: (i, 0))
    er, ei, mag = pl.pallas_call(
        _cmul_kernel,
        grid=(pl.cdiv(BC, bm),),
        in_specs=[spec2, spec2, spec2, spec2],
        out_specs=(spec2, spec2, spec2),
        out_shape=(jax.ShapeDtypeStruct((BC, L), jnp.float32),
                   jax.ShapeDtypeStruct((BC, L), jnp.float32),
                   jax.ShapeDtypeStruct((BC, L), jnp.float32)),
        compiler_params=_COMPILER_PARAMS,
    )(mr, mi, sr, si)
    est = (er + 1j * ei).reshape(BC, F_, T)
    return est, mag.reshape(BC, F_, T)


def bilstm_block(z_sm, p, gn_axes):
    """z_sm: (S, b, A, N) sequence-major.  One fused kernel per call, grid over
    the batch axis b ("parallel" -> sharded across v7x's two TensorCores)."""
    S, b, A, N = z_sm.shape
    H = HID
    unroll = S <= UNROLL_MAX_T

    def full_spec(shape):
        return pl.BlockSpec(shape, lambda i, _n=len(shape): (0,) * _n)

    kernel = functools.partial(_bilstm_block_kernel, gn_axes=gn_axes,
                               hid=H, eps=EPS, unroll=unroll)
    return pl.pallas_call(
        kernel,
        grid=(b,),
        in_specs=[
            pl.BlockSpec((S, 1, A, N), lambda i: (0, i, 0, 0)),
            full_spec(p["gn_g"].shape),
            full_spec(p["gn_b"].shape),
            full_spec(p["w_ih"].shape),
            full_spec(p["b_ih"].shape),
            full_spec(p["w_hh_f"].shape),
            full_spec(p["w_hh_r"].shape),
            full_spec(p["fc_w"].shape),
            full_spec(p["fc_b"].shape),
        ],
        out_specs=pl.BlockSpec((S, 1, A, N), lambda i: (0, i, 0, 0)),
        out_shape=jax.ShapeDtypeStruct((S, b, A, N), jnp.float32),
        scratch_shapes=[pltpu.VMEM((S, A, 8 * H), jnp.float32),  # fwd||rev gate x
                        pltpu.VMEM((S, A, H), jnp.float32),      # h_fwd per step
                        pltpu.VMEM((S, A, H), jnp.float32)],     # h_rev per step
        compiler_params=_COMPILER_PARAMS,
    )(z_sm, p["gn_g"], p["gn_b"], p["w_ih"], p["b_ih"],
      p["w_hh_f"], p["w_hh_r"], p["fc_w"], p["fc_b"])


# ----------------------------- STFT / iSTFT glue ----------------------------
# TODO(synk): FFT has no clean Pallas TPU primitive; STFT/iSTFT use jnp.fft glue.
def hann_window(n):
    k = jnp.arange(n, dtype=jnp.float32)
    return 0.5 - 0.5 * jnp.cos(2.0 * jnp.pi * k / n)


def stft(x, n_fft, hop):
    # matches torch.stft(center=True, pad_mode='reflect', periodic hann,
    # onesided, unnormalized); x: (B, L) -> (B, F, Tframes) complex.
    pad = n_fft // 2
    xp = jnp.pad(x, ((0, 0), (pad, pad)), mode="reflect")
    n_frames = 1 + (xp.shape[1] - n_fft) // hop
    idx = jnp.arange(n_frames)[:, None] * hop + jnp.arange(n_fft)[None, :]
    frames = xp[:, idx] * hann_window(n_fft)            # (B, Tf, n_fft)
    spec = jnp.fft.rfft(frames, axis=-1)                # (B, Tf, F)
    return jnp.transpose(spec, (0, 2, 1))


def istft(spec, n_fft, hop):
    # spec: (B, F, Tf) -> (B, hop*(Tf-1)); vectorized overlap-add using
    # n_fft/hop shifted adds (no per-frame Python loop).
    assert n_fft % hop == 0
    B, _, Tf = spec.shape
    win = hann_window(n_fft)
    frames = jnp.fft.irfft(jnp.transpose(spec, (0, 2, 1)), n=n_fft, axis=-1)
    frames = frames * win                               # (B, Tf, n_fft)
    R = n_fft // hop
    out_len = n_fft + hop * (Tf - 1)
    y = jnp.zeros((B, out_len), jnp.float32)
    wsq = jnp.zeros((out_len,), jnp.float32)
    fr = frames.reshape(B, Tf, R, hop)
    w2 = (win * win).reshape(R, hop)
    for r in range(R):
        y = y.at[:, r * hop:r * hop + Tf * hop].add(
            fr[:, :, r, :].reshape(B, Tf * hop))
        wsq = wsq.at[r * hop:r * hop + Tf * hop].add(jnp.tile(w2[r], Tf))
    y = y / jnp.where(wsq > 1e-11, wsq, 1.0)
    pad = n_fft // 2
    return y[:, pad:out_len - pad]


# ------------------------------- model blocks -------------------------------
def band_seq_module(p, z):
    # z: (b, K, T, N) canonical layout.
    # blstm_seq: sequence over T, batch (b, k), GroupNorm per (b, k).
    z_tm = jnp.transpose(z, (2, 0, 1, 3))                   # (T, b, K, N)
    zhat_tm = bilstm_block(z_tm, p["seq"], gn_axes=(0, 3))  # (T, b, K, N)
    # blstm_band: sequence over K, batch (b, t), GroupNorm per (b, k).
    zhat_bm = jnp.transpose(zhat_tm, (2, 1, 0, 3))          # (K, b, T, N)
    q_bm = bilstm_block(zhat_bm, p["band"], gn_axes=(2, 3))  # (K, b, T, N)
    return jnp.transpose(q_bm, (1, 0, 2, 3))                # (b, K, T, N)


def bsrnn_forward(params, wav):
    b, c, t = wav.shape
    wav2 = wav.reshape(b * c, t)
    spec_c = stft(wav2, N_FFT, HOP)                         # (b*c, F, Tf)
    F_, Tf = spec_c.shape[1], spec_c.shape[2]
    spec_ri = jnp.stack([jnp.real(spec_c), jnp.imag(spec_c)], axis=-1)
    # '(b c) f t ri -> (b t) (f c ri)'  -- lane-dense spectral rows.
    spec_rows = spec_ri.reshape(b, c, F_, Tf, 2).transpose(0, 3, 2, 1, 4)
    spec_rows = spec_rows.reshape(b * Tf, F_ * c * 2)       # (b*Tf, 132)

    # --- band split: fused per-band LN + block-diagonal Linear ---
    z = bandsplit_apply(spec_rows, params["bs_w"], params["bs_b"])
    z = z.reshape(b, Tf, K_SUB, N_FEAT).transpose(0, 2, 1, 3)   # (b, K, T, N)

    # --- band & sequence modeling ---
    for p in params["bandseq"]:
        z = band_seq_module(p, z)

    # --- mask estimation: fused LN + block-diagonal 2-layer MLP ---
    q_rows = z.transpose(0, 2, 1, 3).reshape(b * Tf, K_SUB * N_FEAT)
    mask_rows = maskest_apply(q_rows, params["me_w1"], params["me_b1"],
                              params["me_w2"], params["me_b2"])  # (b*Tf, 132)
    mask = mask_rows.reshape(b, Tf, F_, c, 2).transpose(0, 3, 2, 1, 4)
    mask = mask.reshape(b * c, F_, Tf, 2)

    # --- complex mask application + iSTFT ---
    est_cspec, mask_mag = complex_mask_apply(mask, spec_c)
    est_wav = istft(est_cspec, N_FFT, HOP)                  # (b*c, t)
    est_spec = jnp.stack([jnp.real(est_cspec), jnp.imag(est_cspec)], axis=-1)
    est_spec = est_spec.reshape(b, c, F_, Tf, 2)
    est_wav = est_wav.reshape(b, c, -1)
    return est_spec, est_wav, mask_mag


# ------------------------------ parameter init -------------------------------
def init_params(key):
    """Raw parameters mirroring the PyTorch module."""
    keys = iter(jax.random.split(key, 1024))

    def nrm(shape, scale=0.1):
        return scale * jax.random.normal(next(keys), shape, dtype=jnp.float32)

    params = {"bandsplit": [], "bandseq": [], "maskest": []}
    for itv in INTERVALS:
        D = int(itv) * 2 * CHANNELS
        params["bandsplit"].append({
            "ln_g": jnp.ones((D,), jnp.float32),
            "ln_b": jnp.zeros((D,), jnp.float32),
            "w": nrm((D, N_FEAT)),
            "b": nrm((N_FEAT,), 0.01),
        })

    def lstm_params():
        return {
            "w_ih_f": nrm((N_FEAT, 4 * HID)), "w_hh_f": nrm((HID, 4 * HID)),
            "b_ih_f": nrm((4 * HID,), 0.01), "b_hh_f": nrm((4 * HID,), 0.01),
            "w_ih_r": nrm((N_FEAT, 4 * HID)), "w_hh_r": nrm((HID, 4 * HID)),
            "b_ih_r": nrm((4 * HID,), 0.01), "b_hh_r": nrm((4 * HID,), 0.01),
        }

    for _ in range(NUM_BAND_SEQ):
        params["bandseq"].append({
            "gn1_g": jnp.ones((K_SUB,), jnp.float32),
            "gn1_b": jnp.zeros((K_SUB,), jnp.float32),
            "lstm1": lstm_params(),
            "fc1_w": nrm((2 * HID, N_FEAT)), "fc1_b": nrm((N_FEAT,), 0.01),
            "gn2_g": jnp.ones((K_SUB,), jnp.float32),
            "gn2_b": jnp.zeros((K_SUB,), jnp.float32),
            "lstm2": lstm_params(),
            "fc2_w": nrm((2 * HID, N_FEAT)), "fc2_b": nrm((N_FEAT,), 0.01),
        })

    for itv in INTERVALS:
        D = int(itv) * 2 * CHANNELS
        params["maskest"].append({
            "ln_g": jnp.ones((N_FEAT,), jnp.float32),
            "ln_b": jnp.zeros((N_FEAT,), jnp.float32),
            "w1": nrm((N_FEAT, HID4)), "b1": nrm((HID4,), 0.01),
            "w2": nrm((HID4, D)), "b2": nrm((D,), 0.01),
        })
    return params


def prepare_params(raw):
    """Fold LayerNorms into the following Linears, build block-diagonal
    per-band weights, merge the fwd/rev LSTM input projections, and reorder
    the packed gates to (i, f, o | g)."""
    H = HID
    perm = np.concatenate([np.arange(0, H), np.arange(H, 2 * H),
                           np.arange(3 * H, 4 * H), np.arange(2 * H, 3 * H)])

    # --- band split: block-diagonal (D_SPEC, K*N) with LN folded in ---
    w_bd = jnp.zeros((D_SPEC, K_SUB * N_FEAT), jnp.float32)
    b_bd = jnp.zeros((K_SUB * N_FEAT,), jnp.float32)
    for i, p in enumerate(raw["bandsplit"]):
        lo, hi = SPLIT_SEGS[i]
        w = p["ln_g"][:, None] * p["w"]
        bb = p["ln_b"] @ p["w"] + p["b"]
        w_bd = w_bd.at[lo:hi, i * N_FEAT:(i + 1) * N_FEAT].set(w)
        b_bd = b_bd.at[i * N_FEAT:(i + 1) * N_FEAT].set(bb)

    # --- mask estimation: block-diagonal 2-layer MLP with LN folded in ---
    w1_bd = jnp.zeros((K_SUB * N_FEAT, K_SUB * HID4), jnp.float32)
    b1_bd = jnp.zeros((K_SUB * HID4,), jnp.float32)
    w2_bd = jnp.zeros((K_SUB * HID4, D_SPEC), jnp.float32)
    b2_bd = jnp.zeros((D_SPEC,), jnp.float32)
    for i, p in enumerate(raw["maskest"]):
        olo, ohi = SPLIT_SEGS[i]   # output columns share the (f, c, ri) packing
        w1 = p["ln_g"][:, None] * p["w1"]
        b1 = p["ln_b"] @ p["w1"] + p["b1"]
        w1_bd = w1_bd.at[i * N_FEAT:(i + 1) * N_FEAT,
                         i * HID4:(i + 1) * HID4].set(w1)
        b1_bd = b1_bd.at[i * HID4:(i + 1) * HID4].set(b1)
        w2_bd = w2_bd.at[i * HID4:(i + 1) * HID4, olo:ohi].set(p["w2"])
        b2_bd = b2_bd.at[olo:ohi].set(p["b2"])

    def prep_lstm(lp, fcw, fcb, gn_g, gn_b, gn_shape):
        w_ih = jnp.concatenate([lp["w_ih_f"][:, perm],
                                lp["w_ih_r"][:, perm]], axis=1)      # (N, 8H)
        b_ih = jnp.concatenate([(lp["b_ih_f"] + lp["b_hh_f"])[perm],
                                (lp["b_ih_r"] + lp["b_hh_r"])[perm]])
        return {
            "gn_g": gn_g.reshape(gn_shape),
            "gn_b": gn_b.reshape(gn_shape),
            "w_ih": w_ih,
            "b_ih": b_ih.reshape(1, -1),
            "w_hh_f": lp["w_hh_f"][:, perm],
            "w_hh_r": lp["w_hh_r"][:, perm],
            "fc_w": fcw,
            "fc_b": fcb.reshape(1, -1),
        }

    bandseq = []
    for p in raw["bandseq"]:
        bandseq.append({
            "seq": prep_lstm(p["lstm1"], p["fc1_w"], p["fc1_b"],
                             p["gn1_g"], p["gn1_b"], (1, 1, K_SUB, 1)),
            "band": prep_lstm(p["lstm2"], p["fc2_w"], p["fc2_b"],
                              p["gn2_g"], p["gn2_b"], (K_SUB, 1, 1, 1)),
        })

    return {"bs_w": w_bd, "bs_b": b_bd.reshape(1, -1),
            "me_w1": w1_bd, "me_b1": b1_bd.reshape(1, -1),
            "me_w2": w2_bd, "me_b2": b2_bd.reshape(1, -1),
            "bandseq": bandseq}


# ----------------------------------- main ------------------------------------
if __name__ == "__main__":
    key = jax.random.PRNGKey(0)
    pkey, wkey = jax.random.split(key)
    raw_params = init_params(pkey)
    params = prepare_params(raw_params)

    B, T_SAMPLES = 2, 64
    wav = jax.random.normal(wkey, (B, CHANNELS, T_SAMPLES), dtype=jnp.float32)

    forward = jax.jit(bsrnn_forward)
    est_spec, est_wav, mask_mag = forward(params, wav)
    jax.block_until_ready((est_spec, est_wav, mask_mag))

    Tf = T_SAMPLES // HOP + 1
    assert est_spec.shape == (B, CHANNELS, F_BINS, Tf, 2)
    assert est_wav.shape == (B, CHANNELS, T_SAMPLES)
    assert mask_mag.shape == (B * CHANNELS, F_BINS, Tf)
    assert bool(jnp.all(jnp.isfinite(est_spec)))
    assert bool(jnp.all(jnp.isfinite(est_wav)))
    assert bool(jnp.all(jnp.isfinite(mask_mag)))
    print("KERNEL_OK")
</pallas_src>

<mosaic_0001>
module attributes {stable_mosaic.version = 11 : i64} {
  func.func @_bandsplit_kernel(%arg0: i32, %arg1: memref<10x132xf32, #tpu.memory_space<vmem>>, %arg2: memref<132x80xf32, #tpu.memory_space<vmem>>, %arg3: memref<1x80xf32, #tpu.memory_space<vmem>>, %arg4: memref<10x80xf32, #tpu.memory_space<vmem>>) attributes {dimension_semantics = [#tpu.dimension_semantics<parallel>], iteration_bounds = array<i64: 1>, scalar_prefetch = 0 : i64, scratch_operands = 0 : i64, tpu.core_type = #tpu.core_type<tc>, window_params = [{transform_indices = @transform_0, window_bounds = array<i64: 10, 132>}, {pipeline_mode = #tpu.pipeline_mode<synchronous>, transform_indices = @transform_1, window_bounds = array<i64: 132, 80>}, {pipeline_mode = #tpu.pipeline_mode<synchronous>, transform_indices = @transform_2, window_bounds = array<i64: 1, 80>}, {transform_indices = @transform_3, window_bounds = array<i64: 10, 80>}]} {
    %c0 = arith.constant 0 : index
    %c0_0 = arith.constant 0 : index
    %0 = vector.load %arg1[%c0, %c0_0] : memref<10x132xf32, #tpu.memory_space<vmem>>, vector<10x132xf32>
    %1 = vector.extract_strided_slice %0 {offsets = [0, 0], sizes = [10, 16], strides = [1, 1]} : vector<10x132xf32> to vector<10x16xf32>
    %cst = arith.constant dense<0.000000e+00> : vector<10xf32>
    %2 = vector.multi_reduction <add>, %1, %cst [1] : vector<10x16xf32> to vector<10xf32>
    %3 = vector.shape_cast %2 : vector<10xf32> to vector<10x1xf32>
    %cst_1 = arith.constant 1.600000e+01 : f32
    %4 = vector.broadcast %cst_1 : f32 to vector<10x1xf32>
    %5 = arith.divf %3, %4 : vector<10x1xf32>
    %6 = vector.broadcast %5 : vector<10x1xf32> to vector<10x16xf32>
    %7 = arith.subf %1, %6 : vector<10x16xf32>
    %8 = arith.mulf %7, %7 : vector<10x16xf32>
    %cst_2 = arith.constant dense<0.000000e+00> : vector<10xf32>
    %9 = vector.multi_reduction <add>, %8, %cst_2 [1] : vector<10x16xf32> to vector<10xf32>
    %10 = vector.shape_cast %9 : vector<10xf32> to vector<10x1xf32>
    %cst_3 = arith.constant 1.600000e+01 : f32
    %11 = vector.broadcast %cst_3 : f32 to vector<10x1xf32>
    %12 = arith.divf %10, %11 : vector<10x1xf32>
    %cst_4 = arith.constant 9.99999974E-6 : f32
    %13 = vector.broadcast %cst_4 : f32 to vector<10x1xf32>
    %14 = arith.addf %12, %13 : vector<10x1xf32>
    %15 = math.rsqrt %14 : vector<10x1xf32>
    %16 = vector.broadcast %15 : vector<10x1xf32> to vector<10x16xf32>
    %17 = arith.mulf %7, %16 : vector<10x16xf32>
    %18 = vector.extract_strided_slice %0 {offsets = [0, 16], sizes = [10, 16], strides = [1, 1]} : vector<10x132xf32> to vector<10x16xf32>
    %cst_5 = arith.constant dense<0.000000e+00> : vector<10xf32>
    %19 = vector.multi_reduction <add>, %18, %cst_5 [1] : vector<10x16xf32> to vector<10xf32>
    %20 = vector.shape_cast %19 : vector<10xf32> to vector<10x1xf32>
    %cst_6 = arith.constant 1.600000e+01 : f32
    %21 = vector.broadcast %cst_6 : f32 to vector<10x1xf32>
    %22 = arith.divf %20, %21 : vector<10x1xf32>
    %23 = vector.broadcast %22 : vector<10x1xf32> to vector<10x16xf32>
    %24 = arith.subf %18, %23 : vector<10x16xf32>
    %25 = arith.mulf %24, %24 : vector<10x16xf32>
    %cst_7 = arith.constant dense<0.000000e+00> : vector<10xf32>
    %26 = vector.multi_reduction <add>, %25, %cst_7 [1] : vector<10x16xf32> to vector<10xf32>
    %27 = vector.shape_cast %26 : vector<10xf32> to vector<10x1xf32>
    %cst_8 = arith.constant 1.600000e+01 : f32
    %28 = vector.broadcast %cst_8 : f32 to vector<10x1xf32>
    %29 = arith.divf %27, %28 : vector<10x1xf32>
    %cst_9 = arith.constant 9.99999974E-6 : f32
    %30 = vector.broadcast %cst_9 : f32 to vector<10x1xf32>
    %31 = arith.addf %29, %30 : vector<10x1xf32>
    %32 = math.rsqrt %31 : vector<10x1xf32>
    %33 = vector.broadcast %32 : vector<10x1xf32> to vector<10x16xf32>
    %34 = arith.mulf %24, %33 : vector<10x16xf32>
    %35 = vector.extract_strided_slice %0 {offsets = [0, 32], sizes = [10, 16], strides = [1, 1]} : vector<10x132xf32> to vector<10x16xf32>
    %cst_10 = arith.constant dense<0.000000e+00> : vector<10xf32>
    %36 = vector.multi_reduction <add>, %35, %cst_10 [1] : vector<10x16xf32> to vector<10xf32>
    %37 = vector.shape_cast %36 : vector<10xf32> to vector<10x1xf32>
    %cst_11 = arith.constant 1.600000e+01 : f32
    %38 = vector.broadcast %cst_11 : f32 to vector<10x1xf32>
    %39 = arith.divf %37, %38 : vector<10x1xf32>
    %40 = vector.broadcast %39 : vector<10x1xf32> to vector<10x16xf32>
    %41 = arith.subf %35, %40 : vector<10x16xf32>
    %42 = arith.mulf %41, %41 : vector<10x16xf32>
    %cst_12 = arith.constant dense<0.000000e+00> : vector<10xf32>
    %43 = vector.multi_reduction <add>, %42, %cst_12 [1] : vector<10x16xf32> to vector<10xf32>
    %44 = vector.shape_cast %43 : vector<10xf32> to vector<10x1xf32>
    %cst_13 = arith.constant 1.600000e+01 : f32
    %45 = vector.broadcast %cst_13 : f32 to vector<10x1xf32>
    %46 = arith.divf %44, %45 : vector<10x1xf32>
    %cst_14 = arith.constant 9.99999974E-6 : f32
    %47 = vector.broadcast %cst_14 : f32 to vector<10x1xf32>
    %48 = arith.addf %46, %47 : vector<10x1xf32>
    %49 = math.rsqrt %48 : vector<10x1xf32>
    %50 = vector.broadcast %49 : vector<10x1xf32> to vector<10x16xf32>
    %51 = arith.mulf %41, %50 : vector<10x16xf32>
    %52 = vector.extract_strided_slice %0 {offsets = [0, 48], sizes = [10, 16], strides = [1, 1]} : vector<10x132xf32> to vector<10x16xf32>
    %cst_15 = arith.constant dense<0.000000e+00> : vector<10xf32>
    %53 = vector.multi_reduction <add>, %52, %cst_15 [1] : vector<10x16xf32> to vector<10xf32>
    %54 = vector.shape_cast %53 : vector<10xf32> to vector<10x1xf32>
    %cst_16 = arith.constant 1.600000e+01 : f32
    %55 = vector.broadcast %cst_16 : f32 to vector<10x1xf32>
    %56 = arith.divf %54, %55 : vector<10x1xf32>
    %57 = vector.broadcast %56 : vector<10x1xf32> to vector<10x16xf32>
    %58 = arith.subf %52, %57 : vector<10x16xf32>
    %59 = arith.mulf %58, %58 : vector<10x16xf32>
    %cst_17 = arith.constant dense<0.000000e+00> : vector<10xf32>
    %60 = vector.multi_reduction <add>, %59, %cst_17 [1] : vector<10x16xf32> to vector<10xf32>
    %61 = vector.shape_cast %60 : vector<10xf32> to vector<10x1xf32>
    %cst_18 = arith.constant 1.600000e+01 : f32
    %62 = vector.broadcast %cst_18 : f32 to vector<10x1xf32>
    %63 = arith.divf %61, %62 : vector<10x1xf32>
    %cst_19 = arith.constant 9.99999974E-6 : f32
    %64 = vector.broadcast %cst_19 : f32 to vector<10x1xf32>
    %65 = arith.addf %63, %64 : vector<10x1xf32>
    %66 = math.rsqrt %65 : vector<10x1xf32>
    %67 = vector.broadcast %66 : vector<10x1xf32> to vector<10x16xf32>
    %68 = arith.mulf %58, %67 : vector<10x16xf32>
    %69 = vector.extract_strided_slice %0 {offsets = [0, 64], sizes = [10, 68], strides = [1, 1]} : vector<10x132xf32> to vector<10x68xf32>
    %cst_20 = arith.constant dense<0.000000e+00> : vector<10xf32>
    %70 = vector.multi_reduction <add>, %69, %cst_20 [1] : vector<10x68xf32> to vector<10xf32>
    %71 = vector.shape_cast %70 : vector<10xf32> to vector<10x1xf32>
    %cst_21 = arith.constant 6.800000e+01 : f32
    %72 = vector.broadcast %cst_21 : f32 to vector<10x1xf32>
    %73 = arith.divf %71, %72 : vector<10x1xf32>
    %74 = vector.broadcast %73 : vector<10x1xf32> to vector<10x68xf32>
    %75 = arith.subf %69, %74 : vector<10x68xf32>
    %76 = arith.mulf %75, %75 : vector<10x68xf32>
    %cst_22 = arith.constant dense<0.000000e+00> : vector<10xf32>
    %77 = vector.multi_reduction <add>, %76, %cst_22 [1] : vector<10x68xf32> to vector<10xf32>
    %78 = vector.shape_cast %77 : vector<10xf32> to vector<10x1xf32>
    %cst_23 = arith.constant 6.800000e+01 : f32
    %79 = vector.broadcast %cst_23 : f32 to vector<10x1xf32>
    %80 = arith.divf %78, %79 : vector<10x1xf32>
    %cst_24 = arith.constant 9.99999974E-6 : f32
    %81 = vector.broadcast %cst_24 : f32 to vector<10x1xf32>
    %82 = arith.addf %80, %81 : vector<10x1xf32>
    %83 = math.rsqrt %82 : vector<10x1xf32>
    %84 = vector.broadcast %83 : vector<10x1xf32> to vector<10x68xf32>
    %85 = arith.mulf %75, %84 : vector<10x68xf32>
    %c0_25 = arith.constant 0 : index
    %c0_26 = arith.constant 0 : index
    %86 = vector.load %arg3[%c0_25, %c0_26] : memref<1x80xf32, #tpu.memory_space<vmem>>, vector<1x80xf32>
    %c0_27 = arith.constant 0 : index
    %c0_28 = arith.constant 0 : index
    %87 = vector.load %arg2[%c0_27, %c0_28] : memref<132x80xf32, #tpu.memory_space<vmem>>, vector<16x80xf32>
    %cst_29 = arith.constant dense<0.000000e+00> : vector<10x80xf32>
    %88 = tpu.matmul %17, %87, %cst_29 {dimension_numbers = #tpu.dot_dimension_numbers<[1], [0], [0], [1], [0, 0, 1, 1], [], []>} : vector<10x16xf32>, vector<16x80xf32>, vector<10x80xf32> -> vector<10x80xf32>
    %89 = vector.broadcast %86 : vector<1x80xf32> to vector<10x80xf32>
    %90 = arith.addf %89, %88 : vector<10x80xf32>
    %c16 = arith.constant 16 : index
    %c0_30 = arith.constant 0 : index
    %91 = vector.load %arg2[%c16, %c0_30] : memref<132x80xf32, #tpu.memory_space<vmem>>, vector<16x80xf32>
    %cst_31 = arith.constant dense<0.000000e+00> : vector<10x80xf32>
    %92 = tpu.matmul %34, %91, %cst_31 {dimension_numbers = #tpu.dot_dimension_numbers<[1], [0], [0], [1], [0, 0, 1, 1], [], []>} : vector<10x16xf32>, vector<16x80xf32>, vector<10x80xf32> -> vector<10x80xf32>
    %93 = arith.addf %90, %92 : vector<10x80xf32>
    %c32 = arith.constant 32 : index
    %c0_32 = arith.constant 0 : index
    %94 = vector.load %arg2[%c32, %c0_32] : memref<132x80xf32, #tpu.memory_space<vmem>>, vector<16x80xf32>
    %cst_33 = arith.constant dense<0.000000e+00> : vector<10x80xf32>
    %95 = tpu.matmul %51, %94, %cst_33 {dimension_numbers = #tpu.dot_dimension_numbers<[1], [0], [0], [1], [0, 0, 1, 1], [], []>} : vector<10x16xf32>, vector<16x80xf32>, vector<10x80xf32> -> vector<10x80xf32>
    %96 = arith.addf %93, %95 : vector<10x80xf32>
    %c48 = arith.constant 48 : index
    %c0_34 = arith.constant 0 : index
    %97 = vector.load %arg2[%c48, %c0_34] : memref<132x80xf32, #tpu.memory_space<vmem>>, vector<16x80xf32>
    %cst_35 = arith.constant dense<0.000000e+00> : vector<10x80xf32>
    %98 = tpu.matmul %68, %97, %cst_35 {dimension_numbers = #tpu.dot_dimension_numbers<[1], [0], [0], [1], [0, 0, 1, 1], [], []>} : vector<10x16xf32>, vector<16x80xf32>, vector<10x80xf32> -> vector<10x80xf32>
    %99 = arith.addf %96, %98 : vector<10x80xf32>
    %c64 = arith.constant 64 : index
    %c0_36 = arith.constant 0 : index
    %100 = vector.load %arg2[%c64, %c0_36] : memref<132x80xf32, #tpu.memory_space<vmem>>, vector<68x80xf32>
    %cst_37 = arith.constant dense<0.000000e+00> : vector<10x80xf32>
    %101 = tpu.matmul %85, %100, %cst_37 {dimension_numbers = #tpu.dot_dimension_numbers<[1], [0], [0], [1], [0, 0, 1, 1], [], []>} : vector<10x68xf32>, vector<68x80xf32>, vector<10x80xf32> -> vector<10x80xf32>
    %102 = arith.addf %99, %101 : vector<10x80xf32>
    %c0_38 = arith.constant 0 : index
    %c0_39 = arith.constant 0 : index
    %103 = vector.load %arg4[%c0_38, %c0_39] : memref<10x80xf32, #tpu.memory_space<vmem>>, vector<10x80xf32>
    tpu.vector_store %arg4[%c0_38, %c0_39], %102 {strides = array<i32>} : memref<10x80xf32, #tpu.memory_space<vmem>>, vector<10x80xf32>,
    return
  }
  func.func @transform_0(%arg0: i32) -> (i32, i32) {
    %c0_i32 = arith.constant 0 : i32
    %c0_i32_0 = arith.constant 0 : i32
    return %arg0, %c0_i32 : i32, i32
  }
  func.func @transform_1(%arg0: i32) -> (i32, i32) {
    %c0_i32 = arith.constant 0 : i32
    %c0_i32_0 = arith.constant 0 : i32
    %c0_i32_1 = arith.constant 0 : i32
    return %c0_i32, %c0_i32_0 : i32, i32
  }
  func.func @transform_2(%arg0: i32) -> (i32, i32) {
    %c0_i32 = arith.constant 0 : i32
    %c0_i32_0 = arith.constant 0 : i32
    %c0_i32_1 = arith.constant 0 : i32
    return %c0_i32, %c0_i32_0 : i32, i32
  }
  func.func @transform_3(%arg0: i32) -> (i32, i32) {
    %c0_i32 = arith.constant 0 : i32
    %c0_i32_0 = arith.constant 0 : i32
    return %arg0, %c0_i32 : i32, i32
  }
}

module attributes {stable_mosaic.version = 11 : i64} {
  func.func @_bilstm_block_kernel(%arg0: i32, %arg1: memref<5x1x5x16xf32, #tpu.memory_space<vmem>>, %arg2: memref<1x1x5x1xf32, #tpu.memory_space<vmem>>, %arg3: memref<1x1x5x1xf32, #tpu.memory_space<vmem>>, %arg4: memref<16x128xf32, #tpu.memory_space<vmem>>, %arg5: memref<1x128xf32, #tpu.memory_space<vmem>>, %arg6: memref<16x64xf32, #tpu.memory_space<vmem>>, %arg7: memref<16x64xf32, #tpu.memory_space<vmem>>, %arg8: memref<32x16xf32, #tpu.memory_space<vmem>>, %arg9: memref<1x16xf32, #tpu.memory_space<vmem>>, %arg10: memref<5x1x5x16xf32, #tpu.memory_space<vmem>>, %arg11: memref<5x5x128xf32, #tpu.memory_space<vmem>>, %arg12: memref<5x5x16xf32, #tpu.memory_space<vmem>>, %arg13: memref<5x5x16xf32, #tpu.memory_space<vmem>>) attributes {dimension_semantics = [#tpu.dimension_semantics<parallel>], iteration_bounds = array<i64: 2>, scalar_prefetch = 0 : i64, scratch_operands = 3 : i64, tpu.core_type = #tpu.core_type<tc>, window_params = [{transform_indices = @transform_0, window_bounds = array<i64: 5, 1, 5, 16>}, {pipeline_mode = #tpu.pipeline_mode<synchronous>, transform_indices = @transform_1, window_bounds = array<i64: 1, 1, 5, 1>}, {pipeline_mode = #tpu.pipeline_mode<synchronous>, transform_indices = @transform_2, window_bounds = array<i64: 1, 1, 5, 1>}, {pipeline_mode = #tpu.pipeline_mode<synchronous>, transform_indices = @transform_3, window_bounds = array<i64: 16, 128>}, {pipeline_mode = #tpu.pipeline_mode<synchronous>, transform_indices = @transform_4, window_bounds = array<i64: 1, 128>}, {pipeline_mode = #tpu.pipeline_mode<synchronous>, transform_indices = @transform_5, window_bounds = array<i64: 16, 64>}, {pipeline_mode = #tpu.pipeline_mode<synchronous>, transform_indices = @transform_6, window_bounds = array<i64: 16, 64>}, {pipeline_mode = #tpu.pipeline_mode<synchronous>, transform_indices = @transform_7, window_bounds = array<i64: 32, 16>}, {pipeline_mode = #tpu.pipeline_mode<synchronous>, transform_indices = @transform_8, window_bounds = array<i64: 1, 16>}, {transform_indices = @transform_9, window_bounds = array<i64: 5, 1, 5, 16>}]} {
    %c0 = arith.constant 0 : index
    %c0_0 = arith.constant 0 : index
    %c0_1 = arith.constant 0 : index
    %c0_2 = arith.constant 0 : index
    %0 = vector.load %arg1[%c0, %c0_0, %c0_1, %c0_2] : memref<5x1x5x16xf32, #tpu.memory_space<vmem>>, vector<5x1x5x16xf32>
    %cst = arith.constant dense<0.000000e+00> : vector<1x5x16xf32>
    %1 = vector.multi_reduction <add>, %0, %cst [0] : vector<5x1x5x16xf32> to vector<1x5x16xf32>
    %2 = vector.shape_cast %1 : vector<1x5x16xf32> to vector<1x1x5x16xf32>
    %cst_3 = arith.constant dense<0.000000e+00> : vector<1x1x5xf32>
    %3 = vector.multi_reduction <add>, %2, %cst_3 [3] : vector<1x1x5x16xf32> to vector<1x1x5xf32>
    %4 = vector.shape_cast %3 : vector<1x1x5xf32> to vector<1x1x5x1xf32>
    %cst_4 = arith.constant 8.000000e+01 : f32
    %5 = vector.broadcast %cst_4 : f32 to vector<1x1x5x1xf32>
    %6 = arith.divf %4, %5 : vector<1x1x5x1xf32>
    %7 = vector.broadcast %6 : vector<1x1x5x1xf32> to vector<5x1x5x16xf32>
    %8 = arith.subf %0, %7 : vector<5x1x5x16xf32>
    %9 = arith.mulf %8, %8 : vector<5x1x5x16xf32>
    %cst_5 = arith.constant dense<0.000000e+00> : vector<1x5x16xf32>
    %10 = vector.multi_reduction <add>, %9, %cst_5 [0] : vector<5x1x5x16xf32> to vector<1x5x16xf32>
    %11 = vector.shape_cast %10 : vector<1x5x16xf32> to vector<1x1x5x16xf32>
    %cst_6 = arith.constant dense<0.000000e+00> : vector<1x1x5xf32>
    %12 = vector.multi_reduction <add>, %11, %cst_6 [3] : vector<1x1x5x16xf32> to vector<1x1x5xf32>
    %13 = vector.shape_cast %12 : vector<1x1x5xf32> to vector<1x1x5x1xf32>
    %cst_7 = arith.constant 8.000000e+01 : f32
    %14 = vector.broadcast %cst_7 : f32 to vector<1x1x5x1xf32>
    %15 = arith.divf %13, %14 : vector<1x1x5x1xf32>
    %cst_8 = arith.constant 9.99999974E-6 : f32
    %16 = vector.broadcast %cst_8 : f32 to vector<1x1x5x1xf32>
    %17 = arith.addf %15, %16 : vector<1x1x5x1xf32>
    %18 = math.rsqrt %17 : vector<1x1x5x1xf32>
    %19 = vector.broadcast %18 : vector<1x1x5x1xf32> to vector<5x1x5x16xf32>
    %20 = arith.mulf %8, %19 : vector<5x1x5x16xf32>
    %c0_9 = arith.constant 0 : index
    %c0_10 = arith.constant 0 : index
    %c0_11 = arith.constant 0 : index
    %c0_12 = arith.constant 0 : index
    %21 = vector.load %arg2[%c0_9, %c0_10, %c0_11, %c0_12] : memref<1x1x5x1xf32, #tpu.memory_space<vmem>>, vector<1x1x5x1xf32>
    %22 = vector.broadcast %21 : vector<1x1x5x1xf32> to vector<5x1x5x16xf32>
    %23 = arith.mulf %20, %22 : vector<5x1x5x16xf32>
    %c0_13 = arith.constant 0 : index
    %c0_14 = arith.constant 0 : index
    %c0_15 = arith.constant 0 : index
    %c0_16 = arith.constant 0 : index
    %24 = vector.load %arg3[%c0_13, %c0_14, %c0_15, %c0_16] : memref<1x1x5x1xf32, #tpu.memory_space<vmem>>, vector<1x1x5x1xf32>
    %25 = vector.broadcast %24 : vector<1x1x5x1xf32> to vector<5x1x5x16xf32>
    %26 = arith.addf %23, %25 : vector<5x1x5x16xf32>
    %27 = vector.shape_cast %26 : vector<5x1x5x16xf32> to vector<25x16xf32>
    %c0_17 = arith.constant 0 : index
    %c0_18 = arith.constant 0 : index
    %28 = vector.load %arg4[%c0_17, %c0_18] : memref<16x128xf32, #tpu.memory_space<vmem>>, vector<16x128xf32>
    %cst_19 = arith.constant dense<0.000000e+00> : vector<25x128xf32>
    %29 = tpu.matmul %27, %28, %cst_19 {dimension_numbers = #tpu.dot_dimension_numbers<[1], [0], [0], [1], [0, 0, 1, 1], [], []>} : vector<25x16xf32>, vector<16x128xf32>, vector<25x128xf32> -> vector<25x128xf32>
    %c0_20 = arith.constant 0 : index
    %c0_21 = arith.constant 0 : index
    %30 = vector.load %arg5[%c0_20, %c0_21] : memref<1x128xf32, #tpu.memory_space<vmem>>, vector<1x128xf32>
    %31 = vector.broadcast %30 : vector<1x128xf32> to vector<25x128xf32>
    %32 = arith.addf %29, %31 : vector<25x128xf32>
    %33 = vector.shape_cast %32 : vector<25x128xf32> to vector<5x5x128xf32>
    %c0_22 = arith.constant 0 : index
    %c0_23 = arith.constant 0 : index
    %c0_24 = arith.constant 0 : index
    %34 = vector.load %arg11[%c0_22, %c0_23, %c0_24] : memref<5x5x128xf32, #tpu.memory_space<vmem>>, vector<5x5x128xf32>
    tpu.vector_store %arg11[%c0_22, %c0_23, %c0_24], %33 {strides = array<i32>} : memref<5x5x128xf32, #tpu.memory_space<vmem>>, vector<5x5x128xf32>,
    %c0_25 = arith.constant 0 : index
    %c0_26 = arith.constant 0 : index
    %35 = vector.load %arg6[%c0_25, %c0_26] : memref<16x64xf32, #tpu.memory_space<vmem>>, vector<16x64xf32>
    %c0_27 = arith.constant 0 : index
    %c0_28 = arith.constant 0 : index
    %36 = vector.load %arg7[%c0_27, %c0_28] : memref<16x64xf32, #tpu.memory_space<vmem>>, vector<16x64xf32>
    %cst_29 = arith.constant 0.000000e+00 : f32
    %37 = vector.broadcast %cst_29 : f32 to vector<5x16xf32>
    %c0_30 = arith.constant 0 : index
    %c0_31 = arith.constant 0 : index
    %c0_32 = arith.constant 0 : index
    %38 = vector.load %arg11[%c0_30, %c0_31, %c0_32] : memref<5x5x128xf32, #tpu.memory_space<vmem>>, vector<1x5x128xf32>
    %39 = vector.shape_cast %38 : vector<1x5x128xf32> to vector<5x128xf32>
    %40 = vector.extract_strided_slice %39 {offsets = [0, 0], sizes = [5, 64], strides = [1, 1]} : vector<5x128xf32> to vector<5x64xf32>
    %cst_33 = arith.constant dense<0.000000e+00> : vector<5x64xf32>
    %41 = tpu.matmul %37, %35, %cst_33 {dimension_numbers = #tpu.dot_dimension_numbers<[1], [0], [0], [1], [0, 0, 1, 1], [], []>} : vector<5x16xf32>, vector<16x64xf32>, vector<5x64xf32> -> vector<5x64xf32>
    %42 = arith.addf %40, %41 : vector<5x64xf32>
    %43 = vector.extract_strided_slice %42 {offsets = [0, 0], sizes = [5, 48], strides = [1, 1]} : vector<5x64xf32> to vector<5x48xf32>
    %44 = arith.negf %43 : vector<5x48xf32>
    %45 = math.exp %44 : vector<5x48xf32>
    %cst_34 = arith.constant 1.000000e+00 : f32
    %46 = vector.broadcast %cst_34 : f32 to vector<5x48xf32>
    %47 = arith.addf %46, %45 : vector<5x48xf32>
    %48 = arith.divf %46, %47 : vector<5x48xf32>
    %49 = vector.extract_strided_slice %42 {offsets = [0, 48], sizes = [5, 16], strides = [1, 1]} : vector<5x64xf32> to vector<5x16xf32>
    %50 = math.tanh %49 : vector<5x16xf32>
    %51 = vector.extract_strided_slice %48 {offsets = [0, 0], sizes = [5, 16], strides = [1, 1]} : vector<5x48xf32> to vector<5x16xf32>
    %52 = vector.extract_strided_slice %48 {offsets = [0, 16], sizes = [5, 16], strides = [1, 1]} : vector<5x48xf32> to vector<5x16xf32>
    %53 = vector.extract_strided_slice %48 {offsets = [0, 32], sizes = [5, 16], strides = [1, 1]} : vector<5x48xf32> to vector<5x16xf32>
    %54 = arith.mulf %52, %37 : vector<5x16xf32>
    %55 = arith.mulf %51, %50 : vector<5x16xf32>
    %56 = arith.addf %54, %55 : vector<5x16xf32>
    %57 = math.tanh %56 : vector<5x16xf32>
    %58 = arith.mulf %53, %57 : vector<5x16xf32>
    %c0_35 = arith.constant 0 : index
    %c0_36 = arith.constant 0 : index
    %c0_37 = arith.constant 0 : index
    %59 = vector.load %arg12[%c0_35, %c0_36, %c0_37] : memref<5x5x16xf32, #tpu.memory_space<vmem>>, vector<1x5x16xf32>
    %60 = vector.shape_cast %59 : vector<1x5x16xf32> to vector<5x16xf32>
    %61 = vector.shape_cast %58 : vector<5x16xf32> to vector<1x5x16xf32>
    tpu.vector_store %arg12[%c0_35, %c0_36, %c0_37], %61 {strides = array<i32>} : memref<5x5x16xf32, #tpu.memory_space<vmem>>, vector<1x5x16xf32>,
    %c1 = arith.constant 1 : index
    %c0_38 = arith.constant 0 : index
    %c0_39 = arith.constant 0 : index
    %62 = vector.load %arg11[%c1, %c0_38, %c0_39] : memref<5x5x128xf32, #tpu.memory_space<vmem>>, vector<1x5x128xf32>
    %63 = vector.shape_cast %62 : vector<1x5x128xf32> to vector<5x128xf32>
    %64 = vector.extract_strided_slice %63 {offsets = [0, 0], sizes = [5, 64], strides = [1, 1]} : vector<5x128xf32> to vector<5x64xf32>
    %cst_40 = arith.constant dense<0.000000e+00> : vector<5x64xf32>
    %65 = tpu.matmul %58, %35, %cst_40 {dimension_numbers = #tpu.dot_dimension_numbers<[1], [0], [0], [1], [0, 0, 1, 1], [], []>} : vector<5x16xf32>, vector<16x64xf32>, vector<5x64xf32> -> vector<5x64xf32>
    %66 = arith.addf %64, %65 : vector<5x64xf32>
    %67 = vector.extract_strided_slice %66 {offsets = [0, 0], sizes = [5, 48], strides = [1, 1]} : vector<5x64xf32> to vector<5x48xf32>
    %68 = arith.negf %67 : vector<5x48xf32>
    %69 = math.exp %68 : vector<5x48xf32>
    %cst_41 = arith.constant 1.000000e+00 : f32
    %70 = vector.broadcast %cst_41 : f32 to vector<5x48xf32>
    %71 = arith.addf %70, %69 : vector<5x48xf32>
    %72 = arith.divf %70, %71 : vector<5x48xf32>
    %73 = vector.extract_strided_slice %66 {offsets = [0, 48], sizes = [5, 16], strides = [1, 1]} : vector<5x64xf32> to vector<5x16xf32>
    %74 = math.tanh %73 : vector<5x16xf32>
    %75 = vector.extract_strided_slice %72 {offsets = [0, 0], sizes = [5, 16], strides = [1, 1]} : vector<5x48xf32> to vector<5x16xf32>
    %76 = vector.extract_strided_slice %72 {offsets = [0, 16], sizes = [5, 16], strides = [1, 1]} : vector<5x48xf32> to vector<5x16xf32>
    %77 = vector.extract_strided_slice %72 {offsets = [0, 32], sizes = [5, 16], strides = [1, 1]} : vector<5x48xf32> to vector<5x16xf32>
    %78 = arith.mulf %76, %56 : vector<5x16xf32>
    %79 = arith.mulf %75, %74 : vector<5x16xf32>
    %80 = arith.addf %78, %79 : vector<5x16xf32>
    %81 = math.tanh %80 : vector<5x16xf32>
    %82 = arith.mulf %77, %81 : vector<5x16xf32>
    %c1_42 = arith.constant 1 : index
    %c0_43 = arith.constant 0 : index
    %c0_44 = arith.constant 0 : index
    %83 = vector.load %arg12[%c1_42, %c0_43, %c0_44] : memref<5x5x16xf32, #tpu.memory_space<vmem>>, vector<1x5x16xf32>
    %84 = vector.shape_cast %83 : vector<1x5x16xf32> to vector<5x16xf32>
    %85 = vector.shape_cast %82 : vector<5x16xf32> to vector<1x5x16xf32>
    tpu.vector_store %arg12[%c1_42, %c0_43, %c0_44], %85 {strides = array<i32>} : memref<5x5x16xf32, #tpu.memory_space<vmem>>, vector<1x5x16xf32>,
    %c2 = arith.constant 2 : index
    %c0_45 = arith.constant 0 : index
    %c0_46 = arith.constant 0 : index
    %86 = vector.load %arg11[%c2, %c0_45, %c0_46] : memref<5x5x128xf32, #tpu.memory_space<vmem>>, vector<1x5x128xf32>
    %87 = vector.shape_cast %86 : vector<1x5x128xf32> to vector<5x128xf32>
    %88 = vector.extract_strided_slice %87 {offsets = [0, 0], sizes = [5, 64], strides = [1, 1]} : vector<5x128xf32> to vector<5x64xf32>
    %cst_47 = arith.constant dense<0.000000e+00> : vector<5x64xf32>
    %89 = tpu.matmul %82, %35, %cst_47 {dimension_numbers = #tpu.dot_dimension_numbers<[1], [0], [0], [1], [0, 0, 1, 1], [], []>} : vector<5x16xf32>, vector<16x64xf32>, vector<5x64xf32> -> vector<5x64xf32>
    %90 = arith.addf %88, %89 : vector<5x64xf32>
    %91 = vector.extract_strided_slice %90 {offsets = [0, 0], sizes = [5, 48], strides = [1, 1]} : vector<5x64xf32> to vector<5x48xf32>
    %92 = arith.negf %91 : vector<5x48xf32>
    %93 = math.exp %92 : vector<5x48xf32>
    %cst_48 = arith.constant 1.000000e+00 : f32
    %94 = vector.broadcast %cst_48 : f32 to vector<5x48xf32>
    %95 = arith.addf %94, %93 : vector<5x48xf32>
    %96 = arith.divf %94, %95 : vector<5x48xf32>
    %97 = vector.extract_strided_slice %90 {offsets = [0, 48], sizes = [5, 16], strides = [1, 1]} : vector<5x64xf32> to vector<5x16xf32>
    %98 = math.tanh %97 : vector<5x16xf32>
    %99 = vector.extract_strided_slice %96 {offsets = [0, 0], sizes = [5, 16], strides = [1, 1]} : vector<5x48xf32> to vector<5x16xf32>
    %100 = vector.extract_strided_slice %96 {offsets = [0, 16], sizes = [5, 16], strides = [1, 1]} : vector<5x48xf32> to vector<5x16xf32>
    %101 = vector.extract_strided_slice %96 {offsets = [0, 32], sizes = [5, 16], strides = [1, 1]} : vector<5x48xf32> to vector<5x16xf32>
    %102 = arith.mulf %100, %80 : vector<5x16xf32>
    %103 = arith.mulf %99, %98 : vector<5x16xf32>
    %104 = arith.addf %102, %103 : vector<5x16xf32>
    %105 = math.tanh %104 : vector<5x16xf32>
    %106 = arith.mulf %101, %105 : vector<5x16xf32>
    %c2_49 = arith.constant 2 : index
    %c0_50 = arith.constant 0 : index
    %c0_51 = arith.constant 0 : index
    %107 = vector.load %arg12[%c2_49, %c0_50, %c0_51] : memref<5x5x16xf32, #tpu.memory_space<vmem>>, vector<1x5x16xf32>
    %108 = vector.shape_cast %107 : vector<1x5x16xf32> to vector<5x16xf32>
    %109 = vector.shape_cast %106 : vector<5x16xf32> to vector<1x5x16xf32>
    tpu.vector_store %arg12[%c2_49, %c0_50, %c0_51], %109 {strides = array<i32>} : memref<5x5x16xf32, #tpu.memory_space<vmem>>, vector<1x5x16xf32>,
    %c3 = arith.constant 3 : index
    %c0_52 = arith.constant 0 : index
    %c0_53 = arith.constant 0 : index
    %110 = vector.load %arg11[%c3, %c0_52, %c0_53] : memref<5x5x128xf32, #tpu.memory_space<vmem>>, vector<1x5x128xf32>
    %111 = vector.shape_cast %110 : vector<1x5x128xf32> to vector<5x128xf32>
    %112 = vector.extract_strided_slice %111 {offsets = [0, 0], sizes = [5, 64], strides = [1, 1]} : vector<5x128xf32> to vector<5x64xf32>
    %cst_54 = arith.constant dense<0.000000e+00> : vector<5x64xf32>
    %113 = tpu.matmul %106, %35, %cst_54 {dimension_numbers = #tpu.dot_dimension_numbers<[1], [0], [0], [1], [0, 0, 1, 1], [], []>} : vector<5x16xf32>, vector<16x64xf32>, vector<5x64xf32> -> vector<5x64xf32>
    %114 = arith.addf %112, %113 : vector<5x64xf32>
    %115 = vector.extract_strided_slice %114 {offsets = [0, 0], sizes = [5, 48], strides = [1, 1]} : vector<5x64xf32> to vector<5x48xf32>
    %116 = arith.negf %115 : vector<5x48xf32>
    %117 = math.exp %116 : vector<5x48xf32>
    %cst_55 = arith.constant 1.000000e+00 : f32
    %118 = vector.broadcast %cst_55 : f32 to vector<5x48xf32>
    %119 = arith.addf %118, %117 : vector<5x48xf32>
    %120 = arith.divf %118, %119 : vector<5x48xf32>
    %121 = vector.extract_strided_slice %114 {offsets = [0, 48], sizes = [5, 16], strides = [1, 1]} : vector<5x64xf32> to vector<5x16xf32>
    %122 = math.tanh %121 : vector<5x16xf32>
    %123 = vector.extract_strided_slice %120 {offsets = [0, 0], sizes = [5, 16], strides = [1, 1]} : vector<5x48xf32> to vector<5x16xf32>
    %124 = vector.extract_strided_slice %120 {offsets = [0, 16], sizes = [5, 16], strides = [1, 1]} : vector<5x48xf32> to vector<5x16xf32>
    %125 = vector.extract_strided_slice %120 {offsets = [0, 32], sizes = [5, 16], strides = [1, 1]} : vector<5x48xf32> to vector<5x16xf32>
    %126 = arith.mulf %124, %104 : vector<5x16xf32>
    %127 = arith.mulf %123, %122 : vector<5x16xf32>
    %128 = arith.addf %126, %127 : vector<5x16xf32>
    %129 = math.tanh %128 : vector<5x16xf32>
    %130 = arith.mulf %125, %129 : vector<5x16xf32>
    %c3_56 = arith.constant 3 : index
    %c0_57 = arith.constant 0 : index
    %c0_58 = arith.constant 0 : index
    %131 = vector.load %arg12[%c3_56, %c0_57, %c0_58] : memref<5x5x16xf32, #tpu.memory_space<vmem>>, vector<1x5x16xf32>
    %132 = vector.shape_cast %131 : vector<1x5x16xf32> to vector<5x16xf32>
    %133 = vector.shape_cast %130 : vector<5x16xf32> to vector<1x5x16xf32>
    tpu.vector_store %arg12[%c3_56, %c0_57, %c0_58], %133 {strides = array<i32>} : memref<5x5x16xf32, #tpu.memory_space<vmem>>, vector<1x5x16xf32>,
    %c4 = arith.constant 4 : index
    %c0_59 = arith.constant 0 : index
    %c0_60 = arith.constant 0 : index
    %134 = vector.load %arg11[%c4, %c0_59, %c0_60] : memref<5x5x128xf32, #tpu.memory_space<vmem>>, vector<1x5x128xf32>
    %135 = vector.shape_cast %134 : vector<1x5x128xf32> to vector<5x128xf32>
    %136 = vector.extract_strided_slice %135 {offsets = [0, 0], sizes = [5, 64], strides = [1, 1]} : vector<5x128xf32> to vector<5x64xf32>
    %cst_61 = arith.constant dense<0.000000e+00> : vector<5x64xf32>
    %137 = tpu.matmul %130, %35, %cst_61 {dimension_numbers = #tpu.dot_dimension_numbers<[1], [0], [0], [1], [0, 0, 1, 1], [], []>} : vector<5x16xf32>, vector<16x64xf32>, vector<5x64xf32> -> vector<5x64xf32>
    %138 = arith.addf %136, %137 : vector<5x64xf32>
    %139 = vector.extract_strided_slice %138 {offsets = [0, 0], sizes = [5, 48], strides = [1, 1]} : vector<5x64xf32> to vector<5x48xf32>
    %140 = arith.negf %139 : vector<5x48xf32>
    %141 = math.exp %140 : vector<5x48xf32>
    %cst_62 = arith.constant 1.000000e+00 : f32
    %142 = vector.broadcast %cst_62 : f32 to vector<5x48xf32>
    %143 = arith.addf %142, %141 : vector<5x48xf32>
    %144 = arith.divf %142, %143 : vector<5x48xf32>
    %145 = vector.extract_strided_slice %138 {offsets = [0, 48], sizes = [5, 16], strides = [1, 1]} : vector<5x64xf32> to vector<5x16xf32>
    %146 = math.tanh %145 : vector<5x16xf32>
    %147 = vector.extract_strided_slice %144 {offsets = [0, 0], sizes = [5, 16], strides = [1, 1]} : vector<5x48xf32> to vector<5x16xf32>
    %148 = vector.extract_strided_slice %144 {offsets = [0, 16], sizes = [5, 16], strides = [1, 1]} : vector<5x48xf32> to vector<5x16xf32>
    %149 = vector.extract_strided_slice %144 {offsets = [0, 32], sizes = [5, 16], strides = [1, 1]} : vector<5x48xf32> to vector<5x16xf32>
    %150 = arith.mulf %148, %128 : vector<5x16xf32>
    %151 = arith.mulf %147, %146 : vector<5x16xf32>
    %152 = arith.addf %150, %151 : vector<5x16xf32>
    %153 = math.tanh %152 : vector<5x16xf32>
    %154 = arith.mulf %149, %153 : vector<5x16xf32>
    %c4_63 = arith.constant 4 : index
    %c0_64 = arith.constant 0 : index
    %c0_65 = arith.constant 0 : index
    %155 = vector.load %arg12[%c4_63, %c0_64, %c0_65] : memref<5x5x16xf32, #tpu.memory_space<vmem>>, vector<1x5x16xf32>
    %156 = vector.shape_cast %155 : vector<1x5x16xf32> to vector<5x16xf32>
    %157 = vector.shape_cast %154 : vector<5x16xf32> to vector<1x5x16xf32>
    tpu.vector_store %arg12[%c4_63, %c0_64, %c0_65], %157 {strides = array<i32>} : memref<5x5x16xf32, #tpu.memory_space<vmem>>, vector<1x5x16xf32>,
    %c4_66 = arith.constant 4 : index
    %c0_67 = arith.constant 0 : index
    %c0_68 = arith.constant 0 : index
    %158 = vector.load %arg11[%c4_66, %c0_67, %c0_68] : memref<5x5x128xf32, #tpu.memory_space<vmem>>, vector<1x5x128xf32>
    %159 = vector.shape_cast %158 : vector<1x5x128xf32> to vector<5x128xf32>
    %160 = vector.extract_strided_slice %159 {offsets = [0, 64], sizes = [5, 64], strides = [1, 1]} : vector<5x128xf32> to vector<5x64xf32>
    %cst_69 = arith.constant dense<0.000000e+00> : vector<5x64xf32>
    %161 = tpu.matmul %37, %36, %cst_69 {dimension_numbers = #tpu.dot_dimension_numbers<[1], [0], [0], [1], [0, 0, 1, 1], [], []>} : vector<5x16xf32>, vector<16x64xf32>, vector<5x64xf32> -> vector<5x64xf32>
    %162 = arith.addf %160, %161 : vector<5x64xf32>
    %163 = vector.extract_strided_slice %162 {offsets = [0, 0], sizes = [5, 48], strides = [1, 1]} : vector<5x64xf32> to vector<5x48xf32>
    %164 = arith.negf %163 : vector<5x48xf32>
    %165 = math.exp %164 : vector<5x48xf32>
    %cst_70 = arith.constant 1.000000e+00 : f32
    %166 = vector.broadcast %cst_70 : f32 to vector<5x48xf32>
    %167 = arith.addf %166, %165 : vector<5x48xf32>
    %168 = arith.divf %166, %167 : vector<5x48xf32>
    %169 = vector.extract_strided_slice %162 {offsets = [0, 48], sizes = [5, 16], strides = [1, 1]} : vector<5x64xf32> to vector<5x16xf32>
    %170 = math.tanh %169 : vector<5x16xf32>
    %171 = vector.extract_strided_slice %168 {offsets = [0, 0], sizes = [5, 16], strides = [1, 1]} : vector<5x48xf32> to vector<5x16xf32>
    %172 = vector.extract_strided_slice %168 {offsets = [0, 16], sizes = [5, 16], strides = [1, 1]} : vector<5x48xf32> to vector<5x16xf32>
    %173 = vector.extract_strided_slice %168 {offsets = [0, 32], sizes = [5, 16], strides = [1, 1]} : vector<5x48xf32> to vector<5x16xf32>
    %174 = arith.mulf %172, %37 : vector<5x16xf32>
    %175 = arith.mulf %171, %170 : vector<5x16xf32>
    %176 = arith.addf %174, %175 : vector<5x16xf32>
    %177 = math.tanh %176 : vector<5x16xf32>
    %178 = arith.mulf %173, %177 : vector<5x16xf32>
    %c4_71 = arith.constant 4 : index
    %c0_72 = arith.constant 0 : index
    %c0_73 = arith.constant 0 : index
    %179 = vector.load %arg13[%c4_71, %c0_72, %c0_73] : memref<5x5x16xf32, #tpu.memory_space<vmem>>, vector<1x5x16xf32>
    %180 = vector.shape_cast %179 : vector<1x5x16xf32> to vector<5x16xf32>
    %181 = vector.shape_cast %178 : vector<5x16xf32> to vector<1x5x16xf32>
    tpu.vector_store %arg13[%c4_71, %c0_72, %c0_73], %181 {strides = array<i32>} : memref<5x5x16xf32, #tpu.memory_space<vmem>>, vector<1x5x16xf32>,
    %c3_74 = arith.constant 3 : index
    %c0_75 = arith.constant 0 : index
    %c0_76 = arith.constant 0 : index
    %182 = vector.load %arg11[%c3_74, %c0_75, %c0_76] : memref<5x5x128xf32, #tpu.memory_space<vmem>>, vector<1x5x128xf32>
    %183 = vector.shape_cast %182 : vector<1x5x128xf32> to vector<5x128xf32>
    %184 = vector.extract_strided_slice %183 {offsets = [0, 64], sizes = [5, 64], strides = [1, 1]} : vector<5x128xf32> to vector<5x64xf32>
    %cst_77 = arith.constant dense<0.000000e+00> : vector<5x64xf32>
    %185 = tpu.matmul %178, %36, %cst_77 {dimension_numbers = #tpu.dot_dimension_numbers<[1], [0], [0], [1], [0, 0, 1, 1], [], []>} : vector<5x16xf32>, vector<16x64xf32>, vector<5x64xf32> -> vector<5x64xf32>
    %186 = arith.addf %184, %185 : vector<5x64xf32>
    %187 = vector.extract_strided_slice %186 {offsets = [0, 0], sizes = [5, 48], strides = [1, 1]} : vector<5x64xf32> to vector<5x48xf32>
    %188 = arith.negf %187 : vector<5x48xf32>
    %189 = math.exp %188 : vector<5x48xf32>
    %cst_78 = arith.constant 1.000000e+00 : f32
    %190 = vector.broadcast %cst_78 : f32 to vector<5x48xf32>
    %191 = arith.addf %190, %189 : vector<5x48xf32>
    %192 = arith.divf %190, %191 : vector<5x48xf32>
    %193 = vector.extract_strided_slice %186 {offsets = [0, 48], sizes = [5, 16], strides = [1, 1]} : vector<5x64xf32> to vector<5x16xf32>
    %194 = math.tanh %193 : vector<5x16xf32>
    %195 = vector.extract_strided_slice %192 {offsets = [0, 0], sizes = [5, 16], strides = [1, 1]} : vector<5x48xf32> to vector<5x16xf32>
    %196 = vector.extract_strided_slice %192 {offsets = [0, 16], sizes = [5, 16], strides = [1, 1]} : vector<5x48xf32> to vector<5x16xf32>
    %197 = vector.extract_strided_slice %192 {offsets = [0, 32], sizes = [5, 16], strides = [1, 1]} : vector<5x48xf32> to vector<5x16xf32>
    %198 = arith.mulf %196, %176 : vector<5x16xf32>
    %199 = arith.mulf %195, %194 : vector<5x16xf32>
    %200 = arith.addf %198, %199 : vector<5x16xf32>
    %201 = math.tanh %200 : vector<5x16xf32>
    %202 = arith.mulf %197, %201 : vector<5x16xf32>
    %c3_79 = arith.constant 3 : index
    %c0_80 = arith.constant 0 : index
    %c0_81 = arith.constant 0 : index
    %203 = vector.load %arg13[%c3_79, %c0_80, %c0_81] : memref<5x5x16xf32, #tpu.memory_space<vmem>>, vector<1x5x16xf32>
    %204 = vector.shape_cast %203 : vector<1x5x16xf32> to vector<5x16xf32>
    %205 = vector.shape_cast %202 : vector<5x16xf32> to vector<1x5x16xf32>
    tpu.vector_store %arg13[%c3_79, %c0_80, %c0_81], %205 {strides = array<i32>} : memref<5x5x16xf32, #tpu.memory_space<vmem>>, vector<1x5x16xf32>,
    %c2_82 = arith.constant 2 : index
    %c0_83 = arith.constant 0 : index
    %c0_84 = arith.constant 0 : index
    %206 = vector.load %arg11[%c2_82, %c0_83, %c0_84] : memref<5x5x128xf32, #tpu.memory_space<vmem>>, vector<1x5x128xf32>
    %207 = vector.shape_cast %206 : vector<1x5x128xf32> to vector<5x128xf32>
    %208 = vector.extract_strided_slice %207 {offsets = [0, 64], sizes = [5, 64], strides = [1, 1]} : vector<5x128xf32> to vector<5x64xf32>
    %cst_85 = arith.constant dense<0.000000e+00> : vector<5x64xf32>
    %209 = tpu.matmul %202, %36, %cst_85 {dimension_numbers = #tpu.dot_dimension_numbers<[1], [0], [0], [1], [0, 0, 1, 1], [], []>} : vector<5x16xf32>, vector<16x64xf32>, vector<5x64xf32> -> vector<5x64xf32>
    %210 = arith.addf %208, %209 : vector<5x64xf32>
    %211 = vector.extract_strided_slice %210 {offsets = [0, 0], sizes = [5, 48], strides = [1, 1]} : vector<5x64xf32> to vector<5x48xf32>
    %212 = arith.negf %211 : vector<5x48xf32>
    %213 = math.exp %212 : vector<5x48xf32>
    %cst_86 = arith.constant 1.000000e+00 : f32
    %214 = vector.broadcast %cst_86 : f32 to vector<5x48xf32>
    %215 = arith.addf %214, %213 : vector<5x48xf32>
    %216 = arith.divf %214, %215 : vector<5x48xf32>
    %217 = vector.extract_strided_slice %210 {offsets = [0, 48], sizes = [5, 16], strides = [1, 1]} : vector<5x64xf32> to vector<5x16xf32>
    %218 = math.tanh %217 : vector<5x16xf32>
    %219 = vector.extract_strided_slice %216 {offsets = [0, 0], sizes = [5, 16], strides = [1, 1]} : vector<5x48xf32> to vector<5x16xf32>
    %220 = vector.extract_strided_slice %216 {offsets = [0, 16], sizes = [5, 16], strides = [1, 1]} : vector<5x48xf32> to vector<5x16xf32>
    %221 = vector.extract_strided_slice %216 {offsets = [0, 32], sizes = [5, 16], strides = [1, 1]} : vector<5x48xf32> to vector<5x16xf32>
    %222 = arith.mulf %220, %200 : vector<5x16xf32>
    %223 = arith.mulf %219, %218 : vector<5x16xf32>
    %224 = arith.addf %222, %223 : vector<5x16xf32>
    %225 = math.tanh %224 : vector<5x16xf32>
    %226 = arith.mulf %221, %225 : vector<5x16xf32>
    %c2_87 = arith.constant 2 : index
    %c0_88 = arith.constant 0 : index
    %c0_89 = arith.constant 0 : index
    %227 = vector.load %arg13[%c2_87, %c0_88, %c0_89] : memref<5x5x16xf32, #tpu.memory_space<vmem>>, vector<1x5x16xf32>
    %228 = vector.shape_cast %227 : vector<1x5x16xf32> to vector<5x16xf32>
    %229 = vector.shape_cast %226 : vector<5x16xf32> to vector<1x5x16xf32>
    tpu.vector_store %arg13[%c2_87, %c0_88, %c0_89], %229 {strides = array<i32>} : memref<5x5x16xf32, #tpu.memory_space<vmem>>, vector<1x5x16xf32>,
    %c1_90 = arith.constant 1 : index
    %c0_91 = arith.constant 0 : index
    %c0_92 = arith.constant 0 : index
    %230 = vector.load %arg11[%c1_90, %c0_91, %c0_92] : memref<5x5x128xf32, #tpu.memory_space<vmem>>, vector<1x5x128xf32>
    %231 = vector.shape_cast %230 : vector<1x5x128xf32> to vector<5x128xf32>
    %232 = vector.extract_strided_slice %231 {offsets = [0, 64], sizes = [5, 64], strides = [1, 1]} : vector<5x128xf32> to vector<5x64xf32>
    %cst_93 = arith.constant dense<0.000000e+00> : vector<5x64xf32>
    %233 = tpu.matmul %226, %36, %cst_93 {dimension_numbers = #tpu.dot_dimension_numbers<[1], [0], [0], [1], [0, 0, 1, 1], [], []>} : vector<5x16xf32>, vector<16x64xf32>, vector<5x64xf32> -> vector<5x64xf32>
    %234 = arith.addf %232, %233 : vector<5x64xf32>
    %235 = vector.extract_strided_slice %234 {offsets = [0, 0], sizes = [5, 48], strides = [1, 1]} : vector<5x64xf32> to vector<5x48xf32>
    %236 = arith.negf %235 : vector<5x48xf32>
    %237 = math.exp %236 : vector<5x48xf32>
    %cst_94 = arith.constant 1.000000e+00 : f32
    %238 = vector.broadcast %cst_94 : f32 to vector<5x48xf32>
    %239 = arith.addf %238, %237 : vector<5x48xf32>
    %240 = arith.divf %238, %239 : vector<5x48xf32>
    %241 = vector.extract_strided_slice %234 {offsets = [0, 48], sizes = [5, 16], strides = [1, 1]} : vector<5x64xf32> to vector<5x16xf32>
    %242 = math.tanh %241 : vector<5x16xf32>
    %243 = vector.extract_strided_slice %240 {offsets = [0, 0], sizes = [5, 16], strides = [1, 1]} : vector<5x48xf32> to vector<5x16xf32>
    %244 = vector.extract_strided_slice %240 {offsets = [0, 16], sizes = [5, 16], strides = [1, 1]} : vector<5x48xf32> to vector<5x16xf32>
    %245 = vector.extract_strided_slice %240 {offsets = [0, 32], sizes = [5, 16], strides = [1, 1]} : vector<5x48xf32> to vector<5x16xf32>
    %246 = arith.mulf %244, %224 : vector<5x16xf32>
    %247 = arith.mulf %243, %242 : vector<5x16xf32>
    %248 = arith.addf %246, %247 : vector<5x16xf32>
    %249 = math.tanh %248 : vector<5x16xf32>
    %250 = arith.mulf %245, %249 : vector<5x16xf32>
    %c1_95 = arith.constant 1 : index
    %c0_96 = arith.constant 0 : index
    %c0_97 = arith.constant 0 : index
    %251 = vector.load %arg13[%c1_95, %c0_96, %c0_97] : memref<5x5x16xf32, #tpu.memory_space<vmem>>, vector<1x5x16xf32>
    %252 = vector.shape_cast %251 : vector<1x5x16xf32> to vector<5x16xf32>
    %253 = vector.shape_cast %250 : vector<5x16xf32> to vector<1x5x16xf32>
    tpu.vector_store %arg13[%c1_95, %c0_96, %c0_97], %253 {strides = array<i32>} : memref<5x5x16xf32, #tpu.memory_space<vmem>>, vector<1x5x16xf32>,
    %c0_98 = arith.constant 0 : index
    %c0_99 = arith.constant 0 : index
    %c0_100 = arith.constant 0 : index
    %254 = vector.load %arg11[%c0_98, %c0_99, %c0_100] : memref<5x5x128xf32, #tpu.memory_space<vmem>>, vector<1x5x128xf32>
    %255 = vector.shape_cast %254 : vector<1x5x128xf32> to vector<5x128xf32>
    %256 = vector.extract_strided_slice %255 {offsets = [0, 64], sizes = [5, 64], strides = [1, 1]} : vector<5x128xf32> to vector<5x64xf32>
    %cst_101 = arith.constant dense<0.000000e+00> : vector<5x64xf32>
    %257 = tpu.matmul %250, %36, %cst_101 {dimension_numbers = #tpu.dot_dimension_numbers<[1], [0], [0], [1], [0, 0, 1, 1], [], []>} : vector<5x16xf32>, vector<16x64xf32>, vector<5x64xf32> -> vector<5x64xf32>
    %258 = arith.addf %256, %257 : vector<5x64xf32>
    %259 = vector.extract_strided_slice %258 {offsets = [0, 0], sizes = [5, 48], strides = [1, 1]} : vector<5x64xf32> to vector<5x48xf32>
    %260 = arith.negf %259 : vector<5x48xf32>
    %261 = math.exp %260 : vector<5x48xf32>
    %cst_102 = arith.constant 1.000000e+00 : f32
    %262 = vector.broadcast %cst_102 : f32 to vector<5x48xf32>
    %263 = arith.addf %262, %261 : vector<5x48xf32>
    %264 = arith.divf %262, %263 : vector<5x48xf32>
    %265 = vector.extract_strided_slice %258 {offsets = [0, 48], sizes = [5, 16], strides = [1, 1]} : vector<5x64xf32> to vector<5x16xf32>
    %266 = math.tanh %265 : vector<5x16xf32>
    %267 = vector.extract_strided_slice %264 {offsets = [0, 0], sizes = [5, 16], strides = [1, 1]} : vector<5x48xf32> to vector<5x16xf32>
    %268 = vector.extract_strided_slice %264 {offsets = [0, 16], sizes = [5, 16], strides = [1, 1]} : vector<5x48xf32> to vector<5x16xf32>
    %269 = vector.extract_strided_slice %264 {offsets = [0, 32], sizes = [5, 16], strides = [1, 1]} : vector<5x48xf32> to vector<5x16xf32>
    %270 = arith.mulf %268, %248 : vector<5x16xf32>
    %271 = arith.mulf %267, %266 : vector<5x16xf32>
    %272 = arith.addf %270, %271 : vector<5x16xf32>
    %273 = math.tanh %272 : vector<5x16xf32>
    %274 = arith.mulf %269, %273 : vector<5x16xf32>
    %c0_103 = arith.constant 0 : index
    %c0_104 = arith.constant 0 : index
    %c0_105 = arith.constant 0 : index
    %275 = vector.load %arg13[%c0_103, %c0_104, %c0_105] : memref<5x5x16xf32, #tpu.memory_space<vmem>>, vector<1x5x16xf32>
    %276 = vector.shape_cast %275 : vector<1x5x16xf32> to vector<5x16xf32>
    %277 = vector.shape_cast %274 : vector<5x16xf32> to vector<1x5x16xf32>
    tpu.vector_store %arg13[%c0_103, %c0_104, %c0_105], %277 {strides = array<i32>} : memref<5x5x16xf32, #tpu.memory_space<vmem>>, vector<1x5x16xf32>,
    %c0_106 = arith.constant 0 : index
    %c0_107 = arith.constant 0 : index
    %c0_108 = arith.constant 0 : index
    %278 = vector.load %arg12[%c0_106, %c0_107, %c0_108] : memref<5x5x16xf32, #tpu.memory_space<vmem>>, vector<5x5x16xf32>
    %c0_109 = arith.constant 0 : index
    %c0_110 = arith.constant 0 : index
    %c0_111 = arith.constant 0 : index
    %279 = vector.load %arg13[%c0_109, %c0_110, %c0_111] : memref<5x5x16xf32, #tpu.memory_space<vmem>>, vector<5x5x16xf32>
    %280 = tpu.concatenate %278, %279 in 2 : vector<5x5x16xf32>, vector<5x5x16xf32> -> vector<5x5x32xf32>
    %281 = vector.shape_cast %280 : vector<5x5x32xf32> to vector<25x32xf32>
    %c0_112 = arith.constant 0 : index
    %c0_113 = arith.constant 0 : index
    %282 = vector.load %arg8[%c0_112, %c0_113] : memref<32x16xf32, #tpu.memory_space<vmem>>, vector<32x16xf32>
    %cst_114 = arith.constant dense<0.000000e+00> : vector<25x16xf32>
    %283 = tpu.matmul %281, %282, %cst_114 {dimension_numbers = #tpu.dot_dimension_numbers<[1], [0], [0], [1], [0, 0, 1, 1], [], []>} : vector<25x32xf32>, vector<32x16xf32>, vector<25x16xf32> -> vector<25x16xf32>
    %c0_115 = arith.constant 0 : index
    %c0_116 = arith.constant 0 : index
    %284 = vector.load %arg9[%c0_115, %c0_116] : memref<1x16xf32, #tpu.memory_space<vmem>>, vector<1x16xf32>
    %285 = vector.broadcast %284 : vector<1x16xf32> to vector<25x16xf32>
    %286 = arith.addf %283, %285 : vector<25x16xf32>
    %287 = vector.shape_cast %0 : vector<5x1x5x16xf32> to vector<25x16xf32>
    %288 = arith.addf %286, %287 : vector<25x16xf32>
    %289 = vector.shape_cast %288 : vector<25x16xf32> to vector<5x1x5x16xf32>
    %c0_117 = arith.constant 0 : index
    %c0_118 = arith.constant 0 : index
    %c0_119 = arith.constant 0 : index
    %c0_120 = arith.constant 0 : index
    %290 = vector.load %arg10[%c0_117, %c0_118, %c0_119, %c0_120] : memref<5x1x5x16xf32, #tpu.memory_space<vmem>>, vector<5x1x5x16xf32>
    tpu.vector_store %arg10[%c0_117, %c0_118, %c0_119, %c0_120], %289 {strides = array<i32>} : memref<5x1x5x16xf32, #tpu.memory_space<vmem>>, vector<5x1x5x16xf32>,
    return
  }
  func.func @transform_0(%arg0: i32) -> (i32, i32, i32, i32) {
    %c0_i32 = arith.constant 0 : i32
    %c0_i32_0 = arith.constant 0 : i32
    %c0_i32_1 = arith.constant 0 : i32
    %c0_i32_2 = arith.constant 0 : i32
    return %c0_i32, %arg0, %c0_i32_0, %c0_i32_1 : i32, i32, i32, i32
  }
  func.func @transform_1(%arg0: i32) -> (i32, i32, i32, i32) {
    %c0_i32 = arith.constant 0 : i32
    %c0_i32_0 = arith.constant 0 : i32
    %c0_i32_1 = arith.constant 0 : i32
    %c0_i32_2 = arith.constant 0 : i32
    %c0_i32_3 = arith.constant 0 : i32
    return %c0_i32, %c0_i32_0, %c0_i32_1, %c0_i32_2 : i32, i32, i32, i32
  }
  func.func @transform_2(%arg0: i32) -> (i32, i32, i32, i32) {
    %c0_i32 = arith.constant 0 : i32
    %c0_i32_0 = arith.constant 0 : i32
    %c0_i32_1 = arith.constant 0 : i32
    %c0_i32_2 = arith.constant 0 : i32
    %c0_i32_3 = arith.constant 0 : i32
    return %c0_i32, %c0_i32_0, %c0_i32_1, %c0_i32_2 : i32, i32, i32, i32
  }
  func.func @transform_3(%arg0: i32) -> (i32, i32) {
    %c0_i32 = arith.constant 0 : i32
    %c0_i32_0 = arith.constant 0 : i32
    %c0_i32_1 = arith.constant 0 : i32
    return %c0_i32, %c0_i32_0 : i32, i32
  }
  func.func @transform_4(%arg0: i32) -> (i32, i32) {
    %c0_i32 = arith.constant 0 : i32
    %c0_i32_0 = arith.constant 0 : i32
    %c0_i32_1 = arith.constant 0 : i32
    return %c0_i32, %c0_i32_0 : i32, i32
  }
  func.func @transform_5(%arg0: i32) -> (i32, i32) {
    %c0_i32 = arith.constant 0 : i32
    %c0_i32_0 = arith.constant 0 : i32
    %c0_i32_1 = arith.constant 0 : i32
    return %c0_i32, %c0_i32_0 : i32, i32
  }
  func.func @transform_6(%arg0: i32) -> (i32, i32) {
    %c0_i32 = arith.constant 0 : i32
    %c0_i32_0 = arith.constant 0 : i32
    %c0_i32_1 = arith.constant 0 : i32
    return %c0_i32, %c0_i32_0 : i32, i32
  }
  func.func @transform_7(%arg0: i32) -> (i32, i32) {
    %c0_i32 = arith.constant 0 : i32
    %c0_i32_0 = arith.constant 0 : i32
    %c0_i32_1 = arith.constant 0 : i32
    return %c0_i32, %c0_i32_0 : i32, i32
  }
  func.func @transform_8(%arg0: i32) -> (i32, i32) {
    %c0_i32 = arith.constant 0 : i32
    %c0_i32_0 = arith.constant 0 : i32
    %c0_i32_1 = arith.constant 0 : i32
    return %c0_i32, %c0_i32_0 : i32, i32
  }
  func.func @transform_9(%arg0: i32) -> (i32, i32, i32, i32) {
    %c0_i32 = arith.constant 0 : i32
    %c0_i32_0 = arith.constant 0 : i32
    %c0_i32_1 = arith.constant 0 : i32
    %c0_i32_2 = arith.constant 0 : i32
    return %c0_i32, %arg0, %c0_i32_0, %c0_i32_1 : i32, i32, i32, i32
  }
}

module attributes {stable_mosaic.version = 11 : i64} {
  func.func @_bilstm_block_kernel(%arg0: i32, %arg1: memref<5x1x5x16xf32, #tpu.memory_space<vmem>>, %arg2: memref<5x1x1x1xf32, #tpu.memory_space<vmem>>, %arg3: memref<5x1x1x1xf32, #tpu.memory_space<vmem>>, %arg4: memref<16x128xf32, #tpu.memory_space<vmem>>, %arg5: memref<1x128xf32, #tpu.memory_space<vmem>>, %arg6: memref<16x64xf32, #tpu.memory_space<vmem>>, %arg7: memref<16x64xf32, #tpu.memory_space<vmem>>, %arg8: memref<32x16xf32, #tpu.memory_space<vmem>>, %arg9: memref<1x16xf32, #tpu.memory_space<vmem>>, %arg10: memref<5x1x5x16xf32, #tpu.memory_space<vmem>>, %arg11: memref<5x5x128xf32, #tpu.memory_space<vmem>>, %arg12: memref<5x5x16xf32, #tpu.memory_space<vmem>>, %arg13: memref<5x5x16xf32, #tpu.memory_space<vmem>>) attributes {dimension_semantics = [#tpu.dimension_semantics<parallel>], iteration_bounds = array<i64: 2>, scalar_prefetch = 0 : i64, scratch_operands = 3 : i64, tpu.core_type = #tpu.core_type<tc>, window_params = [{transform_indices = @transform_0, window_bounds = array<i64: 5, 1, 5, 16>}, {pipeline_mode = #tpu.pipeline_mode<synchronous>, transform_indices = @transform_1, window_bounds = array<i64: 5, 1, 1, 1>}, {pipeline_mode = #tpu.pipeline_mode<synchronous>, transform_indices = @transform_2, window_bounds = array<i64: 5, 1, 1, 1>}, {pipeline_mode = #tpu.pipeline_mode<synchronous>, transform_indices = @transform_3, window_bounds = array<i64: 16, 128>}, {pipeline_mode = #tpu.pipeline_mode<synchronous>, transform_indices = @transform_4, window_bounds = array<i64: 1, 128>}, {pipeline_mode = #tpu.pipeline_mode<synchronous>, transform_indices = @transform_5, window_bounds = array<i64: 16, 64>}, {pipeline_mode = #tpu.pipeline_mode<synchronous>, transform_indices = @transform_6, window_bounds = array<i64: 16, 64>}, {pipeline_mode = #tpu.pipeline_mode<synchronous>, transform_indices = @transform_7, window_bounds = array<i64: 32, 16>}, {pipeline_mode = #tpu.pipeline_mode<synchronous>, transform_indices = @transform_8, window_bounds = array<i64: 1, 16>}, {transform_indices = @transform_9, window_bounds = array<i64: 5, 1, 5, 16>}]} {
    %c0 = arith.constant 0 : index
    %c0_0 = arith.constant 0 : index
    %c0_1 = arith.constant 0 : index
    %c0_2 = arith.constant 0 : index
    %0 = vector.load %arg1[%c0, %c0_0, %c0_1, %c0_2] : memref<5x1x5x16xf32, #tpu.memory_space<vmem>>, vector<5x1x5x16xf32>
    %cst = arith.constant dense<0.000000e+00> : vector<5x1x16xf32>
    %1 = vector.multi_reduction <add>, %0, %cst [2] : vector<5x1x5x16xf32> to vector<5x1x16xf32>
    %2 = vector.shape_cast %1 : vector<5x1x16xf32> to vector<5x1x1x16xf32>
    %cst_3 = arith.constant dense<0.000000e+00> : vector<5x1x1xf32>
    %3 = vector.multi_reduction <add>, %2, %cst_3 [3] : vector<5x1x1x16xf32> to vector<5x1x1xf32>
    %4 = vector.shape_cast %3 : vector<5x1x1xf32> to vector<5x1x1x1xf32>
    %cst_4 = arith.constant 8.000000e+01 : f32
    %5 = vector.broadcast %cst_4 : f32 to vector<5x1x1x1xf32>
    %6 = arith.divf %4, %5 : vector<5x1x1x1xf32>
    %7 = vector.broadcast %6 : vector<5x1x1x1xf32> to vector<5x1x5x16xf32>
    %8 = arith.subf %0, %7 : vector<5x1x5x16xf32>
    %9 = arith.mulf %8, %8 : vector<5x1x5x16xf32>
    %cst_5 = arith.constant dense<0.000000e+00> : vector<5x1x16xf32>
    %10 = vector.multi_reduction <add>, %9, %cst_5 [2] : vector<5x1x5x16xf32> to vector<5x1x16xf32>
    %11 = vector.shape_cast %10 : vector<5x1x16xf32> to vector<5x1x1x16xf32>
    %cst_6 = arith.constant dense<0.000000e+00> : vector<5x1x1xf32>
    %12 = vector.multi_reduction <add>, %11, %cst_6 [3] : vector<5x1x1x16xf32> to vector<5x1x1xf32>
    %13 = vector.shape_cast %12 : vector<5x1x1xf32> to vector<5x1x1x1xf32>
    %cst_7 = arith.constant 8.000000e+01 : f32
    %14 = vector.broadcast %cst_7 : f32 to vector<5x1x1x1xf32>
    %15 = arith.divf %13, %14 : vector<5x1x1x1xf32>
    %cst_8 = arith.constant 9.99999974E-6 : f32
    %16 = vector.broadcast %cst_8 : f32 to vector<5x1x1x1xf32>
    %17 = arith.addf %15, %16 : vector<5x1x1x1xf32>
    %18 = math.rsqrt %17 : vector<5x1x1x1xf32>
    %19 = vector.broadcast %18 : vector<5x1x1x1xf32> to vector<5x1x5x16xf32>
    %20 = arith.mulf %8, %19 : vector<5x1x5x16xf32>
    %c0_9 = arith.constant 0 : index
    %c0_10 = arith.constant 0 : index
    %c0_11 = arith.constant 0 : index
    %c0_12 = arith.constant 0 : index
    %21 = vector.load %arg2[%c0_9, %c0_10, %c0_11, %c0_12] : memref<5x1x1x1xf32, #tpu.memory_space<vmem>>, vector<5x1x1x1xf32>
    %22 = vector.broadcast %21 : vector<5x1x1x1xf32> to vector<5x1x5x16xf32>
    %23 = arith.mulf %20, %22 : vector<5x1x5x16xf32>
    %c0_13 = arith.constant 0 : index
    %c0_14 = arith.constant 0 : index
    %c0_15 = arith.constant 0 : index
    %c0_16 = arith.constant 0 : index
    %24 = vector.load %arg3[%c0_13, %c0_14, %c0_15, %c0_16] : memref<5x1x1x1xf32, #tpu.memory_space<vmem>>, vector<5x1x1x1xf32>
    %25 = vector.broadcast %24 : vector<5x1x1x1xf32> to vector<5x1x5x16xf32>
    %26 = arith.addf %23, %25 : vector<5x1x5x16xf32>
    %27 = vector.shape_cast %26 : vector<5x1x5x16xf32> to vector<25x16xf32>
    %c0_17 = arith.constant 0 : index
    %c0_18 = arith.constant 0 : index
    %28 = vector.load %arg4[%c0_17, %c0_18] : memref<16x128xf32, #tpu.memory_space<vmem>>, vector<16x128xf32>
    %cst_19 = arith.constant dense<0.000000e+00> : vector<25x128xf32>
    %29 = tpu.matmul %27, %28, %cst_19 {dimension_numbers = #tpu.dot_dimension_numbers<[1], [0], [0], [1], [0, 0, 1, 1], [], []>} : vector<25x16xf32>, vector<16x128xf32>, vector<25x128xf32> -> vector<25x128xf32>
    %c0_20 = arith.constant 0 : index
    %c0_21 = arith.constant 0 : index
    %30 = vector.load %arg5[%c0_20, %c0_21] : memref<1x128xf32, #tpu.memory_space<vmem>>, vector<1x128xf32>
    %31 = vector.broadcast %30 : vector<1x128xf32> to vector<25x128xf32>
    %32 = arith.addf %29, %31 : vector<25x128xf32>
    %33 = vector.shape_cast %32 : vector<25x128xf32> to vector<5x5x128xf32>
    %c0_22 = arith.constant 0 : index
    %c0_23 = arith.constant 0 : index
    %c0_24 = arith.constant 0 : index
    %34 = vector.load %arg11[%c0_22, %c0_23, %c0_24] : memref<5x5x128xf32, #tpu.memory_space<vmem>>, vector<5x5x128xf32>
    tpu.vector_store %arg11[%c0_22, %c0_23, %c0_24], %33 {strides = array<i32>} : memref<5x5x128xf32, #tpu.memory_space<vmem>>, vector<5x5x128xf32>,
    %c0_25 = arith.constant 0 : index
    %c0_26 = arith.constant 0 : index
    %35 = vector.load %arg6[%c0_25, %c0_26] : memref<16x64xf32, #tpu.memory_space<vmem>>, vector<16x64xf32>
    %c0_27 = arith.constant 0 : index
    %c0_28 = arith.constant 0 : index
    %36 = vector.load %arg7[%c0_27, %c0_28] : memref<16x64xf32, #tpu.memory_space<vmem>>, vector<16x64xf32>
    %cst_29 = arith.constant 0.000000e+00 : f32
    %37 = vector.broadcast %cst_29 : f32 to vector<5x16xf32>
    %c0_30 = arith.constant 0 : index
    %c0_31 = arith.constant 0 : index
    %c0_32 = arith.constant 0 : index
    %38 = vector.load %arg11[%c0_30, %c0_31, %c0_32] : memref<5x5x128xf32, #tpu.memory_space<vmem>>, vector<1x5x128xf32>
    %39 = vector.shape_cast %38 : vector<1x5x128xf32> to vector<5x128xf32>
    %40 = vector.extract_strided_slice %39 {offsets = [0, 0], sizes = [5, 64], strides = [1, 1]} : vector<5x128xf32> to vector<5x64xf32>
    %cst_33 = arith.constant dense<0.000000e+00> : vector<5x64xf32>
    %41 = tpu.matmul %37, %35, %cst_33 {dimension_numbers = #tpu.dot_dimension_numbers<[1], [0], [0], [1], [0, 0, 1, 1], [], []>} : vector<5x16xf32>, vector<16x64xf32>, vector<5x64xf32> -> vector<5x64xf32>
    %42 = arith.addf %40, %41 : vector<5x64xf32>
    %43 = vector.extract_strided_slice %42 {offsets = [0, 0], sizes = [5, 48], strides = [1, 1]} : vector<5x64xf32> to vector<5x48xf32>
    %44 = arith.negf %43 : vector<5x48xf32>
    %45 = math.exp %44 : vector<5x48xf32>
    %cst_34 = arith.constant 1.000000e+00 : f32
    %46 = vector.broadcast %cst_34 : f32 to vector<5x48xf32>
    %47 = arith.addf %46, %45 : vector<5x48xf32>
    %48 = arith.divf %46, %47 : vector<5x48xf32>
    %49 = vector.extract_strided_slice %42 {offsets = [0, 48], sizes = [5, 16], strides = [1, 1]} : vector<5x64xf32> to vector<5x16xf32>
    %50 = math.tanh %49 : vector<5x16xf32>
    %51 = vector.extract_strided_slice %48 {offsets = [0, 0], sizes = [5, 16], strides = [1, 1]} : vector<5x48xf32> to vector<5x16xf32>
    %52 = vector.extract_strided_slice %48 {offsets = [0, 16], sizes = [5, 16], strides = [1, 1]} : vector<5x48xf32> to vector<5x16xf32>
    %53 = vector.extract_strided_slice %48 {offsets = [0, 32], sizes = [5, 16], strides = [1, 1]} : vector<5x48xf32> to vector<5x16xf32>
    %54 = arith.mulf %52, %37 : vector<5x16xf32>
    %55 = arith.mulf %51, %50 : vector<5x16xf32>
    %56 = arith.addf %54, %55 : vector<5x16xf32>
    %57 = math.tanh %56 : vector<5x16xf32>
    %58 = arith.mulf %53, %57 : vector<5x16xf32>
    %c0_35 = arith.constant 0 : index
    %c0_36 = arith.constant 0 : index
    %c0_37 = arith.constant 0 : index
    %59 = vector.load %arg12[%c0_35, %c0_36, %c0_37] : memref<5x5x16xf32, #tpu.memory_space<vmem>>, vector<1x5x16xf32>
    %60 = vector.shape_cast %59 : vector<1x5x16xf32> to vector<5x16xf32>
    %61 = vector.shape_cast %58 : vector<5x16xf32> to vector<1x5x16xf32>
    tpu.vector_store %arg12[%c0_35, %c0_36, %c0_37], %61 {strides = array<i32>} : memref<5x5x16xf32, #tpu.memory_space<vmem>>, vector<1x5x16xf32>,
    %c1 = arith.constant 1 : index
    %c0_38 = arith.constant 0 : index
    %c0_39 = arith.constant 0 : index
    %62 = vector.load %arg11[%c1, %c0_38, %c0_39] : memref<5x5x128xf32, #tpu.memory_space<vmem>>, vector<1x5x128xf32>
    %63 = vector.shape_cast %62 : vector<1x5x128xf32> to vector<5x128xf32>
    %64 = vector.extract_strided_slice %63 {offsets = [0, 0], sizes = [5, 64], strides = [1, 1]} : vector<5x128xf32> to vector<5x64xf32>
    %cst_40 = arith.constant dense<0.000000e+00> : vector<5x64xf32>
    %65 = tpu.matmul %58, %35, %cst_40 {dimension_numbers = #tpu.dot_dimension_numbers<[1], [0], [0], [1], [0, 0, 1, 1], [], []>} : vector<5x16xf32>, vector<16x64xf32>, vector<5x64xf32> -> vector<5x64xf32>
    %66 = arith.addf %64, %65 : vector<5x64xf32>
    %67 = vector.extract_strided_slice %66 {offsets = [0, 0], sizes = [5, 48], strides = [1, 1]} : vector<5x64xf32> to vector<5x48xf32>
    %68 = arith.negf %67 : vector<5x48xf32>
    %69 = math.exp %68 : vector<5x48xf32>
    %cst_41 = arith.constant 1.000000e+00 : f32
    %70 = vector.broadcast %cst_41 : f32 to vector<5x48xf32>
    %71 = arith.addf %70, %69 : vector<5x48xf32>
    %72 = arith.divf %70, %71 : vector<5x48xf32>
    %73 = vector.extract_strided_slice %66 {offsets = [0, 48], sizes = [5, 16], strides = [1, 1]} : vector<5x64xf32> to vector<5x16xf32>
    %74 = math.tanh %73 : vector<5x16xf32>
    %75 = vector.extract_strided_slice %72 {offsets = [0, 0], sizes = [5, 16], strides = [1, 1]} : vector<5x48xf32> to vector<5x16xf32>
    %76 = vector.extract_strided_slice %72 {offsets = [0, 16], sizes = [5, 16], strides = [1, 1]} : vector<5x48xf32> to vector<5x16xf32>
    %77 = vector.extract_strided_slice %72 {offsets = [0, 32], sizes = [5, 16], strides = [1, 1]} : vector<5x48xf32> to vector<5x16xf32>
    %78 = arith.mulf %76, %56 : vector<5x16xf32>
    %79 = arith.mulf %75, %74 : vector<5x16xf32>
    %80 = arith.addf %78, %79 : vector<5x16xf32>
    %81 = math.tanh %80 : vector<5x16xf32>
    %82 = arith.mulf %77, %81 : vector<5x16xf32>
    %c1_42 = arith.constant 1 : index
    %c0_43 = arith.constant 0 : index
    %c0_44 = arith.constant 0 : index
    %83 = vector.load %arg12[%c1_42, %c0_43, %c0_44] : memref<5x5x16xf32, #tpu.memory_space<vmem>>, vector<1x5x16xf32>
    %84 = vector.shape_cast %83 : vector<1x5x16xf32> to vector<5x16xf32>
    %85 = vector.shape_cast %82 : vector<5x16xf32> to vector<1x5x16xf32>
    tpu.vector_store %arg12[%c1_42, %c0_43, %c0_44], %85 {strides = array<i32>} : memref<5x5x16xf32, #tpu.memory_space<vmem>>, vector<1x5x16xf32>,
    %c2 = arith.constant 2 : index
    %c0_45 = arith.constant 0 : index
    %c0_46 = arith.constant 0 : index
    %86 = vector.load %arg11[%c2, %c0_45, %c0_46] : memref<5x5x128xf32, #tpu.memory_space<vmem>>, vector<1x5x128xf32>
    %87 = vector.shape_cast %86 : vector<1x5x128xf32> to vector<5x128xf32>
    %88 = vector.extract_strided_slice %87 {offsets = [0, 0], sizes = [5, 64], strides = [1, 1]} : vector<5x128xf32> to vector<5x64xf32>
    %cst_47 = arith.constant dense<0.000000e+00> : vector<5x64xf32>
    %89 = tpu.matmul %82, %35, %cst_47 {dimension_numbers = #tpu.dot_dimension_numbers<[1], [0], [0], [1], [0, 0, 1, 1], [], []>} : vector<5x16xf32>, vector<16x64xf32>, vector<5x64xf32> -> vector<5x64xf32>
    %90 = arith.addf %88, %89 : vector<5x64xf32>
    %91 = vector.extract_strided_slice %90 {offsets = [0, 0], sizes = [5, 48], strides = [1, 1]} : vector<5x64xf32> to vector<5x48xf32>
    %92 = arith.negf %91 : vector<5x48xf32>
    %93 = math.exp %92 : vector<5x48xf32>
    %cst_48 = arith.constant 1.000000e+00 : f32
    %94 = vector.broadcast %cst_48 : f32 to vector<5x48xf32>
    %95 = arith.addf %94, %93 : vector<5x48xf32>
    %96 = arith.divf %94, %95 : vector<5x48xf32>
    %97 = vector.extract_strided_slice %90 {offsets = [0, 48], sizes = [5, 16], strides = [1, 1]} : vector<5x64xf32> to vector<5x16xf32>
    %98 = math.tanh %97 : vector<5x16xf32>
    %99 = vector.extract_strided_slice %96 {offsets = [0, 0], sizes = [5, 16], strides = [1, 1]} : vector<5x48xf32> to vector<5x16xf32>
    %100 = vector.extract_strided_slice %96 {offsets = [0, 16], sizes = [5, 16], strides = [1, 1]} : vector<5x48xf32> to vector<5x16xf32>
    %101 = vector.extract_strided_slice %96 {offsets = [0, 32], sizes = [5, 16], strides = [1, 1]} : vector<5x48xf32> to vector<5x16xf32>
    %102 = arith.mulf %100, %80 : vector<5x16xf32>
    %103 = arith.mulf %99, %98 : vector<5x16xf32>
    %104 = arith.addf %102, %103 : vector<5x16xf32>
    %105 = math.tanh %104 : vector<5x16xf32>
    %106 = arith.mulf %101, %105 : vector<5x16xf32>
    %c2_49 = arith.constant 2 : index
    %c0_50 = arith.constant 0 : index
    %c0_51 = arith.constant 0 : index
    %107 = vector.load %arg12[%c2_49, %c0_50, %c0_51] : memref<5x5x16xf32, #tpu.memory_space<vmem>>, vector<1x5x16xf32>
    %108 = vector.shape_cast %107 : vector<1x5x16xf32> to vector<5x16xf32>
    %109 = vector.shape_cast %106 : vector<5x16xf32> to vector<1x5x16xf32>
    tpu.vector_store %arg12[%c2_49, %c0_50, %c0_51], %109 {strides = array<i32>} : memref<5x5x16xf32, #tpu.memory_space<vmem>>, vector<1x5x16xf32>,
    %c3 = arith.constant 3 : index
    %c0_52 = arith.constant 0 : index
    %c0_53 = arith.constant 0 : index
    %110 = vector.load %arg11[%c3, %c0_52, %c0_53] : memref<5x5x128xf32, #tpu.memory_space<vmem>>, vector<1x5x128xf32>
    %111 = vector.shape_cast %110 : vector<1x5x128xf32> to vector<5x128xf32>
    %112 = vector.extract_strided_slice %111 {offsets = [0, 0], sizes = [5, 64], strides = [1, 1]} : vector<5x128xf32> to vector<5x64xf32>
    %cst_54 = arith.constant dense<0.000000e+00> : vector<5x64xf32>
    %113 = tpu.matmul %106, %35, %cst_54 {dimension_numbers = #tpu.dot_dimension_numbers<[1], [0], [0], [1], [0, 0, 1, 1], [], []>} : vector<5x16xf32>, vector<16x64xf32>, vector<5x64xf32> -> vector<5x64xf32>
    %114 = arith.addf %112, %113 : vector<5x64xf32>
    %115 = vector.extract_strided_slice %114 {offsets = [0, 0], sizes = [5, 48], strides = [1, 1]} : vector<5x64xf32> to vector<5x48xf32>
    %116 = arith.negf %115 : vector<5x48xf32>
    %117 = math.exp %116 : vector<5x48xf32>
    %cst_55 = arith.constant 1.000000e+00 : f32
    %118 = vector.broadcast %cst_55 : f32 to vector<5x48xf32>
    %119 = arith.addf %118, %117 : vector<5x48xf32>
    %120 = arith.divf %118, %119 : vector<5x48xf32>
    %121 = vector.extract_strided_slice %114 {offsets = [0, 48], sizes = [5, 16], strides = [1, 1]} : vector<5x64xf32> to vector<5x16xf32>
    %122 = math.tanh %121 : vector<5x16xf32>
    %123 = vector.extract_strided_slice %120 {offsets = [0, 0], sizes = [5, 16], strides = [1, 1]} : vector<5x48xf32> to vector<5x16xf32>
    %124 = vector.extract_strided_slice %120 {offsets = [0, 16], sizes = [5, 16], strides = [1, 1]} : vector<5x48xf32> to vector<5x16xf32>
    %125 = vector.extract_strided_slice %120 {offsets = [0, 32], sizes = [5, 16], strides = [1, 1]} : vector<5x48xf32> to vector<5x16xf32>
    %126 = arith.mulf %124, %104 : vector<5x16xf32>
    %127 = arith.mulf %123, %122 : vector<5x16xf32>
    %128 = arith.addf %126, %127 : vector<5x16xf32>
    %129 = math.tanh %128 : vector<5x16xf32>
    %130 = arith.mulf %125, %129 : vector<5x16xf32>
    %c3_56 = arith.constant 3 : index
    %c0_57 = arith.constant 0 : index
    %c0_58 = arith.constant 0 : index
    %131 = vector.load %arg12[%c3_56, %c0_57, %c0_58] : memref<5x5x16xf32, #tpu.memory_space<vmem>>, vector<1x5x16xf32>
    %132 = vector.shape_cast %131 : vector<1x5x16xf32> to vector<5x16xf32>
    %133 = vector.shape_cast %130 : vector<5x16xf32> to vector<1x5x16xf32>
    tpu.vector_store %arg12[%c3_56, %c0_57, %c0_58], %133 {strides = array<i32>} : memref<5x5x16xf32, #tpu.memory_space<vmem>>, vector<1x5x16xf32>,
    %c4 = arith.constant 4 : index
    %c0_59 = arith.constant 0 : index
    %c0_60 = arith.constant 0 : index
    %134 = vector.load %arg11[%c4, %c0_59, %c0_60] : memref<5x5x128xf32, #tpu.memory_space<vmem>>, vector<1x5x128xf32>
    %135 = vector.shape_cast %134 : vector<1x5x128xf32> to vector<5x128xf32>
    %136 = vector.extract_strided_slice %135 {offsets = [0, 0], sizes = [5, 64], strides = [1, 1]} : vector<5x128xf32> to vector<5x64xf32>
    %cst_61 = arith.constant dense<0.000000e+00> : vector<5x64xf32>
    %137 = tpu.matmul %130, %35, %cst_61 {dimension_numbers = #tpu.dot_dimension_numbers<[1], [0], [0], [1], [0, 0, 1, 1], [], []>} : vector<5x16xf32>, vector<16x64xf32>, vector<5x64xf32> -> vector<5x64xf32>
    %138 = arith.addf %136, %137 : vector<5x64xf32>
    %139 = vector.extract_strided_slice %138 {offsets = [0, 0], sizes = [5, 48], strides = [1, 1]} : vector<5x64xf32> to vector<5x48xf32>
    %140 = arith.negf %139 : vector<5x48xf32>
    %141 = math.exp %140 : vector<5x48xf32>
    %cst_62 = arith.constant 1.000000e+00 : f32
    %142 = vector.broadcast %cst_62 : f32 to vector<5x48xf32>
    %143 = arith.addf %142, %141 : vector<5x48xf32>
    %144 = arith.divf %142, %143 : vector<5x48xf32>
    %145 = vector.extract_strided_slice %138 {offsets = [0, 48], sizes = [5, 16], strides = [1, 1]} : vector<5x64xf32> to vector<5x16xf32>
    %146 = math.tanh %145 : vector<5x16xf32>
    %147 = vector.extract_strided_slice %144 {offsets = [0, 0], sizes = [5, 16], strides = [1, 1]} : vector<5x48xf32> to vector<5x16xf32>
    %148 = vector.extract_strided_slice %144 {offsets = [0, 16], sizes = [5, 16], strides = [1, 1]} : vector<5x48xf32> to vector<5x16xf32>
    %149 = vector.extract_strided_slice %144 {offsets = [0, 32], sizes = [5, 16], strides = [1, 1]} : vector<5x48xf32> to vector<5x16xf32>
    %150 = arith.mulf %148, %128 : vector<5x16xf32>
    %151 = arith.mulf %147, %146 : vector<5x16xf32>
    %152 = arith.addf %150, %151 : vector<5x16xf32>
    %153 = math.tanh %152 : vector<5x16xf32>
    %154 = arith.mulf %149, %153 : vector<5x16xf32>
    %c4_63 = arith.constant 4 : index
    %c0_64 = arith.constant 0 : index
    %c0_65 = arith.constant 0 : index
    %155 = vector.load %arg12[%c4_63, %c0_64, %c0_65] : memref<5x5x16xf32, #tpu.memory_space<vmem>>, vector<1x5x16xf32>
    %156 = vector.shape_cast %155 : vector<1x5x16xf32> to vector<5x16xf32>
    %157 = vector.shape_cast %154 : vector<5x16xf32> to vector<1x5x16xf32>
    tpu.vector_store %arg12[%c4_63, %c0_64, %c0_65], %157 {strides = array<i32>} : memref<5x5x16xf32, #tpu.memory_space<vmem>>, vector<1x5x16xf32>,
    %c4_66 = arith.constant 4 : index
    %c0_67 = arith.constant 0 : index
    %c0_68 = arith.constant 0 : index
    %158 = vector.load %arg11[%c4_66, %c0_67, %c0_68] : memref<5x5x128xf32, #tpu.memory_space<vmem>>, vector<1x5x128xf32>
    %159 = vector.shape_cast %158 : vector<1x5x128xf32> to vector<5x128xf32>
    %160 = vector.extract_strided_slice %159 {offsets = [0, 64], sizes = [5, 64], strides = [1, 1]} : vector<5x128xf32> to vector<5x64xf32>
    %cst_69 = arith.constant dense<0.000000e+00> : vector<5x64xf32>
    %161 = tpu.matmul %37, %36, %cst_69 {dimension_numbers = #tpu.dot_dimension_numbers<[1], [0], [0], [1], [0, 0, 1, 1], [], []>} : vector<5x16xf32>, vector<16x64xf32>, vector<5x64xf32> -> vector<5x64xf32>
    %162 = arith.addf %160, %161 : vector<5x64xf32>
    %163 = vector.extract_strided_slice %162 {offsets = [0, 0], sizes = [5, 48], strides = [1, 1]} : vector<5x64xf32> to vector<5x48xf32>
    %164 = arith.negf %163 : vector<5x48xf32>
    %165 = math.exp %164 : vector<5x48xf32>
    %cst_70 = arith.constant 1.000000e+00 : f32
    %166 = vector.broadcast %cst_70 : f32 to vector<5x48xf32>
    %167 = arith.addf %166, %165 : vector<5x48xf32>
    %168 = arith.divf %166, %167 : vector<5x48xf32>
    %169 = vector.extract_strided_slice %162 {offsets = [0, 48], sizes = [5, 16], strides = [1, 1]} : vector<5x64xf32> to vector<5x16xf32>
    %170 = math.tanh %169 : vector<5x16xf32>
    %171 = vector.extract_strided_slice %168 {offsets = [0, 0], sizes = [5, 16], strides = [1, 1]} : vector<5x48xf32> to vector<5x16xf32>
    %172 = vector.extract_strided_slice %168 {offsets = [0, 16], sizes = [5, 16], strides = [1, 1]} : vector<5x48xf32> to vector<5x16xf32>
    %173 = vector.extract_strided_slice %168 {offsets = [0, 32], sizes = [5, 16], strides = [1, 1]} : vector<5x48xf32> to vector<5x16xf32>
    %174 = arith.mulf %172, %37 : vector<5x16xf32>
    %175 = arith.mulf %171, %170 : vector<5x16xf32>
    %176 = arith.addf %174, %175 : vector<5x16xf32>
    %177 = math.tanh %176 : vector<5x16xf32>
    %178 = arith.mulf %173, %177 : vector<5x16xf32>
    %c4_71 = arith.constant 4 : index
    %c0_72 = arith.constant 0 : index
    %c0_73 = arith.constant 0 : index
    %179 = vector.load %arg13[%c4_71, %c0_72, %c0_73] : memref<5x5x16xf32, #tpu.memory_space<vmem>>, vector<1x5x16xf32>
    %180 = vector.shape_cast %179 : vector<1x5x16xf32> to vector<5x16xf32>
    %181 = vector.shape_cast %178 : vector<5x16xf32> to vector<1x5x16xf32>
    tpu.vector_store %arg13[%c4_71, %c0_72, %c0_73], %181 {strides = array<i32>} : memref<5x5x16xf32, #tpu.memory_space<vmem>>, vector<1x5x16xf32>,
    %c3_74 = arith.constant 3 : index
    %c0_75 = arith.constant 0 : index
    %c0_76 = arith.constant 0 : index
    %182 = vector.load %arg11[%c3_74, %c0_75, %c0_76] : memref<5x5x128xf32, #tpu.memory_space<vmem>>, vector<1x5x128xf32>
    %183 = vector.shape_cast %182 : vector<1x5x128xf32> to vector<5x128xf32>
    %184 = vector.extract_strided_slice %183 {offsets = [0, 64], sizes = [5, 64], strides = [1, 1]} : vector<5x128xf32> to vector<5x64xf32>
    %cst_77 = arith.constant dense<0.000000e+00> : vector<5x64xf32>
    %185 = tpu.matmul %178, %36, %cst_77 {dimension_numbers = #tpu.dot_dimension_numbers<[1], [0], [0], [1], [0, 0, 1, 1], [], []>} : vector<5x16xf32>, vector<16x64xf32>, vector<5x64xf32> -> vector<5x64xf32>
    %186 = arith.addf %184, %185 : vector<5x64xf32>
    %187 = vector.extract_strided_slice %186 {offsets = [0, 0], sizes = [5, 48], strides = [1, 1]} : vector<5x64xf32> to vector<5x48xf32>
    %188 = arith.negf %187 : vector<5x48xf32>
    %189 = math.exp %188 : vector<5x48xf32>
    %cst_78 = arith.constant 1.000000e+00 : f32
    %190 = vector.broadcast %cst_78 : f32 to vector<5x48xf32>
    %191 = arith.addf %190, %189 : vector<5x48xf32>
    %192 = arith.divf %190, %191 : vector<5x48xf32>
    %193 = vector.extract_strided_slice %186 {offsets = [0, 48], sizes = [5, 16], strides = [1, 1]} : vector<5x64xf32> to vector<5x16xf32>
    %194 = math.tanh %193 : vector<5x16xf32>
    %195 = vector.extract_strided_slice %192 {offsets = [0, 0], sizes = [5, 16], strides = [1, 1]} : vector<5x48xf32> to vector<5x16xf32>
    %196 = vector.extract_strided_slice %192 {offsets = [0, 16], sizes = [5, 16], strides = [1, 1]} : vector<5x48xf32> to vector<5x16xf32>
    %197 = vector.extract_strided_slice %192 {offsets = [0, 32], sizes = [5, 16], strides = [1, 1]} : vector<5x48xf32> to vector<5x16xf32>
    %198 = arith.mulf %196, %176 : vector<5x16xf32>
    %199 = arith.mulf %195, %194 : vector<5x16xf32>
    %200 = arith.addf %198, %199 : vector<5x16xf32>
    %201 = math.tanh %200 : vector<5x16xf32>
    %202 = arith.mulf %197, %201 : vector<5x16xf32>
    %c3_79 = arith.constant 3 : index
    %c0_80 = arith.constant 0 : index
    %c0_81 = arith.constant 0 : index
    %203 = vector.load %arg13[%c3_79, %c0_80, %c0_81] : memref<5x5x16xf32, #tpu.memory_space<vmem>>, vector<1x5x16xf32>
    %204 = vector.shape_cast %203 : vector<1x5x16xf32> to vector<5x16xf32>
    %205 = vector.shape_cast %202 : vector<5x16xf32> to vector<1x5x16xf32>
    tpu.vector_store %arg13[%c3_79, %c0_80, %c0_81], %205 {strides = array<i32>} : memref<5x5x16xf32, #tpu.memory_space<vmem>>, vector<1x5x16xf32>,
    %c2_82 = arith.constant 2 : index
    %c0_83 = arith.constant 0 : index
    %c0_84 = arith.constant 0 : index
    %206 = vector.load %arg11[%c2_82, %c0_83, %c0_84] : memref<5x5x128xf32, #tpu.memory_space<vmem>>, vector<1x5x128xf32>
    %207 = vector.shape_cast %206 : vector<1x5x128xf32> to vector<5x128xf32>
    %208 = vector.extract_strided_slice %207 {offsets = [0, 64], sizes = [5, 64], strides = [1, 1]} : vector<5x128xf32> to vector<5x64xf32>
    %cst_85 = arith.constant dense<0.000000e+00> : vector<5x64xf32>
    %209 = tpu.matmul %202, %36, %cst_85 {dimension_numbers = #tpu.dot_dimension_numbers<[1], [0], [0], [1], [0, 0, 1, 1], [], []>} : vector<5x16xf32>, vector<16x64xf32>, vector<5x64xf32> -> vector<5x64xf32>
    %210 = arith.addf %208, %209 : vector<5x64xf32>
    %211 = vector.extract_strided_slice %210 {offsets = [0, 0], sizes = [5, 48], strides = [1, 1]} : vector<5x64xf32> to vector<5x48xf32>
    %212 = arith.negf %211 : vector<5x48xf32>
    %213 = math.exp %212 : vector<5x48xf32>
    %cst_86 = arith.constant 1.000000e+00 : f32
    %214 = vector.broadcast %cst_86 : f32 to vector<5x48xf32>
    %215 = arith.addf %214, %213 : vector<5x48xf32>
    %216 = arith.divf %214, %215 : vector<5x48xf32>
    %217 = vector.extract_strided_slice %210 {offsets = [0, 48], sizes = [5, 16], strides = [1, 1]} : vector<5x64xf32> to vector<5x16xf32>
    %218 = math.tanh %217 : vector<5x16xf32>
    %219 = vector.extract_strided_slice %216 {offsets = [0, 0], sizes = [5, 16], strides = [1, 1]} : vector<5x48xf32> to vector<5x16xf32>
    %220 = vector.extract_strided_slice %216 {offsets = [0, 16], sizes = [5, 16], strides = [1, 1]} : vector<5x48xf32> to vector<5x16xf32>
    %221 = vector.extract_strided_slice %216 {offsets = [0, 32], sizes = [5, 16], strides = [1, 1]} : vector<5x48xf32> to vector<5x16xf32>
    %222 = arith.mulf %220, %200 : vector<5x16xf32>
    %223 = arith.mulf %219, %218 : vector<5x16xf32>
    %224 = arith.addf %222, %223 : vector<5x16xf32>
    %225 = math.tanh %224 : vector<5x16xf32>
    %226 = arith.mulf %221, %225 : vector<5x16xf32>
    %c2_87 = arith.constant 2 : index
    %c0_88 = arith.constant 0 : index
    %c0_89 = arith.constant 0 : index
    %227 = vector.load %arg13[%c2_87, %c0_88, %c0_89] : memref<5x5x16xf32, #tpu.memory_space<vmem>>, vector<1x5x16xf32>
    %228 = vector.shape_cast %227 : vector<1x5x16xf32> to vector<5x16xf32>
    %229 = vector.shape_cast %226 : vector<5x16xf32> to vector<1x5x16xf32>
    tpu.vector_store %arg13[%c2_87, %c0_88, %c0_89], %229 {strides = array<i32>} : memref<5x5x16xf32, #tpu.memory_space<vmem>>, vector<1x5x16xf32>,
    %c1_90 = arith.constant 1 : index
    %c0_91 = arith.constant 0 : index
    %c0_92 = arith.constant 0 : index
    %230 = vector.load %arg11[%c1_90, %c0_91, %c0_92] : memref<5x5x128xf32, #tpu.memory_space<vmem>>, vector<1x5x128xf32>
    %231 = vector.shape_cast %230 : vector<1x5x128xf32> to vector<5x128xf32>
    %232 = vector.extract_strided_slice %231 {offsets = [0, 64], sizes = [5, 64], strides = [1, 1]} : vector<5x128xf32> to vector<5x64xf32>
    %cst_93 = arith.constant dense<0.000000e+00> : vector<5x64xf32>
    %233 = tpu.matmul %226, %36, %cst_93 {dimension_numbers = #tpu.dot_dimension_numbers<[1], [0], [0], [1], [0, 0, 1, 1], [], []>} : vector<5x16xf32>, vector<16x64xf32>, vector<5x64xf32> -> vector<5x64xf32>
    %234 = arith.addf %232, %233 : vector<5x64xf32>
    %235 = vector.extract_strided_slice %234 {offsets = [0, 0], sizes = [5, 48], strides = [1, 1]} : vector<5x64xf32> to vector<5x48xf32>
    %236 = arith.negf %235 : vector<5x48xf32>
    %237 = math.exp %236 : vector<5x48xf32>
    %cst_94 = arith.constant 1.000000e+00 : f32
    %238 = vector.broadcast %cst_94 : f32 to vector<5x48xf32>
    %239 = arith.addf %238, %237 : vector<5x48xf32>
    %240 = arith.divf %238, %239 : vector<5x48xf32>
    %241 = vector.extract_strided_slice %234 {offsets = [0, 48], sizes = [5, 16], strides = [1, 1]} : vector<5x64xf32> to vector<5x16xf32>
    %242 = math.tanh %241 : vector<5x16xf32>
    %243 = vector.extract_strided_slice %240 {offsets = [0, 0], sizes = [5, 16], strides = [1, 1]} : vector<5x48xf32> to vector<5x16xf32>
    %244 = vector.extract_strided_slice %240 {offsets = [0, 16], sizes = [5, 16], strides = [1, 1]} : vector<5x48xf32> to vector<5x16xf32>
    %245 = vector.extract_strided_slice %240 {offsets = [0, 32], sizes = [5, 16], strides = [1, 1]} : vector<5x48xf32> to vector<5x16xf32>
    %246 = arith.mulf %244, %224 : vector<5x16xf32>
    %247 = arith.mulf %243, %242 : vector<5x16xf32>
    %248 = arith.addf %246, %247 : vector<5x16xf32>
    %249 = math.tanh %248 : vector<5x16xf32>
    %250 = arith.mulf %245, %249 : vector<5x16xf32>
    %c1_95 = arith.constant 1 : index
    %c0_96 = arith.constant 0 : index
    %c0_97 = arith.constant 0 : index
    %251 = vector.load %arg13[%c1_95, %c0_96, %c0_97] : memref<5x5x16xf32, #tpu.memory_space<vmem>>, vector<1x5x16xf32>
    %252 = vector.shape_cast %251 : vector<1x5x16xf32> to vector<5x16xf32>
    %253 = vector.shape_cast %250 : vector<5x16xf32> to vector<1x5x16xf32>
    tpu.vector_store %arg13[%c1_95, %c0_96, %c0_97], %253 {strides = array<i32>} : memref<5x5x16xf32, #tpu.memory_space<vmem>>, vector<1x5x16xf32>,
    %c0_98 = arith.constant 0 : index
    %c0_99 = arith.constant 0 : index
    %c0_100 = arith.constant 0 : index
    %254 = vector.load %arg11[%c0_98, %c0_99, %c0_100] : memref<5x5x128xf32, #tpu.memory_space<vmem>>, vector<1x5x128xf32>
    %255 = vector.shape_cast %254 : vector<1x5x128xf32> to vector<5x128xf32>
    %256 = vector.extract_strided_slice %255 {offsets = [0, 64], sizes = [5, 64], strides = [1, 1]} : vector<5x128xf32> to vector<5x64xf32>
    %cst_101 = arith.constant dense<0.000000e+00> : vector<5x64xf32>
    %257 = tpu.matmul %250, %36, %cst_101 {dimension_numbers = #tpu.dot_dimension_numbers<[1], [0], [0], [1], [0, 0, 1, 1], [], []>} : vector<5x16xf32>, vector<16x64xf32>, vector<5x64xf32> -> vector<5x64xf32>
    %258 = arith.addf %256, %257 : vector<5x64xf32>
    %259 = vector.extract_strided_slice %258 {offsets = [0, 0], sizes = [5, 48], strides = [1, 1]} : vector<5x64xf32> to vector<5x48xf32>
    %260 = arith.negf %259 : vector<5x48xf32>
    %261 = math.exp %260 : vector<5x48xf32>
    %cst_102 = arith.constant 1.000000e+00 : f32
    %262 = vector.broadcast %cst_102 : f32 to vector<5x48xf32>
    %263 = arith.addf %262, %261 : vector<5x48xf32>
    %264 = arith.divf %262, %263 : vector<5x48xf32>
    %265 = vector.extract_strided_slice %258 {offsets = [0, 48], sizes = [5, 16], strides = [1, 1]} : vector<5x64xf32> to vector<5x16xf32>
    %266 = math.tanh %265 : vector<5x16xf32>
    %267 = vector.extract_strided_slice %264 {offsets = [0, 0], sizes = [5, 16], strides = [1, 1]} : vector<5x48xf32> to vector<5x16xf32>
    %268 = vector.extract_strided_slice %264 {offsets = [0, 16], sizes = [5, 16], strides = [1, 1]} : vector<5x48xf32> to vector<5x16xf32>
    %269 = vector.extract_strided_slice %264 {offsets = [0, 32], sizes = [5, 16], strides = [1, 1]} : vector<5x48xf32> to vector<5x16xf32>
    %270 = arith.mulf %268, %248 : vector<5x16xf32>
    %271 = arith.mulf %267, %266 : vector<5x16xf32>
    %272 = arith.addf %270, %271 : vector<5x16xf32>
    %273 = math.tanh %272 : vector<5x16xf32>
    %274 = arith.mulf %269, %273 : vector<5x16xf32>
    %c0_103 = arith.constant 0 : index
    %c0_104 = arith.constant 0 : index
    %c0_105 = arith.constant 0 : index
    %275 = vector.load %arg13[%c0_103, %c0_104, %c0_105] : memref<5x5x16xf32, #tpu.memory_space<vmem>>, vector<1x5x16xf32>
    %276 = vector.shape_cast %275 : vector<1x5x16xf32> to vector<5x16xf32>
    %277 = vector.shape_cast %274 : vector<5x16xf32> to vector<1x5x16xf32>
    tpu.vector_store %arg13[%c0_103, %c0_104, %c0_105], %277 {strides = array<i32>} : memref<5x5x16xf32, #tpu.memory_space<vmem>>, vector<1x5x16xf32>,
    %c0_106 = arith.constant 0 : index
    %c0_107 = arith.constant 0 : index
    %c0_108 = arith.constant 0 : index
    %278 = vector.load %arg12[%c0_106, %c0_107, %c0_108] : memref<5x5x16xf32, #tpu.memory_space<vmem>>, vector<5x5x16xf32>
    %c0_109 = arith.constant 0 : index
    %c0_110 = arith.constant 0 : index
    %c0_111 = arith.constant 0 : index
    %279 = vector.load %arg13[%c0_109, %c0_110, %c0_111] : memref<5x5x16xf32, #tpu.memory_space<vmem>>, vector<5x5x16xf32>
    %280 = tpu.concatenate %278, %279 in 2 : vector<5x5x16xf32>, vector<5x5x16xf32> -> vector<5x5x32xf32>
    %281 = vector.shape_cast %280 : vector<5x5x32xf32> to vector<25x32xf32>
    %c0_112 = arith.constant 0 : index
    %c0_113 = arith.constant 0 : index
    %282 = vector.load %arg8[%c0_112, %c0_113] : memref<32x16xf32, #tpu.memory_space<vmem>>, vector<32x16xf32>
    %cst_114 = arith.constant dense<0.000000e+00> : vector<25x16xf32>
    %283 = tpu.matmul %281, %282, %cst_114 {dimension_numbers = #tpu.dot_dimension_numbers<[1], [0], [0], [1], [0, 0, 1, 1], [], []>} : vector<25x32xf32>, vector<32x16xf32>, vector<25x16xf32> -> vector<25x16xf32>
    %c0_115 = arith.constant 0 : index
    %c0_116 = arith.constant 0 : index
    %284 = vector.load %arg9[%c0_115, %c0_116] : memref<1x16xf32, #tpu.memory_space<vmem>>, vector<1x16xf32>
    %285 = vector.broadcast %284 : vector<1x16xf32> to vector<25x16xf32>
    %286 = arith.addf %283, %285 : vector<25x16xf32>
    %287 = vector.shape_cast %0 : vector<5x1x5x16xf32> to vector<25x16xf32>
    %288 = arith.addf %286, %287 : vector<25x16xf32>
    %289 = vector.shape_cast %288 : vector<25x16xf32> to vector<5x1x5x16xf32>
    %c0_117 = arith.constant 0 : index
    %c0_118 = arith.constant 0 : index
    %c0_119 = arith.constant 0 : index
    %c0_120 = arith.constant 0 : index
    %290 = vector.load %arg10[%c0_117, %c0_118, %c0_119, %c0_120] : memref<5x1x5x16xf32, #tpu.memory_space<vmem>>, vector<5x1x5x16xf32>
    tpu.vector_store %arg10[%c0_117, %c0_118, %c0_119, %c0_120], %289 {strides = array<i32>} : memref<5x1x5x16xf32, #tpu.memory_space<vmem>>, vector<5x1x5x16xf32>,
    return
  }
  func.func @transform_0(%arg0: i32) -> (i32, i32, i32, i32) {
    %c0_i32 = arith.constant 0 : i32
    %c0_i32_0 = arith.constant 0 : i32
    %c0_i32_1 = arith.constant 0 : i32
    %c0_i32_2 = arith.constant 0 : i32
    return %c0_i32, %arg0, %c0_i32_0, %c0_i32_1 : i32, i32, i32, i32
  }
  func.func @transform_1(%arg0: i32) -> (i32, i32, i32, i32) {
    %c0_i32 = arith.constant 0 : i32
    %c0_i32_0 = arith.constant 0 : i32
    %c0_i32_1 = arith.constant 0 : i32
    %c0_i32_2 = arith.constant 0 : i32
    %c0_i32_3 = arith.constant 0 : i32
    return %c0_i32, %c0_i32_0, %c0_i32_1, %c0_i32_2 : i32, i32, i32, i32
  }
  func.func @transform_2(%arg0: i32) -> (i32, i32, i32, i32) {
    %c0_i32 = arith.constant 0 : i32
    %c0_i32_0 = arith.constant 0 : i32
    %c0_i32_1 = arith.constant 0 : i32
    %c0_i32_2 = arith.constant 0 : i32
    %c0_i32_3 = arith.constant 0 : i32
    return %c0_i32, %c0_i32_0, %c0_i32_1, %c0_i32_2 : i32, i32, i32, i32
  }
  func.func @transform_3(%arg0: i32) -> (i32, i32) {
    %c0_i32 = arith.constant 0 : i32
    %c0_i32_0 = arith.constant 0 : i32
    %c0_i32_1 = arith.constant 0 : i32
    return %c0_i32, %c0_i32_0 : i32, i32
  }
  func.func @transform_4(%arg0: i32) -> (i32, i32) {
    %c0_i32 = arith.constant 0 : i32
    %c0_i32_0 = arith.constant 0 : i32
    %c0_i32_1 = arith.constant 0 : i32
    return %c0_i32, %c0_i32_0 : i32, i32
  }
  func.func @transform_5(%arg0: i32) -> (i32, i32) {
    %c0_i32 = arith.constant 0 : i32
    %c0_i32_0 = arith.constant 0 : i32
    %c0_i32_1 = arith.constant 0 : i32
    return %c0_i32, %c0_i32_0 : i32, i32
  }
  func.func @transform_6(%arg0: i32) -> (i32, i32) {
    %c0_i32 = arith.constant 0 : i32
    %c0_i32_0 = arith.constant 0 : i32
    %c0_i32_1 = arith.constant 0 : i32
    return %c0_i32, %c0_i32_0 : i32, i32
  }
  func.func @transform_7(%arg0: i32) -> (i32, i32) {
    %c0_i32 = arith.constant 0 : i32
    %c0_i32_0 = arith.constant 0 : i32
    %c0_i32_1 = arith.constant 0 : i32
    return %c0_i32, %c0_i32_0 : i32, i32
  }
  func.func @transform_8(%arg0: i32) -> (i32, i32) {
    %c0_i32 = arith.constant 0 : i32
    %c0_i32_0 = arith.constant 0 : i32
    %c0_i32_1 = arith.constant 0 : i32
    return %c0_i32, %c0_i32_0 : i32, i32
  }
  func.func @transform_9(%arg0: i32) -> (i32, i32, i32, i32) {
    %c0_i32 = arith.constant 0 : i32
    %c0_i32_0 = arith.constant 0 : i32
    %c0_i32_1 = arith.constant 0 : i32
    %c0_i32_2 = arith.constant 0 : i32
    return %c0_i32, %arg0, %c0_i32_0, %c0_i32_1 : i32, i32, i32, i32
  }
}

module attributes {stable_mosaic.version = 11 : i64} {
  func.func @_maskest_kernel(%arg0: i32, %arg1: memref<10x80xf32, #tpu.memory_space<vmem>>, %arg2: memref<80x320xf32, #tpu.memory_space<vmem>>, %arg3: memref<1x320xf32, #tpu.memory_space<vmem>>, %arg4: memref<320x132xf32, #tpu.memory_space<vmem>>, %arg5: memref<1x132xf32, #tpu.memory_space<vmem>>, %arg6: memref<10x132xf32, #tpu.memory_space<vmem>>) attributes {dimension_semantics = [#tpu.dimension_semantics<parallel>], iteration_bounds = array<i64: 1>, scalar_prefetch = 0 : i64, scratch_operands = 0 : i64, tpu.core_type = #tpu.core_type<tc>, window_params = [{transform_indices = @transform_0, window_bounds = array<i64: 10, 80>}, {pipeline_mode = #tpu.pipeline_mode<synchronous>, transform_indices = @transform_1, window_bounds = array<i64: 80, 320>}, {pipeline_mode = #tpu.pipeline_mode<synchronous>, transform_indices = @transform_2, window_bounds = array<i64: 1, 320>}, {pipeline_mode = #tpu.pipeline_mode<synchronous>, transform_indices = @transform_3, window_bounds = array<i64: 320, 132>}, {pipeline_mode = #tpu.pipeline_mode<synchronous>, transform_indices = @transform_4, window_bounds = array<i64: 1, 132>}, {transform_indices = @transform_5, window_bounds = array<i64: 10, 132>}]} {
    %c0 = arith.constant 0 : index
    %c0_0 = arith.constant 0 : index
    %0 = vector.load %arg1[%c0, %c0_0] : memref<10x80xf32, #tpu.memory_space<vmem>>, vector<10x80xf32>
    %1 = vector.extract_strided_slice %0 {offsets = [0, 0], sizes = [10, 16], strides = [1, 1]} : vector<10x80xf32> to vector<10x16xf32>
    %cst = arith.constant dense<0.000000e+00> : vector<10xf32>
    %2 = vector.multi_reduction <add>, %1, %cst [1] : vector<10x16xf32> to vector<10xf32>
    %3 = vector.shape_cast %2 : vector<10xf32> to vector<10x1xf32>
    %cst_1 = arith.constant 1.600000e+01 : f32
    %4 = vector.broadcast %cst_1 : f32 to vector<10x1xf32>
    %5 = arith.divf %3, %4 : vector<10x1xf32>
    %6 = vector.broadcast %5 : vector<10x1xf32> to vector<10x16xf32>
    %7 = arith.subf %1, %6 : vector<10x16xf32>
    %8 = arith.mulf %7, %7 : vector<10x16xf32>
    %cst_2 = arith.constant dense<0.000000e+00> : vector<10xf32>
    %9 = vector.multi_reduction <add>, %8, %cst_2 [1] : vector<10x16xf32> to vector<10xf32>
    %10 = vector.shape_cast %9 : vector<10xf32> to vector<10x1xf32>
    %cst_3 = arith.constant 1.600000e+01 : f32
    %11 = vector.broadcast %cst_3 : f32 to vector<10x1xf32>
    %12 = arith.divf %10, %11 : vector<10x1xf32>
    %cst_4 = arith.constant 9.99999974E-6 : f32
    %13 = vector.broadcast %cst_4 : f32 to vector<10x1xf32>
    %14 = arith.addf %12, %13 : vector<10x1xf32>
    %15 = math.rsqrt %14 : vector<10x1xf32>
    %16 = vector.broadcast %15 : vector<10x1xf32> to vector<10x16xf32>
    %17 = arith.mulf %7, %16 : vector<10x16xf32>
    %18 = vector.extract_strided_slice %0 {offsets = [0, 16], sizes = [10, 16], strides = [1, 1]} : vector<10x80xf32> to vector<10x16xf32>
    %cst_5 = arith.constant dense<0.000000e+00> : vector<10xf32>
    %19 = vector.multi_reduction <add>, %18, %cst_5 [1] : vector<10x16xf32> to vector<10xf32>
    %20 = vector.shape_cast %19 : vector<10xf32> to vector<10x1xf32>
    %cst_6 = arith.constant 1.600000e+01 : f32
    %21 = vector.broadcast %cst_6 : f32 to vector<10x1xf32>
    %22 = arith.divf %20, %21 : vector<10x1xf32>
    %23 = vector.broadcast %22 : vector<10x1xf32> to vector<10x16xf32>
    %24 = arith.subf %18, %23 : vector<10x16xf32>
    %25 = arith.mulf %24, %24 : vector<10x16xf32>
    %cst_7 = arith.constant dense<0.000000e+00> : vector<10xf32>
    %26 = vector.multi_reduction <add>, %25, %cst_7 [1] : vector<10x16xf32> to vector<10xf32>
    %27 = vector.shape_cast %26 : vector<10xf32> to vector<10x1xf32>
    %cst_8 = arith.constant 1.600000e+01 : f32
    %28 = vector.broadcast %cst_8 : f32 to vector<10x1xf32>
    %29 = arith.divf %27, %28 : vector<10x1xf32>
    %cst_9 = arith.constant 9.99999974E-6 : f32
    %30 = vector.broadcast %cst_9 : f32 to vector<10x1xf32>
    %31 = arith.addf %29, %30 : vector<10x1xf32>
    %32 = math.rsqrt %31 : vector<10x1xf32>
    %33 = vector.broadcast %32 : vector<10x1xf32> to vector<10x16xf32>
    %34 = arith.mulf %24, %33 : vector<10x16xf32>
    %35 = vector.extract_strided_slice %0 {offsets = [0, 32], sizes = [10, 16], strides = [1, 1]} : vector<10x80xf32> to vector<10x16xf32>
    %cst_10 = arith.constant dense<0.000000e+00> : vector<10xf32>
    %36 = vector.multi_reduction <add>, %35, %cst_10 [1] : vector<10x16xf32> to vector<10xf32>
    %37 = vector.shape_cast %36 : vector<10xf32> to vector<10x1xf32>
    %cst_11 = arith.constant 1.600000e+01 : f32
    %38 = vector.broadcast %cst_11 : f32 to vector<10x1xf32>
    %39 = arith.divf %37, %38 : vector<10x1xf32>
    %40 = vector.broadcast %39 : vector<10x1xf32> to vector<10x16xf32>
    %41 = arith.subf %35, %40 : vector<10x16xf32>
    %42 = arith.mulf %41, %41 : vector<10x16xf32>
    %cst_12 = arith.constant dense<0.000000e+00> : vector<10xf32>
    %43 = vector.multi_reduction <add>, %42, %cst_12 [1] : vector<10x16xf32> to vector<10xf32>
    %44 = vector.shape_cast %43 : vector<10xf32> to vector<10x1xf32>
    %cst_13 = arith.constant 1.600000e+01 : f32
    %45 = vector.broadcast %cst_13 : f32 to vector<10x1xf32>
    %46 = arith.divf %44, %45 : vector<10x1xf32>
    %cst_14 = arith.constant 9.99999974E-6 : f32
    %47 = vector.broadcast %cst_14 : f32 to vector<10x1xf32>
    %48 = arith.addf %46, %47 : vector<10x1xf32>
    %49 = math.rsqrt %48 : vector<10x1xf32>
    %50 = vector.broadcast %49 : vector<10x1xf32> to vector<10x16xf32>
    %51 = arith.mulf %41, %50 : vector<10x16xf32>
    %52 = vector.extract_strided_slice %0 {offsets = [0, 48], sizes = [10, 16], strides = [1, 1]} : vector<10x80xf32> to vector<10x16xf32>
    %cst_15 = arith.constant dense<0.000000e+00> : vector<10xf32>
    %53 = vector.multi_reduction <add>, %52, %cst_15 [1] : vector<10x16xf32> to vector<10xf32>
    %54 = vector.shape_cast %53 : vector<10xf32> to vector<10x1xf32>
    %cst_16 = arith.constant 1.600000e+01 : f32
    %55 = vector.broadcast %cst_16 : f32 to vector<10x1xf32>
    %56 = arith.divf %54, %55 : vector<10x1xf32>
    %57 = vector.broadcast %56 : vector<10x1xf32> to vector<10x16xf32>
    %58 = arith.subf %52, %57 : vector<10x16xf32>
    %59 = arith.mulf %58, %58 : vector<10x16xf32>
    %cst_17 = arith.constant dense<0.000000e+00> : vector<10xf32>
    %60 = vector.multi_reduction <add>, %59, %cst_17 [1] : vector<10x16xf32> to vector<10xf32>
    %61 = vector.shape_cast %60 : vector<10xf32> to vector<10x1xf32>
    %cst_18 = arith.constant 1.600000e+01 : f32
    %62 = vector.broadcast %cst_18 : f32 to vector<10x1xf32>
    %63 = arith.divf %61, %62 : vector<10x1xf32>
    %cst_19 = arith.constant 9.99999974E-6 : f32
    %64 = vector.broadcast %cst_19 : f32 to vector<10x1xf32>
    %65 = arith.addf %63, %64 : vector<10x1xf32>
    %66 = math.rsqrt %65 : vector<10x1xf32>
    %67 = vector.broadcast %66 : vector<10x1xf32> to vector<10x16xf32>
    %68 = arith.mulf %58, %67 : vector<10x16xf32>
    %69 = vector.extract_strided_slice %0 {offsets = [0, 64], sizes = [10, 16], strides = [1, 1]} : vector<10x80xf32> to vector<10x16xf32>
    %cst_20 = arith.constant dense<0.000000e+00> : vector<10xf32>
    %70 = vector.multi_reduction <add>, %69, %cst_20 [1] : vector<10x16xf32> to vector<10xf32>
    %71 = vector.shape_cast %70 : vector<10xf32> to vector<10x1xf32>
    %cst_21 = arith.constant 1.600000e+01 : f32
    %72 = vector.broadcast %cst_21 : f32 to vector<10x1xf32>
    %73 = arith.divf %71, %72 : vector<10x1xf32>
    %74 = vector.broadcast %73 : vector<10x1xf32> to vector<10x16xf32>
    %75 = arith.subf %69, %74 : vector<10x16xf32>
    %76 = arith.mulf %75, %75 : vector<10x16xf32>
    %cst_22 = arith.constant dense<0.000000e+00> : vector<10xf32>
    %77 = vector.multi_reduction <add>, %76, %cst_22 [1] : vector<10x16xf32> to vector<10xf32>
    %78 = vector.shape_cast %77 : vector<10xf32> to vector<10x1xf32>
    %cst_23 = arith.constant 1.600000e+01 : f32
    %79 = vector.broadcast %cst_23 : f32 to vector<10x1xf32>
    %80 = arith.divf %78, %79 : vector<10x1xf32>
    %cst_24 = arith.constant 9.99999974E-6 : f32
    %81 = vector.broadcast %cst_24 : f32 to vector<10x1xf32>
    %82 = arith.addf %80, %81 : vector<10x1xf32>
    %83 = math.rsqrt %82 : vector<10x1xf32>
    %84 = vector.broadcast %83 : vector<10x1xf32> to vector<10x16xf32>
    %85 = arith.mulf %75, %84 : vector<10x16xf32>
    %c0_25 = arith.constant 0 : index
    %c0_26 = arith.constant 0 : index
    %86 = vector.load %arg3[%c0_25, %c0_26] : memref<1x320xf32, #tpu.memory_space<vmem>>, vector<1x320xf32>
    %c0_27 = arith.constant 0 : index
    %c0_28 = arith.constant 0 : index
    %87 = vector.load %arg2[%c0_27, %c0_28] : memref<80x320xf32, #tpu.memory_space<vmem>>, vector<16x320xf32>
    %cst_29 = arith.constant dense<0.000000e+00> : vector<10x320xf32>
    %88 = tpu.matmul %17, %87, %cst_29 {dimension_numbers = #tpu.dot_dimension_numbers<[1], [0], [0], [1], [0, 0, 1, 1], [], []>} : vector<10x16xf32>, vector<16x320xf32>, vector<10x320xf32> -> vector<10x320xf32>
    %89 = vector.broadcast %86 : vector<1x320xf32> to vector<10x320xf32>
    %90 = arith.addf %89, %88 : vector<10x320xf32>
    %c16 = arith.constant 16 : index
    %c0_30 = arith.constant 0 : index
    %91 = vector.load %arg2[%c16, %c0_30] : memref<80x320xf32, #tpu.memory_space<vmem>>, vector<16x320xf32>
    %cst_31 = arith.constant dense<0.000000e+00> : vector<10x320xf32>
    %92 = tpu.matmul %34, %91, %cst_31 {dimension_numbers = #tpu.dot_dimension_numbers<[1], [0], [0], [1], [0, 0, 1, 1], [], []>} : vector<10x16xf32>, vector<16x320xf32>, vector<10x320xf32> -> vector<10x320xf32>
    %93 = arith.addf %90, %92 : vector<10x320xf32>
    %c32 = arith.constant 32 : index
    %c0_32 = arith.constant 0 : index
    %94 = vector.load %arg2[%c32, %c0_32] : memref<80x320xf32, #tpu.memory_space<vmem>>, vector<16x320xf32>
    %cst_33 = arith.constant dense<0.000000e+00> : vector<10x320xf32>
    %95 = tpu.matmul %51, %94, %cst_33 {dimension_numbers = #tpu.dot_dimension_numbers<[1], [0], [0], [1], [0, 0, 1, 1], [], []>} : vector<10x16xf32>, vector<16x320xf32>, vector<10x320xf32> -> vector<10x320xf32>
    %96 = arith.addf %93, %95 : vector<10x320xf32>
    %c48 = arith.constant 48 : index
    %c0_34 = arith.constant 0 : index
    %97 = vector.load %arg2[%c48, %c0_34] : memref<80x320xf32, #tpu.memory_space<vmem>>, vector<16x320xf32>
    %cst_35 = arith.constant dense<0.000000e+00> : vector<10x320xf32>
    %98 = tpu.matmul %68, %97, %cst_35 {dimension_numbers = #tpu.dot_dimension_numbers<[1], [0], [0], [1], [0, 0, 1, 1], [], []>} : vector<10x16xf32>, vector<16x320xf32>, vector<10x320xf32> -> vector<10x320xf32>
    %99 = arith.addf %96, %98 : vector<10x320xf32>
    %c64 = arith.constant 64 : index
    %c0_36 = arith.constant 0 : index
    %100 = vector.load %arg2[%c64, %c0_36] : memref<80x320xf32, #tpu.memory_space<vmem>>, vector<16x320xf32>
    %cst_37 = arith.constant dense<0.000000e+00> : vector<10x320xf32>
    %101 = tpu.matmul %85, %100, %cst_37 {dimension_numbers = #tpu.dot_dimension_numbers<[1], [0], [0], [1], [0, 0, 1, 1], [], []>} : vector<10x16xf32>, vector<16x320xf32>, vector<10x320xf32> -> vector<10x320xf32>
    %102 = arith.addf %99, %101 : vector<10x320xf32>
    %103 = math.tanh %102 : vector<10x320xf32>
    %c0_38 = arith.constant 0 : index
    %c0_39 = arith.constant 0 : index
    %104 = vector.load %arg4[%c0_38, %c0_39] : memref<320x132xf32, #tpu.memory_space<vmem>>, vector<320x132xf32>
    %cst_40 = arith.constant dense<0.000000e+00> : vector<10x132xf32>
    %105 = tpu.matmul %103, %104, %cst_40 {dimension_numbers = #tpu.dot_dimension_numbers<[1], [0], [0], [1], [0, 0, 1, 1], [], []>} : vector<10x320xf32>, vector<320x132xf32>, vector<10x132xf32> -> vector<10x132xf32>
    %c0_41 = arith.constant 0 : index
    %c0_42 = arith.constant 0 : index
    %106 = vector.load %arg5[%c0_41, %c0_42] : memref<1x132xf32, #tpu.memory_space<vmem>>, vector<1x132xf32>
    %107 = vector.broadcast %106 : vector<1x132xf32> to vector<10x132xf32>
    %108 = arith.addf %105, %107 : vector<10x132xf32>
    %c0_43 = arith.constant 0 : index
    %c0_44 = arith.constant 0 : index
    %109 = vector.load %arg6[%c0_43, %c0_44] : memref<10x132xf32, #tpu.memory_space<vmem>>, vector<10x132xf32>
    tpu.vector_store %arg6[%c0_43, %c0_44], %108 {strides = array<i32>} : memref<10x132xf32, #tpu.memory_space<vmem>>, vector<10x132xf32>,
    return
  }
  func.func @transform_0(%arg0: i32) -> (i32, i32) {
    %c0_i32 = arith.constant 0 : i32
    %c0_i32_0 = arith.constant 0 : i32
    return %arg0, %c0_i32 : i32, i32
  }
  func.func @transform_1(%arg0: i32) -> (i32, i32) {
    %c0_i32 = arith.constant 0 : i32
    %c0_i32_0 = arith.constant 0 : i32
    %c0_i32_1 = arith.constant 0 : i32
    return %c0_i32, %c0_i32_0 : i32, i32
  }
  func.func @transform_2(%arg0: i32) -> (i32, i32) {
    %c0_i32 = arith.constant 0 : i32
    %c0_i32_0 = arith.constant 0 : i32
    %c0_i32_1 = arith.constant 0 : i32
    return %c0_i32, %c0_i32_0 : i32, i32
  }
  func.func @transform_3(%arg0: i32) -> (i32, i32) {
    %c0_i32 = arith.constant 0 : i32
    %c0_i32_0 = arith.constant 0 : i32
    %c0_i32_1 = arith.constant 0 : i32
    return %c0_i32, %c0_i32_0 : i32, i32
  }
  func.func @transform_4(%arg0: i32) -> (i32, i32) {
    %c0_i32 = arith.constant 0 : i32
    %c0_i32_0 = arith.constant 0 : i32
    %c0_i32_1 = arith.constant 0 : i32
    return %c0_i32, %c0_i32_0 : i32, i32
  }
  func.func @transform_5(%arg0: i32) -> (i32, i32) {
    %c0_i32 = arith.constant 0 : i32
    %c0_i32_0 = arith.constant 0 : i32
    return %arg0, %c0_i32 : i32, i32
  }
}

module attributes {stable_mosaic.version = 11 : i64} {
  func.func @_cmul_kernel(%arg0: i32, %arg1: memref<4x165xf32, #tpu.memory_space<vmem>>, %arg2: memref<4x165xf32, #tpu.memory_space<vmem>>, %arg3: memref<4x165xf32, #tpu.memory_space<vmem>>, %arg4: memref<4x165xf32, #tpu.memory_space<vmem>>, %arg5: memref<4x165xf32, #tpu.memory_space<vmem>>, %arg6: memref<4x165xf32, #tpu.memory_space<vmem>>, %arg7: memref<4x165xf32, #tpu.memory_space<vmem>>) attributes {dimension_semantics = [#tpu.dimension_semantics<parallel>], iteration_bounds = array<i64: 1>, scalar_prefetch = 0 : i64, scratch_operands = 0 : i64, tpu.core_type = #tpu.core_type<tc>, window_params = [{transform_indices = @transform_0, window_bounds = array<i64: 4, 165>}, {transform_indices = @transform_1, window_bounds = array<i64: 4, 165>}, {transform_indices = @transform_2, window_bounds = array<i64: 4, 165>}, {transform_indices = @transform_3, window_bounds = array<i64: 4, 165>}, {transform_indices = @transform_4, window_bounds = array<i64: 4, 165>}, {transform_indices = @transform_5, window_bounds = array<i64: 4, 165>}, {transform_indices = @transform_6, window_bounds = array<i64: 4, 165>}]} {
    %c0 = arith.constant 0 : index
    %c0_0 = arith.constant 0 : index
    %0 = vector.load %arg1[%c0, %c0_0] : memref<4x165xf32, #tpu.memory_space<vmem>>, vector<4x165xf32>
    %c0_1 = arith.constant 0 : index
    %c0_2 = arith.constant 0 : index
    %1 = vector.load %arg2[%c0_1, %c0_2] : memref<4x165xf32, #tpu.memory_space<vmem>>, vector<4x165xf32>
    %c0_3 = arith.constant 0 : index
    %c0_4 = arith.constant 0 : index
    %2 = vector.load %arg3[%c0_3, %c0_4] : memref<4x165xf32, #tpu.memory_space<vmem>>, vector<4x165xf32>
    %c0_5 = arith.constant 0 : index
    %c0_6 = arith.constant 0 : index
    %3 = vector.load %arg4[%c0_5, %c0_6] : memref<4x165xf32, #tpu.memory_space<vmem>>, vector<4x165xf32>
    %4 = arith.mulf %0, %2 : vector<4x165xf32>
    %5 = arith.mulf %1, %3 : vector<4x165xf32>
    %6 = arith.subf %4, %5 : vector<4x165xf32>
    %c0_7 = arith.constant 0 : index
    %c0_8 = arith.constant 0 : index
    %7 = vector.load %arg5[%c0_7, %c0_8] : memref<4x165xf32, #tpu.memory_space<vmem>>, vector<4x165xf32>
    tpu.vector_store %arg5[%c0_7, %c0_8], %6 {strides = array<i32>} : memref<4x165xf32, #tpu.memory_space<vmem>>, vector<4x165xf32>,
    %8 = arith.mulf %0, %3 : vector<4x165xf32>
    %9 = arith.mulf %1, %2 : vector<4x165xf32>
    %10 = arith.addf %8, %9 : vector<4x165xf32>
    %c0_9 = arith.constant 0 : index
    %c0_10 = arith.constant 0 : index
    %11 = vector.load %arg6[%c0_9, %c0_10] : memref<4x165xf32, #tpu.memory_space<vmem>>, vector<4x165xf32>
    tpu.vector_store %arg6[%c0_9, %c0_10], %10 {strides = array<i32>} : memref<4x165xf32, #tpu.memory_space<vmem>>, vector<4x165xf32>,
    %12 = arith.mulf %0, %0 : vector<4x165xf32>
    %13 = arith.mulf %1, %1 : vector<4x165xf32>
    %14 = arith.addf %12, %13 : vector<4x165xf32>
    %15 = math.sqrt %14 : vector<4x165xf32>
    %c0_11 = arith.constant 0 : index
    %c0_12 = arith.constant 0 : index
    %16 = vector.load %arg7[%c0_11, %c0_12] : memref<4x165xf32, #tpu.memory_space<vmem>>, vector<4x165xf32>
    tpu.vector_store %arg7[%c0_11, %c0_12], %15 {strides = array<i32>} : memref<4x165xf32, #tpu.memory_space<vmem>>, vector<4x165xf32>,
    return
  }
  func.func @transform_0(%arg0: i32) -> (i32, i32) {
    %c0_i32 = arith.constant 0 : i32
    %c0_i32_0 = arith.constant 0 : i32
    return %arg0, %c0_i32 : i32, i32
  }
  func.func @transform_1(%arg0: i32) -> (i32, i32) {
    %c0_i32 = arith.constant 0 : i32
    %c0_i32_0 = arith.constant 0 : i32
    return %arg0, %c0_i32 : i32, i32
  }
  func.func @transform_2(%arg0: i32) -> (i32, i32) {
    %c0_i32 = arith.constant 0 : i32
    %c0_i32_0 = arith.constant 0 : i32
    return %arg0, %c0_i32 : i32, i32
  }
  func.func @transform_3(%arg0: i32) -> (i32, i32) {
    %c0_i32 = arith.constant 0 : i32
    %c0_i32_0 = arith.constant 0 : i32
    return %arg0, %c0_i32 : i32, i32
  }
  func.func @transform_4(%arg0: i32) -> (i32, i32) {
    %c0_i32 = arith.constant 0 : i32
    %c0_i32_0 = arith.constant 0 : i32
    return %arg0, %c0_i32 : i32, i32
  }
  func.func @transform_5(%arg0: i32) -> (i32, i32) {
    %c0_i32 = arith.constant 0 : i32
    %c0_i32_0 = arith.constant 0 : i32
    return %arg0, %c0_i32 : i32, i32
  }
  func.func @transform_6(%arg0: i32) -> (i32, i32) {
    %c0_i32 = arith.constant 0 : i32
    %c0_i32_0 = arith.constant 0 : i32
    return %arg0, %c0_i32 : i32, i32
  }
}

</mosaic_0001>

<bundles_post_ra>
// kernel: tile.30
= control target key start
LH: loop header
LB: loop body
LE: loop exit
PB: predicated region body
PF: predicated region fallthrough
CT: control target
= control target key end

     0   :  { %s22_s0 = inlined_call_operand.vmem [shape: f32[16], index: 0, kind: input, shape index: {}]   ;;  %s23_s1 = inlined_call_operand.vmem [shape: f32[5,16], index: 1, kind: output, shape index: {}]  }
   0x1   :  { %v4_v0 = vld [vmem:[%s22_s0] ss:$0 sm:$0xff] }
   0x2   :  { %5 = vst [vmem:[%s23_s1] sm:$0xff] %v4_v0 }

// kernel: bsrnn_forward.7
= control target key start
LH: loop header
LB: loop body
LE: loop exit
PB: predicated region body
PF: predicated region fallthrough
CT: control target
= control target key end

     0   :  { %s600_s14 = smov 80   ;;  %s601_s15 = smov 96   ;;  %vm18_vm0 = vcmask 130048   ;;  %vm22_vm1 = vcmask 123904   ;;  %vm257_vm2 = vcmask 523264   ;;  %vm262_vm3 = vcmask 556032   ;;  %s880_s0 = inlined_call_operand.vmem [shape: f32[10,132], index: 0, kind: input, shape index: {}]   ;;  %s881_s2 = inlined_call_operand.vmem [shape: f32[1,80], index: 2, kind: input, shape index: {}]   ;;  %s882_s1 = inlined_call_operand.vmem [shape: f32[132,80], index: 1, kind: input, shape index: {}]   ;;  %s883_s3 = inlined_call_operand.vmem [shape: f32[10,80], index: 3, kind: output, shape index: {}]  }
   0x1   :  { %v629_v0 = vld [vmem:[%s880_s0] sm:$0xff]  ;;  %v638_v1 = vld [vmem:[%s880_s0 + $0x10] sm:$0x3]  ;;  %s602_s18 = smov 112   ;;  %v651_v2 = vld [vmem:[%s880_s0 + $0x8] sm:$0xff]  ;;  %s603_s21 = smov 64  }
   0x2   :  { %189 = vrot.lane.b32.xlu1 %v629_v0, %s600_s14  ;;  %131 = vrot.lane.b32.xlu0 %v629_v0, %s601_s15  ;;  %v662_v3 = vld [vmem:[%s880_s0 + $0x18] sm:$0x3]  ;;  %vm266_vm4 = vcmask 549888   ;;  %v604_v24 = vmov 16.0   ;;  %v605_v29 = vmov 68.0  }
   0x3   :  { %75 = vrot.lane.b32.xlu2 %v638_v1, %s602_s18  ;;  %576 = vrcp.f32 %v604_v24 }
   0x4   :  { %578 = vrcp.f32 %v605_v29 }
   0x9   :  { %v577_v25 = vpop.eup %576 }
   0xa   :  { %133 = vrot.lane.b32.xlu1 %v638_v1, %s601_s15  ;;  %73 = vrot.lane.b32.xlu0 %v629_v0, %s602_s18  ;;  %v27_v26 = vmul.f32 16.0, %v577_v25  ;;  %vm31_vm5 = vweird.f32 %v577_v25  ;;  %v579_v31 = vpop.eup %578 }
   0xb   :  { %191 = vrot.lane.b32.xlu2 %v638_v1, %s600_s14  ;;  %v271_v33 = vmul.f32 68.0, %v579_v31  ;;  %vm275_vm6 = vweird.f32 %v579_v31 }
   0xc   :  { %v28_v27 = vsub.f32 1.0, %v27_v26 }
   0xd   :  { %v272_v40 = vsub.f32 1.0, %v271_v33 }
   0xe   :  { %v29_v28 = vmul.f32 %v577_v25, %v28_v27 }
   0xf   :  { %v273_v43 = vmul.f32 %v579_v31, %v272_v40 }
  0x10   :  { %v30_v30 = vadd.f32 %v577_v25, %v29_v28 }
  0x11   :  { %v274_v50 = vadd.f32 %v579_v31, %v273_v43 }
  0x12   :  { %251 = vrot.lane.b32.xlu1 %v651_v2, %s603_s21  ;;  %249 = vrot.lane.b32.xlu0 %v629_v0, %s603_s21  ;;  %v676_v32 = vsel %vm31_vm5, %v577_v25, %v30_v30 }
  0x13   :  { %253 = vrot.lane.b32.xlu2 %v638_v1, %s603_s21  ;;  %v706_v53 = vsel %vm275_vm6, %v579_v31, %v274_v50 }
  0x1a   :  { %255 = vrot.lane.b32.xlu0 %v662_v3, %s603_s21 }
  0x5d   :  { %v76_v8 = vpop.permute.xlu2 %75 }
  0x5e   :  { %v82_v9 = vsel %vm22_vm1, %v76_v8, 0.0 }
  0x65   :  { %v192_v13 = vpop.permute.xlu2 %191 }
  0x66   :  { %v198_v20 = vsel %vm22_vm1, %v192_v13, 0.0  ;;  %v19_v13 = vsel %vm18_vm0, %v629_v0, 0.0 }
  0x6d   :  { %v254_v19 = vpop.permute.xlu2 %253 }
  0x74   :  { %v190_v4 = vpop.permute.xlu1 %189  ;;  %v132_v5 = vpop.permute.xlu0 %131 }
  0x75   :  { %v195_v6 = vsel %vm18_vm0, %v190_v4, 0.0  ;;  %v137_v7 = vsel %vm18_vm0, %v132_v5, 0.0 }
  0x76   :  { %196 = vadd.xlane.f32.xlu0 %v195_v6  ;;  %138 = vadd.xlane.f32.xlu1 %v137_v7 }
  0x7c   :  { %v134_v10 = vpop.permute.xlu1 %133  ;;  %v74_v11 = vpop.permute.xlu0 %73 }
  0x7d   :  { %v79_v12 = vsel %vm18_vm0, %v74_v11, 0.0  ;;  %v140_v14 = vsel %vm22_vm1, %v134_v10, 0.0 }
  0x7e   :  { %80 = vadd.xlane.f32.xlu2 %v79_v12  ;;  %83 = vadd.xlane.f32.xlu1 %v82_v9 }
  0x84   :  { %v252_v15 = vpop.permute.xlu1 %251  ;;  %v250_v16 = vpop.permute.xlu0 %249 }
  0x85   :  { %v258_v17 = vsel %vm257_vm2, %v250_v16, %v252_v15 }
  0x86   :  { %141 = vadd.xlane.f32.xlu2 %v140_v14  ;;  %v263_v18 = vsel %vm262_vm3, %v258_v17, 0.0  ;;  %v23_v14 = vsel %vm22_vm1, %v638_v1, 0.0 }
  0x87   :  { %264 = vadd.xlane.f32.xlu0 %v263_v18 }
  0x8c   :  { %v256_v21 = vpop.permute.xlu0 %255 }
  0x8d   :  { %v259_v22 = vsel %vm257_vm2, %v254_v19, %v256_v21 }
  0x8e   :  { %199 = vadd.xlane.f32.xlu2 %v198_v20  ;;  %v267_v23 = vsel %vm266_vm4, %v259_v22, 0.0 }
  0x8f   :  { %268 = vadd.xlane.f32.xlu1 %v267_v23 }
  0xe9   :  { %v139_v34 = vpop.xlane.xlu1 %138  ;;  %v197_v35 = vpop.xlane.xlu0 %196 }
  0xea   :  { %v143_v36 = vmul.f32 %v139_v34, %v676_v32  ;;  %v201_v37 = vmul.f32 %v197_v35, %v676_v32 }
  0xec   :  { %v681_v38 = vsub.f32 %v629_v0, %v143_v36  ;;  %v684_v39 = vsub.f32 %v629_v0, %v201_v37 }
  0xee   :  { %v147_v41 = vmul.f32 %v681_v38, %v681_v38  ;;  %v205_v42 = vmul.f32 %v684_v39, %v684_v39 }
  0xf0   :  { %151 = vrot.lane.b32.xlu2 %v147_v41, %s601_s15  ;;  %209 = vrot.lane.b32.xlu1 %v205_v42, %s600_s14 }
  0xf1   :  { %v81_v44 = vpop.xlane.xlu2 %80  ;;  %v84_v45 = vpop.xlane.xlu1 %83 }
  0xf2   :  { %v85_v46 = vmul.f32 %v81_v44, %v676_v32  ;;  %v86_v47 = vmul.f32 %v84_v45, %v676_v32 }
  0xf4   :  { %v695_v48 = vsub.f32 %v629_v0, %v85_v46  ;;  %v698_v49 = vsub.f32 %v638_v1, %v86_v47 }
  0xf6   :  { %v89_v51 = vmul.f32 %v695_v48, %v695_v48  ;;  %v90_v52 = vmul.f32 %v698_v49, %v698_v49 }
  0xf8   :  { %93 = vrot.lane.b32.xlu0 %v89_v51, %s602_s18  ;;  %95 = vrot.lane.b32.xlu2 %v90_v52, %s602_s18 }
  0xf9   :  { %v142_v54 = vpop.xlane.xlu2 %141 }
  0xfa   :  { %v144_v55 = vmul.f32 %v142_v54, %v676_v32  ;;  %v265_v56 = vpop.xlane.xlu0 %264 }
  0xfb   :  { %v277_v57 = vmul.f32 %v706_v53, %v265_v56 }
  0xfc   :  { %v711_v58 = vsub.f32 %v638_v1, %v144_v55 }
  0xfd   :  { %v714_v59 = vsub.f32 %v651_v2, %v277_v57  ;;  %v721_v62 = vsub.f32 %v629_v0, %v277_v57 }
  0xfe   :  { %v148_v60 = vmul.f32 %v711_v58, %v711_v58 }
  0xff   :  { %v284_v61 = vmul.f32 %v714_v59, %v714_v59  ;;  %v283_v6 = vmul.f32 %v721_v62, %v721_v62 }
 0x100   :  { %153 = vrot.lane.b32.xlu0 %v148_v60, %s601_s15 }
 0x101   :  { %v200_v63 = vpop.xlane.xlu2 %199  ;;  %293 = vrot.lane.b32.xlu2 %v284_v61, %s603_s21 }
 0x102   :  { %v202_v4 = vmul.f32 %v200_v63, %v676_v32  ;;  %v269_v5 = vpop.xlane.xlu1 %268 }
 0x103   :  { %v278_v7 = vmul.f32 %v706_v53, %v269_v5 }
 0x104   :  { %v727_v2 = vsub.f32 %v638_v1, %v202_v4 }
 0x105   :  { %v737_v9 = vsub.f32 %v638_v1, %v278_v7  ;;  %v740_v10 = vsub.f32 %v662_v3, %v278_v7 }
 0x106   :  { %v206_v8 = vmul.f32 %v727_v2, %v727_v2 }
 0x107   :  { %v285_v11 = vmul.f32 %v737_v9, %v737_v9  ;;  %v286_v12 = vmul.f32 %v740_v10, %v740_v10 }
 0x108   :  { %211 = vrot.lane.b32.xlu1 %v206_v8, %s600_s14  ;;  %291 = vrot.lane.b32.xlu0 %v283_v6, %s603_s21 }
 0x110   :  { %295 = vrot.lane.b32.xlu1 %v285_v11, %s603_s21  ;;  %297 = vrot.lane.b32.xlu0 %v286_v12, %s603_s21 }
 0x12a   :  { %20 = vadd.xlane.f32.xlu2 %v19_v13 }
 0x13a   :  { %24 = vadd.xlane.f32.xlu0 %v23_v14 }
 0x14a   :  { %v152_v3 = vpop.permute.xlu2 %151 }
 0x14b   :  { %v157_v15 = vsel %vm18_vm0, %v152_v3, 0.0 }
 0x14c   :  { %158 = vadd.xlane.f32.xlu1 %v157_v15 }
 0x152   :  { %v96_v20 = vpop.permute.xlu2 %95 }
 0x153   :  { %v102_v23 = vsel %vm22_vm1, %v96_v20, 0.0 }
 0x15b   :  { %v294_v24 = vpop.permute.xlu2 %293 }
 0x162   :  { %v210_v16 = vpop.permute.xlu1 %209 }
 0x163   :  { %v215_v17 = vsel %vm18_vm0, %v210_v16, 0.0 }
 0x164   :  { %216 = vadd.xlane.f32.xlu1 %v215_v17 }
 0x16a   :  { %v94_v18 = vpop.permute.xlu0 %93 }
 0x16b   :  { %v99_v19 = vsel %vm18_vm0, %v94_v18, 0.0 }
 0x16c   :  { %100 = vadd.xlane.f32.xlu2 %v99_v19 }
 0x172   :  { %v154_v21 = vpop.permute.xlu0 %153 }
 0x173   :  { %v160_v22 = vsel %vm22_vm1, %v154_v21, 0.0 }
 0x174   :  { %161 = vadd.xlane.f32.xlu0 %v160_v22  ;;  %103 = vadd.xlane.f32.xlu2 %v102_v23 }
 0x17a   :  { %v212_v25 = vpop.permute.xlu1 %211  ;;  %v292_v26 = vpop.permute.xlu0 %291 }
 0x17b   :  { %v218_v27 = vsel %vm22_vm1, %v212_v25, 0.0  ;;  %v299_v28 = vsel %vm257_vm2, %v292_v26, %v294_v24 }
 0x17c   :  { %219 = vadd.xlane.f32.xlu1 %v218_v27  ;;  %v303_v29 = vsel %vm262_vm3, %v299_v28, 0.0 }
 0x17d   :  { %304 = vadd.xlane.f32.xlu0 %v303_v29 }
 0x182   :  { %v296_v30 = vpop.permute.xlu1 %295  ;;  %v298_v31 = vpop.permute.xlu0 %297 }
 0x183   :  { %v300_v33 = vsel %vm257_vm2, %v296_v30, %v298_v31 }
 0x184   :  { %v306_v34 = vsel %vm266_vm4, %v300_v33, 0.0 }
 0x185   :  { %307 = vadd.xlane.f32.xlu2 %v306_v34 }
 0x19d   :  { %v21_v35 = vpop.xlane.xlu2 %20 }
 0x19e   :  { %v33_v36 = vmul.f32 %v676_v32, %v21_v35 }
 0x1a0   :  { %v764_v37 = vsub.f32 %v629_v0, %v33_v36 }
 0x1a2   :  { %v37_v40 = vmul.f32 %v764_v37, %v764_v37 }
 0x1a4   :  { %v39_v41 = vsel %vm18_vm0, %v37_v40, 0.0 }
 0x1a5   :  { %40 = vadd.xlane.f32.xlu1 %v39_v41 }
 0x1ad   :  { %v25_v42 = vpop.xlane.xlu0 %24 }
 0x1ae   :  { %v34_v43 = vmul.f32 %v676_v32, %v25_v42 }
 0x1b0   :  { %v771_v44 = vsub.f32 %v638_v1, %v34_v43 }
 0x1b2   :  { %v38_v45 = vmul.f32 %v771_v44, %v771_v44 }
 0x1b4   :  { %v42_v46 = vsel %vm22_vm1, %v38_v45, 0.0 }
 0x1b5   :  { %43 = vadd.xlane.f32.xlu0 %v42_v46 }
 0x1bf   :  { %v159_v0 = vpop.xlane.xlu1 %158 }
 0x1c0   :  { %v163_v47 = vmul.f32 %v159_v0, %v676_v32 }
 0x1c2   :  { %v165_v50 = vadd.f32 1e-05, %v163_v47 }
 0x1c4   :  { %580 = vrsqrt.f32 %v165_v50  ;;  %vm173_vm8 = vweird.f32 %v165_v50 }
 0x1ca   :  { %v581_v51 = vpop.eup %580 }
 0x1cb   :  { %v168_v52 = vmul.f32 %v581_v51, %v165_v50  ;;  %vm174_vm7 = vweird.f32 %v581_v51 }
 0x1cc   :  { %vm175_vm9 = vmor %vm173_vm8, %vm174_vm7 }
 0x1cd   :  { %v169_v54 = vmul.f32 %v581_v51, %v168_v52 }
 0x1cf   :  { %v170_v55 = vmul.f32 0.5, %v169_v54 }
 0x1d1   :  { %v171_v56 = vsub.f32 1.5, %v170_v55 }
 0x1d3   :  { %v172_v1 = vmul.f32 %v581_v51, %v171_v56 }
 0x1d5   :  { %v176_v57 = vsel %vm175_vm9, %v581_v51, %v172_v1 }
 0x1d6   :  { %v187_v60 = vmul.f32 %v176_v57, %v681_v38 }
 0x1d7   :  { %v217_v61 = vpop.xlane.xlu1 %216 }
 0x1d8   :  { %v221_v63 = vmul.f32 %v217_v61, %v676_v32  ;;  %415 = vrot.lane.b32.xlu2 %v187_v60, %s601_s15 }
 0x1da   :  { %v223_v4 = vadd.f32 1e-05, %v221_v63 }
 0x1dc   :  { %582 = vrsqrt.f32 %v223_v4  ;;  %vm231_vm10 = vweird.f32 %v223_v4 }
 0x1df   :  { %v101_v5 = vpop.xlane.xlu2 %100 }
 0x1e0   :  { %v105_v6 = vmul.f32 %v101_v5, %v676_v32 }
 0x1e2   :  { %v583_v7 = vpop.eup %582  ;;  %v107_v8 = vadd.f32 1e-05, %v105_v6 }
 0x1e3   :  { %v226_v11 = vmul.f32 %v583_v7, %v223_v4  ;;  %vm232_vm11 = vweird.f32 %v583_v7 }
 0x1e4   :  { %584 = vrsqrt.f32 %v107_v8  ;;  %vm233_vm12 = vmor %vm231_vm10, %vm232_vm11  ;;  %vm115_vm14 = vweird.f32 %v107_v8 }
 0x1e5   :  { %v227_v12 = vmul.f32 %v583_v7, %v226_v11 }
 0x1e7   :  { %v228_v13 = vmul.f32 0.5, %v227_v12  ;;  %v162_v14 = vpop.xlane.xlu0 %161  ;;  %v104_v3 = vpop.xlane.xlu2 %103 }
 0x1e8   :  { %v164_v38 = vmul.f32 %v162_v14, %v676_v32  ;;  %v106_v15 = vmul.f32 %v104_v3, %v676_v32 }
 0x1e9   :  { %v229_v16 = vsub.f32 1.5, %v228_v13 }
 0x1ea   :  { %v585_v17 = vpop.eup %584  ;;  %v166_v18 = vadd.f32 1e-05, %v164_v38  ;;  %v108_v19 = vadd.f32 1e-05, %v106_v15 }
 0x1eb   :  { %v110_v20 = vmul.f32 %v585_v17, %v107_v8  ;;  %v230_v21 = vmul.f32 %v583_v7, %v229_v16  ;;  %vm116_vm13 = vweird.f32 %v585_v17 }
 0x1ec   :  { %586 = vrsqrt.f32 %v166_v18  ;;  %vm117_vm15 = vmor %vm115_vm14, %vm116_vm13  ;;  %vm183_vm5 = vweird.f32 %v166_v18  ;;  %vm125_vm7 = vweird.f32 %v108_v19 }
 0x1ed   :  { %v111_v22 = vmul.f32 %v585_v17, %v110_v20  ;;  %588 = vrsqrt.f32 %v108_v19  ;;  %v234_v23 = vsel %vm233_vm12, %v583_v7, %v230_v21 }
 0x1ee   :  { %v245_v24 = vmul.f32 %v234_v23, %v684_v39  ;;  %v338_v23 = vld [vmem:[%s882_s1] sm:$0xff] }
 0x1ef   :  { %v112_v25 = vmul.f32 0.5, %v111_v22  ;;  %v220_v26 = vpop.xlane.xlu1 %219 }
 0x1f0   :  { %v222_v27 = vmul.f32 %v220_v26, %v676_v32  ;;  %452 = vrot.lane.b32.xlu0 %v245_v24, %s600_s14  ;;  %v305_v28 = vpop.xlane.xlu0 %304  ;;  %v412_v24 = vld [vmem:[%s882_s1 + $0x28] sm:$0xff] }
 0x1f1   :  { %v113_v29 = vsub.f32 1.5, %v112_v25  ;;  %v309_v30 = vmul.f32 %v305_v28, %v706_v53  ;;  %437 = vmatpush.msra.mxu2 %v412_v24 }
 0x1f2   :  { %v587_v31 = vpop.eup %586  ;;  %v224_v33 = vadd.f32 1e-05, %v222_v27 }
 0x1f3   :  { %v589_v34 = vpop.eup %588  ;;  %v178_v35 = vmul.f32 %v587_v31, %v166_v18  ;;  %v311_v36 = vadd.f32 1e-05, %v309_v30  ;;  %v114_v40 = vmul.f32 %v585_v17, %v113_v29  ;;  %vm184_vm1 = vweird.f32 %v587_v31 }
 0x1f4   :  { %v120_v39 = vmul.f32 %v589_v34, %v108_v19  ;;  %590 = vrsqrt.f32 %v224_v33  ;;  %vm126_vm4 = vweird.f32 %v589_v34  ;;  %vm185_vm6 = vmor %vm183_vm5, %vm184_vm1  ;;  %vm241_vm11 = vweird.f32 %v224_v33 }
 0x1f5   :  { %v179_v41 = vmul.f32 %v587_v31, %v178_v35  ;;  %592 = vrsqrt.f32 %v311_v36  ;;  %v118_v42 = vsel %vm117_vm15, %v585_v17, %v114_v40  ;;  %vm127_vm8 = vmor %vm125_vm7, %vm126_vm4  ;;  %vm319_vm13 = vweird.f32 %v311_v36 }
 0x1f6   :  { %v121_v43 = vmul.f32 %v589_v34, %v120_v39  ;;  %v129_v45 = vmul.f32 %v118_v42, %v695_v48 }
 0x1f7   :  { %v180_v46 = vmul.f32 0.5, %v179_v41 }
 0x1f8   :  { %v122_v0 = vmul.f32 0.5, %v121_v43  ;;  %378 = vrot.lane.b32.xlu1 %v129_v45, %s602_s18  ;;  %v308_v47 = vpop.xlane.xlu2 %307 }
 0x1f9   :  { %v181_v50 = vsub.f32 1.5, %v180_v46  ;;  %v310_v51 = vmul.f32 %v308_v47, %v706_v53 }
 0x1fa   :  { %v591_v52 = vpop.eup %590  ;;  %v123_v54 = vsub.f32 1.5, %v122_v0  ;;  %v449_v0 = vld [vmem:[%s882_s1 + $0x38] sm:$0xff] }
 0x1fb   :  { %v593_v55 = vpop.eup %592  ;;  %v236_v56 = vmul.f32 %v591_v52, %v224_v33  ;;  %v312_v1 = vadd.f32 1e-05, %v310_v51  ;;  %v182_v57 = vmul.f32 %v587_v31, %v181_v50  ;;  %vm242_vm9 = vweird.f32 %v591_v52  ;;  %474 = vmatpush.msra.mxu3 %v449_v0 }
 0x1fc   :  { %v314_v48 = vmul.f32 %v593_v55, %v311_v36  ;;  %v124_v60 = vmul.f32 %v589_v34, %v123_v54  ;;  %vm320_vm10 = vweird.f32 %v593_v55  ;;  %vm243_vm12 = vmor %vm241_vm11, %vm242_vm9  ;;  %v374_v54 = vld [vmem:[%s882_s1 + $0x10] sm:$0xff]  ;;  %vm512_vm11 = vcmask 1043456  }
 0x1fd   :  { %v237_v61 = vmul.f32 %v591_v52, %v236_v56  ;;  %594 = vrsqrt.f32 %v312_v1  ;;  %v186_v63 = vsel %vm185_vm6, %v587_v31, %v182_v57  ;;  %vm321_vm14 = vmor %vm319_vm13, %vm320_vm10  ;;  %vm329_vm1 = vweird.f32 %v312_v1  ;;  %v491_v56 = vld [vmem:[%s882_s1 + $0x70] sm:$0xff]  ;;  %v489_v57 = vld [vmem:[%s882_s1 + $0x60] sm:$0xff] }
 0x1fe   :  { %v315_v4 = vmul.f32 %v593_v55, %v314_v48  ;;  %v188_v5 = vmul.f32 %v186_v63, %v711_v58  ;;  %v128_v53 = vsel %vm127_vm8, %v589_v34, %v124_v60  ;;  %v488_v48 = vld [vmem:[%s882_s1 + $0x58] sm:$0xff]  ;;  %v487_v60 = vld [vmem:[%s882_s1 + $0x50] sm:$0xff] }
 0x1ff   :  { %v238_v6 = vmul.f32 0.5, %v237_v61  ;;  %v130_v7 = vmul.f32 %v128_v53, %v698_v49  ;;  %v486_v61 = vld [vmem:[%s882_s1 + $0x48] sm:$0xff] }
 0x200   :  { %v316_v8 = vmul.f32 0.5, %v315_v4  ;;  %417 = vrot.lane.b32.xlu2 %v188_v5, %s601_s15  ;;  %v485_v4 = vld [vmem:[%s882_s1 + $0x40] sm:$0xff] }
 0x201   :  { %v239_v11 = vsub.f32 1.5, %v238_v6  ;;  %380 = vrot.lane.b32.xlu0 %v130_v7, %s602_s18 }
 0x202   :  { %v317_v12 = vsub.f32 1.5, %v316_v8 }
 0x203   :  { %v595_v13 = vpop.eup %594  ;;  %v240_v14 = vmul.f32 %v591_v52, %v239_v11 }
 0x204   :  { %v324_v3 = vmul.f32 %v595_v13, %v312_v1  ;;  %v318_v58 = vmul.f32 %v593_v55, %v317_v12  ;;  %vm330_vm15 = vweird.f32 %v595_v13  ;;  %v490_v1 = vld [vmem:[%s882_s1 + $0x68] sm:$0xff] }
 0x205   :  { %v244_v38 = vsel %vm243_vm12, %v591_v52, %v240_v14  ;;  %vm331_vm4 = vmor %vm329_vm1, %vm330_vm15  ;;  %v375_v52 = vld [vmem:[%s882_s1 + $0x18] sm:$0xff] }
 0x206   :  { %v325_v15 = vmul.f32 %v595_v13, %v324_v3  ;;  %v246_v49 = vmul.f32 %v244_v38, %v727_v2  ;;  %v322_v16 = vsel %vm321_vm14, %v593_v55, %v318_v58  ;;  %v339_v2 = vld [vmem:[%s882_s1 + $0x8] sm:$0xff]  ;;  %400 = vmatpush.msra.mxu1 %v375_v52  ;;  %v493_v55 = vld [vmem:[%s882_s1 + $0x80] sm:$0xf] }
 0x207   :  { %v333_v17 = vmul.f32 %v322_v16, %v721_v62  ;;  %v334_v18 = vmul.f32 %v322_v16, %v714_v59  ;;  %360 = vmatpush.msra.mxu0 %v339_v2  ;;  %v575_v38 = vld [vmem:[%s881_s2] ss:$0 sm:$0xff] }
 0x208   :  { %v326_v19 = vmul.f32 0.5, %v325_v15  ;;  %454 = vrot.lane.b32.xlu1 %v246_v49, %s600_s14  ;;  %401 = vmatpush.msra.mxu1 %v374_v54 }
 0x209   :  { %498 = vrot.lane.b32.xlu2 %v333_v17, %s603_s21  ;;  %500 = vrot.lane.b32.xlu0 %v334_v18, %s603_s21 }
 0x20a   :  { %v327_v20 = vsub.f32 1.5, %v326_v19  ;;  %361 = vmatpush.msra.mxu0 %v338_v23  ;;  %560 = vmatpush.msk.msrb.mxu1 %vm512_vm11, %v493_v55 }
 0x20c   :  { %v328_v21 = vmul.f32 %v595_v13, %v327_v20  ;;  %557 = vmatpush.msk.msrb.mxu0 %vm512_vm11, %v493_v55 }
 0x20e   :  { %v332_v22 = vsel %vm331_vm4, %v595_v13, %v328_v21 }
 0x20f   :  { %v336_v62 = vmul.f32 %v332_v22, %v740_v10  ;;  %v335_v59 = vmul.f32 %v332_v22, %v737_v9  ;;  %v411_v10 = vld [vmem:[%s882_s1 + $0x20] sm:$0xff] }
 0x210   :  { %438 = vmatpush.msra.mxu2 %v411_v10 }
 0x211   :  { %504 = vrot.lane.b32.xlu2 %v336_v62, %s603_s21  ;;  %502 = vrot.lane.b32.xlu1 %v335_v59, %s603_s21 }
 0x218   :  { %v41_v9 = vpop.xlane.xlu1 %40 }
 0x219   :  { %v45_v25 = vmul.f32 %v41_v9, %v676_v32 }
 0x21b   :  { %v47_v26 = vadd.f32 1e-05, %v45_v25 }
 0x21d   :  { %596 = vrsqrt.f32 %v47_v26  ;;  %vm55_vm5 = vweird.f32 %v47_v26 }
 0x223   :  { %v597_v27 = vpop.eup %596 }
 0x224   :  { %v50_v28 = vmul.f32 %v597_v27, %v47_v26  ;;  %vm56_vm6 = vweird.f32 %v597_v27 }
 0x225   :  { %vm57_vm7 = vmor %vm55_vm5, %vm56_vm6 }
 0x226   :  { %v51_v29 = vmul.f32 %v597_v27, %v50_v28 }
 0x228   :  { %v52_v30 = vmul.f32 0.5, %v51_v29  ;;  %v44_v31 = vpop.xlane.xlu0 %43 }
 0x229   :  { %v46_v33 = vmul.f32 %v44_v31, %v676_v32 }
 0x22a   :  { %v53_v34 = vsub.f32 1.5, %v52_v30 }
 0x22b   :  { %v48_v35 = vadd.f32 1e-05, %v46_v33 }
 0x22c   :  { %v54_v36 = vmul.f32 %v597_v27, %v53_v34 }
 0x22d   :  { %598 = vrsqrt.f32 %v48_v35  ;;  %vm65_vm8 = vweird.f32 %v48_v35 }
 0x22e   :  { %v58_v40 = vsel %vm57_vm7, %v597_v27, %v54_v36 }
 0x22f   :  { %v69_v39 = vmul.f32 %v58_v40, %v764_v37  ;;  %v448_v37 = vld [vmem:[%s882_s1 + $0x30] sm:$0xff] }
 0x230   :  { %475 = vmatpush.msra.mxu3 %v448_v37 }
 0x231   :  { %549 = vmatmul.msk.f32.vlgmr.msra.gmra.mxu0 %vm18_vm0, %v69_v39 }
 0x232   :  { %v416_v41 = vpop.permute.xlu2 %415 }
 0x233   :  { %v599_v42 = vpop.eup %598  ;;  %553 = vmatmul.msk.f32.vlgmr.msra.gmra.mxu2 %vm18_vm0, %v416_v41 }
 0x234   :  { %v60_v43 = vmul.f32 %v599_v42, %v48_v35  ;;  %vm66_vm9 = vweird.f32 %v599_v42 }
 0x235   :  { %vm67_vm10 = vmor %vm65_vm8, %vm66_vm9 }
 0x236   :  { %v61_v45 = vmul.f32 %v599_v42, %v60_v43 }
 0x238   :  { %v62_v46 = vmul.f32 0.5, %v61_v45 }
 0x23a   :  { %v63_v32 = vsub.f32 1.5, %v62_v46 }
 0x23c   :  { %v64_v47 = vmul.f32 %v599_v42, %v63_v32 }
 0x23e   :  { %v68_v50 = vsel %vm67_vm10, %v599_v42, %v64_v47 }
 0x23f   :  { %v70_v51 = vmul.f32 %v68_v50, %v771_v44  ;;  %v492_v44 = vld [vmem:[%s882_s1 + $0x78] sm:$0xff] }
 0x240   :  { %524 = vmatpush.msrb.mxu0 %v492_v44  ;;  %561 = vmatpush.msrb.mxu1 %v492_v44 }
 0x241   :  { %550 = vmatmul.msk.f32.gmra.mxu0 %vm18_vm0, %v70_v51 }
 0x242   :  { %525 = vmatpush.msrb.mxu0 %v491_v56  ;;  %562 = vmatpush.msrb.mxu1 %v491_v56 }
 0x244   :  { %526 = vmatpush.msrb.mxu0 %v490_v1  ;;  %563 = vmatpush.msrb.mxu1 %v490_v1 }
 0x246   :  { %527 = vmatpush.msrb.mxu0 %v489_v57  ;;  %564 = vmatpush.msrb.mxu1 %v489_v57 }
 0x248   :  { %528 = vmatpush.msrb.mxu0 %v488_v48  ;;  %565 = vmatpush.msrb.mxu1 %v488_v48 }
 0x24a   :  { %529 = vmatpush.msrb.mxu0 %v487_v60  ;;  %566 = vmatpush.msrb.mxu1 %v487_v60 }
 0x24c   :  { %530 = vmatpush.msrb.mxu0 %v486_v61  ;;  %567 = vmatpush.msrb.mxu1 %v486_v61 }
 0x24e   :  { %531 = vmatpush.msrb.mxu0 %v485_v4  ;;  %568 = vmatpush.msrb.mxu1 %v485_v4 }
 0x25a   :  { %v418_v63 = vpop.permute.xlu2 %417 }
 0x25b   :  { %554 = vmatmul.msk.f32.gmra.mxu2 %vm18_vm0, %v418_v63 }
 0x262   :  { %v453_v5 = vpop.permute.xlu0 %452 }
 0x263   :  { %555 = vmatmul.msk.f32.vlgmr.msra.gmra.mxu3 %vm18_vm0, %v453_v5  ;;  %v499_v7 = vpop.permute.xlu2 %498 }
 0x26a   :  { %v379_v53 = vpop.permute.xlu1 %378 }
 0x26b   :  { %551 = vmatmul.msk.f32.vlgmr.msra.gmra.mxu1 %vm18_vm0, %v379_v53  ;;  %v505_v13 = vpop.permute.xlu2 %504 }
 0x273   :  { %v381_v6 = vpop.permute.xlu0 %380 }
 0x274   :  { %552 = vmatmul.msk.f32.gmra.mxu1 %vm18_vm0, %v381_v6 }
 0x27a   :  { %v455_v8 = vpop.permute.xlu1 %454 }
 0x27b   :  { %556 = vmatmul.msk.f32.gmra.mxu3 %vm18_vm0, %v455_v8  ;;  %v501_v11 = vpop.permute.xlu0 %500  ;;  %vm541_vm0 = vcmask 654336  }
 0x27c   :  { %v506_v12 = vsel %vm257_vm2, %v499_v7, %v501_v11 }
 0x27d   :  { %558 = vmatmul.msk.f32.vlgmr.msrb.gmra.mxu0 %vm262_vm3, %v506_v12 }
 0x283   :  { %v503_v14 = vpop.permute.xlu1 %502 }
 0x284   :  { %v507_v3 = vsel %vm257_vm2, %v503_v14, %v505_v13  ;;  %vm543_vm2 = vcmask 648192  }
 0x285   :  { %559 = vmatmul.msk.f32.vlgmr.msrb.gmra.mxu1 %vm262_vm3, %v507_v3 }
 0x2ae   :  { %v363_v58 = vpop.f32.mrf.mxu0 }
 0x2af   :  { %v372_v49 = vadd.f32 %v575_v38, %v363_v58 }
 0x2b6   :  { %v440_v18 = vpop.f32.mrf.mxu2 }
 0x2be   :  { %v366_v17 = vpop.f32.mrf.mxu0 }
 0x2bf   :  { %v373_v22 = vadd.f32 %v575_v38, %v366_v17 }
 0x2de   :  { %v443_v24 = vpop.f32.mrf.mxu2 }
 0x2e6   :  { %v477_v20 = vpop.f32.mrf.mxu3 }
 0x2e8   :  { %v403_v15 = vpop.f32.mrf.mxu1 }
 0x2e9   :  { %v409_v16 = vadd.f32 %v403_v15, %v372_v49 }
 0x2eb   :  { %v446_v19 = vadd.f32 %v440_v18, %v409_v16 }
 0x2ed   :  { %v483_v2 = vadd.f32 %v477_v20, %v446_v19 }
 0x2f1   :  { %v406_v21 = vpop.f32.mrf.mxu1 }
 0x2f2   :  { %v410_v59 = vadd.f32 %v406_v21, %v373_v22 }
 0x2f4   :  { %v447_v9 = vadd.f32 %v443_v24, %v410_v59 }
 0x2fa   :  { %v533_v62 = vpop.f32.mrf.mxu0 }
 0x2fb   :  { %v539_v23 = vadd.f32 %v533_v62, %v483_v2 }
 0x2fd   :  { %542 = vst.msk [vmem:[%s883_s3] sm:$0xff] %vm541_vm0, %v539_v23 }
 0x2fe   :  { %v480_v10 = vpop.f32.mrf.mxu3 }
 0x2ff   :  { %v484_v25 = vadd.f32 %v480_v10, %v447_v9 }
 0x302   :  { %v536_v26 = vpop.f32.mrf.mxu1 }
 0x303   :  { %v540_v27 = vadd.f32 %v536_v26, %v484_v25 }
 0x305   :  { %544 = vst.msk [vmem:[%s883_s3 + $0x8] sm:$0x3] %vm543_vm2, %v540_v27 }

// kernel: bsrnn_forward.8
= control target key start
LH: loop header
LB: loop body
LE: loop exit
PB: predicated region body
PF: predicated region fallthrough
CT: control target
= control target key end

     0   :  { %s1975_s30 = smov 0   ;;  %s1977_s10 = smov 0   ;;  %s2268_s0 = inlined_call_operand.vmem [shape: f32[5,2,5,16], index: 0, kind: input, shape index: {}]   ;;  %s2269_s1 = inlined_call_operand.vmem [shape: f32[1,1,5,1], index: 1, kind: input, shape index: {}]   ;;  %s2270_s2 = inlined_call_operand.vmem [shape: f32[1,1,5,1], index: 2, kind: input, shape index: {}]   ;;  %s2271_s3 = inlined_call_operand.vmem [shape: f32[16,128], index: 3, kind: input, shape index: {}]   ;;  %s2272_s4 = inlined_call_operand.vmem [shape: f32[1,128], index: 4, kind: input, shape index: {}]   ;;  %s2273_s5 = inlined_call_operand.vmem [shape: f32[16,64], index: 5, kind: input, shape index: {}]   ;;  %s2274_s6 = inlined_call_operand.vmem [shape: f32[16,64], index: 6, kind: input, shape index: {}]   ;;  %s2275_s7 = inlined_call_operand.vmem [shape: f32[32,16], index: 7, kind: input, shape index: {}]   ;;  %s2276_s8 = inlined_call_operand.vmem [shape: f32[1,16], index: 8, kind: input, shape index: {}]   ;;  %s2277_s9 = inlined_call_operand.vmem [shape: f32[5,2,5,16], index: 9, kind: output, shape index: {}]  }
   0x1   :  { %s1979_s11 = smov 0  }
   0x2 LB: > { %s1728_s12 = sadd.s32 4294967295, %s1915_s11   ;;  %s1992_s13 = sadd.s32 1, %s1915_s11   ;;  %s1915_s11 = sphi %s1979_s11, %s2281_s11   ;;  %s1911_s10 = sphi %s1977_s10, %s2280_s10   ;;  %s1907_s30 = sphi %s1975_s30, %s2279_s30  }
   0x3   : > { %s23_s14 = ssub.s32 %s1915_s11, %s1992_s13  ;;  %s26_s15 = sadd.s32 1, %s1911_s10 }
   0x4   : > { %p24_p0 = scmp.eq.s32.totalorder %s23_s14, 0  ;;  %p33_p1 = scmp.ne.s32.totalorder %s1911_s10, %s1907_s30 }
   0x5   : > { %p34_p2 = scmp.eq.s32.totalorder %s1915_s11, 0  ;;  %p231_p3 = scmp.eq.s32.totalorder %s1728_s12, 1 }
   0x6   : > { %s2003_s16 = scalar_select %p24_p0, %s1911_s10, %s26_s15  }
   0x7   : > { %p35_p4 = por %p34_p2, %p33_p1  ;;  %p2005_p5 = por %p231_p3, %p33_p1 }
   0x8   : > { %p1731_p6 = scmp.ge.s32.totalorder %s1915_s11, 2 }
   0xa   : > { %277 = sbr.rel (%p1731_p6) target bundleno = 24 (0x18), region = 48 }
   0xf   : > { %280 = sbr.rel (!%p35_p4) target bundleno = 24 (0x18), region = 52  ;;  %s282_s18 = sand.u32 (%p35_p4), 1, %s1911_s10  }
  0x10   : > { %s1732_s19 = sshll.u32 (%p35_p4), %s1915_s11, 3  ;;  %s1767_s20 = smul.u32 (%p35_p4), 40, %s282_s18 }
  0x11   : > { %s286_s23 = scalar_lea.vmem (%p35_p4), %s2268_s0, %s1732_s19 }
  0x12   : > { %v323_v0 = vld [vmem:[%s286_s23] sm:$0xff] (%p35_p4)  ;;  %v325_v1 = vld [vmem:[%s286_s23 + $0x10] sm:$0xff] (%p35_p4)  ;;  %s284_s24 = scalar_lea.vmem (%p35_p4), [#allocation5], %s1767_s20 }
  0x13   : > { %v327_v2 = vld [vmem:[%s286_s23 + $0x20] sm:$0xff] (%p35_p4)  ;;  %324 = vst [vmem:[%s284_s24] sm:$0xff] (%p35_p4), %v323_v0  ;;  %v329_v3 = vld [vmem:[%s286_s23 + $0x30] sm:$0xff] (%p35_p4) }
  0x14   : > { %326 = vst [vmem:[%s284_s24 + $0x8] sm:$0xff] %v325_v1  ;;  %v331_v4 = vld [vmem:[%s286_s23 + $0x40] sm:$0xff] }
  0x15   : > { %328 = vst [vmem:[%s284_s24 + $0x10] sm:$0xff] %v327_v2 }
  0x16   : > { %330 = vst [vmem:[%s284_s24 + $0x18] sm:$0xff] %v329_v3 }
  0x17   : > { %332 = vst [vmem:[%s284_s24 + $0x20] sm:$0xff] %v331_v4 }
  0x18 PF: > { %p1733_p7 = scmp.ge.s32.totalorder %s1915_s11, 1  ;;  %p337_p8 = scmp.lt.s32.totalorder %s1915_s11, 3 }
  0x1a   : > { %p338_p9 = pnand %p1733_p7, %p337_p8 }
  0x1b   : > { %s344_s25 = sand.u32 (!%p338_p9), 1, %s1907_s30   ;;  %s1920_s29 = smov (!%p338_p9), 80  }
  0x1c   : > { %341 = sbr.rel (%p338_p9) target bundleno = 5231 (0x146f), region = 90  ;;  %s1921_s30 = smov (!%p338_p9), 16  }
  0x1d   : > { %s2018_s26 = smul.u32 (!%p338_p9), 40, %s344_s25  ;;  %s1922_s14 = smov (!%p338_p9), 96  }
  0x1e   : > { %s1923_s21 = smov (!%p338_p9), 64   ;;  %s1924_s22 = smov (!%p338_p9), 32  }
  0x1f   : > { %s2021_s27 = scalar_lea.vmem (!%p338_p9), [#allocation5], %s2018_s26 }
  0x21   : > { %vm383_vm0 = vcmask 126976   ;;  %v378_v5 = vld [vmem:[%s2021_s27] sm:$0x1f]  ;;  %v379_v6 = vld [vmem:[%s2021_s27 + $0x8] sm:$0x1f]  ;;  %v1917_v20 = vmov 80.0  }
  0x22   : > { %v380_v7 = vld [vmem:[%s2021_s27 + $0x10] sm:$0x1f]  ;;  %v2027_v8 = vld [vmem:[%s2021_s27 + $0x18] sm:$0x1f]  ;;  %v384_v9 = vsel %vm383_vm0, %v378_v5, 0.0  ;;  %v385_v10 = vsel %vm383_vm0, %v379_v6, 0.0  ;;  %1805 = vrcp.f32 %v1917_v20 }
  0x23   : > { %v382_v11 = vld [vmem:[%s2021_s27 + $0x20] sm:$0x1f]  ;;  %v386_v12 = vadd.f32 %v385_v10, %v384_v9  ;;  %v387_v13 = vsel %vm383_vm0, %v380_v7, 0.0  ;;  %v389_v14 = vsel %vm383_vm0, %v2027_v8, 0.0  ;;  %v1918_v25 = vmov 0  }
  0x24   : > { %v391_v16 = vsel %vm383_vm0, %v382_v11, 0.0  ;;  %v443_v23 = vld [vmem:[%s2269_s1] sm:$0x1f]  ;;  %1801 = vset.pattern.permute.xlu1 %v1918_v25  ;;  %1802 = vset.pattern.permute.xlu0 %v1918_v25  ;;  %v491_v63 = vld [vmem:[%s2271_s3 + $0x8] sm:$0xff]  ;;  %vm532_vm5 = vcmask 130048  }
  0x25   : > { %v388_v15 = vadd.f32 %v387_v13, %v386_v12  ;;  %446 = vperm.xlu1 %1801, %v443_v23   ;;  %v454_v27 = vld [vmem:[%s2270_s2] sm:$0x1f]  ;;  %555 = vmatpush.msra.mxu0 %v491_v63  ;;  %v640_v20 = vld [vmem:[%s2273_s5 + $0x8] sm:$0xff] }
  0x26   : > { %v490_v2 = vld [vmem:[%s2271_s3] sm:$0xff]  ;;  %661 = vmatpush.msra.mxu1 %v640_v20  ;;  %728 = vmatpush.msra.mxu2 %v640_v20 }
  0x27   : > { %v390_v17 = vadd.f32 %v389_v14, %v388_v15  ;;  %556 = vmatpush.msra.mxu0 %v490_v2  ;;  %v639_v23 = vld [vmem:[%s2273_s5] sm:$0xff]  ;;  %796 = vmatpush.msra.mxu3 %v640_v20 }
  0x28   : > { %v1806_v21 = vpop.eup %1805  ;;  %662 = vmatpush.msra.mxu1 %v639_v23  ;;  %729 = vmatpush.msra.mxu2 %v639_v23 }
  0x29   : > { %v392_v18 = vadd.f32 %v391_v16, %v390_v17  ;;  %v397_v22 = vmul.f32 80.0, %v1806_v21  ;;  %vm401_vm1 = vweird.f32 %v1806_v21  ;;  %797 = vmatpush.msra.mxu3 %v639_v23 }
  0x2a   : > { %864 = vmatpush.msrb.mxu1 %v640_v20  ;;  %932 = vmatpush.msrb.mxu2 %v640_v20 }
  0x2b   : > { %v393_v19 = vsel %vm383_vm0, %v392_v18, 0.0  ;;  %v398_v24 = vsub.f32 1.0, %v397_v22 }
  0x2c   : > { %394 = vadd.xlane.f32.xlu0 %v393_v19  ;;  %865 = vmatpush.msrb.mxu1 %v639_v23 }
  0x2d   : > { %v399_v26 = vmul.f32 %v1806_v21, %v398_v24  ;;  %457 = vperm.xlu1 %1801, %v454_v27   ;;  %v1919_v27 = vmov 0.0   ;;  %933 = vmatpush.msrb.mxu2 %v639_v23 }
  0x2e   : > { %663 = vmatmul.f32.vlgmr.msra.gmra.mxu1 %v1919_v27 }
  0x2f   : > { %v400_v28 = vadd.f32 %v1806_v21, %v399_v26 }
  0x31   : > { %v402_v29 = vsel %vm401_vm1, %v1806_v21, %v400_v28 }
  0x97   : > { %v2054_v59 = vpop.permute.xlu1 %446 }
  0x9f   : > { %v395_v30 = vpop.xlane.xlu0 %394 }
  0xa0   : > { %v403_v31 = vmul.f32 %v402_v29, %v395_v30 }
  0xa2   : > { %v404_v32 = vsub.f32 %v378_v5, %v403_v31  ;;  %v405_v33 = vsub.f32 %v379_v6, %v403_v31  ;;  %v406_v34 = vsub.f32 %v380_v7, %v403_v31  ;;  %v407_v35 = vsub.f32 %v2027_v8, %v403_v31  ;;  %v458_v5 = vpop.permute.xlu1 %457 }
  0xa3   : > { %v2044_v36 = vsub.f32 %v382_v11, %v403_v31 }
  0xa4   : > { %v409_v37 = vmul.f32 %v404_v32, %v404_v32  ;;  %v410_v38 = vmul.f32 %v405_v33, %v405_v33  ;;  %v411_v39 = vmul.f32 %v406_v34, %v406_v34  ;;  %v412_v40 = vmul.f32 %v407_v35, %v407_v35 }
  0xa5   : > { %v413_v44 = vmul.f32 %v2044_v36, %v2044_v36 }
  0xa6   : > { %v414_v41 = vsel %vm383_vm0, %v409_v37, 0.0  ;;  %v415_v42 = vsel %vm383_vm0, %v410_v38, 0.0  ;;  %v417_v45 = vsel %vm383_vm0, %v411_v39, 0.0  ;;  %v419_v47 = vsel %vm383_vm0, %v412_v40, 0.0 }
  0xa7   : > { %v416_v43 = vadd.f32 %v415_v42, %v414_v41  ;;  %v421_v49 = vsel %vm383_vm0, %v413_v44, 0.0 }
  0xa9   : > { %v418_v46 = vadd.f32 %v417_v45, %v416_v43  ;;  %v2082_v45 = vld [vmem:[%s2272_s4] ss:$0 sm:$0xff] }
  0xab   : > { %v420_v48 = vadd.f32 %v419_v47, %v418_v46 }
  0xad   : > { %v422_v50 = vadd.f32 %v421_v49, %v420_v48 }
  0xaf   : > { %v423_v51 = vsel %vm383_vm0, %v422_v50, 0.0 }
  0xb0   : > { %424 = vadd.xlane.f32.xlu0 %v423_v51 }
 0x123   : > { %v425_v52 = vpop.xlane.xlu0 %424 }
 0x124   : > { %v426_v53 = vmul.f32 %v425_v52, %v402_v29 }
 0x126   : > { %v427_v54 = vadd.f32 1e-05, %v426_v53 }
 0x128   : > { %1807 = vrsqrt.f32 %v427_v54  ;;  %vm434_vm3 = vweird.f32 %v427_v54 }
 0x12e   : > { %v1808_v55 = vpop.eup %1807 }
 0x12f   : > { %v429_v56 = vmul.f32 %v1808_v55, %v427_v54  ;;  %vm435_vm2 = vweird.f32 %v1808_v55 }
 0x130   : > { %vm436_vm4 = vmor %vm434_vm3, %vm435_vm2 }
 0x131   : > { %v430_v57 = vmul.f32 %v1808_v55, %v429_v56 }
 0x133   : > { %v431_v58 = vmul.f32 0.5, %v430_v57 }
 0x135   : > { %v432_v60 = vsub.f32 1.5, %v431_v58 }
 0x137   : > { %v433_v61 = vmul.f32 %v1808_v55, %v432_v60 }
 0x139   : > { %v437_v62 = vsel %vm436_vm4, %v1808_v55, %v433_v61 }
 0x13a   : > { %v438_v0 = vmul.f32 %v437_v62, %v404_v32  ;;  %v439_v1 = vmul.f32 %v437_v62, %v405_v33  ;;  %v440_v15 = vmul.f32 %v437_v62, %v406_v34  ;;  %v441_v17 = vmul.f32 %v437_v62, %v407_v35 }
 0x13b   : > { %v442_v31 = vmul.f32 %v437_v62, %v2044_v36 }
 0x13c   : > { %v449_v3 = vmul.f32 %v2054_v59, %v438_v0  ;;  %v450_v4 = vmul.f32 %v2054_v59, %v439_v1  ;;  %v451_v16 = vmul.f32 %v2054_v59, %v440_v15  ;;  %v452_v24 = vmul.f32 %v2054_v59, %v441_v17 }
 0x13d   : > { %v453_v32 = vmul.f32 %v2054_v59, %v442_v31  ;;  %v664_v59 = vpop.f32.mrf.mxu1 }
 0x13e   : > { %v460_v6 = vadd.f32 %v458_v5, %v449_v3  ;;  %v461_v7 = vadd.f32 %v458_v5, %v450_v4  ;;  %v462_v18 = vadd.f32 %v458_v5, %v451_v16  ;;  %v463_v30 = vadd.f32 %v458_v5, %v452_v24 }
 0x13f   : > { %v464_v34 = vadd.f32 %v458_v5, %v453_v32 }
 0x140   : > { %v470_v9 = vrot.slane %v460_v6, 1  ;;  %v471_v10 = vrot.slane %v460_v6, 2  ;;  %v472_v11 = vrot.slane %v460_v6, 3  ;;  %496 = vst [vmem:[#allocation1] ss:$9 sm:$0xff] %v460_v6  ;;  %v473_v12 = vrot.slane %v460_v6, 4 }
 0x141   : > { %506 = vst [vmem:[#allocation1 + $0x5] ss:$9 sm:$0xff] %v461_v7  ;;  %v474_v13 = vrot.slane %v461_v7, 1  ;;  %v475_v14 = vrot.slane %v461_v7, 2  ;;  %v476_v19 = vrot.slane %v461_v7, 3  ;;  %v477_v21 = vrot.slane %v461_v7, 4 }
 0x142   : > { %498 = vst [vmem:[#allocation1 + $0x1] ss:$9 sm:$0xff] %v470_v9  ;;  %v478_v25 = vrot.slane %v462_v18, 1  ;;  %v479_v26 = vrot.slane %v462_v18, 2  ;;  %v480_v28 = vrot.slane %v462_v18, 3  ;;  %v481_v29 = vrot.slane %v462_v18, 4 }
 0x143   : > { %500 = vst [vmem:[#allocation1 + $0x2] ss:$9 sm:$0xff] %v471_v10  ;;  %v482_v33 = vrot.slane %v463_v30, 1  ;;  %v483_v35 = vrot.slane %v463_v30, 2  ;;  %v484_v38 = vrot.slane %v463_v30, 3  ;;  %v485_v39 = vrot.slane %v463_v30, 4 }
 0x144   : > { %502 = vst [vmem:[#allocation1 + $0x3] ss:$9 sm:$0xff] %v472_v11  ;;  %v486_v40 = vrot.slane %v464_v34, 1  ;;  %v487_v41 = vrot.slane %v464_v34, 2  ;;  %v488_v36 = vrot.slane %v464_v34, 3  ;;  %v489_v42 = vrot.slane %v464_v34, 4 }
 0x145   : > { %504 = vst [vmem:[#allocation1 + $0x4] ss:$9 sm:$0xff] %v473_v12 }
 0x146   : > { %508 = vst [vmem:[#allocation1 + $0x6] ss:$9 sm:$0xff] %v474_v13 }
 0x147   : > { %510 = vst [vmem:[#allocation1 + $0x7] ss:$9 sm:$0xff] %v475_v14 }
 0x14e   : > { %v511_v22 = vld [vmem:[#allocation1] sm:$0xff] }
 0x14f   : > { %512 = vst [vmem:[#allocation1] ss:$9 sm:$0xff] %v476_v19  ;;  %1734 = vmatmul.msk.f32.vlgmr.msra.gmra.mxu0 %vm532_vm5, %v511_v22 }
 0x150   : > { %513 = vst [vmem:[#allocation1 + $0x1] ss:$9 sm:$0xff] %v477_v21 }
 0x151   : > { %514 = vst [vmem:[#allocation1 + $0x2] ss:$9 sm:$0xff] %v462_v18 }
 0x152   : > { %515 = vst [vmem:[#allocation1 + $0x3] ss:$9 sm:$0xff] %v478_v25 }
 0x153   : > { %516 = vst [vmem:[#allocation1 + $0x4] ss:$9 sm:$0xff] %v479_v26 }
 0x154   : > { %517 = vst [vmem:[#allocation1 + $0x5] ss:$9 sm:$0xff] %v480_v28 }
 0x155   : > { %518 = vst [vmem:[#allocation1 + $0x6] ss:$9 sm:$0xff] %v481_v29 }
 0x156   : > { %519 = vst [vmem:[#allocation1 + $0x7] ss:$9 sm:$0xff] %v463_v30 }
 0x15d   : > { %v520_v37 = vld [vmem:[#allocation1] sm:$0xff] }
 0x15e   : > { %521 = vst [vmem:[#allocation1] ss:$9 sm:$0xff] %v482_v33  ;;  %1735 = vmatmul.msk.f32.gmra.mxu0 %vm532_vm5, %v520_v37 }
 0x15f   : > { %522 = vst [vmem:[#allocation1 + $0x1] ss:$9 sm:$0xff] %v483_v35 }
 0x160   : > { %523 = vst [vmem:[#allocation1 + $0x2] ss:$9 sm:$0xff] %v484_v38 }
 0x161   : > { %524 = vst [vmem:[#allocation1 + $0x3] ss:$9 sm:$0xff] %v485_v39 }
 0x162   : > { %525 = vst [vmem:[#allocation1 + $0x4] ss:$9 sm:$0xff] %v464_v34 }
 0x163   : > { %526 = vst [vmem:[#allocation1 + $0x5] ss:$9 sm:$0xff] %v486_v40 }
 0x164   : > { %527 = vst [vmem:[#allocation1 + $0x6] ss:$9 sm:$0xff] %v487_v41 }
 0x165   : > { %528 = vst [vmem:[#allocation1 + $0x7] ss:$9 sm:$0xff] %v488_v36 }
 0x16c   : > { %v529_v43 = vld [vmem:[#allocation1] sm:$0xff] }
 0x16d   : > { %530 = vst [vmem:[#allocation1] ss:$9 sm:$0xff] %v489_v42  ;;  %1736 = vmatmul.msk.f32.gmra.mxu0 %vm532_vm5, %v529_v43 }
 0x174   : > { %v531_v44 = vld [vmem:[#allocation1] sm:$0xff] }
 0x175   : > { %1737 = vmatmul.msk.f32.gmra.mxu0 %vm532_vm5, %v531_v44 }
 0x1cc   : > { %v558_v46 = vpop.f32.mrf.mxu0 }
 0x1cd   : > { %v559_v47 = vadd.f32 %v2082_v45, %v558_v46 }
 0x1cf   : > { %v574_v48 = vrot.slane %v559_v47, 1  ;;  %v575_v49 = vrot.slane %v559_v47, 2  ;;  %v576_v50 = vrot.slane %v559_v47, 3  ;;  %595 = vst [vmem:[#allocation1] ss:$9 sm:$0xff] %v559_v47  ;;  %v577_v51 = vrot.slane %v559_v47, 4 }
 0x1d0   : > { %v578_v52 = vrot.slane %v559_v47, 5  ;;  %v579_v53 = vrot.slane %v559_v47, 6  ;;  %v580_v56 = vrot.slane %v559_v47, 7 }
 0x1d1   : > { %597 = vst [vmem:[#allocation1 + $0x1] ss:$9 sm:$0xff] %v574_v48 }
 0x1d2   : > { %599 = vst [vmem:[#allocation1 + $0x2] ss:$9 sm:$0xff] %v575_v49 }
 0x1d3   : > { %601 = vst [vmem:[#allocation1 + $0x3] ss:$9 sm:$0xff] %v576_v50 }
 0x1d4   : > { %603 = vst [vmem:[#allocation1 + $0x4] ss:$9 sm:$0xff] %v577_v51 }
 0x1db   : > { %v604_v54 = vld [vmem:[#allocation1] sm:$0xff]  ;;  %v561_v55 = vpop.f32.mrf.mxu0 }
 0x1dc   : > { %605 = vst [vmem:[#allocation1] ss:$9 sm:$0xff] %v578_v52  ;;  %v562_v57 = vadd.f32 %v2082_v45, %v561_v55 }
 0x1dd   : > { %606 = vst [vmem:[#allocation1 + $0x1] ss:$9 sm:$0xff] %v579_v53 }
 0x1de   : > { %607 = vst [vmem:[#allocation1 + $0x2] ss:$9 sm:$0xff] %v580_v56  ;;  %v581_v58 = vrot.slane %v562_v57, 1  ;;  %v582_v61 = vrot.slane %v562_v57, 2  ;;  %v583_v63 = vrot.slane %v562_v57, 3  ;;  %v584_v1 = vrot.slane %v562_v57, 4 }
 0x1df   : > { %634 = vst [vmem:[#allocation2 + $0x8] sm:$0x1f] %v604_v54  ;;  %v585_v2 = vrot.slane %v562_v57, 5  ;;  %v586_v3 = vrot.slane %v562_v57, 6  ;;  %v587_v7 = vrot.slane %v562_v57, 7 }
 0x1e0   : > { %608 = vst [vmem:[#allocation1 + $0x3] ss:$9 sm:$0xff] %v562_v57 }
 0x1e1   : > { %609 = vst [vmem:[#allocation1 + $0x4] ss:$9 sm:$0xff] %v581_v58 }
 0x1e6   : > { %v643_v60 = vld [vmem:[#allocation2 + $0x8] sm:$0x1f] }
 0x1e7   : > { %v667_v62 = vadd.f32 %v664_v59, %v643_v60 }
 0x1e8   : > { %v610_v0 = vld [vmem:[#allocation1] sm:$0xff] }
 0x1e9   : > { %611 = vst [vmem:[#allocation1] ss:$9 sm:$0xff] %v582_v61  ;;  %1809 = vtanh.f32 %v667_v62  ;;  %v1738_v21 = vmul.f32 -1.442695, %v667_v62 }
 0x1ea   : > { %612 = vst [vmem:[#allocation1 + $0x1] ss:$9 sm:$0xff] %v583_v63  ;;  %v564_v5 = vpop.f32.mrf.mxu0 }
 0x1eb   : > { %613 = vst [vmem:[#allocation1 + $0x2] ss:$9 sm:$0xff] %v584_v1  ;;  %v565_v6 = vadd.f32 %v2082_v45, %v564_v5  ;;  %1811 = vpow2.f32 %v1738_v21  ;;  %v2104_v5 = vld [vmem:[%s2274_s6 + $0x8] sm:$0xff] }
 0x1ec   : > { %614 = vst [vmem:[#allocation1 + $0x3] ss:$9 sm:$0xff] %v585_v2  ;;  %997 = vmatpush.msrb.mxu3 %v2104_v5  ;;  %1068 = vmatpush.msra.mxu1 %v2104_v5 }
 0x1ed   : > { %615 = vst [vmem:[#allocation1 + $0x4] ss:$9 sm:$0xff] %v586_v3  ;;  %v588_v10 = vrot.slane %v565_v6, 1  ;;  %v589_v11 = vrot.slane %v565_v6, 2  ;;  %v590_v12 = vrot.slane %v565_v6, 3  ;;  %v591_v13 = vrot.slane %v565_v6, 4 }
 0x1ee   : > { %635 = vst [vmem:[#allocation2] sm:$0x1f] %v610_v0  ;;  %v592_v14 = vrot.slane %v565_v6, 5  ;;  %v593_v16 = vrot.slane %v565_v6, 6  ;;  %v594_v18 = vrot.slane %v565_v6, 7 }
 0x1ef   : > { %v1810_v4 = vpop.eup %1809 }
 0x1f0   : > { %690 = vrot.lane.b32.xlu2 %v1810_v4, %s1920_s29 }
 0x1f1   : > { %v1812_v22 = vpop.eup %1811 }
 0x1f2   : > { %v567_v17 = vpop.f32.mrf.mxu0  ;;  %v671_v23 = vadd.f32 1.0, %v1812_v22 }
 0x1f3   : > { %v568_v19 = vadd.f32 %v2082_v45, %v567_v17 }
 0x1f4   : > { %v616_v9 = vld [vmem:[#allocation1] sm:$0xff]  ;;  %1813 = vrcp.f32 %v671_v23  ;;  %v683_v30 = vand.u32 2147483648, %v671_v23  ;;  %vm677_vm7 = vweird.f32 %v671_v23  ;;  %v681_v31 = vand.u32 2147483647, %v671_v23 }
 0x1f5   : > { %617 = vst [vmem:[#allocation1] ss:$9 sm:$0xff] %v587_v7  ;;  %v711_v44 = vld [vmem:[#allocation2] sm:$0x1f] }
 0x1f6   : > { %636 = vst [vmem:[#allocation2 + $0x20] sm:$0x1f] %v616_v9  ;;  %v684_v33 = vor.u32 1.1754944e-38, %v683_v30  ;;  %vm682_vm9 = vcmp.eq.f32.partialorder %v681_v31, 8.507059e+37 }
 0x1f7   : > { %618 = vst [vmem:[#allocation1 + $0x1] ss:$9 sm:$0xff] %v565_v6  ;;  %v2109_v6 = vld [vmem:[%s2274_s6] sm:$0xff] }
 0x1f8   : > { %619 = vst [vmem:[#allocation1 + $0x2] ss:$9 sm:$0xff] %v588_v10  ;;  %998 = vmatpush.msrb.mxu3 %v2109_v6  ;;  %1069 = vmatpush.msra.mxu1 %v2109_v6 }
 0x1f9   : > { %620 = vst [vmem:[#allocation1 + $0x3] ss:$9 sm:$0xff] %v589_v11 }
 0x1fa   : > { %621 = vst [vmem:[#allocation1 + $0x4] ss:$9 sm:$0xff] %v590_v12  ;;  %v1814_v24 = vpop.eup %1813 }
 0x1fb   : > { %v673_v25 = vmul.f32 %v1814_v24, %v671_v23  ;;  %vm678_vm6 = vweird.f32 %v1814_v24 }
 0x1fc   : > { %vm679_vm8 = vmor %vm677_vm7, %vm678_vm6 }
 0x1fd   : > { %v674_v26 = vsub.f32 1.0, %v673_v25  ;;  %v779_v9 = vld [vmem:[#allocation2 + $0x20] sm:$0x1f] }
 0x1ff   : > { %v675_v28 = vmul.f32 %v1814_v24, %v674_v26 }
 0x201   : > { %v622_v15 = vld [vmem:[#allocation1] sm:$0xff]  ;;  %v676_v29 = vadd.f32 %v1814_v24, %v675_v28 }
 0x202   : > { %623 = vst [vmem:[#allocation1] ss:$9 sm:$0xff] %v591_v13 }
 0x203   : > { %624 = vst [vmem:[#allocation1 + $0x1] ss:$9 sm:$0xff] %v592_v14  ;;  %v680_v32 = vsel %vm679_vm8, %v1814_v24, %v676_v29 }
 0x204   : > { %625 = vst [vmem:[#allocation1 + $0x2] ss:$9 sm:$0xff] %v593_v16  ;;  %v685_v35 = vsel %vm682_vm9, %v684_v33, %v680_v32 }
 0x205   : > { %626 = vst [vmem:[#allocation1 + $0x3] ss:$9 sm:$0xff] %v594_v18  ;;  %v688_v38 = vmul.f32 0.0, %v685_v35 }
 0x206   : > { %637 = vst [vmem:[#allocation2 + $0x10] sm:$0x1f] %v622_v15 }
 0x207   : > { %627 = vst [vmem:[#allocation1 + $0x4] ss:$9 sm:$0xff] %v568_v19 }
 0x20e   : > { %v628_v20 = vld [vmem:[#allocation1] sm:$0xff] }
 0x20f   : > { %638 = vst [vmem:[#allocation2 + $0x18] sm:$0x1f] %v628_v20 }
 0x216   : > { %v982_v18 = vld [vmem:[#allocation2 + $0x18] sm:$0x1f] }
 0x24a   : > { %v691_v34 = vpop.permute.xlu2 %690 }
 0x24b   : > { %v693_v37 = vmul.f32 %v691_v34, %v685_v35 }
 0x24d   : > { %695 = vrot.lane.b32.xlu2 %v693_v37, %s1921_s30 }
 0x2a7   : > { %v696_v39 = vpop.permute.xlu2 %695 }
 0x2a8   : > { %v698_v40 = vadd.f32 %v696_v39, %v688_v38 }
 0x2aa   : > { %1815 = vtanh.f32 %v698_v40 }
 0x2b0   : > { %v1816_v41 = vpop.eup %1815 }
 0x2b1   : > { %701 = vrot.lane.b32.xlu0 %v1816_v41, %s1921_s30 }
 0x323   : > { %v702_v36 = vpop.permute.xlu0 %701 }
 0x324   : > { %v704_v42 = vmul.f32 %v702_v36, %v685_v35 }
 0x326   : > { %706 = vrot.lane.b32.xlu1 %v704_v42, %s1922_s14 }
 0x398   : > { %v707_v43 = vpop.permute.xlu1 %706 }
 0x399   : > { %709 = vst.msk [vmem:[#allocation3] sm:$0x1f] %vm383_vm0, %v707_v43  ;;  %1739 = vmatmul.msk.f32.vlgmr.msra.gmra.mxu2 %vm532_vm5, %v707_v43 }
 0x39a   : > { %1139 = vmatpush.msra.mxu2 %v2104_v5 }
 0x39c   : > { %1140 = vmatpush.msra.mxu2 %v2109_v6 }
 0x41c   : > { %v731_v45 = vpop.f32.mrf.mxu2 }
 0x41d   : > { %v734_v46 = vadd.f32 %v731_v45, %v711_v44 }
 0x41f   : > { %1817 = vtanh.f32 %v734_v46  ;;  %v1740_v48 = vmul.f32 -1.442695, %v734_v46 }
 0x421   : > { %1819 = vpow2.f32 %v1740_v48 }
 0x425   : > { %v1818_v47 = vpop.eup %1817 }
 0x426   : > { %757 = vrot.lane.b32.xlu2 %v1818_v47, %s1920_s29 }
 0x427   : > { %v1820_v49 = vpop.eup %1819 }
 0x428   : > { %v738_v50 = vadd.f32 1.0, %v1820_v49 }
 0x42a   : > { %1821 = vrcp.f32 %v738_v50  ;;  %v750_v56 = vand.u32 2147483648, %v738_v50  ;;  %vm744_vm11 = vweird.f32 %v738_v50  ;;  %v748_v57 = vand.u32 2147483647, %v738_v50 }
 0x42c   : > { %v751_v59 = vor.u32 1.1754944e-38, %v750_v56  ;;  %vm749_vm13 = vcmp.eq.f32.partialorder %v748_v57, 8.507059e+37 }
 0x430   : > { %v1822_v51 = vpop.eup %1821 }
 0x431   : > { %v740_v52 = vmul.f32 %v1822_v51, %v738_v50  ;;  %vm745_vm10 = vweird.f32 %v1822_v51 }
 0x432   : > { %vm746_vm12 = vmor %vm744_vm11, %vm745_vm10 }
 0x433   : > { %v741_v53 = vsub.f32 1.0, %v740_v52 }
 0x435   : > { %v742_v54 = vmul.f32 %v1822_v51, %v741_v53 }
 0x437   : > { %v743_v55 = vadd.f32 %v1822_v51, %v742_v54 }
 0x439   : > { %v747_v58 = vsel %vm746_vm12, %v1822_v51, %v743_v55 }
 0x43a   : > { %v752_v61 = vsel %vm749_vm13, %v751_v59, %v747_v58 }
 0x43b   : > { %v755_v63 = vmul.f32 %v752_v61, %v698_v40 }
 0x480   : > { %v758_v60 = vpop.permute.xlu2 %757 }
 0x481   : > { %v760_v62 = vmul.f32 %v758_v60, %v752_v61 }
 0x483   : > { %762 = vrot.lane.b32.xlu1 %v760_v62, %s1921_s30  ;;  %v847_v62 = vld [vmem:[#allocation2 + $0x10] sm:$0x1f] }
 0x4f5   : > { %v763_v0 = vpop.permute.xlu1 %762 }
 0x4f6   : > { %v2096_v1 = vadd.f32 %v763_v0, %v755_v63 }
 0x4f8   : > { %1823 = vtanh.f32 %v2096_v1 }
 0x4fe   : > { %v1824_v2 = vpop.eup %1823 }
 0x4ff   : > { %768 = vrot.lane.b32.xlu2 %v1824_v2, %s1921_s30 }
 0x559   : > { %v769_v3 = vpop.permute.xlu2 %768 }
 0x55a   : > { %v771_v4 = vmul.f32 %v769_v3, %v752_v61 }
 0x55c   : > { %773 = vrot.lane.b32.xlu1 %v771_v4, %s1922_s14 }
 0x5ce   : > { %v774_v7 = vpop.permute.xlu1 %773 }
 0x5cf   : > { %777 = vst.msk [vmem:[#allocation3 + $0x8] sm:$0x1f] %vm383_vm0, %v774_v7  ;;  %1741 = vmatmul.msk.f32.vlgmr.msra.gmra.mxu3 %vm532_vm5, %v774_v7 }
 0x5d0   : > { %1210 = vmatpush.msra.mxu3 %v2104_v5 }
 0x5d2   : > { %1211 = vmatpush.msra.mxu3 %v2109_v6 }
 0x5d7   : > { %999 = vmatmul.f32.vlgmr.msrb.gmra.mxu3 %v1919_v27 }
 0x652   : > { %v799_v10 = vpop.f32.mrf.mxu3 }
 0x653   : > { %v802_v11 = vadd.f32 %v799_v10, %v779_v9 }
 0x655   : > { %1825 = vtanh.f32 %v802_v11  ;;  %v1742_v14 = vmul.f32 -1.442695, %v802_v11 }
 0x657   : > { %1827 = vpow2.f32 %v1742_v14 }
 0x65a   : > { %v1000_v12 = vpop.f32.mrf.mxu3 }
 0x65b   : > { %v1826_v13 = vpop.eup %1825  ;;  %1004 = vrot.lane.b32.xlu2 %v1000_v12, %s1923_s21 }
 0x65c   : > { %825 = vrot.lane.b32.xlu0 %v1826_v13, %s1920_s29 }
 0x65d   : > { %v1828_v15 = vpop.eup %1827 }
 0x65e   : > { %v806_v16 = vadd.f32 1.0, %v1828_v15 }
 0x660   : > { %1829 = vrcp.f32 %v806_v16  ;;  %v818_v25 = vand.u32 2147483648, %v806_v16  ;;  %vm812_vm15 = vweird.f32 %v806_v16  ;;  %v816_v26 = vand.u32 2147483647, %v806_v16 }
 0x662   : > { %v819_v29 = vor.u32 1.1754944e-38, %v818_v25  ;;  %vm817_vm2 = vcmp.eq.f32.partialorder %v816_v26, 8.507059e+37 }
 0x666   : > { %v1830_v27 = vpop.eup %1829 }
 0x667   : > { %v808_v20 = vmul.f32 %v1830_v27, %v806_v16  ;;  %vm813_vm14 = vweird.f32 %v1830_v27 }
 0x668   : > { %vm814_vm1 = vmor %vm812_vm15, %vm813_vm14 }
 0x669   : > { %v809_v22 = vsub.f32 1.0, %v808_v20 }
 0x66b   : > { %v810_v23 = vmul.f32 %v1830_v27, %v809_v22 }
 0x66d   : > { %v811_v24 = vadd.f32 %v1830_v27, %v810_v23 }
 0x66f   : > { %v815_v28 = vsel %vm814_vm1, %v1830_v27, %v811_v24 }
 0x670   : > { %v820_v31 = vsel %vm817_vm2, %v819_v29, %v815_v28 }
 0x671   : > { %v823_v41 = vmul.f32 %v820_v31, %v2096_v1 }
 0x6b5   : > { %v1005_v17 = vpop.permute.xlu2 %1004 }
 0x6b6   : > { %v1007_v19 = vadd.f32 %v1005_v17, %v982_v18 }
 0x6b8   : > { %1831 = vtanh.f32 %v1007_v19  ;;  %v1747_v33 = vmul.f32 -1.442695, %v1007_v19  ;;  %v1051_v19 = vld [vmem:[#allocation2 + $0x10] sm:$0x1f] }
 0x6ba   : > { %1833 = vpow2.f32 %v1747_v33 }
 0x6be   : > { %v1832_v21 = vpop.eup %1831 }
 0x6bf   : > { %1030 = vrot.lane.b32.xlu1 %v1832_v21, %s1920_s29 }
 0x6c0   : > { %v1834_v34 = vpop.eup %1833 }
 0x6c1   : > { %v1011_v35 = vadd.f32 1.0, %v1834_v34 }
 0x6c3   : > { %1835 = vrcp.f32 %v1011_v35  ;;  %v1023_v43 = vand.u32 2147483648, %v1011_v35  ;;  %vm1017_vm4 = vweird.f32 %v1011_v35  ;;  %v1021_v45 = vand.u32 2147483647, %v1011_v35 }
 0x6c5   : > { %v1024_v47 = vor.u32 1.1754944e-38, %v1023_v43  ;;  %vm1022_vm7 = vcmp.eq.f32.partialorder %v1021_v45, 8.507059e+37 }
 0x6c9   : > { %v1836_v37 = vpop.eup %1835 }
 0x6ca   : > { %v1013_v38 = vmul.f32 %v1836_v37, %v1011_v35  ;;  %vm1018_vm3 = vweird.f32 %v1836_v37 }
 0x6cb   : > { %vm1019_vm6 = vmor %vm1017_vm4, %vm1018_vm3 }
 0x6cc   : > { %v1014_v39 = vsub.f32 1.0, %v1013_v38 }
 0x6ce   : > { %v826_v30 = vpop.permute.xlu0 %825  ;;  %v1015_v40 = vmul.f32 %v1836_v37, %v1014_v39 }
 0x6cf   : > { %v828_v32 = vmul.f32 %v826_v30, %v820_v31 }
 0x6d0   : > { %v1016_v36 = vadd.f32 %v1836_v37, %v1015_v40 }
 0x6d1   : > { %830 = vrot.lane.b32.xlu2 %v828_v32, %s1921_s30 }
 0x6d2   : > { %v1020_v46 = vsel %vm1019_vm6, %v1836_v37, %v1016_v36 }
 0x6d3   : > { %v1025_v49 = vsel %vm1022_vm7, %v1024_v47, %v1020_v46 }
 0x6d4   : > { %v1028_v52 = vmul.f32 0.0, %v1025_v49 }
 0x72b   : > { %v831_v42 = vpop.permute.xlu2 %830 }
 0x72c   : > { %v2127_v44 = vadd.f32 %v831_v42, %v823_v41 }
 0x72e   : > { %1837 = vtanh.f32 %v2127_v44 }
 0x731   : > { %v1031_v48 = vpop.permute.xlu1 %1030 }
 0x732   : > { %v1033_v50 = vmul.f32 %v1031_v48, %v1025_v49 }
 0x734   : > { %v1838_v51 = vpop.eup %1837  ;;  %1035 = vrot.lane.b32.xlu0 %v1033_v50, %s1921_s30 }
 0x735   : > { %836 = vrot.lane.b32.xlu1 %v1838_v51, %s1921_s30 }
 0x7a6   : > { %v1036_v53 = vpop.permute.xlu0 %1035 }
 0x7a7   : > { %v2132_v54 = vadd.f32 %v1036_v53, %v1028_v52  ;;  %v837_v55 = vpop.permute.xlu1 %836 }
 0x7a8   : > { %v839_v56 = vmul.f32 %v837_v55, %v820_v31 }
 0x7a9   : > { %1839 = vtanh.f32 %v2132_v54 }
 0x7aa   : > { %841 = vrot.lane.b32.xlu0 %v839_v56, %s1922_s14 }
 0x7af   : > { %v1840_v57 = vpop.eup %1839 }
 0x7b0   : > { %1041 = vrot.lane.b32.xlu2 %v1840_v57, %s1921_s30 }
 0x80a   : > { %v1042_v58 = vpop.permute.xlu2 %1041 }
 0x80b   : > { %v1044_v59 = vmul.f32 %v1042_v58, %v1025_v49 }
 0x80d   : > { %1046 = vrot.lane.b32.xlu1 %v1044_v59, %s1924_s22 }
 0x81c   : > { %v842_v60 = vpop.permute.xlu0 %841 }
 0x81d   : > { %845 = vst.msk [vmem:[#allocation3 + $0x10] sm:$0x1f] %vm383_vm0, %v842_v60  ;;  %1743 = vmatmul.msk.f32.vlgmr.msrb.gmra.mxu1 %vm532_vm5, %v842_v60 }
 0x81e   : > { %1281 = vmatpush.msrb.mxu1 %v2104_v5 }
 0x820   : > { %1282 = vmatpush.msrb.mxu1 %v2109_v6 }
 0x87f   : > { %v1047_v61 = vpop.permute.xlu1 %1046 }
 0x880   : > { %1050 = vst.msk [vmem:[#allocation4 + $0x20] sm:$0x1f] %vm383_vm0, %v1047_v61  ;;  %1748 = vmatmul.msk.f32.vlgmr.msra.gmra.mxu1 %vm532_vm5, %v1047_v61 }
 0x89a   : > { %v867_v63 = vpop.f32.mrf.mxu1 }
 0x89b   : > { %v870_v0 = vadd.f32 %v867_v63, %v847_v62 }
 0x89d   : > { %1841 = vtanh.f32 %v870_v0  ;;  %v1744_v2 = vmul.f32 -1.442695, %v870_v0 }
 0x89f   : > { %1843 = vpow2.f32 %v1744_v2 }
 0x8a3   : > { %v1842_v1 = vpop.eup %1841 }
 0x8a4   : > { %893 = vrot.lane.b32.xlu0 %v1842_v1, %s1920_s29 }
 0x8a5   : > { %v1844_v3 = vpop.eup %1843 }
 0x8a6   : > { %v874_v4 = vadd.f32 1.0, %v1844_v3 }
 0x8a8   : > { %1845 = vrcp.f32 %v874_v4  ;;  %v886_v12 = vand.u32 2147483648, %v874_v4  ;;  %vm880_vm9 = vweird.f32 %v874_v4  ;;  %v884_v13 = vand.u32 2147483647, %v874_v4 }
 0x8aa   : > { %v887_v15 = vor.u32 1.1754944e-38, %v886_v12  ;;  %vm885_vm11 = vcmp.eq.f32.partialorder %v884_v13, 8.507059e+37 }
 0x8ae   : > { %v1846_v6 = vpop.eup %1845 }
 0x8af   : > { %v876_v7 = vmul.f32 %v1846_v6, %v874_v4  ;;  %vm881_vm8 = vweird.f32 %v1846_v6 }
 0x8b0   : > { %vm882_vm10 = vmor %vm880_vm9, %vm881_vm8 }
 0x8b1   : > { %v877_v9 = vsub.f32 1.0, %v876_v7 }
 0x8b3   : > { %v878_v10 = vmul.f32 %v1846_v6, %v877_v9 }
 0x8b5   : > { %v879_v11 = vadd.f32 %v1846_v6, %v878_v10 }
 0x8b7   : > { %v883_v14 = vsel %vm882_vm10, %v1846_v6, %v879_v11 }
 0x8b8   : > { %v888_v17 = vsel %vm885_vm11, %v887_v15, %v883_v14 }
 0x8b9   : > { %v891_v22 = vmul.f32 %v888_v17, %v2127_v44 }
 0x8fd   : > { %v1071_v5 = vpop.f32.mrf.mxu1 }
 0x8fe   : > { %1075 = vrot.lane.b32.xlu2 %v1071_v5, %s1923_s21 }
 0x916   : > { %v894_v16 = vpop.permute.xlu0 %893 }
 0x917   : > { %v896_v18 = vmul.f32 %v894_v16, %v888_v17 }
 0x919   : > { %898 = vrot.lane.b32.xlu2 %v896_v18, %s1921_s30  ;;  %v1193_v18 = vld [vmem:[#allocation2] sm:$0x1f] }
 0x958   : > { %v1076_v27 = vpop.permute.xlu2 %1075 }
 0x959   : > { %v1078_v20 = vadd.f32 %v1076_v27, %v1051_v19 }
 0x95b   : > { %1847 = vtanh.f32 %v1078_v20  ;;  %v1749_v26 = vmul.f32 -1.442695, %v1078_v20 }
 0x961   : > { %v1848_v21 = vpop.eup %1847 }
 0x962   : > { %1101 = vrot.lane.b32.xlu1 %v1848_v21, %s1920_s29 }
 0x973   : > { %v899_v23 = vpop.permute.xlu2 %898 }
 0x974   : > { %v2149_v24 = vadd.f32 %v899_v23, %v891_v22 }
 0x976   : > { %1849 = vtanh.f32 %v2149_v24 }
 0x977   : > { %1851 = vpow2.f32 %v1749_v26 }
 0x97c   : > { %v1850_v25 = vpop.eup %1849 }
 0x97d   : > { %904 = vrot.lane.b32.xlu1 %v1850_v25, %s1921_s30  ;;  %v1852_v28 = vpop.eup %1851 }
 0x97e   : > { %v1082_v29 = vadd.f32 1.0, %v1852_v28 }
 0x980   : > { %1853 = vrcp.f32 %v1082_v29  ;;  %v1094_v35 = vand.u32 2147483648, %v1082_v29  ;;  %vm1088_vm13 = vweird.f32 %v1082_v29  ;;  %v1092_v37 = vand.u32 2147483647, %v1082_v29 }
 0x982   : > { %v1095_v39 = vor.u32 1.1754944e-38, %v1094_v35  ;;  %vm1093_vm15 = vcmp.eq.f32.partialorder %v1092_v37, 8.507059e+37 }
 0x986   : > { %v1854_v30 = vpop.eup %1853 }
 0x987   : > { %v1084_v31 = vmul.f32 %v1854_v30, %v1082_v29  ;;  %vm1089_vm12 = vweird.f32 %v1854_v30 }
 0x988   : > { %vm1090_vm14 = vmor %vm1088_vm13, %vm1089_vm12 }
 0x989   : > { %v1085_v32 = vsub.f32 1.0, %v1084_v31 }
 0x98b   : > { %v1086_v33 = vmul.f32 %v1854_v30, %v1085_v32 }
 0x98d   : > { %v1087_v34 = vadd.f32 %v1854_v30, %v1086_v33 }
 0x98f   : > { %v1091_v38 = vsel %vm1090_vm14, %v1854_v30, %v1087_v34 }
 0x990   : > { %v1096_v41 = vsel %vm1093_vm15, %v1095_v39, %v1091_v38 }
 0x991   : > { %v1099_v44 = vmul.f32 %v1096_v41, %v2132_v54  ;;  %v1122_v54 = vld [vmem:[#allocation2 + $0x20] sm:$0x1f] }
 0x9d4   : > { %v1102_v40 = vpop.permute.xlu1 %1101 }
 0x9d5   : > { %v1104_v36 = vmul.f32 %v1102_v40, %v1096_v41 }
 0x9d7   : > { %1106 = vrot.lane.b32.xlu0 %v1104_v36, %s1921_s30 }
 0x9ef   : > { %v905_v42 = vpop.permute.xlu1 %904 }
 0x9f0   : > { %v907_v43 = vmul.f32 %v905_v42, %v888_v17 }
 0x9f2   : > { %909 = vrot.lane.b32.xlu0 %v907_v43, %s1922_s14 }
 0xa49   : > { %v1107_v45 = vpop.permute.xlu0 %1106 }
 0xa4a   : > { %v1109_v46 = vadd.f32 %v1107_v45, %v1099_v44  ;;  %v915_v45 = vld [vmem:[#allocation2 + $0x18] sm:$0x1f] }
 0xa4c   : > { %1855 = vtanh.f32 %v1109_v46 }
 0xa52   : > { %v1856_v47 = vpop.eup %1855 }
 0xa53   : > { %1112 = vrot.lane.b32.xlu2 %v1856_v47, %s1921_s30 }
 0xa64   : > { %v910_v48 = vpop.permute.xlu0 %909 }
 0xa65   : > { %913 = vst.msk [vmem:[#allocation3 + $0x18] sm:$0x1f] %vm383_vm0, %v910_v48  ;;  %1745 = vmatmul.msk.f32.vlgmr.msrb.gmra.mxu2 %vm532_vm5, %v910_v48 }
 0xaad   : > { %v1113_v49 = vpop.permute.xlu2 %1112 }
 0xaae   : > { %v1115_v50 = vmul.f32 %v1113_v49, %v1096_v41  ;;  %v1264_v49 = vld [vmem:[#allocation2 + $0x8] sm:$0x1f] }
 0xab0   : > { %1117 = vrot.lane.b32.xlu1 %v1115_v50, %s1924_s22 }
 0xae8   : > { %v2162_v52 = vpop.f32.mrf.mxu2 }
 0xb22   : > { %v1118_v51 = vpop.permute.xlu1 %1117 }
 0xb23   : > { %1121 = vst.msk [vmem:[#allocation4 + $0x18] sm:$0x1f] %vm383_vm0, %v1118_v51  ;;  %1750 = vmatmul.msk.f32.vlgmr.msra.gmra.mxu2 %vm532_vm5, %v1118_v51 }
 0xba6   : > { %v1142_v53 = vpop.f32.mrf.mxu2 }
 0xba7   : > { %1146 = vrot.lane.b32.xlu2 %v1142_v53, %s1923_s21 }
 0xc01   : > { %v1147_v55 = vpop.permute.xlu2 %1146 }
 0xc02   : > { %v1149_v56 = vadd.f32 %v1147_v55, %v1122_v54 }
 0xc04   : > { %1857 = vtanh.f32 %v1149_v56  ;;  %v1751_v58 = vmul.f32 -1.442695, %v1149_v56 }
 0xc06   : > { %1859 = vpow2.f32 %v1751_v58 }
 0xc0a   : > { %v1858_v57 = vpop.eup %1857 }
 0xc0b   : > { %1172 = vrot.lane.b32.xlu0 %v1858_v57, %s1920_s29 }
 0xc0c   : > { %v1860_v59 = vpop.eup %1859 }
 0xc0d   : > { %v1153_v60 = vadd.f32 1.0, %v1860_v59 }
 0xc0f   : > { %1861 = vrcp.f32 %v1153_v60  ;;  %v1165_v2 = vand.u32 2147483648, %v1153_v60  ;;  %vm1159_vm2 = vweird.f32 %v1153_v60  ;;  %v1163_v3 = vand.u32 2147483647, %v1153_v60 }
 0xc11   : > { %v1166_v5 = vor.u32 1.1754944e-38, %v1165_v2  ;;  %vm1164_vm4 = vcmp.eq.f32.partialorder %v1163_v3, 8.507059e+37 }
 0xc15   : > { %v1862_v61 = vpop.eup %1861 }
 0xc16   : > { %v1155_v62 = vmul.f32 %v1862_v61, %v1153_v60  ;;  %vm1160_vm1 = vweird.f32 %v1862_v61 }
 0xc17   : > { %vm1161_vm3 = vmor %vm1159_vm2, %vm1160_vm1 }
 0xc18   : > { %v1156_v63 = vsub.f32 1.0, %v1155_v62 }
 0xc1a   : > { %v1157_v0 = vmul.f32 %v1862_v61, %v1156_v63 }
 0xc1c   : > { %v1158_v1 = vadd.f32 %v1862_v61, %v1157_v0 }
 0xc1e   : > { %v1162_v4 = vsel %vm1161_vm3, %v1862_v61, %v1158_v1  ;;  %vm1438_vm3 = vcmask 261120  }
 0xc1f   : > { %v1167_v7 = vsel %vm1164_vm4, %v1166_v5, %v1162_v4 }
 0xc20   : > { %v1170_v10 = vmul.f32 %v1167_v7, %v1109_v46  ;;  %v938_v46 = vadd.f32 %v2162_v52, %v915_v45  ;;  %v1396_v45 = vld [vmem:[%s2275_s7 + $0x10] sm:$0xff] }
 0xc22   : > { %v1746_v55 = vmul.f32 -1.442695, %v938_v46 }
 0xc7d   : > { %v1173_v6 = vpop.permute.xlu0 %1172 }
 0xc7e   : > { %v1175_v9 = vmul.f32 %v1173_v6, %v1167_v7 }
 0xc80   : > { %1177 = vrot.lane.b32.xlu1 %v1175_v9, %s1921_s30 }
 0xcf2   : > { %v1178_v11 = vpop.permute.xlu1 %1177 }
 0xcf3   : > { %v1180_v12 = vadd.f32 %v1178_v11, %v1170_v10 }
 0xcf5   : > { %1863 = vtanh.f32 %v1180_v12 }
 0xcfb   : > { %v1864_v13 = vpop.eup %1863 }
 0xcfc   : > { %1183 = vrot.lane.b32.xlu2 %v1864_v13, %s1921_s30 }
 0xd56   : > { %v1184_v14 = vpop.permute.xlu2 %1183 }
 0xd57   : > { %v1186_v15 = vmul.f32 %v1184_v14, %v1167_v7 }
 0xd59   : > { %1188 = vrot.lane.b32.xlu0 %v1186_v15, %s1924_s22 }
 0xdcb   : > { %v1189_v16 = vpop.permute.xlu0 %1188 }
 0xdcc   : > { %1192 = vst.msk [vmem:[#allocation4 + $0x10] sm:$0x1f] %vm383_vm0, %v1189_v16  ;;  %1752 = vmatmul.msk.f32.vlgmr.msra.gmra.mxu3 %vm532_vm5, %v1189_v16 }
 0xe4f   : > { %v1213_v17 = vpop.f32.mrf.mxu3 }
 0xe50   : > { %1217 = vrot.lane.b32.xlu1 %v1213_v17, %s1923_s21 }
 0xec2   : > { %v1218_v19 = vpop.permute.xlu1 %1217 }
 0xec3   : > { %v1220_v27 = vadd.f32 %v1218_v19, %v1193_v18 }
 0xec5   : > { %1865 = vtanh.f32 %v1220_v27  ;;  %v1753_v21 = vmul.f32 -1.442695, %v1220_v27 }
 0xec7   : > { %1867 = vpow2.f32 %v1753_v21 }
 0xecb   : > { %v1866_v20 = vpop.eup %1865 }
 0xecc   : > { %1243 = vrot.lane.b32.xlu2 %v1866_v20, %s1920_s29 }
 0xecd   : > { %v1868_v22 = vpop.eup %1867 }
 0xece   : > { %v1224_v23 = vadd.f32 1.0, %v1868_v22 }
 0xed0   : > { %1869 = vrcp.f32 %v1224_v23  ;;  %v1236_v31 = vand.u32 2147483648, %v1224_v23  ;;  %vm1230_vm7 = vweird.f32 %v1224_v23  ;;  %v1234_v32 = vand.u32 2147483647, %v1224_v23 }
 0xed2   : > { %v1237_v34 = vor.u32 1.1754944e-38, %v1236_v31  ;;  %vm1235_vm9 = vcmp.eq.f32.partialorder %v1234_v32, 8.507059e+37 }
 0xed6   : > { %v1870_v25 = vpop.eup %1869 }
 0xed7   : > { %v1226_v26 = vmul.f32 %v1870_v25, %v1224_v23  ;;  %vm1231_vm6 = vweird.f32 %v1870_v25 }
 0xed8   : > { %vm1232_vm8 = vmor %vm1230_vm7, %vm1231_vm6 }
 0xed9   : > { %v1227_v28 = vsub.f32 1.0, %v1226_v26 }
 0xedb   : > { %v1228_v29 = vmul.f32 %v1870_v25, %v1227_v28 }
 0xedd   : > { %v1229_v30 = vadd.f32 %v1870_v25, %v1228_v29  ;;  %v1341_v29 = vld [vmem:[#allocation4 + $0x10] sm:$0x1f] }
 0xedf   : > { %v1233_v33 = vsel %vm1232_vm8, %v1870_v25, %v1229_v30  ;;  %v1343_v30 = vld [vmem:[#allocation4 + $0x20] sm:$0x1f] }
 0xee0   : > { %v1238_v37 = vsel %vm1235_vm9, %v1237_v34, %v1233_v33 }
 0xee1   : > { %v1241_v39 = vmul.f32 %v1238_v37, %v1180_v12 }
 0xf26   : > { %v1244_v35 = vpop.permute.xlu2 %1243 }
 0xf27   : > { %v1246_v38 = vmul.f32 %v1244_v35, %v1238_v37 }
 0xf29   : > { %1248 = vrot.lane.b32.xlu0 %v1246_v38, %s1921_s30 }
 0xf9b   : > { %v1249_v40 = vpop.permute.xlu0 %1248 }
 0xf9c   : > { %v2174_v41 = vadd.f32 %v1249_v40, %v1241_v39 }
 0xf9e   : > { %1871 = vtanh.f32 %v2174_v41 }
 0xf9f   : > { %1873 = vtanh.f32 %v938_v46  ;;  %v1395_v46 = vld [vmem:[%s2275_s7 + $0x8] sm:$0xff] }
 0xfa4   : > { %v1872_v36 = vpop.eup %1871 }
 0xfa5   : > { %1254 = vrot.lane.b32.xlu1 %v1872_v36, %s1921_s30  ;;  %v1874_v48 = vpop.eup %1873 }
0x1017   : > { %v1255_v42 = vpop.permute.xlu1 %1254 }
0x1018   : > { %v1257_v43 = vmul.f32 %v1255_v42, %v1238_v37  ;;  %v1335_v37 = vld [vmem:[#allocation3 + $0x8] sm:$0x1f] }
0x101a   : > { %1259 = vrot.lane.b32.xlu2 %v1257_v43, %s1924_s22  ;;  %v1342_v43 = vld [vmem:[#allocation4 + $0x18] sm:$0x1f] }
0x1074   : > { %v1260_v44 = vpop.permute.xlu2 %1259 }
0x1075   : > { %1263 = vst.msk [vmem:[#allocation4 + $0x8] sm:$0x1f] %vm383_vm0, %v1260_v44  ;;  %1754 = vmatmul.msk.f32.vlgmr.msrb.gmra.mxu1 %vm532_vm5, %v1260_v44  ;;  %v1397_v44 = vld [vmem:[%s2275_s7 + $0x18] sm:$0xff] }
0x1076   : > { %1459 = vmatpush.msrb.mxu2 %v1397_v44  ;;  %1763 = vmatpush.msrb.mxu3 %v1397_v44 }
0x1078   : > { %1460 = vmatpush.msrb.mxu2 %v1396_v45  ;;  %1764 = vmatpush.msrb.mxu3 %v1396_v45 }
0x107a   : > { %1461 = vmatpush.msrb.mxu2 %v1395_v46  ;;  %1765 = vmatpush.msrb.mxu3 %v1395_v46 }
0x10f2   : > { %v1284_v47 = vpop.f32.mrf.mxu1 }
0x10f3   : > { %1288 = vrot.lane.b32.xlu0 %v1284_v47, %s1923_s21  ;;  %v1394_v47 = vld [vmem:[%s2275_s7] sm:$0xff] }
0x10f4   : > { %1462 = vmatpush.msrb.mxu2 %v1394_v47  ;;  %1766 = vmatpush.msrb.mxu3 %v1394_v47 }
0x10fb   : > { %961 = vrot.lane.b32.xlu0 %v1874_v48, %s1920_s29  ;;  %v1334_v48 = vld [vmem:[#allocation3] sm:$0x1f] }
0x1165   : > { %v1289_v50 = vpop.permute.xlu0 %1288 }
0x1166   : > { %v1291_v51 = vadd.f32 %v1289_v50, %v1264_v49 }
0x1168   : > { %1875 = vtanh.f32 %v1291_v51  ;;  %v1755_v54 = vmul.f32 -1.442695, %v1291_v51 }
0x116a   : > { %1877 = vpow2.f32 %v1755_v54 }
0x116b   : > { %1879 = vpow2.f32 %v1746_v55 }
0x116d   : > { %v962_v16 = vpop.permute.xlu0 %961 }
0x116e   : > { %v1876_v53 = vpop.eup %1875 }
0x116f   : > { %1314 = vrot.lane.b32.xlu1 %v1876_v53, %s1920_s29 }
0x1170   : > { %v1878_v56 = vpop.eup %1877 }
0x1171   : > { %v1295_v52 = vadd.f32 1.0, %v1878_v56  ;;  %v1880_v57 = vpop.eup %1879 }
0x1172   : > { %v942_v58 = vadd.f32 1.0, %v1880_v57 }
0x1173   : > { %1881 = vrcp.f32 %v1295_v52  ;;  %v1307_v3 = vand.u32 2147483648, %v1295_v52  ;;  %vm1301_vm11 = vweird.f32 %v1295_v52  ;;  %v1305_v4 = vand.u32 2147483647, %v1295_v52 }
0x1174   : > { %1883 = vrcp.f32 %v942_v58  ;;  %v954_v13 = vand.u32 2147483648, %v942_v58  ;;  %vm948_vm15 = vweird.f32 %v942_v58  ;;  %v952_v14 = vand.u32 2147483647, %v942_v58 }
0x1175   : > { %v1308_v7 = vor.u32 1.1754944e-38, %v1307_v3  ;;  %vm1306_vm13 = vcmp.eq.f32.partialorder %v1305_v4, 8.507059e+37 }
0x1176   : > { %v955_v17 = vor.u32 1.1754944e-38, %v954_v13  ;;  %vm953_vm2 = vcmp.eq.f32.partialorder %v952_v14, 8.507059e+37 }
0x1179   : > { %v1882_v59 = vpop.eup %1881 }
0x117a   : > { %v1297_v60 = vmul.f32 %v1882_v59, %v1295_v52  ;;  %v1884_v62 = vpop.eup %1883  ;;  %vm1302_vm10 = vweird.f32 %v1882_v59  ;;  %v1336_v52 = vld [vmem:[#allocation3 + $0x10] sm:$0x1f] }
0x117b   : > { %v944_v63 = vmul.f32 %v1884_v62, %v942_v58  ;;  %vm1303_vm12 = vmor %vm1301_vm11, %vm1302_vm10  ;;  %vm949_vm14 = vweird.f32 %v1884_v62 }
0x117c   : > { %v1298_v61 = vsub.f32 1.0, %v1297_v60  ;;  %vm950_vm1 = vmor %vm948_vm15, %vm949_vm14 }
0x117d   : > { %v945_v1 = vsub.f32 1.0, %v944_v63 }
0x117e   : > { %v1299_v0 = vmul.f32 %v1882_v59, %v1298_v61 }
0x117f   : > { %v946_v5 = vmul.f32 %v1884_v62, %v945_v1 }
0x1180   : > { %v1300_v2 = vadd.f32 %v1882_v59, %v1299_v0 }
0x1181   : > { %v947_v11 = vadd.f32 %v1884_v62, %v946_v5 }
0x1182   : > { %v1304_v6 = vsel %vm1303_vm12, %v1882_v59, %v1300_v2  ;;  %v1337_v2 = vld [vmem:[#allocation3 + $0x18] sm:$0x1f] }
0x1183   : > { %v1309_v10 = vsel %vm1306_vm13, %v1308_v7, %v1304_v6  ;;  %v951_v15 = vsel %vm950_vm1, %v1884_v62, %v947_v11 }
0x1184   : > { %v956_v18 = vsel %vm953_vm2, %v955_v17, %v951_v15  ;;  %v1312_v27 = vmul.f32 %v1309_v10, %v2174_v41 }
0x1185   : > { %v964_v19 = vmul.f32 %v962_v16, %v956_v18  ;;  %v959_v22 = vmul.f32 %v956_v18, %v2149_v24  ;;  %v1340_v24 = vld [vmem:[#allocation4 + $0x8] sm:$0x1f] }
0x11e1   : > { %v1315_v9 = vpop.permute.xlu1 %1314 }
0x11e2   : > { %v1317_v12 = vmul.f32 %v1315_v9, %v1309_v10 }
0x11e4   : > { %1319 = vrot.lane.b32.xlu2 %v1317_v12, %s1921_s30 }
0x11ec   : > { %966 = vrot.lane.b32.xlu2 %v964_v19, %s1921_s30 }
0x123e   : > { %v1320_v20 = vpop.permute.xlu2 %1319 }
0x123f   : > { %v1322_v21 = vadd.f32 %v1320_v20, %v1312_v27 }
0x1241   : > { %1885 = vtanh.f32 %v1322_v21 }
0x1246   : > { %v967_v23 = vpop.permute.xlu2 %966 }
0x1247   : > { %v1886_v25 = vpop.eup %1885  ;;  %v969_v26 = vadd.f32 %v967_v23, %v959_v22  ;;  %v1890_v23 = vld [vmem:[%s2021_s27 + $0x8] sm:$0x1f] }
0x1248   : > { %1325 = vrot.lane.b32.xlu1 %v1886_v25, %s1921_s30  ;;  %v1485_v25 = vrot.slane %v1890_v23, 1 }
0x1249   : > { %1887 = vtanh.f32 %v969_v26  ;;  %v1486_v26 = vrot.slane %v1890_v23, 2 }
0x124f   : > { %v1888_v28 = vpop.eup %1887 }
0x1250   : > { %972 = vrot.lane.b32.xlu1 %v1888_v28, %s1921_s30  ;;  %v1487_v28 = vrot.slane %v1890_v23, 3 }
0x1258   : > { %1353 = vrot.lane.b32.xlu1 %v1341_v29, %s1921_s30  ;;  %v1488_v29 = vrot.slane %v1890_v23, 4 }
0x1260   : > { %1357 = vrot.lane.b32.xlu1 %v1343_v30, %s1921_s30  ;;  %v1891_v30 = vld [vmem:[%s2021_s27 + $0x10] sm:$0x1f] }
0x12ba   : > { %v1326_v31 = vpop.permute.xlu1 %1325 }
0x12bb   : > { %v1328_v32 = vmul.f32 %v1326_v31, %v1309_v10  ;;  %v1489_v31 = vrot.slane %v1891_v30, 1 }
0x12bd   : > { %1330 = vrot.lane.b32.xlu0 %v1328_v32, %s1924_s22 }
0x12c2   : > { %v973_v33 = vpop.permute.xlu1 %972 }
0x12c3   : > { %v975_v34 = vmul.f32 %v973_v33, %v956_v18  ;;  %v1889_v18 = vld [vmem:[%s2021_s27] sm:$0x1f]  ;;  %v1491_v33 = vrot.slane %v1891_v30, 3 }
0x12c4   : > { %v1481_v19 = vrot.slane %v1889_v18, 1  ;;  %v1482_v27 = vrot.slane %v1889_v18, 2  ;;  %v1483_v20 = vrot.slane %v1889_v18, 3  ;;  %v1484_v22 = vrot.slane %v1889_v18, 4 }
0x12c5   : > { %1351 = vrot.lane.b32.xlu0 %v1340_v24, %s1921_s30  ;;  %v1490_v24 = vrot.slane %v1891_v30, 2 }
0x12ca   : > { %v1354_v56 = vpop.permute.xlu1 %1353 }
0x12cb   : > { %v1366_v57 = vsel %vm532_vm5, %v1336_v52, %v1354_v56 }
0x12cc   : > { %v1382_v61 = vrot.slane %v1366_v57, 1  ;;  %v1383_v62 = vrot.slane %v1366_v57, 2  ;;  %v1384_v63 = vrot.slane %v1366_v57, 3  ;;  %v1385_v1 = vrot.slane %v1366_v57, 4 }
0x12cd   : > { %977 = vrot.lane.b32.xlu0 %v975_v34, %s1922_s14  ;;  %v1492_v34 = vrot.slane %v1891_v30, 4 }
0x12d2   : > { %v1358_v6 = vpop.permute.xlu1 %1357 }
0x132f   : > { %v1331_v35 = vpop.permute.xlu0 %1330 }
0x1330   : > { %1333 = vst.msk [vmem:[#allocation4] sm:$0x1f] %vm383_vm0, %v1331_v35  ;;  %v1493_v35 = vrot.slane %v2027_v8, 1 }
0x1337   : > { %v1352_v38 = vpop.permute.xlu0 %1351  ;;  %v1339_v39 = vld [vmem:[#allocation4] sm:$0x1f] }
0x1338   : > { %v1365_v40 = vsel %vm532_vm5, %v1335_v37, %v1352_v38  ;;  %1349 = vrot.lane.b32.xlu2 %v1339_v39, %s1921_s30  ;;  %v1494_v37 = vrot.slane %v2027_v8, 2  ;;  %v1495_v38 = vrot.slane %v2027_v8, 3  ;;  %v1496_v39 = vrot.slane %v2027_v8, 4 }
0x1339   : > { %v1378_v41 = vrot.slane %v1365_v40, 1  ;;  %v1379_v36 = vrot.slane %v1365_v40, 2  ;;  %1412 = vst [vmem:[#allocation1 + $0x5] ss:$9 sm:$0xff] %v1365_v40  ;;  %v1380_v58 = vrot.slane %v1365_v40, 3  ;;  %v1381_v59 = vrot.slane %v1365_v40, 4 }
0x133b   : > { %1414 = vst [vmem:[#allocation1 + $0x6] ss:$9 sm:$0xff] %v1378_v41  ;;  %v1892_v41 = vld [vmem:[%s2021_s27 + $0x20] sm:$0x1f]  ;;  %s2234_s27 = scalar_lea.vmem [#allocation6], %s2018_s26  ;;  %s1760_s26 = sshll.u32 (%p2005_p5), %s1728_s12, 3 }
0x133c   : > { %1416 = vst [vmem:[#allocation1 + $0x7] ss:$9 sm:$0xff] %v1379_v36  ;;  %v1497_v36 = vrot.slane %v1892_v41, 1  ;;  %v1500_v44 = vrot.slane %v1892_v41, 4  ;;  %s1622_s22 = scalar_lea.vmem (%p2005_p5), %s2277_s9, %s1760_s26 }
0x133f   : > { %v978_v42 = vpop.permute.xlu0 %977 }
0x1340   : > { %981 = vst.msk [vmem:[#allocation3 + $0x20] sm:$0x1f] %vm383_vm0, %v978_v42  ;;  %1355 = vrot.lane.b32.xlu2 %v1342_v43, %s1921_s30  ;;  %v1498_v42 = vrot.slane %v1892_v41, 2  ;;  %v1499_v43 = vrot.slane %v1892_v41, 3 }
0x1347   : > { %v1338_v4 = vld [vmem:[#allocation3 + $0x20] sm:$0x1f] }
0x1348   : > { %v1368_v10 = vsel %vm532_vm5, %v1338_v4, %v1358_v6 }
0x1349   : > { %v1390_v13 = vrot.slane %v1368_v10, 1  ;;  %v1391_v14 = vrot.slane %v1368_v10, 2  ;;  %v1392_v15 = vrot.slane %v1368_v10, 3  ;;  %v1393_v16 = vrot.slane %v1368_v10, 4 }
0x1392   : > { %v1350_v49 = vpop.permute.xlu2 %1349 }
0x1393   : > { %v1364_v50 = vsel %vm532_vm5, %v1334_v48, %v1350_v49 }
0x1394   : > { %v1374_v51 = vrot.slane %v1364_v50, 1  ;;  %v1375_v53 = vrot.slane %v1364_v50, 2  ;;  %v1376_v54 = vrot.slane %v1364_v50, 3  ;;  %1402 = vst [vmem:[#allocation1] ss:$9 sm:$0xff] %v1364_v50  ;;  %v1377_v55 = vrot.slane %v1364_v50, 4 }
0x1396   : > { %1404 = vst [vmem:[#allocation1 + $0x1] ss:$9 sm:$0xff] %v1374_v51 }
0x1397   : > { %1406 = vst [vmem:[#allocation1 + $0x2] ss:$9 sm:$0xff] %v1375_v53 }
0x1398   : > { %1408 = vst [vmem:[#allocation1 + $0x3] ss:$9 sm:$0xff] %v1376_v54 }
0x1399   : > { %1410 = vst [vmem:[#allocation1 + $0x4] ss:$9 sm:$0xff] %v1377_v55 }
0x139a   : > { %v1356_v0 = vpop.permute.xlu2 %1355 }
0x139b   : > { %v1367_v3 = vsel %vm532_vm5, %v1337_v2, %v1356_v0 }
0x139c   : > { %v1386_v5 = vrot.slane %v1367_v3, 1  ;;  %v1387_v7 = vrot.slane %v1367_v3, 2  ;;  %v1388_v11 = vrot.slane %v1367_v3, 3  ;;  %v1389_v12 = vrot.slane %v1367_v3, 4 }
0x13a0   : > { %v1417_v60 = vld [vmem:[#allocation1] sm:$0xff] }
0x13a1   : > { %1418 = vst [vmem:[#allocation1] ss:$9 sm:$0xff] %v1380_v58  ;;  %1756 = vmatmul.msk.f32.vlgmr.msrb.gmra.mxu2 %vm1438_vm3, %v1417_v60 }
0x13a2   : > { %1419 = vst [vmem:[#allocation1 + $0x1] ss:$9 sm:$0xff] %v1381_v59 }
0x13a3   : > { %1420 = vst [vmem:[#allocation1 + $0x2] ss:$9 sm:$0xff] %v1366_v57 }
0x13a4   : > { %1421 = vst [vmem:[#allocation1 + $0x3] ss:$9 sm:$0xff] %v1382_v61 }
0x13a5   : > { %1422 = vst [vmem:[#allocation1 + $0x4] ss:$9 sm:$0xff] %v1383_v62 }
0x13a6   : > { %1423 = vst [vmem:[#allocation1 + $0x5] ss:$9 sm:$0xff] %v1384_v63 }
0x13a7   : > { %1424 = vst [vmem:[#allocation1 + $0x6] ss:$9 sm:$0xff] %v1385_v1 }
0x13a8   : > { %1425 = vst [vmem:[#allocation1 + $0x7] ss:$9 sm:$0xff] %v1367_v3 }
0x13af   : > { %v1426_v9 = vld [vmem:[#allocation1] sm:$0xff] }
0x13b0   : > { %1427 = vst [vmem:[#allocation1] ss:$9 sm:$0xff] %v1386_v5  ;;  %1757 = vmatmul.msk.f32.gmra.mxu2 %vm1438_vm3, %v1426_v9 }
0x13b1   : > { %1428 = vst [vmem:[#allocation1 + $0x1] ss:$9 sm:$0xff] %v1387_v7 }
0x13b2   : > { %1429 = vst [vmem:[#allocation1 + $0x2] ss:$9 sm:$0xff] %v1388_v11 }
0x13b3   : > { %1430 = vst [vmem:[#allocation1 + $0x3] ss:$9 sm:$0xff] %v1389_v12 }
0x13b4   : > { %1431 = vst [vmem:[#allocation1 + $0x4] ss:$9 sm:$0xff] %v1368_v10 }
0x13b5   : > { %1432 = vst [vmem:[#allocation1 + $0x5] ss:$9 sm:$0xff] %v1390_v13 }
0x13b6   : > { %1433 = vst [vmem:[#allocation1 + $0x6] ss:$9 sm:$0xff] %v1391_v14 }
0x13b7   : > { %1434 = vst [vmem:[#allocation1 + $0x7] ss:$9 sm:$0xff] %v1392_v15 }
0x13be   : > { %v1435_v17 = vld [vmem:[#allocation1] sm:$0xff] }
0x13bf   : > { %1436 = vst [vmem:[#allocation1] ss:$9 sm:$0xff] %v1393_v16  ;;  %1758 = vmatmul.msk.f32.vlgmr.msrb.gmra.mxu3 %vm1438_vm3, %v1435_v17 }
0x13c6   : > { %v1437_v21 = vld [vmem:[#allocation1] sm:$0xff] }
0x13c7   : > { %1501 = vst [vmem:[#allocation1] ss:$9 sm:$0xff] %v1889_v18  ;;  %1759 = vmatmul.msk.f32.gmra.mxu3 %vm1438_vm3, %v1437_v21 }
0x13c8   : > { %1503 = vst [vmem:[#allocation1 + $0x1] ss:$9 sm:$0xff] %v1481_v19 }
0x13c9   : > { %1505 = vst [vmem:[#allocation1 + $0x2] ss:$9 sm:$0xff] %v1482_v27 }
0x13ca   : > { %1507 = vst [vmem:[#allocation1 + $0x3] ss:$9 sm:$0xff] %v1483_v20 }
0x13cb   : > { %1509 = vst [vmem:[#allocation1 + $0x4] ss:$9 sm:$0xff] %v1484_v22 }
0x13cc   : > { %1511 = vst [vmem:[#allocation1 + $0x5] ss:$9 sm:$0xff] %v1890_v23 }
0x13cd   : > { %1513 = vst [vmem:[#allocation1 + $0x6] ss:$9 sm:$0xff] %v1485_v25 }
0x13ce   : > { %1515 = vst [vmem:[#allocation1 + $0x7] ss:$9 sm:$0xff] %v1486_v26 }
0x13d5   : > { %v1516_v32 = vld [vmem:[#allocation1] sm:$0xff] }
0x13d6   : > { %1517 = vst [vmem:[#allocation1] ss:$9 sm:$0xff] %v1487_v28 }
0x13d7   : > { %1518 = vst [vmem:[#allocation1 + $0x1] ss:$9 sm:$0xff] %v1488_v29 }
0x13d8   : > { %1519 = vst [vmem:[#allocation1 + $0x2] ss:$9 sm:$0xff] %v1891_v30 }
0x13d9   : > { %1520 = vst [vmem:[#allocation1 + $0x3] ss:$9 sm:$0xff] %v1489_v31 }
0x13da   : > { %1521 = vst [vmem:[#allocation1 + $0x4] ss:$9 sm:$0xff] %v1490_v24 }
0x13db   : > { %1522 = vst [vmem:[#allocation1 + $0x5] ss:$9 sm:$0xff] %v1491_v33 }
0x13dc   : > { %1523 = vst [vmem:[#allocation1 + $0x6] ss:$9 sm:$0xff] %v1492_v34 }
0x13dd   : > { %1524 = vst [vmem:[#allocation1 + $0x7] ss:$9 sm:$0xff] %v2027_v8  ;;  %v1804_v8 = vld [vmem:[%s2276_s8] ss:$0 sm:$0xff] }
0x13e4   : > { %v1525_v40 = vld [vmem:[#allocation1] sm:$0xff] }
0x13e5   : > { %1526 = vst [vmem:[#allocation1] ss:$9 sm:$0xff] %v1493_v35 }
0x13e6   : > { %1527 = vst [vmem:[#allocation1 + $0x1] ss:$9 sm:$0xff] %v1494_v37 }
0x13e7   : > { %1528 = vst [vmem:[#allocation1 + $0x2] ss:$9 sm:$0xff] %v1495_v38 }
0x13e8   : > { %1529 = vst [vmem:[#allocation1 + $0x3] ss:$9 sm:$0xff] %v1496_v39 }
0x13e9   : > { %1530 = vst [vmem:[#allocation1 + $0x4] ss:$9 sm:$0xff] %v1892_v41 }
0x13ea   : > { %1531 = vst [vmem:[#allocation1 + $0x5] ss:$9 sm:$0xff] %v1497_v36 }
0x13eb   : > { %1532 = vst [vmem:[#allocation1 + $0x6] ss:$9 sm:$0xff] %v1498_v42 }
0x13ec   : > { %1533 = vst [vmem:[#allocation1 + $0x7] ss:$9 sm:$0xff] %v1499_v43 }
0x13f3   : > { %v1534_v45 = vld [vmem:[#allocation1] sm:$0xff] }
0x13f4   : > { %1535 = vst [vmem:[#allocation1] ss:$9 sm:$0xff] %v1500_v44 }
0x13fb   : > { %v1536_v48 = vld [vmem:[#allocation1] sm:$0xff] }
0x1424   : > { %v1464_v46 = vpop.f32.mrf.mxu2 }
0x1425   : > { %v1465_v47 = vadd.f32 %v1804_v8, %v1464_v46 }
0x1427   : > { %v1541_v49 = vadd.f32 %v1516_v32, %v1465_v47 }
0x1429   : > { %v1549_v50 = vrot.slane %v1541_v49, 1  ;;  %v1550_v51 = vrot.slane %v1541_v49, 2  ;;  %v1551_v53 = vrot.slane %v1541_v49, 3  ;;  %1570 = vst [vmem:[#allocation1] ss:$9 sm:$0xff] %v1541_v49  ;;  %v1552_v54 = vrot.slane %v1541_v49, 4 }
0x142a   : > { %v1553_v56 = vrot.slane %v1541_v49, 5  ;;  %v1554_v57 = vrot.slane %v1541_v49, 6  ;;  %v1555_v59 = vrot.slane %v1541_v49, 7 }
0x142b   : > { %1572 = vst [vmem:[#allocation1 + $0x1] ss:$9 sm:$0xff] %v1549_v50 }
0x142c   : > { %1574 = vst [vmem:[#allocation1 + $0x2] ss:$9 sm:$0xff] %v1550_v51 }
0x142d   : > { %1576 = vst [vmem:[#allocation1 + $0x3] ss:$9 sm:$0xff] %v1551_v53 }
0x142e   : > { %1578 = vst [vmem:[#allocation1 + $0x4] ss:$9 sm:$0xff] %v1552_v54 }
0x1433   : > { %v1467_v55 = vpop.f32.mrf.mxu2 }
0x1434   : > { %v1468_v52 = vadd.f32 %v1804_v8, %v1467_v55 }
0x1435   : > { %v1579_v58 = vld [vmem:[#allocation1] sm:$0xff] }
0x1436   : > { %v1542_v60 = vadd.f32 %v1525_v40, %v1468_v52  ;;  %1580 = vst [vmem:[#allocation1] ss:$9 sm:$0xff] %v1553_v56 }
0x1437   : > { %1581 = vst [vmem:[#allocation1 + $0x1] ss:$9 sm:$0xff] %v1554_v57 }
0x1438   : > { %v1556_v61 = vrot.slane %v1542_v60, 1  ;;  %1582 = vst [vmem:[#allocation1 + $0x2] ss:$9 sm:$0xff] %v1555_v59  ;;  %v1557_v62 = vrot.slane %v1542_v60, 2  ;;  %v1558_v63 = vrot.slane %v1542_v60, 3  ;;  %v1559_v1 = vrot.slane %v1542_v60, 4 }
0x1439   : > { %1583 = vst [vmem:[#allocation1 + $0x3] ss:$9 sm:$0xff] %v1542_v60  ;;  %v1560_v2 = vrot.slane %v1542_v60, 5  ;;  %v1561_v4 = vrot.slane %v1542_v60, 6  ;;  %v1562_v7 = vrot.slane %v1542_v60, 7 }
0x143a   : > { %1584 = vst [vmem:[#allocation1 + $0x4] ss:$9 sm:$0xff] %v1556_v61 }
0x143b   : > { %1609 = vst.msk [vmem:[%s2234_s27] sm:$0x1f] %vm383_vm0, %v1579_v58 }
0x1441   : > { %v1585_v0 = vld [vmem:[#allocation1] sm:$0xff] }
0x1442   : > { %1586 = vst [vmem:[#allocation1] ss:$9 sm:$0xff] %v1557_v62  ;;  %v1470_v3 = vpop.f32.mrf.mxu3  ;;  %v1659_v21 = vld [vmem:[%s2234_s27] sm:$0xff] (%p2005_p5) }
0x1443   : > { %1587 = vst [vmem:[#allocation1 + $0x1] ss:$9 sm:$0xff] %v1558_v63  ;;  %v1471_v5 = vadd.f32 %v1804_v8, %v1470_v3 }
0x1444   : > { %1588 = vst [vmem:[#allocation1 + $0x2] ss:$9 sm:$0xff] %v1559_v1 }
0x1445   : > { %1589 = vst [vmem:[#allocation1 + $0x3] ss:$9 sm:$0xff] %v1560_v2  ;;  %v1543_v6 = vadd.f32 %v1534_v45, %v1471_v5 }
0x1446   : > { %1590 = vst [vmem:[#allocation1 + $0x4] ss:$9 sm:$0xff] %v1561_v4 }
0x1447   : > { %1610 = vst.msk [vmem:[%s2234_s27 + $0x8] sm:$0x1f] %vm383_vm0, %v1585_v0  ;;  %v1563_v10 = vrot.slane %v1543_v6, 1  ;;  %v1564_v11 = vrot.slane %v1543_v6, 2  ;;  %v1565_v12 = vrot.slane %v1543_v6, 3  ;;  %v1566_v14 = vrot.slane %v1543_v6, 4 }
0x1448   : > { %v1567_v16 = vrot.slane %v1543_v6, 5  ;;  %v1568_v18 = vrot.slane %v1543_v6, 6  ;;  %v1569_v19 = vrot.slane %v1543_v6, 7  ;;  %1660 = vst [vmem:[%s1622_s22] sm:$0xff] (%p2005_p5), %v1659_v21 }
0x144a   : > { %v1473_v13 = vpop.f32.mrf.mxu3 }
0x144b   : > { %v1474_v15 = vadd.f32 %v1804_v8, %v1473_v13 }
0x144d   : > { %v1591_v9 = vld [vmem:[#allocation1] sm:$0xff]  ;;  %v1544_v27 = vadd.f32 %v1536_v48, %v1474_v15 }
0x144e   : > { %1592 = vst [vmem:[#allocation1] ss:$9 sm:$0xff] %v1562_v7  ;;  %v1661_v22 = vld [vmem:[%s2234_s27 + $0x8] sm:$0xff] (%p2005_p5) }
0x144f   : > { %1593 = vst [vmem:[#allocation1 + $0x1] ss:$9 sm:$0xff] %v1543_v6 }
0x1450   : > { %1594 = vst [vmem:[#allocation1 + $0x2] ss:$9 sm:$0xff] %v1563_v10 }
0x1451   : > { %1595 = vst [vmem:[#allocation1 + $0x3] ss:$9 sm:$0xff] %v1564_v11 }
0x1452   : > { %1596 = vst [vmem:[#allocation1 + $0x4] ss:$9 sm:$0xff] %v1565_v12 }
0x1453   : > { %1611 = vst.msk [vmem:[%s2234_s27 + $0x10] sm:$0x1f] %vm383_vm0, %v1591_v9 }
0x1454   : > { %1662 = vst [vmem:[%s1622_s22 + $0x10] sm:$0xff] (%p2005_p5), %v1661_v22 }
0x1459   : > { %v1597_v17 = vld [vmem:[#allocation1] sm:$0xff] }
0x145a   : > { %1598 = vst [vmem:[#allocation1] ss:$9 sm:$0xff] %v1566_v14  ;;  %v1663_v23 = vld [vmem:[%s2234_s27 + $0x10] sm:$0xff] (%p2005_p5) }
0x145b   : > { %1599 = vst [vmem:[#allocation1 + $0x1] ss:$9 sm:$0xff] %v1567_v16 }
0x145c   : > { %1600 = vst [vmem:[#allocation1 + $0x2] ss:$9 sm:$0xff] %v1568_v18 }
0x145d   : > { %1601 = vst [vmem:[#allocation1 + $0x3] ss:$9 sm:$0xff] %v1569_v19 }
0x145e   : > { %1602 = vst [vmem:[#allocation1 + $0x4] ss:$9 sm:$0xff] %v1544_v27 }
0x145f   : > { %1612 = vst.msk [vmem:[%s2234_s27 + $0x18] sm:$0x1f] %vm383_vm0, %v1597_v17 }
0x1460   : > { %1664 = vst [vmem:[%s1622_s22 + $0x20] sm:$0xff] (%p2005_p5), %v1663_v23 }
0x1462   : > { %1620 = sbr.rel (!%p2005_p5) target bundleno = 5231 (0x146f), region = 98 }
0x1465   : > { %v1603_v20 = vld [vmem:[#allocation1] sm:$0xff] }
0x1466   : > { %1613 = vst.msk [vmem:[%s2234_s27 + $0x20] sm:$0x1f] %vm383_vm0, %v1603_v20  ;;  %v1665_v25 = vld [vmem:[%s2234_s27 + $0x18] sm:$0xff] (%p2005_p5) }
0x1467   : > { %1666 = vst [vmem:[%s1622_s22 + $0x30] sm:$0xff] %v1665_v25 }
0x146d   : > { %v1667_v26 = vld [vmem:[%s2234_s27 + $0x20] sm:$0xff] }
0x146e   : > { %1668 = vst [vmem:[%s1622_s22 + $0x40] sm:$0xff] %v1667_v26 }
0x146f PF: > { %p16_p10 = scmp.ge.s32.totalorder %s1992_s13, 4   ;;  %s2279_s30 = smov %s1911_s10 }
0x1470   : > { %s2280_s10 = smov %s2003_s16  ;;  %s2281_s11 = smov %s1992_s13 }
0x1471   :  { %18 = sbr.rel (!%p16_p10) target bundleno = 2 (0x2), region = 208 }

// kernel: bsrnn_forward.9
= control target key start
LH: loop header
LB: loop body
LE: loop exit
PB: predicated region body
PF: predicated region fallthrough
CT: control target
= control target key end

     0   :  { %s2180_s30 = smov 0   ;;  %s2182_s10 = smov 0   ;;  %s2549_s0 = inlined_call_operand.vmem [shape: f32[5,2,5,16], index: 0, kind: input, shape index: {}]   ;;  %s2550_s1 = inlined_call_operand.vmem [shape: f32[5,1,1,1], index: 1, kind: input, shape index: {}]   ;;  %s2551_s2 = inlined_call_operand.vmem [shape: f32[5,1,1,1], index: 2, kind: input, shape index: {}]   ;;  %s2552_s3 = inlined_call_operand.vmem [shape: f32[16,128], index: 3, kind: input, shape index: {}]   ;;  %s2553_s4 = inlined_call_operand.vmem [shape: f32[1,128], index: 4, kind: input, shape index: {}]   ;;  %s2554_s5 = inlined_call_operand.vmem [shape: f32[16,64], index: 5, kind: input, shape index: {}]   ;;  %s2555_s6 = inlined_call_operand.vmem [shape: f32[16,64], index: 6, kind: input, shape index: {}]   ;;  %s2556_s7 = inlined_call_operand.vmem [shape: f32[32,16], index: 7, kind: input, shape index: {}]   ;;  %s2557_s8 = inlined_call_operand.vmem [shape: f32[1,16], index: 8, kind: input, shape index: {}]   ;;  %s2558_s9 = inlined_call_operand.vmem [shape: f32[5,2,5,16], index: 9, kind: output, shape index: {}]  }
   0x1   :  { %s2184_s11 = smov 0  }
   0x2 LB: > { %s1914_s12 = sadd.s32 4294967295, %s2120_s11   ;;  %s2197_s13 = sadd.s32 1, %s2120_s11   ;;  %s2120_s11 = sphi %s2184_s11, %s2562_s11   ;;  %s2116_s10 = sphi %s2182_s10, %s2561_s10   ;;  %s2112_s30 = sphi %s2180_s30, %s2560_s30  }
   0x3   : > { %s23_s14 = ssub.s32 %s2120_s11, %s2197_s13  ;;  %s26_s15 = sadd.s32 1, %s2116_s10 }
   0x4   : > { %p24_p0 = scmp.eq.s32.totalorder %s23_s14, 0  ;;  %p33_p1 = scmp.ne.s32.totalorder %s2116_s10, %s2112_s30 }
   0x5   : > { %p34_p2 = scmp.eq.s32.totalorder %s2120_s11, 0  ;;  %p231_p3 = scmp.eq.s32.totalorder %s1914_s12, 1 }
   0x6   : > { %s2208_s16 = scalar_select %p24_p0, %s2116_s10, %s26_s15  }
   0x7   : > { %p35_p4 = por %p34_p2, %p33_p1  ;;  %p2210_p5 = por %p231_p3, %p33_p1 }
   0x8   : > { %p1917_p6 = scmp.ge.s32.totalorder %s2120_s11, 2 }
   0xa   : > { %277 = sbr.rel (%p1917_p6) target bundleno = 24 (0x18), region = 48 }
   0xf   : > { %280 = sbr.rel (!%p35_p4) target bundleno = 24 (0x18), region = 52  ;;  %s282_s18 = sand.u32 (%p35_p4), 1, %s2116_s10  }
  0x10   : > { %s1918_s19 = sshll.u32 (%p35_p4), %s2120_s11, 3  ;;  %s1953_s20 = smul.u32 (%p35_p4), 40, %s282_s18 }
  0x11   : > { %s286_s23 = scalar_lea.vmem (%p35_p4), %s2549_s0, %s1918_s19 }
  0x12   : > { %v323_v0 = vld [vmem:[%s286_s23] sm:$0xff] (%p35_p4)  ;;  %v325_v1 = vld [vmem:[%s286_s23 + $0x10] sm:$0xff] (%p35_p4)  ;;  %s284_s24 = scalar_lea.vmem (%p35_p4), [#allocation5], %s1953_s20 }
  0x13   : > { %v327_v2 = vld [vmem:[%s286_s23 + $0x20] sm:$0xff] (%p35_p4)  ;;  %324 = vst [vmem:[%s284_s24] sm:$0xff] (%p35_p4), %v323_v0  ;;  %v329_v3 = vld [vmem:[%s286_s23 + $0x30] sm:$0xff] (%p35_p4) }
  0x14   : > { %326 = vst [vmem:[%s284_s24 + $0x8] sm:$0xff] %v325_v1  ;;  %v331_v4 = vld [vmem:[%s286_s23 + $0x40] sm:$0xff] }
  0x15   : > { %328 = vst [vmem:[%s284_s24 + $0x10] sm:$0xff] %v327_v2 }
  0x16   : > { %330 = vst [vmem:[%s284_s24 + $0x18] sm:$0xff] %v329_v3 }
  0x17   : > { %332 = vst [vmem:[%s284_s24 + $0x20] sm:$0xff] %v331_v4 }
  0x18 PF: > { %p1919_p7 = scmp.ge.s32.totalorder %s2120_s11, 1  ;;  %p337_p8 = scmp.lt.s32.totalorder %s2120_s11, 3 }
  0x1a   : > { %p338_p9 = pnand %p1919_p7, %p337_p8 }
  0x1b   : > { %s344_s27 = sand.u32 (!%p338_p9), 1, %s2112_s30   ;;  %s2125_s15 = smov (!%p338_p9), 80  }
  0x1c   : > { %341 = sbr.rel (%p338_p9) target bundleno = 5386 (0x150a), region = 90  ;;  %s2126_s18 = smov (!%p338_p9), 16  }
  0x1d   : > { %s2226_s28 = smul.u32 (!%p338_p9), 40, %s344_s27  ;;  %s2127_s19 = smov (!%p338_p9), 96  }
  0x1e   : > { %s2128_s24 = smov (!%p338_p9), 64   ;;  %s2129_s25 = smov (!%p338_p9), 32  }
  0x1f   : > { %s2229_s29 = scalar_lea.vmem (!%p338_p9), [#allocation5], %s2226_s28 }
  0x21   : > { %v1990_v5 = vld [vmem:[%s2550_s1] ss:$0 sm:$0xff]  ;;  %v2122_v6 = vmov 0   ;;  %vm383_vm0 = vcmask 126976   ;;  %v2233_v8 = vld [vmem:[%s2229_s29 + $0x8] sm:$0x1f] }
  0x22   : > { %1987 = vset.pattern.permute.xlu2 %v2122_v6  ;;  %1988 = vset.pattern.permute.xlu0 %v2122_v6  ;;  %v378_v7 = vld [vmem:[%s2229_s29] sm:$0x1f]  ;;  %v391_v12 = vsel %vm383_vm0, %v2233_v8, 0.0  ;;  %vm419_vm1 = vcmask 130048   ;;  %v2243_v24 = vld [vmem:[%s2229_s29 + $0x10] sm:$0x1f] }
  0x23   : > { %588 = vperm.xlu2 %1987, %v1990_v5   ;;  %1989 = vset.pattern.permute.xlu1 %v2122_v6  ;;  %v384_v9 = vsel %vm383_vm0, %v378_v7, 0.0  ;;  %v1991_v10 = vld [vmem:[%s2550_s1 + $0x1] ss:$0 sm:$0xff]  ;;  %v392_v13 = vrot.slane %v391_v12, 4  ;;  %v398_v26 = vsel %vm383_vm0, %v2243_v24, 0.0  ;;  %v2123_v37 = vmov 80.0  }
  0x24   : > { %v385_v11 = vrot.slane %v384_v9, 4  ;;  %v399_v28 = vrot.slane %v398_v26, 4  ;;  %v1992_v33 = vld [vmem:[%s2551_s2] ss:$0 sm:$0xff]  ;;  %v1993_v36 = vld [vmem:[%s2550_s1 + $0x2] ss:$0 sm:$0xff]  ;;  %2002 = vrcp.f32 %v2123_v37 }
  0x25   : > { %v393_v15 = vadd.f32 %v392_v13, %v391_v12  ;;  %v1994_v38 = vld [vmem:[%s2551_s2 + $0x3] ss:$0 sm:$0xff] }
  0x26   : > { %v386_v14 = vadd.f32 %v385_v11, %v384_v9  ;;  %v400_v29 = vadd.f32 %v399_v28, %v398_v26  ;;  %v2259_v44 = vld [vmem:[%s2229_s29 + $0x20] sm:$0x1f] }
  0x27   : > { %v394_v17 = vrot.slane %v393_v15, 2  ;;  %v412_v45 = vsel %vm383_vm0, %v2259_v44, 0.0 }
  0x28   : > { %v387_v16 = vrot.slane %v386_v14, 2  ;;  %v401_v30 = vrot.slane %v400_v29, 2  ;;  %v413_v46 = vrot.slane %v412_v45, 4 }
  0x29   : > { %v395_v19 = vadd.f32 %v394_v17, %v393_v15  ;;  %v1996_v15 = vld [vmem:[%s2551_s2 + $0x2] ss:$0 sm:$0xff] }
  0x2a   : > { %v388_v18 = vadd.f32 %v387_v16, %v386_v14  ;;  %v402_v31 = vadd.f32 %v401_v30, %v400_v29  ;;  %v2003_v39 = vpop.eup %2002  ;;  %v414_v48 = vadd.f32 %v413_v46, %v412_v45  ;;  %v1995_v29 = vld [vmem:[%s2551_s2 + $0x1] ss:$0 sm:$0xff] }
  0x2b   : > { %592 = vperm.xlu2 %1987, %v1991_v10   ;;  %v396_v22 = vrot.slane %v395_v19, 1  ;;  %v436_v40 = vmul.f32 80.0, %v2003_v39  ;;  %vm440_vm2 = vweird.f32 %v2003_v39 }
  0x2c   : > { %v389_v20 = vrot.slane %v388_v18, 1  ;;  %v403_v32 = vrot.slane %v402_v31, 1  ;;  %v415_v51 = vrot.slane %v414_v48, 2 }
  0x2d   : > { %v397_v25 = vadd.f32 %v396_v22, %v395_v19  ;;  %v437_v41 = vsub.f32 1.0, %v436_v40  ;;  %v1998_v40 = vld [vmem:[%s2550_s1 + $0x4] ss:$0 sm:$0xff] }
  0x2e   : > { %v390_v21 = vadd.f32 %v389_v20, %v388_v18  ;;  %v404_v34 = vadd.f32 %v403_v32, %v402_v31  ;;  %v416_v53 = vadd.f32 %v415_v51, %v414_v48 }
  0x2f   : > { %v423_v27 = vsel %vm419_vm1, %v397_v25, 0.0  ;;  %v438_v42 = vmul.f32 %v2003_v39, %v437_v41 }
  0x30   : > { %v420_v23 = vsel %vm419_vm1, %v390_v21, 0.0  ;;  %v426_v35 = vsel %vm419_vm1, %v404_v34, 0.0  ;;  %v417_v55 = vrot.slane %v416_v53, 1 }
  0x31   : > { %421 = vadd.xlane.f32.xlu0 %v420_v23  ;;  %v439_v43 = vadd.f32 %v2003_v39, %v438_v42 }
  0x32   : > { %v418_v57 = vadd.f32 %v417_v55, %v416_v53 }
  0x33   : > { %v2263_v47 = vsel %vm440_vm2, %v2003_v39, %v439_v43  ;;  %v1997_v39 = vld [vmem:[%s2550_s1 + $0x3] ss:$0 sm:$0xff] }
  0x34   : > { %v432_v61 = vsel %vm419_vm1, %v418_v57, 0.0 }
  0x39   : > { %424 = vadd.xlane.f32.xlu0 %v423_v27 }
  0x4d   : > { %628 = vperm.xlu0 %1988, %v1992_v33  }
  0x54   : > { %427 = vadd.xlane.f32.xlu2 %v426_v35 }
  0x6c   : > { %596 = vperm.xlu2 %1987, %v1993_v36  }
  0x74   : > { %640 = vperm.xlu2 %1987, %v1994_v38  }
  0x77   : > { %433 = vadd.xlane.f32.xlu0 %v432_v61 }
  0x7d   : > { %v2276_v0 = vpop.permute.xlu2 %588 }
  0x85   : > { %v2282_v12 = vpop.permute.xlu2 %592 }
  0x8b   : > { %636 = vperm.xlu0 %1988, %v1996_v15  }
  0xa4   : > { %v422_v49 = vpop.xlane.xlu0 %421 }
  0xa5   : > { %v442_v50 = vmul.f32 %v2263_v47, %v422_v49 }
  0xa7   : > { %v2266_v52 = vsub.f32 %v378_v7, %v442_v50 }
  0xa9   : > { %v452_v54 = vmul.f32 %v2266_v52, %v2266_v52 }
  0xab   : > { %v457_v56 = vsel %vm383_vm0, %v452_v54, 0.0  ;;  %v678_v54 = vld [vmem:[%s2552_s3 + $0x8] sm:$0xff] }
  0xac   : > { %v458_v58 = vrot.slane %v457_v56, 4  ;;  %v425_v59 = vpop.xlane.xlu0 %424  ;;  %741 = vmatpush.msra.mxu0 %v678_v54 }
  0xad   : > { %v443_v60 = vmul.f32 %v2263_v47, %v425_v59 }
  0xae   : > { %v459_v62 = vadd.f32 %v458_v58, %v457_v56  ;;  %v677_v56 = vld [vmem:[%s2552_s3] sm:$0xff] }
  0xaf   : > { %v2274_v63 = vsub.f32 %v2233_v8, %v443_v60  ;;  %742 = vmatpush.msra.mxu0 %v677_v56 }
  0xb0   : > { %v460_v1 = vrot.slane %v459_v62, 2 }
  0xb1   : > { %v453_v2 = vmul.f32 %v2274_v63, %v2274_v63 }
  0xb2   : > { %v461_v3 = vadd.f32 %v460_v1, %v459_v62 }
  0xb3   : > { %v464_v4 = vsel %vm383_vm0, %v453_v2, 0.0 }
  0xb4   : > { %v465_v5 = vrot.slane %v464_v4, 4  ;;  %v462_v6 = vrot.slane %v461_v3, 1 }
  0xb6   : > { %v463_v7 = vadd.f32 %v462_v6, %v461_v3  ;;  %v466_v9 = vadd.f32 %v465_v5, %v464_v4 }
  0xb8   : > { %v492_v10 = vsel %vm419_vm1, %v463_v7, 0.0  ;;  %v467_v11 = vrot.slane %v466_v9, 2 }
  0xb9   : > { %493 = vadd.xlane.f32.xlu1 %v492_v10 }
  0xba   : > { %v468_v8 = vadd.f32 %v467_v11, %v466_v9 }
  0xbc   : > { %v469_v13 = vrot.slane %v468_v8, 1 }
  0xbe   : > { %v470_v14 = vadd.f32 %v469_v13, %v468_v8 }
  0xbf   : > { %v629_v6 = vpop.permute.xlu0 %628 }
  0xc0   : > { %v495_v16 = vsel %vm419_vm1, %v470_v14, 0.0 }
  0xc1   : > { %496 = vadd.xlane.f32.xlu1 %v495_v16 }
  0xc7   : > { %v428_v17 = vpop.xlane.xlu2 %427 }
  0xc8   : > { %v444_v18 = vmul.f32 %v2263_v47, %v428_v17 }
  0xca   : > { %v2290_v19 = vsub.f32 %v2243_v24, %v444_v18  ;;  %v2300_v24 = vld [vmem:[%s2229_s29 + $0x18] sm:$0x1f] }
  0xcb   : > { %v405_v31 = vsel %vm383_vm0, %v2300_v24, 0.0 }
  0xcc   : > { %v454_v20 = vmul.f32 %v2290_v19, %v2290_v19  ;;  %v406_v32 = vrot.slane %v405_v31, 4 }
  0xce   : > { %v471_v21 = vsel %vm383_vm0, %v454_v20, 0.0  ;;  %v407_v33 = vadd.f32 %v406_v32, %v405_v31 }
  0xcf   : > { %v472_v22 = vrot.slane %v471_v21, 4  ;;  %v2313_v51 = vpop.permute.xlu2 %596 }
  0xd0   : > { %v408_v34 = vrot.slane %v407_v33, 2 }
  0xd1   : > { %v473_v23 = vadd.f32 %v472_v22, %v471_v21 }
  0xd2   : > { %v409_v35 = vadd.f32 %v408_v34, %v407_v33 }
  0xd3   : > { %v474_v25 = vrot.slane %v473_v23, 2 }
  0xd4   : > { %v410_v36 = vrot.slane %v409_v35, 1 }
  0xd5   : > { %v475_v26 = vadd.f32 %v474_v25, %v473_v23 }
  0xd6   : > { %v411_v37 = vadd.f32 %v410_v36, %v409_v35 }
  0xd7   : > { %v476_v27 = vrot.slane %v475_v26, 1  ;;  %v2322_v2 = vpop.permute.xlu2 %640 }
  0xd8   : > { %v429_v38 = vsel %vm419_vm1, %v411_v37, 0.0 }
  0xd9   : > { %v477_v28 = vadd.f32 %v476_v27, %v475_v26 }
  0xda   : > { %632 = vperm.xlu1 %1989, %v1995_v29  }
  0xdb   : > { %v498_v30 = vsel %vm419_vm1, %v477_v28, 0.0 }
  0xdc   : > { %499 = vadd.xlane.f32.xlu2 %v498_v30 }
 0x104   : > { %430 = vadd.xlane.f32.xlu1 %v429_v38 }
 0x11d   : > { %600 = vperm.xlu1 %1989, %v1997_v39  }
 0x125   : > { %604 = vperm.xlu1 %1989, %v1998_v40  }
 0x12c   : > { %v494_v41 = vpop.xlane.xlu1 %493 }
 0x12d   : > { %v507_v42 = vmul.f32 %v494_v41, %v2263_v47 }
 0x12f   : > { %v512_v43 = vadd.f32 1e-05, %v507_v42 }
 0x131   : > { %2004 = vrsqrt.f32 %v512_v43  ;;  %vm523_vm4 = vweird.f32 %v512_v43 }
 0x134   : > { %v497_v45 = vpop.xlane.xlu1 %496 }
 0x135   : > { %v508_v46 = vmul.f32 %v497_v45, %v2263_v47 }
 0x137   : > { %v2005_v48 = vpop.eup %2004  ;;  %v513_v49 = vadd.f32 1e-05, %v508_v46 }
 0x138   : > { %v518_v50 = vmul.f32 %v2005_v48, %v512_v43  ;;  %vm524_vm3 = vweird.f32 %v2005_v48 }
 0x139   : > { %2006 = vrsqrt.f32 %v513_v49  ;;  %vm525_vm5 = vmor %vm523_vm4, %vm524_vm3  ;;  %vm533_vm7 = vweird.f32 %v513_v49 }
 0x13a   : > { %v519_v53 = vmul.f32 %v2005_v48, %v518_v50 }
 0x13c   : > { %v520_v55 = vmul.f32 0.5, %v519_v53 }
 0x13e   : > { %v521_v57 = vsub.f32 1.5, %v520_v55 }
 0x13f   : > { %v2007_v58 = vpop.eup %2006 }
 0x140   : > { %v528_v59 = vmul.f32 %v2007_v58, %v513_v49  ;;  %v522_v60 = vmul.f32 %v2005_v48, %v521_v57  ;;  %vm534_vm6 = vweird.f32 %v2007_v58 }
 0x141   : > { %vm535_vm8 = vmor %vm533_vm7, %vm534_vm6 }
 0x142   : > { %v529_v61 = vmul.f32 %v2007_v58, %v528_v59  ;;  %v526_v62 = vsel %vm525_vm5, %v2005_v48, %v522_v60 }
 0x143   : > { %v567_v1 = vmul.f32 %v526_v62, %v2266_v52 }
 0x144   : > { %v530_v3 = vmul.f32 0.5, %v529_v61 }
 0x145   : > { %v607_v4 = vmul.f32 %v2276_v0, %v567_v1  ;;  %v826_v1 = vld [vmem:[%s2554_s5 + $0x8] sm:$0xff] }
 0x146   : > { %v531_v5 = vsub.f32 1.5, %v530_v3  ;;  %v825_v3 = vld [vmem:[%s2554_s5] sm:$0xff]  ;;  %847 = vmatpush.msra.mxu1 %v826_v1  ;;  %914 = vmatpush.msra.mxu2 %v826_v1 }
 0x147   : > { %v647_v7 = vadd.f32 %v629_v6, %v607_v4  ;;  %982 = vmatpush.msra.mxu3 %v826_v1 }
 0x148   : > { %v532_v9 = vmul.f32 %v2007_v58, %v531_v5  ;;  %848 = vmatpush.msra.mxu1 %v825_v3  ;;  %915 = vmatpush.msra.mxu2 %v825_v3  ;;  %v2124_v5 = vmov 0.0  }
 0x149   : > { %v657_v10 = vrot.slane %v647_v7, 1  ;;  %v658_v11 = vrot.slane %v647_v7, 2  ;;  %v659_v8 = vrot.slane %v647_v7, 3  ;;  %683 = vst [vmem:[#allocation1] ss:$9 sm:$0xff] %v647_v7  ;;  %v660_v13 = vrot.slane %v647_v7, 4  ;;  %849 = vmatmul.f32.vlgmr.msra.gmra.mxu1 %v2124_v5  ;;  %983 = vmatpush.msra.mxu3 %v825_v3 }
 0x14a   : > { %v536_v14 = vsel %vm535_vm8, %v2007_v58, %v532_v9  ;;  %1050 = vmatpush.msrb.mxu1 %v826_v1  ;;  %1118 = vmatpush.msrb.mxu2 %v826_v1  ;;  %v1999_v7 = vld [vmem:[%s2551_s2 + $0x4] ss:$0 sm:$0xff] }
 0x14b   : > { %685 = vst [vmem:[#allocation1 + $0x1] ss:$9 sm:$0xff] %v657_v10  ;;  %v568_v52 = vmul.f32 %v536_v14, %v2274_v63 }
 0x14c   : > { %687 = vst [vmem:[#allocation1 + $0x2] ss:$9 sm:$0xff] %v658_v11  ;;  %v633_v17 = vpop.permute.xlu1 %632  ;;  %1051 = vmatpush.msrb.mxu1 %v825_v3  ;;  %1119 = vmatpush.msrb.mxu2 %v825_v3 }
 0x14d   : > { %689 = vst [vmem:[#allocation1 + $0x3] ss:$9 sm:$0xff] %v659_v8  ;;  %v608_v0 = vmul.f32 %v2282_v12, %v568_v52  ;;  %v434_v12 = vpop.xlane.xlu0 %433 }
 0x14e   : > { %691 = vst [vmem:[#allocation1 + $0x4] ss:$9 sm:$0xff] %v660_v13  ;;  %v446_v41 = vmul.f32 %v2263_v47, %v434_v12 }
 0x14f   : > { %v500_v15 = vpop.xlane.xlu2 %499  ;;  %v648_v18 = vadd.f32 %v633_v17, %v608_v0 }
 0x150   : > { %v509_v16 = vmul.f32 %v500_v15, %v2263_v47  ;;  %v2333_v42 = vsub.f32 %v2259_v44, %v446_v41 }
 0x151   : > { %v661_v21 = vrot.slane %v648_v18, 1  ;;  %v662_v22 = vrot.slane %v648_v18, 2  ;;  %693 = vst [vmem:[#allocation1 + $0x5] ss:$9 sm:$0xff] %v648_v18  ;;  %v663_v63 = vrot.slane %v648_v18, 3  ;;  %v664_v26 = vrot.slane %v648_v18, 4 }
 0x152   : > { %v514_v20 = vadd.f32 1e-05, %v509_v16 }
 0x153   : > { %695 = vst [vmem:[#allocation1 + $0x6] ss:$9 sm:$0xff] %v661_v21 }
 0x154   : > { %2008 = vrsqrt.f32 %v514_v20  ;;  %697 = vst [vmem:[#allocation1 + $0x7] ss:$9 sm:$0xff] %v662_v22  ;;  %vm543_vm9 = vweird.f32 %v514_v20 }
 0x155   : > { %v637_v35 = vpop.permute.xlu0 %636 }
 0x15a   : > { %v2009_v23 = vpop.eup %2008 }
 0x15b   : > { %v538_v25 = vmul.f32 %v2009_v23, %v514_v20  ;;  %v698_v27 = vld [vmem:[#allocation1] sm:$0xff]  ;;  %vm544_vm10 = vweird.f32 %v2009_v23 }
 0x15c   : > { %699 = vst [vmem:[#allocation1] ss:$9 sm:$0xff] %v663_v63  ;;  %1920 = vmatmul.msk.f32.vlgmr.msra.gmra.mxu0 %vm419_vm1, %v698_v27  ;;  %vm545_vm11 = vmor %vm543_vm9, %vm544_vm10 }
 0x15d   : > { %v539_v28 = vmul.f32 %v2009_v23, %v538_v25  ;;  %700 = vst [vmem:[#allocation1 + $0x1] ss:$9 sm:$0xff] %v664_v26 }
 0x15f   : > { %v540_v29 = vmul.f32 0.5, %v539_v28 }
 0x161   : > { %v541_v30 = vsub.f32 1.5, %v540_v29 }
 0x163   : > { %v542_v31 = vmul.f32 %v2009_v23, %v541_v30 }
 0x165   : > { %v546_v32 = vsel %vm545_vm11, %v2009_v23, %v542_v31 }
 0x166   : > { %v569_v33 = vmul.f32 %v546_v32, %v2290_v19  ;;  %v456_v19 = vmul.f32 %v2333_v42, %v2333_v42 }
 0x168   : > { %v609_v34 = vmul.f32 %v2313_v51, %v569_v33  ;;  %v485_v45 = vsel %vm383_vm0, %v456_v19, 0.0  ;;  %v2361_v19 = vld [vmem:[%s2553_s4] ss:$0 sm:$0xff] }
 0x169   : > { %v486_v49 = vrot.slane %v485_v45, 4 }
 0x16a   : > { %v649_v36 = vadd.f32 %v637_v35, %v609_v34 }
 0x16b   : > { %v487_v54 = vadd.f32 %v486_v49, %v485_v45 }
 0x16c   : > { %v665_v37 = vrot.slane %v649_v36, 1  ;;  %v667_v38 = vrot.slane %v649_v36, 3  ;;  %v668_v39 = vrot.slane %v649_v36, 4  ;;  %701 = vst [vmem:[#allocation1 + $0x2] ss:$9 sm:$0xff] %v649_v36  ;;  %v666_v40 = vrot.slane %v649_v36, 2 }
 0x16d   : > { %v488_v44 = vrot.slane %v487_v54, 2 }
 0x16e   : > { %702 = vst [vmem:[#allocation1 + $0x3] ss:$9 sm:$0xff] %v665_v37 }
 0x16f   : > { %704 = vst [vmem:[#allocation1 + $0x5] ss:$9 sm:$0xff] %v667_v38  ;;  %v489_v59 = vadd.f32 %v488_v44, %v487_v54 }
 0x170   : > { %705 = vst [vmem:[#allocation1 + $0x6] ss:$9 sm:$0xff] %v668_v39 }
 0x171   : > { %703 = vst [vmem:[#allocation1 + $0x4] ss:$9 sm:$0xff] %v666_v40  ;;  %v490_v62 = vrot.slane %v489_v59, 1 }
 0x173   : > { %v491_v4 = vadd.f32 %v490_v62, %v489_v59 }
 0x175   : > { %v504_v6 = vsel %vm419_vm1, %v491_v4, 0.0 }
 0x177   : > { %v431_v43 = vpop.xlane.xlu1 %430 }
 0x178   : > { %v445_v46 = vmul.f32 %v2263_v47, %v431_v43 }
 0x17a   : > { %v450_v48 = vsub.f32 %v2300_v24, %v445_v46 }
 0x17c   : > { %v455_v50 = vmul.f32 %v450_v48, %v450_v48 }
 0x17e   : > { %v478_v51 = vsel %vm383_vm0, %v455_v50, 0.0 }
 0x17f   : > { %v479_v53 = vrot.slane %v478_v51, 4 }
 0x181   : > { %v480_v55 = vadd.f32 %v479_v53, %v478_v51 }
 0x183   : > { %v481_v56 = vrot.slane %v480_v55, 2 }
 0x185   : > { %v482_v57 = vadd.f32 %v481_v56, %v480_v55 }
 0x187   : > { %v483_v58 = vrot.slane %v482_v57, 1 }
 0x189   : > { %v484_v60 = vadd.f32 %v483_v58, %v482_v57 }
 0x18b   : > { %v501_v61 = vsel %vm419_vm1, %v484_v60, 0.0 }
 0x18c   : > { %502 = vadd.xlane.f32.xlu2 %v501_v61 }
 0x18f   : > { %v601_v22 = vpop.permute.xlu1 %600 }
 0x194   : > { %505 = vadd.xlane.f32.xlu2 %v504_v6 }
 0x197   : > { %v605_v31 = vpop.permute.xlu1 %604 }
 0x1ac   : > { %644 = vperm.xlu2 %1987, %v1999_v7  }
 0x1c6   : > { %v850_v57 = vpop.f32.mrf.mxu1 }
 0x1d9   : > { %v744_v45 = vpop.f32.mrf.mxu0 }
 0x1da   : > { %v745_v46 = vadd.f32 %v2361_v19, %v744_v45 }
 0x1dc   : > { %v761_v50 = vrot.slane %v745_v46, 2  ;;  %v762_v51 = vrot.slane %v745_v46, 3  ;;  %v763_v53 = vrot.slane %v745_v46, 4  ;;  %v764_v54 = vrot.slane %v745_v46, 5 }
 0x1dd   : > { %v765_v55 = vrot.slane %v745_v46, 6  ;;  %v766_v44 = vrot.slane %v745_v46, 7 }
 0x1ff   : > { %v503_v9 = vpop.xlane.xlu2 %502 }
 0x200   : > { %v510_v10 = vmul.f32 %v503_v9, %v2263_v47 }
 0x202   : > { %v515_v11 = vadd.f32 1e-05, %v510_v10 }
 0x204   : > { %2010 = vrsqrt.f32 %v515_v11  ;;  %vm553_vm13 = vweird.f32 %v515_v11 }
 0x207   : > { %v506_v8 = vpop.xlane.xlu2 %505 }
 0x208   : > { %v511_v13 = vmul.f32 %v506_v8, %v2263_v47 }
 0x20a   : > { %v2011_v14 = vpop.eup %2010  ;;  %v516_v52 = vadd.f32 1e-05, %v511_v13 }
 0x20b   : > { %v548_v15 = vmul.f32 %v2011_v14, %v515_v11  ;;  %vm554_vm12 = vweird.f32 %v2011_v14 }
 0x20c   : > { %2012 = vrsqrt.f32 %v516_v52  ;;  %vm555_vm14 = vmor %vm553_vm13, %vm554_vm12  ;;  %vm563_vm2 = vweird.f32 %v516_v52 }
 0x20d   : > { %v549_v0 = vmul.f32 %v2011_v14, %v548_v15 }
 0x20f   : > { %v550_v16 = vmul.f32 0.5, %v549_v0  ;;  %v645_v33 = vpop.permute.xlu2 %644 }
 0x211   : > { %v551_v17 = vsub.f32 1.5, %v550_v16 }
 0x212   : > { %v2013_v18 = vpop.eup %2012 }
 0x213   : > { %v552_v20 = vmul.f32 %v2011_v14, %v551_v17  ;;  %v558_v21 = vmul.f32 %v2013_v18, %v516_v52  ;;  %vm564_vm15 = vweird.f32 %v2013_v18 }
 0x214   : > { %vm565_vm3 = vmor %vm563_vm2, %vm564_vm15 }
 0x215   : > { %v556_v23 = vsel %vm555_vm14, %v2011_v14, %v552_v20  ;;  %v559_v25 = vmul.f32 %v2013_v18, %v558_v21 }
 0x216   : > { %v570_v63 = vmul.f32 %v556_v23, %v450_v48  ;;  %v760_v48 = vrot.slane %v745_v46, 1 }
 0x217   : > { %v560_v26 = vmul.f32 0.5, %v559_v25 }
 0x218   : > { %v610_v27 = vmul.f32 %v601_v22, %v570_v63 }
 0x219   : > { %v561_v47 = vsub.f32 1.5, %v560_v26 }
 0x21a   : > { %v650_v28 = vadd.f32 %v2322_v2, %v610_v27 }
 0x21b   : > { %v562_v12 = vmul.f32 %v2013_v18, %v561_v47 }
 0x21c   : > { %706 = vst [vmem:[#allocation1 + $0x7] ss:$9 sm:$0xff] %v650_v28  ;;  %v670_v34 = vrot.slane %v650_v28, 2  ;;  %v671_v36 = vrot.slane %v650_v28, 3  ;;  %v672_v38 = vrot.slane %v650_v28, 4  ;;  %v669_v39 = vrot.slane %v650_v28, 1 }
 0x21d   : > { %v566_v29 = vsel %vm565_vm3, %v2013_v18, %v562_v12 }
 0x21e   : > { %v571_v30 = vmul.f32 %v566_v29, %v2333_v42 }
 0x220   : > { %v611_v32 = vmul.f32 %v605_v31, %v571_v30 }
 0x222   : > { %v651_v35 = vadd.f32 %v645_v33, %v611_v32 }
 0x223   : > { %v707_v37 = vld [vmem:[#allocation1] sm:$0xff] }
 0x224   : > { %709 = vst [vmem:[#allocation1 + $0x1] ss:$9 sm:$0xff] %v670_v34  ;;  %1921 = vmatmul.msk.f32.gmra.mxu0 %vm419_vm1, %v707_v37  ;;  %v673_v2 = vrot.slane %v651_v35, 1  ;;  %v674_v40 = vrot.slane %v651_v35, 2  ;;  %v675_v41 = vrot.slane %v651_v35, 3  ;;  %v676_v42 = vrot.slane %v651_v35, 4 }
 0x225   : > { %710 = vst [vmem:[#allocation1 + $0x2] ss:$9 sm:$0xff] %v671_v36 }
 0x226   : > { %711 = vst [vmem:[#allocation1 + $0x3] ss:$9 sm:$0xff] %v672_v38 }
 0x227   : > { %708 = vst [vmem:[#allocation1] ss:$9 sm:$0xff] %v669_v39 }
 0x228   : > { %712 = vst [vmem:[#allocation1 + $0x4] ss:$9 sm:$0xff] %v651_v35 }
 0x229   : > { %713 = vst [vmem:[#allocation1 + $0x5] ss:$9 sm:$0xff] %v673_v2 }
 0x22a   : > { %714 = vst [vmem:[#allocation1 + $0x6] ss:$9 sm:$0xff] %v674_v40 }
 0x22b   : > { %715 = vst [vmem:[#allocation1 + $0x7] ss:$9 sm:$0xff] %v675_v41 }
 0x232   : > { %v716_v43 = vld [vmem:[#allocation1] sm:$0xff] }
 0x233   : > { %717 = vst [vmem:[#allocation1] ss:$9 sm:$0xff] %v676_v42  ;;  %1922 = vmatmul.msk.f32.gmra.mxu0 %vm419_vm1, %v716_v43 }
 0x23a   : > { %v718_v49 = vld [vmem:[#allocation1] sm:$0xff] }
 0x23b   : > { %781 = vst [vmem:[#allocation1] ss:$9 sm:$0xff] %v745_v46  ;;  %1923 = vmatmul.msk.f32.gmra.mxu0 %vm419_vm1, %v718_v49 }
 0x23c   : > { %783 = vst [vmem:[#allocation1 + $0x1] ss:$9 sm:$0xff] %v760_v48 }
 0x23d   : > { %785 = vst [vmem:[#allocation1 + $0x2] ss:$9 sm:$0xff] %v761_v50 }
 0x23e   : > { %787 = vst [vmem:[#allocation1 + $0x3] ss:$9 sm:$0xff] %v762_v51 }
 0x23f   : > { %789 = vst [vmem:[#allocation1 + $0x4] ss:$9 sm:$0xff] %v763_v53 }
 0x246   : > { %v790_v56 = vld [vmem:[#allocation1] sm:$0xff] }
 0x247   : > { %791 = vst [vmem:[#allocation1] ss:$9 sm:$0xff] %v764_v54 }
 0x248   : > { %792 = vst [vmem:[#allocation1 + $0x1] ss:$9 sm:$0xff] %v765_v55 }
 0x249   : > { %793 = vst [vmem:[#allocation1 + $0x2] ss:$9 sm:$0xff] %v766_v44 }
 0x24a   : > { %820 = vst [vmem:[#allocation2 + $0x8] sm:$0x1f] %v790_v56 }
 0x251   : > { %v829_v58 = vld [vmem:[#allocation2 + $0x8] sm:$0x1f] }
 0x252   : > { %v853_v59 = vadd.f32 %v850_v57, %v829_v58 }
 0x254   : > { %2014 = vtanh.f32 %v853_v59  ;;  %v1924_v61 = vmul.f32 -1.442695, %v853_v59 }
 0x256   : > { %2016 = vpow2.f32 %v1924_v61 }
 0x25a   : > { %v2015_v60 = vpop.eup %2014 }
 0x25b   : > { %876 = vrot.lane.b32.xlu1 %v2015_v60, %s2125_s15 }
 0x25c   : > { %v2017_v4 = vpop.eup %2016 }
 0x25d   : > { %v857_v7 = vadd.f32 1.0, %v2017_v4 }
 0x25f   : > { %2018 = vrcp.f32 %v857_v7  ;;  %v869_v12 = vand.u32 2147483648, %v857_v7  ;;  %vm863_vm5 = vweird.f32 %v857_v7  ;;  %v867_v30 = vand.u32 2147483647, %v857_v7 }
 0x261   : > { %v870_v33 = vor.u32 1.1754944e-38, %v869_v12  ;;  %vm868_vm7 = vcmp.eq.f32.partialorder %v867_v30, 8.507059e+37 }
 0x265   : > { %v2019_v52 = vpop.eup %2018 }
 0x266   : > { %v859_v17 = vmul.f32 %v2019_v52, %v857_v7  ;;  %vm864_vm4 = vweird.f32 %v2019_v52 }
 0x267   : > { %vm865_vm6 = vmor %vm863_vm5, %vm864_vm4 }
 0x268   : > { %v860_v22 = vsub.f32 1.0, %v859_v17 }
 0x26a   : > { %v861_v23 = vmul.f32 %v2019_v52, %v860_v22 }
 0x26c   : > { %v862_v27 = vadd.f32 %v2019_v52, %v861_v23 }
 0x26e   : > { %v866_v32 = vsel %vm865_vm6, %v2019_v52, %v862_v27 }
 0x26f   : > { %v871_v35 = vsel %vm868_vm7, %v870_v33, %v866_v32 }
 0x270   : > { %v874_v38 = vmul.f32 0.0, %v871_v35 }
 0x2a1   : > { %v747_v62 = vpop.f32.mrf.mxu0 }
 0x2a2   : > { %v748_v1 = vadd.f32 %v2361_v19, %v747_v62 }
 0x2a4   : > { %v767_v3 = vrot.slane %v748_v1, 1  ;;  %794 = vst [vmem:[#allocation1 + $0x3] ss:$9 sm:$0xff] %v748_v1  ;;  %v768_v6 = vrot.slane %v748_v1, 2  ;;  %v769_v9 = vrot.slane %v748_v1, 3  ;;  %v770_v11 = vrot.slane %v748_v1, 4 }
 0x2a5   : > { %v771_v8 = vrot.slane %v748_v1, 5  ;;  %v772_v13 = vrot.slane %v748_v1, 6  ;;  %v773_v0 = vrot.slane %v748_v1, 7 }
 0x2a6   : > { %795 = vst [vmem:[#allocation1 + $0x4] ss:$9 sm:$0xff] %v767_v3 }
 0x2ad   : > { %v796_v10 = vld [vmem:[#allocation1] sm:$0xff] }
 0x2ae   : > { %797 = vst [vmem:[#allocation1] ss:$9 sm:$0xff] %v768_v6 }
 0x2af   : > { %798 = vst [vmem:[#allocation1 + $0x1] ss:$9 sm:$0xff] %v769_v9 }
 0x2b0   : > { %799 = vst [vmem:[#allocation1 + $0x2] ss:$9 sm:$0xff] %v770_v11  ;;  %v750_v14 = vpop.f32.mrf.mxu0  ;;  %v2385_v11 = vld [vmem:[%s2555_s6 + $0x8] sm:$0xff] }
 0x2b1   : > { %800 = vst [vmem:[#allocation1 + $0x3] ss:$9 sm:$0xff] %v771_v8  ;;  %v751_v15 = vadd.f32 %v2361_v19, %v750_v14  ;;  %v2390_v8 = vld [vmem:[%s2555_s6] sm:$0xff]  ;;  %1183 = vmatpush.msrb.mxu3 %v2385_v11  ;;  %1254 = vmatpush.msra.mxu1 %v2385_v11 }
 0x2b2   : > { %801 = vst [vmem:[#allocation1 + $0x4] ss:$9 sm:$0xff] %v772_v13 }
 0x2b3   : > { %821 = vst [vmem:[#allocation2] sm:$0x1f] %v796_v10  ;;  %v774_v18 = vrot.slane %v751_v15, 1  ;;  %v775_v20 = vrot.slane %v751_v15, 2  ;;  %v776_v21 = vrot.slane %v751_v15, 3  ;;  %v777_v25 = vrot.slane %v751_v15, 4  ;;  %1184 = vmatpush.msrb.mxu3 %v2390_v8  ;;  %1255 = vmatpush.msra.mxu1 %v2390_v8 }
 0x2b4   : > { %v778_v63 = vrot.slane %v751_v15, 5  ;;  %v779_v47 = vrot.slane %v751_v15, 6  ;;  %v780_v29 = vrot.slane %v751_v15, 7 }
 0x2b8   : > { %v753_v28 = vpop.f32.mrf.mxu0 }
 0x2b9   : > { %v802_v16 = vld [vmem:[#allocation1] sm:$0xff]  ;;  %v754_v31 = vadd.f32 %v2361_v19, %v753_v28 }
 0x2ba   : > { %803 = vst [vmem:[#allocation1] ss:$9 sm:$0xff] %v773_v0  ;;  %v897_v43 = vld [vmem:[#allocation2] sm:$0x1f] }
 0x2bb   : > { %822 = vst [vmem:[#allocation2 + $0x20] sm:$0x1f] %v802_v16 }
 0x2bc   : > { %804 = vst [vmem:[#allocation1 + $0x1] ss:$9 sm:$0xff] %v751_v15 }
 0x2bd   : > { %805 = vst [vmem:[#allocation1 + $0x2] ss:$9 sm:$0xff] %v774_v18 }
 0x2be   : > { %806 = vst [vmem:[#allocation1 + $0x3] ss:$9 sm:$0xff] %v775_v20 }
 0x2bf   : > { %807 = vst [vmem:[#allocation1 + $0x4] ss:$9 sm:$0xff] %v776_v21 }
 0x2c2   : > { %v965_v14 = vld [vmem:[#allocation2 + $0x20] sm:$0x1f] }
 0x2c6   : > { %v808_v26 = vld [vmem:[#allocation1] sm:$0xff] }
 0x2c7   : > { %809 = vst [vmem:[#allocation1] ss:$9 sm:$0xff] %v777_v25 }
 0x2c8   : > { %810 = vst [vmem:[#allocation1 + $0x1] ss:$9 sm:$0xff] %v778_v63 }
 0x2c9   : > { %811 = vst [vmem:[#allocation1 + $0x2] ss:$9 sm:$0xff] %v779_v47 }
 0x2ca   : > { %812 = vst [vmem:[#allocation1 + $0x3] ss:$9 sm:$0xff] %v780_v29 }
 0x2cb   : > { %823 = vst [vmem:[#allocation2 + $0x10] sm:$0x1f] %v808_v26 }
 0x2cc   : > { %813 = vst [vmem:[#allocation1 + $0x4] ss:$9 sm:$0xff] %v754_v31 }
 0x2cd   : > { %v877_v34 = vpop.permute.xlu1 %876 }
 0x2ce   : > { %v879_v36 = vmul.f32 %v877_v34, %v871_v35 }
 0x2d0   : > { %881 = vrot.lane.b32.xlu0 %v879_v36, %s2126_s18 }
 0x2d3   : > { %v814_v37 = vld [vmem:[#allocation1] sm:$0xff] }
 0x2d4   : > { %824 = vst [vmem:[#allocation2 + $0x18] sm:$0x1f] %v814_v37 }
 0x2db   : > { %v1168_v22 = vld [vmem:[#allocation2 + $0x18] sm:$0x1f] }
 0x342   : > { %v882_v39 = vpop.permute.xlu0 %881 }
 0x343   : > { %v884_v2 = vadd.f32 %v882_v39, %v874_v38 }
 0x345   : > { %2020 = vtanh.f32 %v884_v2 }
 0x34b   : > { %v2021_v40 = vpop.eup %2020 }
 0x34c   : > { %887 = vrot.lane.b32.xlu2 %v2021_v40, %s2126_s18 }
 0x3a6   : > { %v888_v41 = vpop.permute.xlu2 %887 }
 0x3a7   : > { %v890_v42 = vmul.f32 %v888_v41, %v871_v35 }
 0x3a9   : > { %892 = vrot.lane.b32.xlu1 %v890_v42, %s2127_s19 }
 0x41b   : > { %v893_v19 = vpop.permute.xlu1 %892 }
 0x41c   : > { %895 = vst.msk [vmem:[#allocation3] sm:$0x1f] %vm383_vm0, %v893_v19  ;;  %1925 = vmatmul.msk.f32.vlgmr.msra.gmra.mxu2 %vm419_vm1, %v893_v19 }
 0x41d   : > { %1325 = vmatpush.msra.mxu2 %v2385_v11 }
 0x41f   : > { %1326 = vmatpush.msra.mxu2 %v2390_v8 }
 0x49f   : > { %v917_v45 = vpop.f32.mrf.mxu2 }
 0x4a0   : > { %v920_v46 = vadd.f32 %v917_v45, %v897_v43 }
 0x4a2   : > { %2022 = vtanh.f32 %v920_v46  ;;  %v1926_v49 = vmul.f32 -1.442695, %v920_v46 }
 0x4a4   : > { %2024 = vpow2.f32 %v1926_v49 }
 0x4a8   : > { %v2023_v48 = vpop.eup %2022 }
 0x4a9   : > { %943 = vrot.lane.b32.xlu0 %v2023_v48, %s2125_s15 }
 0x4aa   : > { %v2025_v50 = vpop.eup %2024 }
 0x4ab   : > { %v924_v51 = vadd.f32 1.0, %v2025_v50 }
 0x4ad   : > { %2026 = vrcp.f32 %v924_v51  ;;  %v936_v57 = vand.u32 2147483648, %v924_v51  ;;  %vm930_vm9 = vweird.f32 %v924_v51  ;;  %v934_v58 = vand.u32 2147483647, %v924_v51 }
 0x4af   : > { %v937_v60 = vor.u32 1.1754944e-38, %v936_v57  ;;  %vm935_vm11 = vcmp.eq.f32.partialorder %v934_v58, 8.507059e+37 }
 0x4b3   : > { %v2027_v53 = vpop.eup %2026 }
 0x4b4   : > { %v926_v54 = vmul.f32 %v2027_v53, %v924_v51  ;;  %vm931_vm8 = vweird.f32 %v2027_v53 }
 0x4b5   : > { %vm932_vm10 = vmor %vm930_vm9, %vm931_vm8 }
 0x4b6   : > { %v927_v55 = vsub.f32 1.0, %v926_v54 }
 0x4b8   : > { %v928_v56 = vmul.f32 %v2027_v53, %v927_v55 }
 0x4ba   : > { %v929_v44 = vadd.f32 %v2027_v53, %v928_v56 }
 0x4bc   : > { %v933_v59 = vsel %vm932_vm10, %v2027_v53, %v929_v44 }
 0x4bd   : > { %v938_v62 = vsel %vm935_vm11, %v937_v60, %v933_v59 }
 0x4be   : > { %v941_v3 = vmul.f32 %v938_v62, %v884_v2 }
 0x51b   : > { %v944_v61 = vpop.permute.xlu0 %943 }
 0x51c   : > { %v946_v1 = vmul.f32 %v944_v61, %v938_v62 }
 0x51e   : > { %948 = vrot.lane.b32.xlu2 %v946_v1, %s2126_s18  ;;  %v1033_v1 = vld [vmem:[#allocation2 + $0x10] sm:$0x1f] }
 0x578   : > { %v949_v4 = vpop.permute.xlu2 %948 }
 0x579   : > { %v2377_v6 = vadd.f32 %v949_v4, %v941_v3 }
 0x57b   : > { %2028 = vtanh.f32 %v2377_v6 }
 0x581   : > { %v2029_v7 = vpop.eup %2028 }
 0x582   : > { %954 = vrot.lane.b32.xlu1 %v2029_v7, %s2126_s18 }
 0x5f4   : > { %v955_v9 = vpop.permute.xlu1 %954 }
 0x5f5   : > { %v957_v10 = vmul.f32 %v955_v9, %v938_v62 }
 0x5f7   : > { %959 = vrot.lane.b32.xlu0 %v957_v10, %s2127_s19 }
 0x669   : > { %v960_v13 = vpop.permute.xlu0 %959 }
 0x66a   : > { %963 = vst.msk [vmem:[#allocation3 + $0x8] sm:$0x1f] %vm383_vm0, %v960_v13  ;;  %1927 = vmatmul.msk.f32.vlgmr.msra.gmra.mxu3 %vm419_vm1, %v960_v13 }
 0x66b   : > { %1396 = vmatpush.msra.mxu3 %v2385_v11 }
 0x66d   : > { %1397 = vmatpush.msra.mxu3 %v2390_v8 }
 0x672   : > { %1185 = vmatmul.f32.vlgmr.msrb.gmra.mxu3 %v2124_v5 }
 0x6ed   : > { %v985_v52 = vpop.f32.mrf.mxu3 }
 0x6ee   : > { %v988_v15 = vadd.f32 %v985_v52, %v965_v14 }
 0x6f0   : > { %2030 = vtanh.f32 %v988_v15  ;;  %v1928_v17 = vmul.f32 -1.442695, %v988_v15 }
 0x6f2   : > { %2032 = vpow2.f32 %v1928_v17 }
 0x6f5   : > { %v1186_v0 = vpop.f32.mrf.mxu3 }
 0x6f6   : > { %v2031_v16 = vpop.eup %2030  ;;  %1190 = vrot.lane.b32.xlu2 %v1186_v0, %s2128_s24 }
 0x6f7   : > { %1011 = vrot.lane.b32.xlu1 %v2031_v16, %s2125_s15 }
 0x6f8   : > { %v2033_v18 = vpop.eup %2032 }
 0x6f9   : > { %v992_v20 = vadd.f32 1.0, %v2033_v18 }
 0x6fb   : > { %2034 = vrcp.f32 %v992_v20  ;;  %v1004_v28 = vand.u32 2147483648, %v992_v20  ;;  %vm998_vm13 = vweird.f32 %v992_v20  ;;  %v1002_v12 = vand.u32 2147483647, %v992_v20 }
 0x6fd   : > { %v1005_v30 = vor.u32 1.1754944e-38, %v1004_v28  ;;  %vm1003_vm15 = vcmp.eq.f32.partialorder %v1002_v12, 8.507059e+37 }
 0x701   : > { %v2035_v5 = vpop.eup %2034 }
 0x702   : > { %v994_v25 = vmul.f32 %v2035_v5, %v992_v20  ;;  %vm999_vm12 = vweird.f32 %v2035_v5 }
 0x703   : > { %vm1000_vm14 = vmor %vm998_vm13, %vm999_vm12 }
 0x704   : > { %v995_v26 = vsub.f32 1.0, %v994_v25 }
 0x706   : > { %v996_v27 = vmul.f32 %v2035_v5, %v995_v26 }
 0x708   : > { %v997_v47 = vadd.f32 %v2035_v5, %v996_v27 }
 0x70a   : > { %v1001_v29 = vsel %vm1000_vm14, %v2035_v5, %v997_v47 }
 0x70b   : > { %v1006_v32 = vsel %vm1003_vm15, %v1005_v30, %v1001_v29 }
 0x70c   : > { %v1009_v40 = vmul.f32 %v1006_v32, %v2377_v6 }
 0x750   : > { %v1191_v21 = vpop.permute.xlu2 %1190 }
 0x751   : > { %v1193_v23 = vadd.f32 %v1191_v21, %v1168_v22 }
 0x753   : > { %2036 = vtanh.f32 %v1193_v23  ;;  %v1933_v34 = vmul.f32 -1.442695, %v1193_v23  ;;  %v1237_v23 = vld [vmem:[#allocation2 + $0x10] sm:$0x1f] }
 0x755   : > { %2038 = vpow2.f32 %v1933_v34 }
 0x759   : > { %v2037_v63 = vpop.eup %2036 }
 0x75a   : > { %1216 = vrot.lane.b32.xlu0 %v2037_v63, %s2125_s15 }
 0x75b   : > { %v2039_v35 = vpop.eup %2038 }
 0x75c   : > { %v1197_v36 = vadd.f32 1.0, %v2039_v35 }
 0x75e   : > { %2040 = vrcp.f32 %v1197_v36  ;;  %v1209_v19 = vand.u32 2147483648, %v1197_v36  ;;  %vm1203_vm3 = vweird.f32 %v1197_v36  ;;  %v1207_v45 = vand.u32 2147483647, %v1197_v36 }
 0x760   : > { %v1210_v48 = vor.u32 1.1754944e-38, %v1209_v19  ;;  %vm1208_vm5 = vcmp.eq.f32.partialorder %v1207_v45, 8.507059e+37 }
 0x764   : > { %v2041_v37 = vpop.eup %2040 }
 0x765   : > { %v1199_v38 = vmul.f32 %v2041_v37, %v1197_v36  ;;  %vm1204_vm2 = vweird.f32 %v2041_v37 }
 0x766   : > { %vm1205_vm4 = vmor %vm1203_vm3, %vm1204_vm2 }
 0x767   : > { %v1200_v39 = vsub.f32 1.0, %v1199_v38 }
 0x769   : > { %v1012_v31 = vpop.permute.xlu1 %1011  ;;  %v1201_v2 = vmul.f32 %v2041_v37, %v1200_v39 }
 0x76a   : > { %v1014_v33 = vmul.f32 %v1012_v31, %v1006_v32 }
 0x76b   : > { %v1202_v41 = vadd.f32 %v2041_v37, %v1201_v2 }
 0x76c   : > { %1016 = vrot.lane.b32.xlu2 %v1014_v33, %s2126_s18 }
 0x76d   : > { %v1206_v46 = vsel %vm1205_vm4, %v2041_v37, %v1202_v41 }
 0x76e   : > { %v1211_v50 = vsel %vm1208_vm5, %v1210_v48, %v1206_v46 }
 0x76f   : > { %v1214_v54 = vmul.f32 0.0, %v1211_v50 }
 0x7c6   : > { %v1017_v42 = vpop.permute.xlu2 %1016 }
 0x7c7   : > { %v2408_v43 = vadd.f32 %v1017_v42, %v1009_v40 }
 0x7c9   : > { %2042 = vtanh.f32 %v2408_v43 }
 0x7cc   : > { %v1217_v49 = vpop.permute.xlu0 %1216 }
 0x7cd   : > { %v1219_v51 = vmul.f32 %v1217_v49, %v1211_v50 }
 0x7cf   : > { %v2043_v53 = vpop.eup %2042  ;;  %1221 = vrot.lane.b32.xlu1 %v1219_v51, %s2126_s18 }
 0x7d0   : > { %1022 = vrot.lane.b32.xlu0 %v2043_v53, %s2126_s18 }
 0x841   : > { %v1222_v55 = vpop.permute.xlu1 %1221 }
 0x842   : > { %v2413_v56 = vadd.f32 %v1222_v55, %v1214_v54  ;;  %v1023_v44 = vpop.permute.xlu0 %1022 }
 0x843   : > { %v1025_v57 = vmul.f32 %v1023_v44, %v1006_v32 }
 0x844   : > { %2044 = vtanh.f32 %v2413_v56 }
 0x845   : > { %1027 = vrot.lane.b32.xlu1 %v1025_v57, %s2127_s19 }
 0x84a   : > { %v2045_v58 = vpop.eup %2044 }
 0x84b   : > { %1227 = vrot.lane.b32.xlu2 %v2045_v58, %s2126_s18 }
 0x8a5   : > { %v1228_v59 = vpop.permute.xlu2 %1227 }
 0x8a6   : > { %v1230_v60 = vmul.f32 %v1228_v59, %v1211_v50 }
 0x8a8   : > { %1232 = vrot.lane.b32.xlu0 %v1230_v60, %s2129_s25 }
 0x8b7   : > { %v1028_v61 = vpop.permute.xlu1 %1027 }
 0x8b8   : > { %1031 = vst.msk [vmem:[#allocation3 + $0x10] sm:$0x1f] %vm383_vm0, %v1028_v61  ;;  %1929 = vmatmul.msk.f32.vlgmr.msrb.gmra.mxu1 %vm419_vm1, %v1028_v61 }
 0x8b9   : > { %1467 = vmatpush.msrb.mxu1 %v2385_v11 }
 0x8bb   : > { %1468 = vmatpush.msrb.mxu1 %v2390_v8 }
 0x91a   : > { %v1233_v62 = vpop.permute.xlu0 %1232 }
 0x91b   : > { %1236 = vst.msk [vmem:[#allocation4 + $0x20] sm:$0x1f] %vm383_vm0, %v1233_v62  ;;  %1934 = vmatmul.msk.f32.vlgmr.msra.gmra.mxu1 %vm419_vm1, %v1233_v62 }
 0x935   : > { %v1053_v3 = vpop.f32.mrf.mxu1 }
 0x936   : > { %v1056_v4 = vadd.f32 %v1053_v3, %v1033_v1 }
 0x938   : > { %2046 = vtanh.f32 %v1056_v4  ;;  %v1930_v7 = vmul.f32 -1.442695, %v1056_v4 }
 0x93a   : > { %2048 = vpow2.f32 %v1930_v7 }
 0x93e   : > { %v2047_v6 = vpop.eup %2046 }
 0x93f   : > { %1079 = vrot.lane.b32.xlu1 %v2047_v6, %s2125_s15 }
 0x940   : > { %v2049_v9 = vpop.eup %2048 }
 0x941   : > { %v1060_v10 = vadd.f32 1.0, %v2049_v9 }
 0x943   : > { %2050 = vrcp.f32 %v1060_v10  ;;  %v1072_v0 = vand.u32 2147483648, %v1060_v10  ;;  %vm1066_vm7 = vweird.f32 %v1060_v10  ;;  %v1070_v16 = vand.u32 2147483647, %v1060_v10 }
 0x945   : > { %v1073_v18 = vor.u32 1.1754944e-38, %v1072_v0  ;;  %vm1071_vm9 = vcmp.eq.f32.partialorder %v1070_v16, 8.507059e+37 }
 0x949   : > { %v2051_v8 = vpop.eup %2050 }
 0x94a   : > { %v1062_v13 = vmul.f32 %v2051_v8, %v1060_v10  ;;  %vm1067_vm6 = vweird.f32 %v2051_v8 }
 0x94b   : > { %vm1068_vm8 = vmor %vm1066_vm7, %vm1067_vm6 }
 0x94c   : > { %v1063_v14 = vsub.f32 1.0, %v1062_v13 }
 0x94e   : > { %v1064_v52 = vmul.f32 %v2051_v8, %v1063_v14 }
 0x950   : > { %v1065_v15 = vadd.f32 %v2051_v8, %v1064_v52 }
 0x952   : > { %v1069_v17 = vsel %vm1068_vm8, %v2051_v8, %v1065_v15 }
 0x953   : > { %v1074_v21 = vsel %vm1071_vm9, %v1073_v18, %v1069_v17 }
 0x954   : > { %v1077_v26 = vmul.f32 %v1074_v21, %v2408_v43 }
 0x998   : > { %v1257_v11 = vpop.f32.mrf.mxu1 }
 0x999   : > { %1261 = vrot.lane.b32.xlu2 %v1257_v11, %s2128_s24 }
 0x9b1   : > { %v1080_v20 = vpop.permute.xlu1 %1079 }
 0x9b2   : > { %v1082_v22 = vmul.f32 %v1080_v20, %v1074_v21 }
 0x9b4   : > { %1084 = vrot.lane.b32.xlu2 %v1082_v22, %s2126_s18  ;;  %v1379_v22 = vld [vmem:[#allocation2] sm:$0x1f] }
 0x9f3   : > { %v1262_v5 = vpop.permute.xlu2 %1261 }
 0x9f4   : > { %v1264_v25 = vadd.f32 %v1262_v5, %v1237_v23 }
 0x9f6   : > { %2052 = vtanh.f32 %v1264_v25  ;;  %v1935_v12 = vmul.f32 -1.442695, %v1264_v25 }
 0x9fc   : > { %v2053_v63 = vpop.eup %2052 }
 0x9fd   : > { %1287 = vrot.lane.b32.xlu0 %v2053_v63, %s2125_s15 }
 0xa0e   : > { %v1085_v27 = vpop.permute.xlu2 %1084 }
 0xa0f   : > { %v2430_v47 = vadd.f32 %v1085_v27, %v1077_v26 }
 0xa11   : > { %2054 = vtanh.f32 %v2430_v47 }
 0xa12   : > { %2056 = vpow2.f32 %v1935_v12 }
 0xa17   : > { %v2055_v28 = vpop.eup %2054 }
 0xa18   : > { %1090 = vrot.lane.b32.xlu0 %v2055_v28, %s2126_s18  ;;  %v2057_v29 = vpop.eup %2056 }
 0xa19   : > { %v1268_v30 = vadd.f32 1.0, %v2057_v29 }
 0xa1b   : > { %2058 = vrcp.f32 %v1268_v30  ;;  %v1280_v36 = vand.u32 2147483648, %v1268_v30  ;;  %vm1274_vm11 = vweird.f32 %v1268_v30  ;;  %v1278_v37 = vand.u32 2147483647, %v1268_v30 }
 0xa1d   : > { %v1281_v39 = vor.u32 1.1754944e-38, %v1280_v36  ;;  %vm1279_vm13 = vcmp.eq.f32.partialorder %v1278_v37, 8.507059e+37 }
 0xa21   : > { %v2059_v31 = vpop.eup %2058 }
 0xa22   : > { %v1270_v32 = vmul.f32 %v2059_v31, %v1268_v30  ;;  %vm1275_vm10 = vweird.f32 %v2059_v31 }
 0xa23   : > { %vm1276_vm12 = vmor %vm1274_vm11, %vm1275_vm10 }
 0xa24   : > { %v1271_v33 = vsub.f32 1.0, %v1270_v32 }
 0xa26   : > { %v1272_v34 = vmul.f32 %v2059_v31, %v1271_v33 }
 0xa28   : > { %v1273_v35 = vadd.f32 %v2059_v31, %v1272_v34 }
 0xa2a   : > { %v1277_v38 = vsel %vm1276_vm12, %v2059_v31, %v1273_v35 }
 0xa2b   : > { %v1282_v40 = vsel %vm1279_vm13, %v1281_v39, %v1277_v38 }
 0xa2c   : > { %v1285_v43 = vmul.f32 %v1282_v40, %v2413_v56  ;;  %v1308_v56 = vld [vmem:[#allocation2 + $0x20] sm:$0x1f] }
 0xa6f   : > { %v1288_v2 = vpop.permute.xlu0 %1287 }
 0xa70   : > { %v1290_v41 = vmul.f32 %v1288_v2, %v1282_v40 }
 0xa72   : > { %1292 = vrot.lane.b32.xlu1 %v1290_v41, %s2126_s18 }
 0xa8a   : > { %v1091_v42 = vpop.permute.xlu0 %1090 }
 0xa8b   : > { %v1093_v19 = vmul.f32 %v1091_v42, %v1074_v21 }
 0xa8d   : > { %1095 = vrot.lane.b32.xlu1 %v1093_v19, %s2127_s19 }
 0xae4   : > { %v1293_v45 = vpop.permute.xlu1 %1292 }
 0xae5   : > { %v1295_v46 = vadd.f32 %v1293_v45, %v1285_v43  ;;  %v1101_v45 = vld [vmem:[#allocation2 + $0x18] sm:$0x1f] }
 0xae7   : > { %2060 = vtanh.f32 %v1295_v46 }
 0xaed   : > { %v2061_v48 = vpop.eup %2060 }
 0xaee   : > { %1298 = vrot.lane.b32.xlu2 %v2061_v48, %s2126_s18 }
 0xaff   : > { %v1096_v49 = vpop.permute.xlu1 %1095 }
 0xb00   : > { %1099 = vst.msk [vmem:[#allocation3 + $0x18] sm:$0x1f] %vm383_vm0, %v1096_v49  ;;  %1931 = vmatmul.msk.f32.vlgmr.msrb.gmra.mxu2 %vm419_vm1, %v1096_v49 }
 0xb48   : > { %v1299_v50 = vpop.permute.xlu2 %1298 }
 0xb49   : > { %v1301_v51 = vmul.f32 %v1299_v50, %v1282_v40  ;;  %v1450_v50 = vld [vmem:[#allocation2 + $0x8] sm:$0x1f] }
 0xb4b   : > { %1303 = vrot.lane.b32.xlu0 %v1301_v51, %s2129_s25 }
 0xb83   : > { %v2443_v54 = vpop.f32.mrf.mxu2 }
 0xbbd   : > { %v1304_v53 = vpop.permute.xlu0 %1303 }
 0xbbe   : > { %1307 = vst.msk [vmem:[#allocation4 + $0x18] sm:$0x1f] %vm383_vm0, %v1304_v53  ;;  %1936 = vmatmul.msk.f32.vlgmr.msra.gmra.mxu2 %vm419_vm1, %v1304_v53 }
 0xc41   : > { %v1328_v55 = vpop.f32.mrf.mxu2 }
 0xc42   : > { %1332 = vrot.lane.b32.xlu2 %v1328_v55, %s2128_s24 }
 0xc9c   : > { %v1333_v44 = vpop.permute.xlu2 %1332 }
 0xc9d   : > { %v1335_v57 = vadd.f32 %v1333_v44, %v1308_v56 }
 0xc9f   : > { %2062 = vtanh.f32 %v1335_v57  ;;  %v1937_v59 = vmul.f32 -1.442695, %v1335_v57 }
 0xca1   : > { %2064 = vpow2.f32 %v1937_v59 }
 0xca5   : > { %v2063_v58 = vpop.eup %2062 }
 0xca6   : > { %1358 = vrot.lane.b32.xlu1 %v2063_v58, %s2125_s15 }
 0xca7   : > { %v2065_v60 = vpop.eup %2064 }
 0xca8   : > { %v1339_v61 = vadd.f32 1.0, %v2065_v60 }
 0xcaa   : > { %2066 = vrcp.f32 %v1339_v61  ;;  %v1351_v7 = vand.u32 2147483648, %v1339_v61  ;;  %vm1345_vm15 = vweird.f32 %v1339_v61  ;;  %v1349_v9 = vand.u32 2147483647, %v1339_v61 }
 0xcac   : > { %v1352_v11 = vor.u32 1.1754944e-38, %v1351_v7  ;;  %vm1350_vm3 = vcmp.eq.f32.partialorder %v1349_v9, 8.507059e+37 }
 0xcb0   : > { %v2067_v62 = vpop.eup %2066 }
 0xcb1   : > { %v1341_v1 = vmul.f32 %v2067_v62, %v1339_v61  ;;  %vm1346_vm14 = vweird.f32 %v2067_v62 }
 0xcb2   : > { %vm1347_vm2 = vmor %vm1345_vm15, %vm1346_vm14 }
 0xcb3   : > { %v1342_v3 = vsub.f32 1.0, %v1341_v1 }
 0xcb5   : > { %v1343_v4 = vmul.f32 %v2067_v62, %v1342_v3 }
 0xcb7   : > { %v1344_v6 = vadd.f32 %v2067_v62, %v1343_v4 }
 0xcb9   : > { %v1348_v10 = vsel %vm1347_vm2, %v2067_v62, %v1344_v6  ;;  %vm1624_vm2 = vcmask 261120  }
 0xcba   : > { %v1353_v13 = vsel %vm1350_vm3, %v1352_v11, %v1348_v10 }
 0xcbb   : > { %v1356_v52 = vmul.f32 %v1353_v13, %v1295_v46  ;;  %v1124_v46 = vadd.f32 %v2443_v54, %v1101_v45  ;;  %v1582_v45 = vld [vmem:[%s2556_s7 + $0x10] sm:$0xff] }
 0xcbd   : > { %v1932_v44 = vmul.f32 -1.442695, %v1124_v46 }
 0xd18   : > { %v1359_v8 = vpop.permute.xlu1 %1358 }
 0xd19   : > { %v1361_v14 = vmul.f32 %v1359_v8, %v1353_v13 }
 0xd1b   : > { %1363 = vrot.lane.b32.xlu0 %v1361_v14, %s2126_s18 }
 0xd8d   : > { %v1364_v15 = vpop.permute.xlu0 %1363 }
 0xd8e   : > { %v1366_v0 = vadd.f32 %v1364_v15, %v1356_v52 }
 0xd90   : > { %2068 = vtanh.f32 %v1366_v0 }
 0xd96   : > { %v2069_v16 = vpop.eup %2068 }
 0xd97   : > { %1369 = vrot.lane.b32.xlu2 %v2069_v16, %s2126_s18 }
 0xdf1   : > { %v1370_v17 = vpop.permute.xlu2 %1369 }
 0xdf2   : > { %v1372_v18 = vmul.f32 %v1370_v17, %v1353_v13 }
 0xdf4   : > { %1374 = vrot.lane.b32.xlu1 %v1372_v18, %s2129_s25 }
 0xe66   : > { %v1375_v20 = vpop.permute.xlu1 %1374 }
 0xe67   : > { %1378 = vst.msk [vmem:[#allocation4 + $0x10] sm:$0x1f] %vm383_vm0, %v1375_v20  ;;  %1938 = vmatmul.msk.f32.vlgmr.msra.gmra.mxu3 %vm419_vm1, %v1375_v20 }
 0xeea   : > { %v1399_v21 = vpop.f32.mrf.mxu3 }
 0xeeb   : > { %1403 = vrot.lane.b32.xlu0 %v1399_v21, %s2128_s24 }
 0xf5d   : > { %v1404_v23 = vpop.permute.xlu0 %1403 }
 0xf5e   : > { %v1406_v5 = vadd.f32 %v1404_v23, %v1379_v22 }
 0xf60   : > { %2070 = vtanh.f32 %v1406_v5  ;;  %v1939_v63 = vmul.f32 -1.442695, %v1406_v5 }
 0xf62   : > { %2072 = vpow2.f32 %v1939_v63 }
 0xf66   : > { %v2071_v25 = vpop.eup %2070 }
 0xf67   : > { %1429 = vrot.lane.b32.xlu2 %v2071_v25, %s2125_s15 }
 0xf68   : > { %v2073_v26 = vpop.eup %2072 }
 0xf69   : > { %v1410_v27 = vadd.f32 1.0, %v2073_v26 }
 0xf6b   : > { %2074 = vrcp.f32 %v1410_v27  ;;  %v1422_v32 = vand.u32 2147483648, %v1410_v27  ;;  %vm1416_vm5 = vweird.f32 %v1410_v27  ;;  %v1420_v33 = vand.u32 2147483647, %v1410_v27 }
 0xf6d   : > { %v1423_v35 = vor.u32 1.1754944e-38, %v1422_v32  ;;  %vm1421_vm7 = vcmp.eq.f32.partialorder %v1420_v33, 8.507059e+37 }
 0xf71   : > { %v2075_v28 = vpop.eup %2074 }
 0xf72   : > { %v1412_v12 = vmul.f32 %v2075_v28, %v1410_v27  ;;  %vm1417_vm4 = vweird.f32 %v2075_v28 }
 0xf73   : > { %vm1418_vm6 = vmor %vm1416_vm5, %vm1417_vm4 }
 0xf74   : > { %v1413_v29 = vsub.f32 1.0, %v1412_v12 }
 0xf76   : > { %v1414_v30 = vmul.f32 %v2075_v28, %v1413_v29 }
 0xf78   : > { %v1415_v31 = vadd.f32 %v2075_v28, %v1414_v30  ;;  %v1527_v30 = vld [vmem:[#allocation4 + $0x10] sm:$0x1f] }
 0xf7a   : > { %v1419_v34 = vsel %vm1418_vm6, %v2075_v28, %v1415_v31  ;;  %v1529_v31 = vld [vmem:[#allocation4 + $0x20] sm:$0x1f] }
 0xf7b   : > { %v1424_v37 = vsel %vm1421_vm7, %v1423_v35, %v1419_v34 }
 0xf7c   : > { %v1427_v39 = vmul.f32 %v1424_v37, %v1366_v0 }
 0xfc1   : > { %v1430_v36 = vpop.permute.xlu2 %1429 }
 0xfc2   : > { %v1432_v38 = vmul.f32 %v1430_v36, %v1424_v37 }
 0xfc4   : > { %1434 = vrot.lane.b32.xlu1 %v1432_v38, %s2126_s18 }
0x1036   : > { %v1435_v2 = vpop.permute.xlu1 %1434 }
0x1037   : > { %v2455_v40 = vadd.f32 %v1435_v2, %v1427_v39 }
0x1039   : > { %2076 = vtanh.f32 %v2455_v40 }
0x103a   : > { %2078 = vtanh.f32 %v1124_v46  ;;  %v1581_v46 = vld [vmem:[%s2556_s7 + $0x8] sm:$0xff] }
0x103f   : > { %v2077_v41 = vpop.eup %2076 }
0x1040   : > { %1440 = vrot.lane.b32.xlu0 %v2077_v41, %s2126_s18  ;;  %v2079_v49 = vpop.eup %2078 }
0x10b2   : > { %v1441_v42 = vpop.permute.xlu0 %1440 }
0x10b3   : > { %v1443_v19 = vmul.f32 %v1441_v42, %v1424_v37  ;;  %v1521_v37 = vld [vmem:[#allocation3 + $0x8] sm:$0x1f] }
0x10b5   : > { %1445 = vrot.lane.b32.xlu2 %v1443_v19, %s2129_s25  ;;  %v1528_v19 = vld [vmem:[#allocation4 + $0x18] sm:$0x1f] }
0x110f   : > { %v1446_v43 = vpop.permute.xlu2 %1445 }
0x1110   : > { %1449 = vst.msk [vmem:[#allocation4 + $0x8] sm:$0x1f] %vm383_vm0, %v1446_v43  ;;  %1940 = vmatmul.msk.f32.vlgmr.msrb.gmra.mxu1 %vm419_vm1, %v1446_v43  ;;  %v1583_v43 = vld [vmem:[%s2556_s7 + $0x18] sm:$0xff] }
0x1111   : > { %1645 = vmatpush.msrb.mxu2 %v1583_v43  ;;  %1949 = vmatpush.msrb.mxu3 %v1583_v43 }
0x1113   : > { %1646 = vmatpush.msrb.mxu2 %v1582_v45  ;;  %1950 = vmatpush.msrb.mxu3 %v1582_v45 }
0x1115   : > { %1647 = vmatpush.msrb.mxu2 %v1581_v46  ;;  %1951 = vmatpush.msrb.mxu3 %v1581_v46 }
0x118d   : > { %v1470_v48 = vpop.f32.mrf.mxu1 }
0x118e   : > { %1474 = vrot.lane.b32.xlu1 %v1470_v48, %s2128_s24  ;;  %v1580_v48 = vld [vmem:[%s2556_s7] sm:$0xff] }
0x118f   : > { %1648 = vmatpush.msrb.mxu2 %v1580_v48  ;;  %1952 = vmatpush.msrb.mxu3 %v1580_v48 }
0x1196   : > { %1147 = vrot.lane.b32.xlu1 %v2079_v49, %s2125_s15  ;;  %v1520_v49 = vld [vmem:[#allocation3] sm:$0x1f] }
0x1200   : > { %v1475_v51 = vpop.permute.xlu1 %1474 }
0x1201   : > { %v1477_v53 = vadd.f32 %v1475_v51, %v1450_v50 }
0x1203   : > { %2080 = vtanh.f32 %v1477_v53  ;;  %v1941_v56 = vmul.f32 -1.442695, %v1477_v53 }
0x1205   : > { %2082 = vpow2.f32 %v1941_v56 }
0x1206   : > { %2084 = vpow2.f32 %v1932_v44 }
0x1208   : > { %v1148_v20 = vpop.permute.xlu1 %1147 }
0x1209   : > { %v2081_v55 = vpop.eup %2080 }
0x120a   : > { %1500 = vrot.lane.b32.xlu0 %v2081_v55, %s2125_s15 }
0x120b   : > { %v2083_v57 = vpop.eup %2082 }
0x120c   : > { %v1481_v54 = vadd.f32 1.0, %v2083_v57  ;;  %v2085_v58 = vpop.eup %2084 }
0x120d   : > { %v1128_v59 = vadd.f32 1.0, %v2085_v58 }
0x120e   : > { %2086 = vrcp.f32 %v1481_v54  ;;  %v1493_v9 = vand.u32 2147483648, %v1481_v54  ;;  %vm1487_vm9 = vweird.f32 %v1481_v54  ;;  %v1491_v10 = vand.u32 2147483647, %v1481_v54 }
0x120f   : > { %2088 = vrcp.f32 %v1128_v59  ;;  %v1140_v16 = vand.u32 2147483648, %v1128_v59  ;;  %vm1134_vm13 = vweird.f32 %v1128_v59  ;;  %v1138_v17 = vand.u32 2147483647, %v1128_v59 }
0x1210   : > { %v1494_v13 = vor.u32 1.1754944e-38, %v1493_v9  ;;  %vm1492_vm11 = vcmp.eq.f32.partialorder %v1491_v10, 8.507059e+37 }
0x1211   : > { %v1141_v21 = vor.u32 1.1754944e-38, %v1140_v16  ;;  %vm1139_vm15 = vcmp.eq.f32.partialorder %v1138_v17, 8.507059e+37 }
0x1214   : > { %v2087_v60 = vpop.eup %2086 }
0x1215   : > { %v1483_v61 = vmul.f32 %v2087_v60, %v1481_v54  ;;  %v2089_v1 = vpop.eup %2088  ;;  %vm1488_vm8 = vweird.f32 %v2087_v60  ;;  %v1522_v54 = vld [vmem:[#allocation3 + $0x10] sm:$0x1f] }
0x1216   : > { %v1130_v3 = vmul.f32 %v2089_v1, %v1128_v59  ;;  %vm1489_vm10 = vmor %vm1487_vm9, %vm1488_vm8  ;;  %vm1135_vm12 = vweird.f32 %v2089_v1 }
0x1217   : > { %v1484_v62 = vsub.f32 1.0, %v1483_v61  ;;  %vm1136_vm14 = vmor %vm1134_vm13, %vm1135_vm12 }
0x1218   : > { %v1131_v6 = vsub.f32 1.0, %v1130_v3 }
0x1219   : > { %v1485_v4 = vmul.f32 %v2087_v60, %v1484_v62 }
0x121a   : > { %v1132_v11 = vmul.f32 %v2089_v1, %v1131_v6 }
0x121b   : > { %v1486_v7 = vadd.f32 %v2087_v60, %v1485_v4 }
0x121c   : > { %v1133_v15 = vadd.f32 %v2089_v1, %v1132_v11 }
0x121d   : > { %v1490_v8 = vsel %vm1489_vm10, %v2087_v60, %v1486_v7  ;;  %v1523_v7 = vld [vmem:[#allocation3 + $0x18] sm:$0x1f] }
0x121e   : > { %v1495_v52 = vsel %vm1492_vm11, %v1494_v13, %v1490_v8  ;;  %v1137_v18 = vsel %vm1136_vm14, %v2089_v1, %v1133_v15 }
0x121f   : > { %v1142_v22 = vsel %vm1139_vm15, %v1141_v21, %v1137_v18  ;;  %v1498_v5 = vmul.f32 %v1495_v52, %v2455_v40 }
0x1220   : > { %v1150_v23 = vmul.f32 %v1148_v20, %v1142_v22  ;;  %v1145_v26 = vmul.f32 %v1142_v22, %v2430_v47  ;;  %v1526_v47 = vld [vmem:[#allocation4 + $0x8] sm:$0x1f] }
0x127c   : > { %v1501_v14 = vpop.permute.xlu0 %1500 }
0x127d   : > { %v1503_v0 = vmul.f32 %v1501_v14, %v1495_v52 }
0x127f   : > { %1505 = vrot.lane.b32.xlu2 %v1503_v0, %s2126_s18 }
0x1287   : > { %1152 = vrot.lane.b32.xlu2 %v1150_v23, %s2126_s18 }
0x12d9   : > { %v1506_v25 = vpop.permute.xlu2 %1505 }
0x12da   : > { %v1508_v63 = vadd.f32 %v1506_v25, %v1498_v5 }
0x12dc   : > { %2090 = vtanh.f32 %v1508_v63 }
0x12e1   : > { %v1153_v27 = vpop.permute.xlu2 %1152 }
0x12e2   : > { %v2091_v28 = vpop.eup %2090  ;;  %v1155_v12 = vadd.f32 %v1153_v27, %v1145_v26  ;;  %v2095_v27 = vld [vmem:[%s2229_s29 + $0x8] sm:$0x1f] }
0x12e3   : > { %1511 = vrot.lane.b32.xlu0 %v2091_v28, %s2126_s18  ;;  %v1671_v28 = vrot.slane %v2095_v27, 1 }
0x12e4   : > { %2092 = vtanh.f32 %v1155_v12  ;;  %v1672_v12 = vrot.slane %v2095_v27, 2 }
0x12ea   : > { %v2093_v29 = vpop.eup %2092 }
0x12eb   : > { %1158 = vrot.lane.b32.xlu0 %v2093_v29, %s2126_s18  ;;  %v1673_v29 = vrot.slane %v2095_v27, 3 }
0x12f3   : > { %1539 = vrot.lane.b32.xlu0 %v1527_v30, %s2126_s18  ;;  %v1674_v30 = vrot.slane %v2095_v27, 4 }
0x12fb   : > { %1543 = vrot.lane.b32.xlu0 %v1529_v31, %s2126_s18  ;;  %v2096_v31 = vld [vmem:[%s2229_s29 + $0x10] sm:$0x1f] }
0x1355   : > { %v1512_v32 = vpop.permute.xlu0 %1511 }
0x1356   : > { %v1514_v33 = vmul.f32 %v1512_v32, %v1495_v52  ;;  %v1675_v32 = vrot.slane %v2096_v31, 1 }
0x1358   : > { %1516 = vrot.lane.b32.xlu1 %v1514_v33, %s2129_s25 }
0x135d   : > { %v1159_v34 = vpop.permute.xlu0 %1158 }
0x135e   : > { %v1161_v35 = vmul.f32 %v1159_v34, %v1142_v22  ;;  %v2094_v22 = vld [vmem:[%s2229_s29] sm:$0x1f]  ;;  %v1677_v34 = vrot.slane %v2096_v31, 3 }
0x135f   : > { %v1667_v23 = vrot.slane %v2094_v22, 1  ;;  %v1668_v5 = vrot.slane %v2094_v22, 2  ;;  %v1669_v25 = vrot.slane %v2094_v22, 3  ;;  %v1670_v26 = vrot.slane %v2094_v22, 4 }
0x1360   : > { %1537 = vrot.lane.b32.xlu1 %v1526_v47, %s2126_s18  ;;  %v1676_v47 = vrot.slane %v2096_v31, 2 }
0x1365   : > { %v1540_v57 = vpop.permute.xlu0 %1539 }
0x1366   : > { %v1552_v58 = vsel %vm419_vm1, %v1522_v54, %v1540_v57 }
0x1367   : > { %v1568_v62 = vrot.slane %v1552_v58, 1  ;;  %v1569_v1 = vrot.slane %v1552_v58, 2  ;;  %v1570_v3 = vrot.slane %v1552_v58, 3  ;;  %v1571_v6 = vrot.slane %v1552_v58, 4 }
0x1368   : > { %1163 = vrot.lane.b32.xlu1 %v1161_v35, %s2127_s19  ;;  %v1678_v35 = vrot.slane %v2096_v31, 4 }
0x136d   : > { %v1544_v8 = vpop.permute.xlu0 %1543 }
0x13ca   : > { %v1517_v36 = vpop.permute.xlu1 %1516 }
0x13cb   : > { %1519 = vst.msk [vmem:[#allocation4] sm:$0x1f] %vm383_vm0, %v1517_v36  ;;  %v1679_v36 = vrot.slane %v2300_v24, 1 }
0x13d2   : > { %v1538_v38 = vpop.permute.xlu1 %1537  ;;  %v1525_v39 = vld [vmem:[#allocation4] sm:$0x1f] }
0x13d3   : > { %v1551_v2 = vsel %vm419_vm1, %v1521_v37, %v1538_v38  ;;  %1535 = vrot.lane.b32.xlu2 %v1525_v39, %s2126_s18  ;;  %v1680_v37 = vrot.slane %v2300_v24, 2  ;;  %v1681_v38 = vrot.slane %v2300_v24, 3  ;;  %v1682_v39 = vrot.slane %v2300_v24, 4 }
0x13d4   : > { %v1564_v40 = vrot.slane %v1551_v2, 1  ;;  %v1565_v41 = vrot.slane %v1551_v2, 2  ;;  %1598 = vst [vmem:[#allocation1 + $0x5] ss:$9 sm:$0xff] %v1551_v2  ;;  %v1566_v59 = vrot.slane %v1551_v2, 3  ;;  %v1567_v60 = vrot.slane %v1551_v2, 4 }
0x13d6   : > { %1600 = vst [vmem:[#allocation1 + $0x6] ss:$9 sm:$0xff] %v1564_v40  ;;  %v2097_v40 = vld [vmem:[%s2229_s29 + $0x20] sm:$0x1f]  ;;  %s2515_s29 = scalar_lea.vmem [#allocation6], %s2226_s28  ;;  %s1946_s28 = sshll.u32 (%p2210_p5), %s1914_s12, 3 }
0x13d7   : > { %1602 = vst [vmem:[#allocation1 + $0x7] ss:$9 sm:$0xff] %v1565_v41  ;;  %v1683_v41 = vrot.slane %v2097_v40, 1  ;;  %v1686_v43 = vrot.slane %v2097_v40, 4  ;;  %s1808_s25 = scalar_lea.vmem (%p2210_p5), %s2558_s9, %s1946_s28 }
0x13da   : > { %v1164_v42 = vpop.permute.xlu1 %1163 }
0x13db   : > { %1167 = vst.msk [vmem:[#allocation3 + $0x20] sm:$0x1f] %vm383_vm0, %v1164_v42  ;;  %1541 = vrot.lane.b32.xlu2 %v1528_v19, %s2126_s18  ;;  %v1684_v42 = vrot.slane %v2097_v40, 2  ;;  %v1685_v19 = vrot.slane %v2097_v40, 3 }
0x13e2   : > { %v1524_v10 = vld [vmem:[#allocation3 + $0x20] sm:$0x1f] }
0x13e3   : > { %v1554_v52 = vsel %vm419_vm1, %v1524_v10, %v1544_v8 }
0x13e4   : > { %v1576_v16 = vrot.slane %v1554_v52, 1  ;;  %v1577_v17 = vrot.slane %v1554_v52, 2  ;;  %v1578_v18 = vrot.slane %v1554_v52, 3  ;;  %v1579_v20 = vrot.slane %v1554_v52, 4 }
0x142d   : > { %v1536_v50 = vpop.permute.xlu2 %1535 }
0x142e   : > { %v1550_v51 = vsel %vm419_vm1, %v1520_v49, %v1536_v50 }
0x142f   : > { %v1560_v53 = vrot.slane %v1550_v51, 1  ;;  %v1561_v55 = vrot.slane %v1550_v51, 2  ;;  %v1562_v56 = vrot.slane %v1550_v51, 3  ;;  %1588 = vst [vmem:[#allocation1] ss:$9 sm:$0xff] %v1550_v51  ;;  %v1563_v44 = vrot.slane %v1550_v51, 4 }
0x1431   : > { %1590 = vst [vmem:[#allocation1 + $0x1] ss:$9 sm:$0xff] %v1560_v53 }
0x1432   : > { %1592 = vst [vmem:[#allocation1 + $0x2] ss:$9 sm:$0xff] %v1561_v55 }
0x1433   : > { %1594 = vst [vmem:[#allocation1 + $0x3] ss:$9 sm:$0xff] %v1562_v56 }
0x1434   : > { %1596 = vst [vmem:[#allocation1 + $0x4] ss:$9 sm:$0xff] %v1563_v44 }
0x1435   : > { %v1542_v4 = vpop.permute.xlu2 %1541 }
0x1436   : > { %v1553_v9 = vsel %vm419_vm1, %v1523_v7, %v1542_v4 }
0x1437   : > { %v1572_v11 = vrot.slane %v1553_v9, 1  ;;  %v1573_v13 = vrot.slane %v1553_v9, 2  ;;  %v1574_v15 = vrot.slane %v1553_v9, 3  ;;  %v1575_v0 = vrot.slane %v1553_v9, 4 }
0x143b   : > { %v1603_v61 = vld [vmem:[#allocation1] sm:$0xff] }
0x143c   : > { %1604 = vst [vmem:[#allocation1] ss:$9 sm:$0xff] %v1566_v59  ;;  %1942 = vmatmul.msk.f32.vlgmr.msrb.gmra.mxu2 %vm1624_vm2, %v1603_v61 }
0x143d   : > { %1605 = vst [vmem:[#allocation1 + $0x1] ss:$9 sm:$0xff] %v1567_v60 }
0x143e   : > { %1606 = vst [vmem:[#allocation1 + $0x2] ss:$9 sm:$0xff] %v1552_v58 }
0x143f   : > { %1607 = vst [vmem:[#allocation1 + $0x3] ss:$9 sm:$0xff] %v1568_v62 }
0x1440   : > { %1608 = vst [vmem:[#allocation1 + $0x4] ss:$9 sm:$0xff] %v1569_v1 }
0x1441   : > { %1609 = vst [vmem:[#allocation1 + $0x5] ss:$9 sm:$0xff] %v1570_v3 }
0x1442   : > { %1610 = vst [vmem:[#allocation1 + $0x6] ss:$9 sm:$0xff] %v1571_v6 }
0x1443   : > { %1611 = vst [vmem:[#allocation1 + $0x7] ss:$9 sm:$0xff] %v1553_v9 }
0x144a   : > { %v1612_v14 = vld [vmem:[#allocation1] sm:$0xff] }
0x144b   : > { %1613 = vst [vmem:[#allocation1] ss:$9 sm:$0xff] %v1572_v11  ;;  %1943 = vmatmul.msk.f32.gmra.mxu2 %vm1624_vm2, %v1612_v14 }
0x144c   : > { %1614 = vst [vmem:[#allocation1 + $0x1] ss:$9 sm:$0xff] %v1573_v13 }
0x144d   : > { %1615 = vst [vmem:[#allocation1 + $0x2] ss:$9 sm:$0xff] %v1574_v15 }
0x144e   : > { %1616 = vst [vmem:[#allocation1 + $0x3] ss:$9 sm:$0xff] %v1575_v0 }
0x144f   : > { %1617 = vst [vmem:[#allocation1 + $0x4] ss:$9 sm:$0xff] %v1554_v52 }
0x1450   : > { %1618 = vst [vmem:[#allocation1 + $0x5] ss:$9 sm:$0xff] %v1576_v16 }
0x1451   : > { %1619 = vst [vmem:[#allocation1 + $0x6] ss:$9 sm:$0xff] %v1577_v17 }
0x1452   : > { %1620 = vst [vmem:[#allocation1 + $0x7] ss:$9 sm:$0xff] %v1578_v18 }
0x1459   : > { %v1621_v21 = vld [vmem:[#allocation1] sm:$0xff] }
0x145a   : > { %1622 = vst [vmem:[#allocation1] ss:$9 sm:$0xff] %v1579_v20  ;;  %1944 = vmatmul.msk.f32.vlgmr.msrb.gmra.mxu3 %vm1624_vm2, %v1621_v21 }
0x1461   : > { %v1623_v63 = vld [vmem:[#allocation1] sm:$0xff] }
0x1462   : > { %1687 = vst [vmem:[#allocation1] ss:$9 sm:$0xff] %v2094_v22  ;;  %1945 = vmatmul.msk.f32.gmra.mxu3 %vm1624_vm2, %v1623_v63 }
0x1463   : > { %1689 = vst [vmem:[#allocation1 + $0x1] ss:$9 sm:$0xff] %v1667_v23 }
0x1464   : > { %1691 = vst [vmem:[#allocation1 + $0x2] ss:$9 sm:$0xff] %v1668_v5 }
0x1465   : > { %1693 = vst [vmem:[#allocation1 + $0x3] ss:$9 sm:$0xff] %v1669_v25 }
0x1466   : > { %1695 = vst [vmem:[#allocation1 + $0x4] ss:$9 sm:$0xff] %v1670_v26 }
0x1467   : > { %1697 = vst [vmem:[#allocation1 + $0x5] ss:$9 sm:$0xff] %v2095_v27 }
0x1468   : > { %1699 = vst [vmem:[#allocation1 + $0x6] ss:$9 sm:$0xff] %v1671_v28 }
0x1469   : > { %1701 = vst [vmem:[#allocation1 + $0x7] ss:$9 sm:$0xff] %v1672_v12 }
0x1470   : > { %v1702_v33 = vld [vmem:[#allocation1] sm:$0xff] }
0x1471   : > { %1703 = vst [vmem:[#allocation1] ss:$9 sm:$0xff] %v1673_v29 }
0x1472   : > { %1704 = vst [vmem:[#allocation1 + $0x1] ss:$9 sm:$0xff] %v1674_v30 }
0x1473   : > { %1705 = vst [vmem:[#allocation1 + $0x2] ss:$9 sm:$0xff] %v2096_v31 }
0x1474   : > { %1706 = vst [vmem:[#allocation1 + $0x3] ss:$9 sm:$0xff] %v1675_v32 }
0x1475   : > { %1707 = vst [vmem:[#allocation1 + $0x4] ss:$9 sm:$0xff] %v1676_v47 }
0x1476   : > { %1708 = vst [vmem:[#allocation1 + $0x5] ss:$9 sm:$0xff] %v1677_v34 }
0x1477   : > { %1709 = vst [vmem:[#allocation1 + $0x6] ss:$9 sm:$0xff] %v1678_v35 }
0x1478   : > { %1710 = vst [vmem:[#allocation1 + $0x7] ss:$9 sm:$0xff] %v2300_v24  ;;  %v2001_v24 = vld [vmem:[%s2557_s8] ss:$0 sm:$0xff] }
0x147f   : > { %v1711_v2 = vld [vmem:[#allocation1] sm:$0xff] }
0x1480   : > { %1712 = vst [vmem:[#allocation1] ss:$9 sm:$0xff] %v1679_v36 }
0x1481   : > { %1713 = vst [vmem:[#allocation1 + $0x1] ss:$9 sm:$0xff] %v1680_v37 }
0x1482   : > { %1714 = vst [vmem:[#allocation1 + $0x2] ss:$9 sm:$0xff] %v1681_v38 }
0x1483   : > { %1715 = vst [vmem:[#allocation1 + $0x3] ss:$9 sm:$0xff] %v1682_v39 }
0x1484   : > { %1716 = vst [vmem:[#allocation1 + $0x4] ss:$9 sm:$0xff] %v2097_v40 }
0x1485   : > { %1717 = vst [vmem:[#allocation1 + $0x5] ss:$9 sm:$0xff] %v1683_v41 }
0x1486   : > { %1718 = vst [vmem:[#allocation1 + $0x6] ss:$9 sm:$0xff] %v1684_v42 }
0x1487   : > { %1719 = vst [vmem:[#allocation1 + $0x7] ss:$9 sm:$0xff] %v1685_v19 }
0x148e   : > { %v1720_v45 = vld [vmem:[#allocation1] sm:$0xff] }
0x148f   : > { %1721 = vst [vmem:[#allocation1] ss:$9 sm:$0xff] %v1686_v43 }
0x1496   : > { %v1722_v49 = vld [vmem:[#allocation1] sm:$0xff] }
0x14bf   : > { %v1650_v46 = vpop.f32.mrf.mxu2 }
0x14c0   : > { %v1651_v48 = vadd.f32 %v2001_v24, %v1650_v46 }
0x14c2   : > { %v1727_v50 = vadd.f32 %v1702_v33, %v1651_v48 }
0x14c4   : > { %v1735_v51 = vrot.slane %v1727_v50, 1  ;;  %v1736_v53 = vrot.slane %v1727_v50, 2  ;;  %v1737_v55 = vrot.slane %v1727_v50, 3  ;;  %1756 = vst [vmem:[#allocation1] ss:$9 sm:$0xff] %v1727_v50  ;;  %v1738_v56 = vrot.slane %v1727_v50, 4 }
0x14c5   : > { %v1739_v57 = vrot.slane %v1727_v50, 5  ;;  %v1740_v58 = vrot.slane %v1727_v50, 6  ;;  %v1741_v60 = vrot.slane %v1727_v50, 7 }
0x14c6   : > { %1758 = vst [vmem:[#allocation1 + $0x1] ss:$9 sm:$0xff] %v1735_v51 }
0x14c7   : > { %1760 = vst [vmem:[#allocation1 + $0x2] ss:$9 sm:$0xff] %v1736_v53 }
0x14c8   : > { %1762 = vst [vmem:[#allocation1 + $0x3] ss:$9 sm:$0xff] %v1737_v55 }
0x14c9   : > { %1764 = vst [vmem:[#allocation1 + $0x4] ss:$9 sm:$0xff] %v1738_v56 }
0x14ce   : > { %v1653_v44 = vpop.f32.mrf.mxu2 }
0x14cf   : > { %v1654_v54 = vadd.f32 %v2001_v24, %v1653_v44 }
0x14d0   : > { %v1765_v59 = vld [vmem:[#allocation1] sm:$0xff] }
0x14d1   : > { %v1728_v61 = vadd.f32 %v1711_v2, %v1654_v54  ;;  %1766 = vst [vmem:[#allocation1] ss:$9 sm:$0xff] %v1739_v57 }
0x14d2   : > { %1767 = vst [vmem:[#allocation1 + $0x1] ss:$9 sm:$0xff] %v1740_v58 }
0x14d3   : > { %v1742_v62 = vrot.slane %v1728_v61, 1  ;;  %1768 = vst [vmem:[#allocation1 + $0x2] ss:$9 sm:$0xff] %v1741_v60  ;;  %v1743_v1 = vrot.slane %v1728_v61, 2  ;;  %v1744_v3 = vrot.slane %v1728_v61, 3  ;;  %v1745_v6 = vrot.slane %v1728_v61, 4 }
0x14d4   : > { %1769 = vst [vmem:[#allocation1 + $0x3] ss:$9 sm:$0xff] %v1728_v61  ;;  %v1746_v7 = vrot.slane %v1728_v61, 5  ;;  %v1747_v10 = vrot.slane %v1728_v61, 6  ;;  %v1748_v13 = vrot.slane %v1728_v61, 7 }
0x14d5   : > { %1770 = vst [vmem:[#allocation1 + $0x4] ss:$9 sm:$0xff] %v1742_v62 }
0x14d6   : > { %1795 = vst.msk [vmem:[%s2515_s29] sm:$0x1f] %vm383_vm0, %v1765_v59 }
0x14dc   : > { %v1771_v4 = vld [vmem:[#allocation1] sm:$0xff] }
0x14dd   : > { %1772 = vst [vmem:[#allocation1] ss:$9 sm:$0xff] %v1743_v1  ;;  %v1656_v9 = vpop.f32.mrf.mxu3  ;;  %v1845_v63 = vld [vmem:[%s2515_s29] sm:$0xff] (%p2210_p5) }
0x14de   : > { %1773 = vst [vmem:[#allocation1 + $0x1] ss:$9 sm:$0xff] %v1744_v3  ;;  %v1657_v11 = vadd.f32 %v2001_v24, %v1656_v9 }
0x14df   : > { %1774 = vst [vmem:[#allocation1 + $0x2] ss:$9 sm:$0xff] %v1745_v6 }
0x14e0   : > { %1775 = vst [vmem:[#allocation1 + $0x3] ss:$9 sm:$0xff] %v1746_v7  ;;  %v1729_v8 = vadd.f32 %v1720_v45, %v1657_v11 }
0x14e1   : > { %1776 = vst [vmem:[#allocation1 + $0x4] ss:$9 sm:$0xff] %v1747_v10 }
0x14e2   : > { %1796 = vst.msk [vmem:[%s2515_s29 + $0x8] sm:$0x1f] %vm383_vm0, %v1771_v4  ;;  %v1749_v52 = vrot.slane %v1729_v8, 1  ;;  %v1750_v15 = vrot.slane %v1729_v8, 2  ;;  %v1751_v0 = vrot.slane %v1729_v8, 3  ;;  %v1752_v17 = vrot.slane %v1729_v8, 4 }
0x14e3   : > { %v1753_v20 = vrot.slane %v1729_v8, 5  ;;  %v1754_v22 = vrot.slane %v1729_v8, 6  ;;  %v1755_v23 = vrot.slane %v1729_v8, 7  ;;  %1846 = vst [vmem:[%s1808_s25] sm:$0xff] (%p2210_p5), %v1845_v63 }
0x14e5   : > { %v1659_v16 = vpop.f32.mrf.mxu3 }
0x14e6   : > { %v1660_v18 = vadd.f32 %v2001_v24, %v1659_v16 }
0x14e8   : > { %v1777_v14 = vld [vmem:[#allocation1] sm:$0xff]  ;;  %v1730_v5 = vadd.f32 %v1722_v49, %v1660_v18 }
0x14e9   : > { %1778 = vst [vmem:[#allocation1] ss:$9 sm:$0xff] %v1748_v13  ;;  %v1847_v26 = vld [vmem:[%s2515_s29 + $0x8] sm:$0xff] (%p2210_p5) }
0x14ea   : > { %1779 = vst [vmem:[#allocation1 + $0x1] ss:$9 sm:$0xff] %v1729_v8 }
0x14eb   : > { %1780 = vst [vmem:[#allocation1 + $0x2] ss:$9 sm:$0xff] %v1749_v52 }
0x14ec   : > { %1781 = vst [vmem:[#allocation1 + $0x3] ss:$9 sm:$0xff] %v1750_v15 }
0x14ed   : > { %1782 = vst [vmem:[#allocation1 + $0x4] ss:$9 sm:$0xff] %v1751_v0 }
0x14ee   : > { %1797 = vst.msk [vmem:[%s2515_s29 + $0x10] sm:$0x1f] %vm383_vm0, %v1777_v14 }
0x14ef   : > { %1848 = vst [vmem:[%s1808_s25 + $0x10] sm:$0xff] (%p2210_p5), %v1847_v26 }
0x14f4   : > { %v1783_v21 = vld [vmem:[#allocation1] sm:$0xff] }
0x14f5   : > { %1784 = vst [vmem:[#allocation1] ss:$9 sm:$0xff] %v1752_v17  ;;  %v1849_v27 = vld [vmem:[%s2515_s29 + $0x10] sm:$0xff] (%p2210_p5) }
0x14f6   : > { %1785 = vst [vmem:[#allocation1 + $0x1] ss:$9 sm:$0xff] %v1753_v20 }
0x14f7   : > { %1786 = vst [vmem:[#allocation1 + $0x2] ss:$9 sm:$0xff] %v1754_v22 }
0x14f8   : > { %1787 = vst [vmem:[#allocation1 + $0x3] ss:$9 sm:$0xff] %v1755_v23 }
0x14f9   : > { %1788 = vst [vmem:[#allocation1 + $0x4] ss:$9 sm:$0xff] %v1730_v5 }
0x14fa   : > { %1798 = vst.msk [vmem:[%s2515_s29 + $0x18] sm:$0x1f] %vm383_vm0, %v1783_v21 }
0x14fb   : > { %1850 = vst [vmem:[%s1808_s25 + $0x20] sm:$0xff] (%p2210_p5), %v1849_v27 }
0x14fd   : > { %1806 = sbr.rel (!%p2210_p5) target bundleno = 5386 (0x150a), region = 98 }
0x1500   : > { %v1789_v25 = vld [vmem:[#allocation1] sm:$0xff] }
0x1501   : > { %1799 = vst.msk [vmem:[%s2515_s29 + $0x20] sm:$0x1f] %vm383_vm0, %v1789_v25  ;;  %v1851_v28 = vld [vmem:[%s2515_s29 + $0x18] sm:$0xff] (%p2210_p5) }
0x1502   : > { %1852 = vst [vmem:[%s1808_s25 + $0x30] sm:$0xff] %v1851_v28 }
0x1508   : > { %v1853_v12 = vld [vmem:[%s2515_s29 + $0x20] sm:$0xff] }
0x1509   : > { %1854 = vst [vmem:[%s1808_s25 + $0x40] sm:$0xff] %v1853_v12 }
0x150a PF: > { %p16_p10 = scmp.ge.s32.totalorder %s2197_s13, 4   ;;  %s2560_s30 = smov %s2116_s10 }
0x150b   : > { %s2561_s10 = smov %s2208_s16  ;;  %s2562_s11 = smov %s2197_s13 }
0x150c   :  { %18 = sbr.rel (!%p16_p10) target bundleno = 2 (0x2), region = 208 }

// kernel: bsrnn_forward.12
= control target key start
LH: loop header
LB: loop body
LE: loop exit
PB: predicated region body
PF: predicated region fallthrough
CT: control target
= control target key end

     0   :  { %s1090_s22 = smov 112   ;;  %s1091_s23 = smov 80   ;;  %vm22_vm0 = vcmask 130048   ;;  %vm26_vm1 = vcmask 123904   ;;  %v1094_v19 = vmov 16.0   ;;  %s1711_s0 = inlined_call_operand.vmem [shape: f32[10,80], index: 0, kind: input, shape index: {}]   ;;  %s1712_s1 = inlined_call_operand.vmem [shape: f32[80,320], index: 1, kind: input, shape index: {}]   ;;  %s1713_s3 = inlined_call_operand.vmem [shape: f32[320,132], index: 3, kind: input, shape index: {}]   ;;  %s1714_s2 = inlined_call_operand.vmem [shape: f32[1,320], index: 2, kind: input, shape index: {}]   ;;  %s1715_s4 = inlined_call_operand.vmem [shape: f32[1,132], index: 4, kind: input, shape index: {}]   ;;  %s1716_s5 = inlined_call_operand.vmem [shape: f32[10,132], index: 5, kind: output, shape index: {}]  }
   0x1   :  { %v1128_v0 = vld [vmem:[%s1711_s0 + $0x8] sm:$0x3]  ;;  %v1133_v1 = vld [vmem:[%s1711_s0] sm:$0xff]  ;;  %s1092_s24 = smov 96   ;;  %s1093_s0 = smov 64   ;;  %1056 = vrcp.f32 %v1094_v19 }
   0x2   :  { %79 = vrot.lane.b32.xlu1 %v1128_v0, %s1090_s22  ;;  %77 = vrot.lane.b32.xlu0 %v1133_v1, %s1090_s22  ;;  %v23_v2 = vsel %vm22_vm0, %v1133_v1, 0.0  ;;  %v27_v55 = vsel %vm26_vm1, %v1128_v0, 0.0 }
   0x3   :  { %193 = vrot.lane.b32.xlu2 %v1133_v1, %s1091_s23 }
   0x7   :  { %v1057_v20 = vpop.eup %1056 }
   0x8   :  { %v31_v21 = vmul.f32 16.0, %v1057_v20  ;;  %vm35_vm2 = vweird.f32 %v1057_v20 }
   0xa   :  { %135 = vrot.lane.b32.xlu0 %v1133_v1, %s1092_s24  ;;  %137 = vrot.lane.b32.xlu1 %v1128_v0, %s1092_s24  ;;  %v32_v22 = vsub.f32 1.0, %v31_v21 }
   0xb   :  { %195 = vrot.lane.b32.xlu2 %v1128_v0, %s1091_s23 }
   0xc   :  { %v33_v23 = vmul.f32 %v1057_v20, %v32_v22  ;;  %v313_v22 = vld [vmem:[%s1712_s1 + $0x18] sm:$0xff] }
   0xd   :  { %336 = vmatpush.msra.mxu0 %v313_v22 }
   0xe   :  { %v34_v25 = vadd.f32 %v1057_v20, %v33_v23  ;;  %v315_v23 = vld [vmem:[%s1712_s1 + $0x28] sm:$0xff] }
   0xf   :  { %382 = vmatpush.msra.mxu2 %v315_v23 }
  0x10   :  { %v1161_v26 = vsel %vm35_vm2, %v1057_v20, %v34_v25  ;;  %v312_v25 = vld [vmem:[%s1712_s1 + $0x10] sm:$0xff] }
  0x11   :  { %383 = vmatpush.msra.mxu2 %v312_v25 }
  0x12   :  { %251 = vrot.lane.b32.xlu0 %v1133_v1, %s1093_s0 }
  0x1a   :  { %253 = vrot.lane.b32.xlu0 %v1128_v0, %s1093_s0 }
  0x34   :  { %24 = vadd.xlane.f32.xlu1 %v23_v2 }
  0x5d   :  { %v194_v7 = vpop.permute.xlu2 %193 }
  0x5e   :  { %v199_v8 = vsel %vm22_vm0, %v194_v7, 0.0 }
  0x65   :  { %v196_v15 = vpop.permute.xlu2 %195 }
  0x66   :  { %v202_v16 = vsel %vm26_vm1, %v196_v15, 0.0 }
  0x74   :  { %v80_v3 = vpop.permute.xlu1 %79  ;;  %v78_v4 = vpop.permute.xlu0 %77 }
  0x75   :  { %v86_v5 = vsel %vm26_vm1, %v80_v3, 0.0  ;;  %v83_v6 = vsel %vm22_vm0, %v78_v4, 0.0 }
  0x76   :  { %87 = vadd.xlane.f32.xlu0 %v86_v5  ;;  %84 = vadd.xlane.f32.xlu1 %v83_v6 }
  0x7c   :  { %v136_v9 = vpop.permute.xlu0 %135  ;;  %v138_v11 = vpop.permute.xlu1 %137 }
  0x7d   :  { %v141_v10 = vsel %vm22_vm0, %v136_v9, 0.0  ;;  %v144_v12 = vsel %vm26_vm1, %v138_v11, 0.0 }
  0x7e   :  { %142 = vadd.xlane.f32.xlu2 %v141_v10  ;;  %200 = vadd.xlane.f32.xlu1 %v199_v8 }
  0x84   :  { %v252_v13 = vpop.permute.xlu0 %251 }
  0x85   :  { %v257_v14 = vsel %vm22_vm0, %v252_v13, 0.0 }
  0x86   :  { %145 = vadd.xlane.f32.xlu2 %v144_v12  ;;  %258 = vadd.xlane.f32.xlu1 %v257_v14 }
  0x8c   :  { %v254_v17 = vpop.permute.xlu0 %253 }
  0x8d   :  { %v260_v18 = vsel %vm26_vm1, %v254_v17, 0.0 }
  0x8e   :  { %203 = vadd.xlane.f32.xlu2 %v202_v16 }
  0x96   :  { %261 = vadd.xlane.f32.xlu2 %v260_v18 }
  0xa7   :  { %v25_v24 = vpop.xlane.xlu1 %24 }
  0xa8   :  { %v37_v60 = vmul.f32 %v1161_v26, %v25_v24  ;;  %v310_v24 = vld [vmem:[%s1712_s1] sm:$0xff] }
  0xa9   :  { %337 = vmatpush.msra.mxu0 %v310_v24  ;;  %v314_v24 = vld [vmem:[%s1712_s1 + $0x20] sm:$0xff] }
  0xaa   :  { %v1223_v62 = vsub.f32 %v1133_v1, %v37_v60  ;;  %1049 = vmatpush.msra.mxu1 %v314_v24 }
  0xab   :  { %359 = vmatpush.msrb.mxu0 %v314_v24 }
  0xac   :  { %v41_v2 = vmul.f32 %v1223_v62, %v1223_v62 }
  0xae   :  { %v43_v4 = vsel %vm22_vm0, %v41_v2, 0.0 }
  0xe9   :  { %v88_v27 = vpop.xlane.xlu0 %87  ;;  %v85_v28 = vpop.xlane.xlu1 %84 }
  0xea   :  { %v90_v29 = vmul.f32 %v88_v27, %v1161_v26  ;;  %v89_v30 = vmul.f32 %v85_v28, %v1161_v26 }
  0xec   :  { %v1166_v31 = vsub.f32 %v1128_v0, %v90_v29  ;;  %v1169_v32 = vsub.f32 %v1133_v1, %v89_v30 }
  0xee   :  { %v94_v33 = vmul.f32 %v1166_v31, %v1166_v31  ;;  %v93_v34 = vmul.f32 %v1169_v32, %v1169_v32 }
  0xf0   :  { %99 = vrot.lane.b32.xlu2 %v94_v33, %s1090_s22  ;;  %97 = vrot.lane.b32.xlu0 %v93_v34, %s1090_s22 }
  0xf1   :  { %v143_v35 = vpop.xlane.xlu2 %142  ;;  %v201_v40 = vpop.xlane.xlu1 %200 }
  0xf2   :  { %v147_v36 = vmul.f32 %v143_v35, %v1161_v26  ;;  %v205_v43 = vmul.f32 %v201_v40, %v1161_v26 }
  0xf4   :  { %v1179_v37 = vsub.f32 %v1133_v1, %v147_v36  ;;  %v1193_v45 = vsub.f32 %v1133_v1, %v205_v43 }
  0xf6   :  { %v151_v38 = vmul.f32 %v1179_v37, %v1179_v37  ;;  %v209_v47 = vmul.f32 %v1193_v45, %v1193_v45 }
  0xf8   :  { %155 = vrot.lane.b32.xlu1 %v151_v38, %s1092_s24 }
  0xf9   :  { %v146_v39 = vpop.xlane.xlu2 %145  ;;  %v259_v50 = vpop.xlane.xlu1 %258 }
  0xfa   :  { %v148_v41 = vmul.f32 %v146_v39, %v1161_v26  ;;  %v263_v52 = vmul.f32 %v259_v50, %v1161_v26 }
  0xfc   :  { %v1186_v42 = vsub.f32 %v1128_v0, %v148_v41  ;;  %v1207_v53 = vsub.f32 %v1133_v1, %v263_v52 }
  0xfe   :  { %v152_v44 = vmul.f32 %v1186_v42, %v1186_v42  ;;  %v267_v54 = vmul.f32 %v1207_v53, %v1207_v53 }
 0x100   :  { %157 = vrot.lane.b32.xlu0 %v152_v44, %s1092_s24 }
 0x101   :  { %v204_v46 = vpop.xlane.xlu2 %203 }
 0x102   :  { %v206_v48 = vmul.f32 %v204_v46, %v1161_v26 }
 0x104   :  { %v1200_v49 = vsub.f32 %v1128_v0, %v206_v48 }
 0x106   :  { %v210_v51 = vmul.f32 %v1200_v49, %v1200_v49 }
 0x108   :  { %213 = vrot.lane.b32.xlu0 %v209_v47, %s1091_s23 }
 0x109   :  { %v262_v56 = vpop.xlane.xlu2 %261 }
 0x10a   :  { %v264_v57 = vmul.f32 %v262_v56, %v1161_v26 }
 0x10c   :  { %v1216_v58 = vsub.f32 %v1128_v0, %v264_v57 }
 0x10e   :  { %v268_v59 = vmul.f32 %v1216_v58, %v1216_v58 }
 0x110   :  { %215 = vrot.lane.b32.xlu0 %v210_v51, %s1091_s23 }
 0x118   :  { %271 = vrot.lane.b32.xlu0 %v267_v54, %s1093_s0 }
 0x119   :  { %28 = vadd.xlane.f32.xlu2 %v27_v55 }
 0x131   :  { %273 = vrot.lane.b32.xlu2 %v268_v59, %s1093_s0 }
 0x14a   :  { %v100_v6 = vpop.permute.xlu2 %99 }
 0x14b   :  { %v106_v8 = vsel %vm26_vm1, %v100_v6, 0.0 }
 0x162   :  { %v98_v61 = vpop.permute.xlu0 %97 }
 0x163   :  { %v103_v63 = vsel %vm22_vm0, %v98_v61, 0.0 }
 0x164   :  { %104 = vadd.xlane.f32.xlu0 %v103_v63 }
 0x16a   :  { %v156_v3 = vpop.permute.xlu1 %155 }
 0x16b   :  { %v161_v5 = vsel %vm22_vm0, %v156_v3, 0.0 }
 0x16c   :  { %44 = vadd.xlane.f32.xlu0 %v43_v4  ;;  %162 = vadd.xlane.f32.xlu1 %v161_v5 }
 0x172   :  { %v158_v7 = vpop.permute.xlu0 %157 }
 0x173   :  { %v164_v1 = vsel %vm26_vm1, %v158_v7, 0.0 }
 0x174   :  { %107 = vadd.xlane.f32.xlu1 %v106_v8 }
 0x17a   :  { %v214_v9 = vpop.permute.xlu0 %213 }
 0x17b   :  { %v219_v10 = vsel %vm22_vm0, %v214_v9, 0.0 }
 0x17c   :  { %165 = vadd.xlane.f32.xlu1 %v164_v1 }
 0x182   :  { %v216_v11 = vpop.permute.xlu0 %215 }
 0x183   :  { %v222_v12 = vsel %vm26_vm1, %v216_v11, 0.0 }
 0x184   :  { %223 = vadd.xlane.f32.xlu2 %v222_v12  ;;  %220 = vadd.xlane.f32.xlu1 %v219_v10 }
 0x18a   :  { %v272_v13 = vpop.permute.xlu0 %271 }
 0x18b   :  { %v277_v14 = vsel %vm22_vm0, %v272_v13, 0.0 }
 0x18c   :  { %v29_v15 = vpop.xlane.xlu2 %28  ;;  %278 = vadd.xlane.f32.xlu0 %v277_v14 }
 0x18d   :  { %v38_v16 = vmul.f32 %v1161_v26, %v29_v15 }
 0x18f   :  { %v1237_v17 = vsub.f32 %v1128_v0, %v38_v16 }
 0x191   :  { %v42_v18 = vmul.f32 %v1237_v17, %v1237_v17 }
 0x193   :  { %v46_v19 = vsel %vm26_vm1, %v42_v18, 0.0 }
 0x194   :  { %47 = vadd.xlane.f32.xlu1 %v46_v19  ;;  %v274_v20 = vpop.permute.xlu2 %273 }
 0x195   :  { %v280_v21 = vsel %vm26_vm1, %v274_v20, 0.0 }
 0x19c   :  { %281 = vadd.xlane.f32.xlu1 %v280_v21 }
 0x1d7   :  { %v105_v0 = vpop.xlane.xlu0 %104 }
 0x1d8   :  { %v109_v27 = vmul.f32 %v105_v0, %v1161_v26 }
 0x1da   :  { %v111_v28 = vadd.f32 1e-05, %v109_v27 }
 0x1dc   :  { %1058 = vrsqrt.f32 %v111_v28  ;;  %vm119_vm4 = vweird.f32 %v111_v28 }
 0x1df   :  { %v45_v29 = vpop.xlane.xlu0 %44  ;;  %v163_v30 = vpop.xlane.xlu1 %162 }
 0x1e0   :  { %v49_v33 = vmul.f32 %v45_v29, %v1161_v26  ;;  %v167_v34 = vmul.f32 %v163_v30, %v1161_v26  ;;  %v311_v29 = vld [vmem:[%s1712_s1 + $0x8] sm:$0xff] }
 0x1e1   :  { %1050 = vmatpush.msra.mxu1 %v311_v29  ;;  %360 = vmatpush.msrb.mxu0 %v311_v29  ;;  %v496_v29 = vld [vmem:[%s1712_s1 + $0x68] sm:$0xff] }
 0x1e2   :  { %v1059_v35 = vpop.eup %1058  ;;  %v51_v36 = vadd.f32 1e-05, %v49_v33  ;;  %v169_v38 = vadd.f32 1e-05, %v167_v34 }
 0x1e3   :  { %v114_v39 = vmul.f32 %v1059_v35, %v111_v28  ;;  %vm120_vm3 = vweird.f32 %v1059_v35 }
 0x1e4   :  { %1060 = vrsqrt.f32 %v51_v36  ;;  %vm121_vm5 = vmor %vm119_vm4, %vm120_vm3  ;;  %vm59_vm8 = vweird.f32 %v51_v36  ;;  %vm177_vm10 = vweird.f32 %v169_v38 }
 0x1e5   :  { %v115_v40 = vmul.f32 %v1059_v35, %v114_v39  ;;  %1062 = vrsqrt.f32 %v169_v38 }
 0x1e7   :  { %v116_v41 = vmul.f32 0.5, %v115_v40  ;;  %v108_v43 = vpop.xlane.xlu1 %107 }
 0x1e8   :  { %v110_v44 = vmul.f32 %v108_v43, %v1161_v26 }
 0x1e9   :  { %v117_v46 = vsub.f32 1.5, %v116_v41 }
 0x1ea   :  { %v1061_v47 = vpop.eup %1060  ;;  %v112_v48 = vadd.f32 1e-05, %v110_v44 }
 0x1eb   :  { %v1063_v50 = vpop.eup %1062  ;;  %v54_v51 = vmul.f32 %v1061_v47, %v51_v36  ;;  %v118_v52 = vmul.f32 %v1059_v35, %v117_v46  ;;  %vm60_vm6 = vweird.f32 %v1061_v47 }
 0x1ec   :  { %v172_v54 = vmul.f32 %v1063_v50, %v169_v38  ;;  %1064 = vrsqrt.f32 %v112_v48  ;;  %vm178_vm7 = vweird.f32 %v1063_v50  ;;  %vm61_vm9 = vmor %vm59_vm8, %vm60_vm6  ;;  %vm129_vm13 = vweird.f32 %v112_v48 }
 0x1ed   :  { %v55_v55 = vmul.f32 %v1061_v47, %v54_v51  ;;  %v122_v56 = vsel %vm121_vm5, %v1059_v35, %v118_v52  ;;  %vm179_vm11 = vmor %vm177_vm10, %vm178_vm7  ;;  %v407_v51 = vld [vmem:[%s1712_s1 + $0x48] sm:$0xff]  ;;  %v408_v52 = vld [vmem:[%s1712_s1 + $0x50] sm:$0xff] }
 0x1ee   :  { %v173_v57 = vmul.f32 %v1063_v50, %v172_v54  ;;  %v133_v59 = vmul.f32 %v122_v56, %v1169_v32  ;;  %v409_v54 = vld [vmem:[%s1712_s1 + $0x58] sm:$0xff]  ;;  %434 = vmatpush.msra.mxu3 %v407_v51 }
 0x1ef   :  { %v56_v60 = vmul.f32 0.5, %v55_v55  ;;  %v166_v61 = vpop.xlane.xlu1 %165  ;;  %v404_v55 = vld [vmem:[%s1712_s1 + $0x30] sm:$0xff]  ;;  %v405_v56 = vld [vmem:[%s1712_s1 + $0x38] sm:$0xff]  ;;  %480 = vmatpush.msrb.mxu1 %v409_v54 }
 0x1f0   :  { %v174_v63 = vmul.f32 0.5, %v173_v57  ;;  %v168_v2 = vmul.f32 %v166_v61, %v1161_v26  ;;  %412 = vrot.lane.b32.xlu0 %v133_v59, %s1090_s22  ;;  %v406_v57 = vld [vmem:[%s1712_s1 + $0x40] sm:$0xff]  ;;  %435 = vmatpush.msra.mxu3 %v404_v55 }
 0x1f1   :  { %v57_v3 = vsub.f32 1.5, %v56_v60  ;;  %481 = vmatpush.msrb.mxu1 %v406_v57  ;;  %v805_v57 = vld [vmem:[%s1713_s3 + $0xf8] sm:$0xff] }
 0x1f2   :  { %v1065_v4 = vpop.eup %1064  ;;  %v175_v5 = vsub.f32 1.5, %v174_v63  ;;  %v170_v6 = vadd.f32 1e-05, %v168_v2 }
 0x1f3   :  { %v124_v7 = vmul.f32 %v1065_v4, %v112_v48  ;;  %v58_v8 = vmul.f32 %v1061_v47, %v57_v3  ;;  %vm130_vm12 = vweird.f32 %v1065_v4 }
 0x1f4   :  { %1066 = vrsqrt.f32 %v170_v6  ;;  %v176_v32 = vmul.f32 %v1063_v50, %v175_v5  ;;  %vm131_vm14 = vmor %vm129_vm13, %vm130_vm12  ;;  %vm187_vm1 = vweird.f32 %v170_v6 }
 0x1f5   :  { %v125_v1 = vmul.f32 %v1065_v4, %v124_v7  ;;  %v62_v9 = vsel %vm61_vm9, %v1061_v47, %v58_v8 }
 0x1f6   :  { %v1263_v10 = vmul.f32 %v62_v9, %v1223_v62  ;;  %v180_v11 = vsel %vm179_vm11, %v1063_v50, %v176_v32 }
 0x1f7   :  { %v126_v12 = vmul.f32 0.5, %v125_v1  ;;  %v224_v13 = vpop.xlane.xlu2 %223  ;;  %v221_v14 = vpop.xlane.xlu1 %220  ;;  %v191_v15 = vmul.f32 %v180_v11, %v1179_v37 }
 0x1f8   :  { %v226_v16 = vmul.f32 %v224_v13, %v1161_v26  ;;  %v225_v18 = vmul.f32 %v221_v14, %v1161_v26  ;;  %1015 = vmatmul.msk.f32.vlgmr.msra.gmra.mxu0 %vm22_vm0, %v1263_v10  ;;  %1019 = vmatmul.msk.f32.vlgmr.msra.gmra.mxu2 %vm22_vm0, %v1263_v10 }
 0x1f9   :  { %v127_v19 = vsub.f32 1.5, %v126_v12  ;;  %503 = vrot.lane.b32.xlu1 %v191_v15, %s1092_s24  ;;  %457 = vmatpush.msra.mxu0 %v408_v52 }
 0x1fa   :  { %v1067_v62 = vpop.eup %1066  ;;  %v228_v20 = vadd.f32 1e-05, %v226_v16  ;;  %v1273_v21 = vadd.f32 1e-05, %v225_v18 }
 0x1fb   :  { %v182_v37 = vmul.f32 %v1067_v62, %v170_v6  ;;  %v128_v22 = vmul.f32 %v1065_v4, %v127_v19  ;;  %vm188_vm15 = vweird.f32 %v1067_v62  ;;  %458 = vmatpush.msra.mxu0 %v405_v56  ;;  %v804_v56 = vld [vmem:[%s1713_s3 + $0xf0] sm:$0xff] }
 0x1fc   :  { %1068 = vrsqrt.f32 %v228_v20  ;;  %vm189_vm2 = vmor %vm187_vm1, %vm188_vm15  ;;  %vm245_vm3 = vweird.f32 %v228_v20  ;;  %vm235_vm7 = vweird.f32 %v1273_v21 }
 0x1fd   :  { %v183_v23 = vmul.f32 %v1067_v62, %v182_v37  ;;  %1070 = vrsqrt.f32 %v1273_v21  ;;  %v132_v0 = vsel %vm131_vm14, %v1065_v4, %v128_v22 }
 0x1fe   :  { %v134_v25 = vmul.f32 %v132_v0, %v1166_v31 }
 0x1ff   :  { %v184_v27 = vmul.f32 0.5, %v183_v23  ;;  %v279_v28 = vpop.xlane.xlu0 %278 }
 0x200   :  { %v283_v30 = vmul.f32 %v279_v28, %v1161_v26  ;;  %414 = vrot.lane.b32.xlu0 %v134_v25, %s1090_s22  ;;  %v499_v28 = vld [vmem:[%s1712_s1 + $0x80] sm:$0xff] }
 0x201   :  { %v185_v33 = vsub.f32 1.5, %v184_v27  ;;  %v495_v27 = vld [vmem:[%s1712_s1 + $0x60] sm:$0xff]  ;;  %548 = vmatpush.msrb.mxu3 %v499_v28 }
 0x202   :  { %v1069_v34 = vpop.eup %1068  ;;  %v285_v35 = vadd.f32 1e-05, %v283_v30  ;;  %v497_v30 = vld [vmem:[%s1712_s1 + $0x70] sm:$0xff]  ;;  %v822_v28 = vld [vmem:[%s1713_s3 + $0x180] sm:$0xff] }
 0x203   :  { %v1071_v36 = vpop.eup %1070  ;;  %v240_v31 = vmul.f32 %v1069_v34, %v228_v20  ;;  %v186_v38 = vmul.f32 %v1067_v62, %v185_v33  ;;  %vm246_vm4 = vweird.f32 %v1069_v34  ;;  %549 = vmatpush.msrb.mxu3 %v496_v29  ;;  %v587_v33 = vld [vmem:[%s1712_s1 + $0x98] sm:$0xff]  ;;  %v780_v29 = vld [vmem:[%s1713_s3 + $0x30] sm:$0xff] }
 0x204   :  { %v230_v39 = vmul.f32 %v1071_v36, %v1273_v21  ;;  %1072 = vrsqrt.f32 %v285_v35  ;;  %vm236_vm5 = vweird.f32 %v1071_v36  ;;  %vm247_vm6 = vmor %vm245_vm3, %vm246_vm4  ;;  %vm293_vm9 = vweird.f32 %v285_v35 }
 0x205   :  { %v241_v40 = vmul.f32 %v1069_v34, %v240_v31  ;;  %v190_v41 = vsel %vm189_vm2, %v1067_v62, %v186_v38  ;;  %vm237_vm8 = vmor %vm235_vm7, %vm236_vm5  ;;  %v586_v31 = vld [vmem:[%s1712_s1 + $0x90] sm:$0xff]  ;;  %v680_v38 = vld [vmem:[%s1712_s1 + $0xd8] sm:$0xff]  ;;  %vm1006_vm3 = vcmask 31744   ;;  %vm1009_vm4 = vcmask 25600  }
 0x206   :  { %v231_v43 = vmul.f32 %v1071_v36, %v230_v39  ;;  %v192_v44 = vmul.f32 %v190_v41, %v1186_v42  ;;  %v588_v39 = vld [vmem:[%s1712_s1 + $0xa0] sm:$0xff] }
 0x207   :  { %v242_v46 = vmul.f32 0.5, %v241_v40  ;;  %v48_v47 = vpop.xlane.xlu1 %47  ;;  %v682_v40 = vld [vmem:[%s1712_s1 + $0xe8] sm:$0xff]  ;;  %v677_v41 = vld [vmem:[%s1712_s1 + $0xc0] sm:$0xff] }
 0x208   :  { %v232_v48 = vmul.f32 0.5, %v231_v43  ;;  %v50_v50 = vmul.f32 %v48_v47, %v1161_v26  ;;  %505 = vrot.lane.b32.xlu2 %v192_v44, %s1092_s24  ;;  %v679_v44 = vld [vmem:[%s1712_s1 + $0xd0] sm:$0xff]  ;;  %v678_v47 = vld [vmem:[%s1712_s1 + $0xc8] sm:$0xff] }
 0x209   :  { %v243_v42 = vsub.f32 1.5, %v242_v46  ;;  %v681_v46 = vld [vmem:[%s1712_s1 + $0xe0] sm:$0xff] }
 0x20a   :  { %v1073_v59 = vpop.eup %1072  ;;  %v233_v60 = vsub.f32 1.5, %v232_v48  ;;  %v52_v61 = vadd.f32 1e-05, %v50_v50 }
 0x20b   :  { %v288_v63 = vmul.f32 %v1073_v59, %v285_v35  ;;  %v244_v2 = vmul.f32 %v1069_v34, %v243_v42  ;;  %vm294_vm10 = vweird.f32 %v1073_v59  ;;  %v591_v35 = vld [vmem:[%s1712_s1 + $0xb8] sm:$0xff] }
 0x20c   :  { %1074 = vrsqrt.f32 %v52_v61  ;;  %v234_v3 = vmul.f32 %v1071_v36, %v233_v60  ;;  %vm295_vm11 = vmor %vm293_vm9, %vm294_vm10  ;;  %vm69_vm13 = vweird.f32 %v52_v61  ;;  %v803_v60 = vld [vmem:[%s1713_s3 + $0xe8] sm:$0xff] }
 0x20d   :  { %v289_v4 = vmul.f32 %v1073_v59, %v288_v63  ;;  %v248_v5 = vsel %vm247_vm6, %v1069_v34, %v244_v2  ;;  %v589_v34 = vld [vmem:[%s1712_s1 + $0xa8] sm:$0xff]  ;;  %v800_v63 = vld [vmem:[%s1713_s3 + $0xd0] sm:$0xff]  ;;  %v801_v2 = vld [vmem:[%s1713_s3 + $0xd8] sm:$0xff] }
 0x20e   :  { %v250_v6 = vmul.f32 %v248_v5, %v1200_v49  ;;  %v238_v7 = vsel %vm237_vm8, %v1071_v36, %v234_v3  ;;  %v798_v3 = vld [vmem:[%s1713_s3 + $0xc0] sm:$0xff]  ;;  %v796_v5 = vld [vmem:[%s1713_s3 + $0xb0] sm:$0xff] }
 0x20f   :  { %v290_v8 = vmul.f32 0.5, %v289_v4  ;;  %v282_v32 = vpop.xlane.xlu1 %281  ;;  %v249_v1 = vmul.f32 %v238_v7, %v1193_v45  ;;  %v799_v4 = vld [vmem:[%s1713_s3 + $0xc8] sm:$0xff]  ;;  %v797_v7 = vld [vmem:[%s1713_s3 + $0xb8] sm:$0xff] }
 0x210   :  { %v284_v9 = vmul.f32 %v282_v32, %v1161_v26  ;;  %596 = vrot.lane.b32.xlu1 %v250_v6, %s1091_s23  ;;  %v836_v6 = vld [vmem:[%s1713_s3 + $0x1f0] sm:$0xff]  ;;  %v794_v32 = vld [vmem:[%s1713_s3 + $0xa0] sm:$0xff] }
 0x211   :  { %v291_v11 = vsub.f32 1.5, %v290_v8  ;;  %594 = vrot.lane.b32.xlu0 %v249_v1, %s1091_s23  ;;  %v834_v8 = vld [vmem:[%s1713_s3 + $0x1e0] sm:$0xff]  ;;  %v795_v1 = vld [vmem:[%s1713_s3 + $0xa8] sm:$0xff] }
 0x212   :  { %v1075_v12 = vpop.eup %1074  ;;  %v286_v13 = vadd.f32 1e-05, %v284_v9  ;;  %v792_v9 = vld [vmem:[%s1713_s3 + $0x90] sm:$0xff] }
 0x213   :  { %v64_v14 = vmul.f32 %v1075_v12, %v52_v61  ;;  %v292_v15 = vmul.f32 %v1073_v59, %v291_v11  ;;  %vm70_vm12 = vweird.f32 %v1075_v12  ;;  %v832_v11 = vld [vmem:[%s1713_s3 + $0x1d0] sm:$0xff] }
 0x214   :  { %1076 = vrsqrt.f32 %v286_v13  ;;  %vm71_vm14 = vmor %vm69_vm13, %vm70_vm12  ;;  %vm303_vm1 = vweird.f32 %v286_v13 }
 0x215   :  { %v65_v49 = vmul.f32 %v1075_v12, %v64_v14  ;;  %v296_v16 = vsel %vm295_vm11, %v1073_v59, %v292_v15  ;;  %v802_v59 = vld [vmem:[%s1713_s3 + $0xe0] sm:$0xff] }
 0x216   :  { %v307_v18 = vmul.f32 %v296_v16, %v1207_v53  ;;  %v790_v14 = vld [vmem:[%s1713_s3 + $0x80] sm:$0xff]  ;;  %v852_v16 = vld [vmem:[%s1713_s3 + $0x270] sm:$0xff] }
 0x217   :  { %v66_v45 = vmul.f32 0.5, %v65_v49  ;;  %v830_v15 = vld [vmem:[%s1713_s3 + $0x1c0] sm:$0xff]  ;;  %v791_v49 = vld [vmem:[%s1713_s3 + $0x88] sm:$0xff] }
 0x219   :  { %v67_v19 = vsub.f32 1.5, %v66_v45  ;;  %685 = vrot.lane.b32.xlu0 %v307_v18, %s1093_s0  ;;  %v788_v18 = vld [vmem:[%s1713_s3 + $0x70] sm:$0xff] }
 0x21a   :  { %v1077_v26 = vpop.eup %1076  ;;  %v828_v45 = vld [vmem:[%s1713_s3 + $0x1b0] sm:$0xff] }
 0x21b   :  { %v298_v62 = vmul.f32 %v1077_v26, %v286_v13  ;;  %v68_v20 = vmul.f32 %v1075_v12, %v67_v19  ;;  %vm304_vm15 = vweird.f32 %v1077_v26  ;;  %v789_v19 = vld [vmem:[%s1713_s3 + $0x78] sm:$0xff] }
 0x21c   :  { %vm305_vm2 = vmor %vm303_vm1, %vm304_vm15 }
 0x21d   :  { %v299_v21 = vmul.f32 %v1077_v26, %v298_v62  ;;  %v72_v37 = vsel %vm71_vm14, %v1075_v12, %v68_v20  ;;  %v793_v12 = vld [vmem:[%s1713_s3 + $0x98] sm:$0xff]  ;;  %v786_v62 = vld [vmem:[%s1713_s3 + $0x60] sm:$0xff] }
 0x21e   :  { %v74_v22 = vmul.f32 %v72_v37, %v1237_v17  ;;  %v498_v17 = vld [vmem:[%s1712_s1 + $0x78] sm:$0xff]  ;;  %v787_v37 = vld [vmem:[%s1713_s3 + $0x68] sm:$0xff] }
 0x21f   :  { %v300_v23 = vmul.f32 0.5, %v299_v21  ;;  %525 = vmatpush.msrb.mxu2 %v498_v17  ;;  %v826_v21 = vld [vmem:[%s1713_s3 + $0x1a0] sm:$0xff] }
 0x220   :  { %1016 = vmatmul.msk.f32.gmra.mxu0 %vm22_vm0, %v74_v22  ;;  %1018 = vmatmul.msk.f32.vlgmr.msra.gmra.mxu1 %vm22_vm0, %v74_v22  ;;  %v846_v17 = vld [vmem:[%s1713_s3 + $0x240] sm:$0xff] }
 0x221   :  { %v301_v53 = vsub.f32 1.5, %v300_v23  ;;  %1020 = vmatmul.msk.f32.gmra.mxu2 %vm22_vm0, %v74_v22  ;;  %616 = vmatpush.msra.mxu1 %v589_v34  ;;  %v848_v22 = vld [vmem:[%s1713_s3 + $0x250] sm:$0xff] }
 0x222   :  { %526 = vmatpush.msrb.mxu2 %v495_v27  ;;  %v782_v27 = vld [vmem:[%s1713_s3 + $0x40] sm:$0xff] }
 0x223   :  { %v302_v0 = vmul.f32 %v1077_v26, %v301_v53  ;;  %617 = vmatpush.msra.mxu1 %v586_v31  ;;  %v784_v53 = vld [vmem:[%s1713_s3 + $0x50] sm:$0xff]  ;;  %v818_v31 = vld [vmem:[%s1713_s3 + $0x160] sm:$0xff] }
 0x225   :  { %v306_v24 = vsel %vm305_vm2, %v1077_v26, %v302_v0  ;;  %v850_v26 = vld [vmem:[%s1713_s3 + $0x260] sm:$0xff]  ;;  %v824_v0 = vld [vmem:[%s1713_s3 + $0x190] sm:$0xff] }
 0x226   :  { %v308_v25 = vmul.f32 %v306_v24, %v1216_v58  ;;  %v590_v58 = vld [vmem:[%s1712_s1 + $0xb0] sm:$0xff]  ;;  %v785_v24 = vld [vmem:[%s1713_s3 + $0x58] sm:$0xff] }
 0x227   :  { %639 = vmatpush.msra.mxu2 %v590_v58  ;;  %v783_v58 = vld [vmem:[%s1713_s3 + $0x48] sm:$0xff] }
 0x228   :  { %1017 = vmatmul.msk.f32.vlgmr.msrb.gmra.mxu0 %vm22_vm0, %v1263_v10  ;;  %687 = vrot.lane.b32.xlu1 %v308_v25, %s1093_s0  ;;  %v500_v10 = vld [vmem:[%s1712_s1 + $0x88] sm:$0xff] }
 0x229   :  { %571 = vmatpush.msrb.mxu0 %v500_v10  ;;  %640 = vmatpush.msra.mxu2 %v587_v33  ;;  %v844_v10 = vld [vmem:[%s1713_s3 + $0x230] sm:$0xff]  ;;  %v781_v33 = vld [vmem:[%s1713_s3 + $0x38] sm:$0xff] }
 0x22b   :  { %572 = vmatpush.msrb.mxu0 %v497_v30  ;;  %v820_v30 = vld [vmem:[%s1713_s3 + $0x170] sm:$0xff] }
 0x262   :  { %v413_v36 = vpop.permute.xlu0 %412  ;;  %v506_v50 = vpop.permute.xlu2 %505 }
 0x263   :  { %1021 = vmatmul.msk.f32.vlgmr.msra.gmra.mxu3 %vm22_vm0, %v413_v36  ;;  %1023 = vmatmul.msk.f32.vlgmr.msra.gmra.mxu0 %vm22_vm0, %v413_v36 }
 0x264   :  { %1025 = vmatmul.msk.f32.vlgmr.msrb.gmra.mxu1 %vm22_vm0, %v413_v36  ;;  %662 = vmatpush.msra.mxu3 %v591_v35  ;;  %v842_v35 = vld [vmem:[%s1713_s3 + $0x220] sm:$0xff] }
 0x265   :  { %707 = vmatpush.msra.mxu0 %v680_v38  ;;  %730 = vmatpush.msrb.mxu1 %v681_v46  ;;  %v778_v36 = vld [vmem:[%s1713_s3 + $0x20] sm:$0xff]  ;;  %v777_v46 = vld [vmem:[%s1713_s3 + $0x18] sm:$0xff] }
 0x266   :  { %663 = vmatpush.msra.mxu3 %v588_v39  ;;  %v779_v39 = vld [vmem:[%s1713_s3 + $0x28] sm:$0xff] }
 0x267   :  { %708 = vmatpush.msra.mxu0 %v677_v41  ;;  %731 = vmatpush.msrb.mxu1 %v678_v47 }
 0x26b   :  { %v504_v43 = vpop.permute.xlu1 %503 }
 0x26c   :  { %1027 = vmatmul.msk.f32.vlgmr.msrb.gmra.mxu2 %vm22_vm0, %v504_v43 }
 0x26d   :  { %753 = vmatpush.msrb.mxu2 %v682_v40  ;;  %v840_v40 = vld [vmem:[%s1713_s3 + $0x210] sm:$0xff] }
 0x26f   :  { %754 = vmatpush.msrb.mxu2 %v679_v44  ;;  %v816_v44 = vld [vmem:[%s1713_s3 + $0x150] sm:$0xff] }
 0x272   :  { %v415_v48 = vpop.permute.xlu0 %414 }
 0x273   :  { %1022 = vmatmul.msk.f32.gmra.mxu3 %vm22_vm0, %v415_v48  ;;  %1024 = vmatmul.msk.f32.gmra.mxu0 %vm22_vm0, %v415_v48 }
 0x274   :  { %1026 = vmatmul.msk.f32.gmra.mxu1 %vm22_vm0, %v415_v48  ;;  %1028 = vmatmul.msk.f32.gmra.mxu2 %vm22_vm0, %v506_v50  ;;  %v838_v48 = vld [vmem:[%s1713_s3 + $0x200] sm:$0xff] }
 0x275   :  { %v1403_v55 = vpop.f32.mrf.mxu0 }
 0x27b   :  { %1029 = vmatmul.msk.f32.vlgmr.msrb.gmra.mxu3 %vm22_vm0, %v504_v43  ;;  %1031 = vmatmul.msk.f32.vlgmr.msrb.gmra.mxu0 %vm22_vm0, %v504_v43  ;;  %v1487_v20 = vpop.f32.mrf.mxu2  ;;  %v776_v43 = vld [vmem:[%s1713_s3 + $0x10] sm:$0xff] }
 0x27c   :  { %867 = vmatpush.msrb.mxu3 %v804_v56  ;;  %890 = vmatpush.msrb.mxu0 %v836_v6  ;;  %v835_v56 = vld [vmem:[%s1713_s3 + $0x1e8] sm:$0xff]  ;;  %v806_v6 = vld [vmem:[%s1713_s3 + $0x100] sm:$0xff] }
 0x27e   :  { %868 = vmatpush.msrb.mxu3 %v802_v59  ;;  %891 = vmatpush.msrb.mxu0 %v834_v8  ;;  %v1615_v8 = vld [vmem:[%s1714_s2] sm:$0x7] }
 0x280   :  { %869 = vmatpush.msrb.mxu3 %v800_v63  ;;  %892 = vmatpush.msrb.mxu0 %v832_v11  ;;  %v851_v11 = vld [vmem:[%s1713_s3 + $0x268] sm:$0xff] }
 0x282   :  { %v597_v52 = vpop.permute.xlu1 %596  ;;  %870 = vmatpush.msrb.mxu3 %v798_v3  ;;  %893 = vmatpush.msrb.mxu0 %v830_v15  ;;  %v808_v3 = vld [vmem:[%s1713_s3 + $0x110] sm:$0xff] }
 0x283   :  { %v595_v51 = vpop.permute.xlu0 %594  ;;  %1030 = vmatmul.msk.f32.gmra.mxu3 %vm22_vm0, %v506_v50  ;;  %1032 = vmatmul.msk.f32.gmra.mxu0 %vm22_vm0, %v506_v50  ;;  %v774_v50 = vld [vmem:[%s1713_s3] sm:$0xff] }
 0x284   :  { %1033 = vmatmul.msk.f32.vlgmr.msra.gmra.mxu1 %vm22_vm0, %v595_v51  ;;  %1035 = vmatmul.msk.f32.vlgmr.msra.gmra.mxu2 %vm22_vm0, %v595_v51 }
 0x285   :  { %936 = vmatpush.msra.mxu2 %v805_v57  ;;  %871 = vmatpush.msrb.mxu3 %v796_v5  ;;  %v810_v57 = vld [vmem:[%s1713_s3 + $0x120] sm:$0xff] }
 0x286   :  { %921 = vmatpush.msra.mxu1 %v852_v16  ;;  %894 = vmatpush.msrb.mxu0 %v828_v45  ;;  %v823_v16 = vld [vmem:[%s1713_s3 + $0x188] sm:$0xff] }
 0x287   :  { %937 = vmatpush.msra.mxu2 %v803_v60  ;;  %872 = vmatpush.msrb.mxu3 %v794_v32  ;;  %v833_v60 = vld [vmem:[%s1713_s3 + $0x1d8] sm:$0xff]  ;;  %v827_v32 = vld [vmem:[%s1713_s3 + $0x1a8] sm:$0xff] }
 0x288   :  { %922 = vmatpush.msra.mxu1 %v850_v26  ;;  %895 = vmatpush.msrb.mxu0 %v826_v21  ;;  %v847_v26 = vld [vmem:[%s1713_s3 + $0x248] sm:$0xff] }
 0x289   :  { %938 = vmatpush.msra.mxu2 %v801_v2  ;;  %873 = vmatpush.msrb.mxu3 %v792_v9  ;;  %v825_v9 = vld [vmem:[%s1713_s3 + $0x198] sm:$0xff]  ;;  %v819_v21 = vld [vmem:[%s1713_s3 + $0x168] sm:$0xff] }
 0x28a   :  { %923 = vmatpush.msra.mxu1 %v848_v22  ;;  %896 = vmatpush.msrb.mxu0 %v824_v0  ;;  %v843_v22 = vld [vmem:[%s1713_s3 + $0x228] sm:$0xff]  ;;  %v841_v0 = vld [vmem:[%s1713_s3 + $0x218] sm:$0xff] }
 0x28b   :  { %v686_v54 = vpop.permute.xlu0 %685  ;;  %1037 = vmatmul.msk.f32.vlgmr.msra.gmra.mxu3 %vm22_vm0, %v595_v51  ;;  %939 = vmatpush.msra.mxu2 %v799_v4  ;;  %v814_v51 = vld [vmem:[%s1713_s3 + $0x140] sm:$0xff]  ;;  %v831_v4 = vld [vmem:[%s1713_s3 + $0x1c8] sm:$0xff] }
 0x28c   :  { %1034 = vmatmul.msk.f32.gmra.mxu1 %vm22_vm0, %v597_v52  ;;  %1036 = vmatmul.msk.f32.gmra.mxu2 %vm22_vm0, %v597_v52 }
 0x28d   :  { %1039 = vmatmul.msk.f32.vlgmr.msra.gmra.mxu0 %vm22_vm0, %v686_v54  ;;  %940 = vmatpush.msra.mxu2 %v797_v7  ;;  %v829_v7 = vld [vmem:[%s1713_s3 + $0x1b8] sm:$0xff] }
 0x28e   :  { %874 = vmatpush.msrb.mxu3 %v790_v14  ;;  %924 = vmatpush.msra.mxu1 %v846_v17  ;;  %v392_v14 = vperm.slane %v1615_v8, 0 }
 0x28f   :  { %941 = vmatpush.msra.mxu2 %v795_v1  ;;  %897 = vmatpush.msrb.mxu0 %v822_v28  ;;  %v853_v1 = vld [vmem:[%s1713_s3 + $0x278] sm:$0xff]  ;;  %v815_v28 = vld [vmem:[%s1713_s3 + $0x148] sm:$0xff] }
 0x290   :  { %875 = vmatpush.msrb.mxu3 %v788_v18  ;;  %925 = vmatpush.msra.mxu1 %v844_v10  ;;  %v849_v18 = vld [vmem:[%s1713_s3 + $0x258] sm:$0xff] }
 0x291   :  { %942 = vmatpush.msra.mxu2 %v793_v12  ;;  %898 = vmatpush.msrb.mxu0 %v820_v30  ;;  %v813_v30 = vld [vmem:[%s1713_s3 + $0x138] sm:$0xff] }
 0x292   :  { %876 = vmatpush.msrb.mxu3 %v786_v62  ;;  %926 = vmatpush.msra.mxu1 %v842_v35  ;;  %v398_v62 = vadd.f32 %v392_v14, %v1403_v55  ;;  %v817_v55 = vld [vmem:[%s1713_s3 + $0x158] sm:$0xff] }
 0x293   :  { %1038 = vmatmul.msk.f32.gmra.mxu3 %vm22_vm0, %v597_v52  ;;  %943 = vmatpush.msra.mxu2 %v791_v49  ;;  %v775_v52 = vld [vmem:[%s1713_s3 + $0x8] sm:$0xff] }
 0x294   :  { %1041 = vmatmul.msk.f32.vlgmr.msrb.gmra.mxu1 %vm22_vm0, %v686_v54  ;;  %1043 = vmatmul.msk.f32.vlgmr.msrb.gmra.mxu2 %vm22_vm0, %v686_v54  ;;  %v837_v54 = vld [vmem:[%s1713_s3 + $0x1f8] sm:$0xff] }
 0x295   :  { %944 = vmatpush.msra.mxu2 %v789_v19  ;;  %877 = vmatpush.msrb.mxu3 %v784_v53  ;;  %v821_v19 = vld [vmem:[%s1713_s3 + $0x178] sm:$0xff] }
 0x296   :  { %899 = vmatpush.msrb.mxu0 %v818_v31  ;;  %927 = vmatpush.msra.mxu1 %v840_v40 }
 0x297   :  { %945 = vmatpush.msra.mxu2 %v787_v37  ;;  %878 = vmatpush.msrb.mxu3 %v782_v27  ;;  %v845_v37 = vld [vmem:[%s1713_s3 + $0x238] sm:$0xff] }
 0x298   :  { %900 = vmatpush.msrb.mxu0 %v816_v44  ;;  %928 = vmatpush.msra.mxu1 %v838_v48  ;;  %v807_v48 = vld [vmem:[%s1713_s3 + $0x108] sm:$0xff] }
 0x299   :  { %946 = vmatpush.msra.mxu2 %v785_v24  ;;  %879 = vmatpush.msrb.mxu3 %v780_v29 }
 0x29a   :  { %v688_v42 = vpop.permute.xlu1 %687  ;;  %901 = vmatpush.msrb.mxu0 %v814_v51  ;;  %959 = vmatpush.msrb.mxu1 %v837_v54 }
 0x29b   :  { %1040 = vmatmul.msk.f32.gmra.mxu0 %vm22_vm0, %v688_v42  ;;  %947 = vmatpush.msra.mxu2 %v783_v58  ;;  %v393_v58 = vperm.slane %v1615_v8, 1 }
 0x29c   :  { %1042 = vmatmul.msk.f32.gmra.mxu1 %vm22_vm0, %v688_v42  ;;  %1044 = vmatmul.msk.f32.gmra.mxu2 %vm22_vm0, %v688_v42  ;;  %v812_v42 = vld [vmem:[%s1713_s3 + $0x130] sm:$0xff]  ;;  %vm860_vm0 = vcmask 523264  }
 0x29d   :  { %v1417_v61 = vpop.f32.mrf.mxu0  ;;  %v1509_v25 = vpop.f32.mrf.mxu1  ;;  %948 = vmatpush.msra.mxu2 %v781_v33  ;;  %880 = vmatpush.msrb.mxu3 %v778_v36  ;;  %v839_v33 = vld [vmem:[%s1713_s3 + $0x208] sm:$0xff] }
 0x29e   :  { %902 = vmatpush.msrb.mxu0 %v812_v42  ;;  %960 = vmatpush.msrb.mxu1 %v835_v56  ;;  %v402_v42 = vadd.f32 %v393_v58, %v1509_v25 }
 0x29f   :  { %949 = vmatpush.msra.mxu2 %v779_v39  ;;  %881 = vmatpush.msrb.mxu3 %v776_v43  ;;  %v394_v39 = vperm.slane %v1615_v8, 2  ;;  %v809_v43 = vld [vmem:[%s1713_s3 + $0x118] sm:$0xff] }
 0x2a0   :  { %903 = vmatpush.msrb.mxu0 %v810_v57  ;;  %961 = vmatpush.msrb.mxu1 %v833_v60 }
 0x2a1   :  { %950 = vmatpush.msra.mxu2 %v777_v46  ;;  %882 = vmatpush.msrb.mxu3 %v774_v50  ;;  %v400_v50 = vadd.f32 %v394_v39, %v1487_v20 }
 0x2a2   :  { %904 = vmatpush.msrb.mxu0 %v808_v3  ;;  %962 = vmatpush.msrb.mxu1 %v831_v4 }
 0x2a3   :  { %951 = vmatpush.msra.mxu2 %v775_v52  ;;  %990 = vmatpush.msra.mxu3 %v853_v1 }
 0x2a4   :  { %v1535_v34 = vpop.f32.mrf.mxu2  ;;  %905 = vmatpush.msrb.mxu0 %v806_v6  ;;  %963 = vmatpush.msrb.mxu1 %v829_v7 }
 0x2a5   :  { %v1458_v13 = vpop.f32.mrf.mxu0  ;;  %991 = vmatpush.msra.mxu3 %v851_v11  ;;  %v403_v25 = vadd.f32 %v394_v39, %v1535_v34 }
 0x2a6   :  { %964 = vmatpush.msrb.mxu1 %v827_v32  ;;  %v399_v35 = vadd.f32 %v393_v58, %v1458_v13  ;;  %v401_v13 = vadd.f32 %v392_v14, %v1417_v61 }
 0x2a7   :  { %992 = vmatpush.msra.mxu3 %v849_v18 }
 0x2a8   :  { %965 = vmatpush.msrb.mxu1 %v825_v9 }
 0x2a9   :  { %993 = vmatpush.msra.mxu3 %v847_v26 }
 0x2aa   :  { %966 = vmatpush.msrb.mxu1 %v823_v16 }
 0x2ab   :  { %994 = vmatpush.msra.mxu3 %v845_v37 }
 0x2ac   :  { %967 = vmatpush.msrb.mxu1 %v821_v19 }
 0x2ad   :  { %995 = vmatpush.msra.mxu3 %v843_v22 }
 0x2ae   :  { %968 = vmatpush.msrb.mxu1 %v819_v21 }
 0x2af   :  { %996 = vmatpush.msra.mxu3 %v841_v0 }
 0x2b0   :  { %969 = vmatpush.msrb.mxu1 %v817_v55 }
 0x2b1   :  { %997 = vmatpush.msra.mxu3 %v839_v33 }
 0x2b2   :  { %970 = vmatpush.msrb.mxu1 %v815_v28 }
 0x2b4   :  { %971 = vmatpush.msrb.mxu1 %v813_v30 }
 0x2e0   :  { %v1498_v23 = vpop.f32.mrf.mxu0 }
 0x2e1   :  { %v1565_v47 = vpop.f32.mrf.mxu1  ;;  %v490_v40 = vadd.f32 %v1498_v23, %v399_v35 }
 0x2e2   :  { %v491_v56 = vadd.f32 %v1565_v47, %v400_v50 }
 0x2e6   :  { %v1546_v38 = vpop.f32.mrf.mxu3 }
 0x2e7   :  { %v489_v53 = vadd.f32 %v1546_v38, %v398_v62  ;;  %v811_v38 = vld [vmem:[%s1713_s3 + $0x128] sm:$0xff] }
 0x2e8   :  { %972 = vmatpush.msrb.mxu1 %v811_v38 }
 0x2ea   :  { %973 = vmatpush.msrb.mxu1 %v809_v43 }
 0x2ec   :  { %974 = vmatpush.msrb.mxu1 %v807_v48 }
 0x2ef   :  { %v528_v59 = vpop.f32.mrf.mxu2 }
 0x2f0   :  { %v1554_v41 = vpop.f32.mrf.mxu0  ;;  %v580_v24 = vadd.f32 %v528_v59, %v489_v53 }
 0x2f1   :  { %v1604_v5 = vpop.f32.mrf.mxu1  ;;  %v493_v59 = vadd.f32 %v1554_v41, %v402_v42 }
 0x2f2   :  { %v494_v41 = vadd.f32 %v1604_v5, %v403_v25 }
 0x2f6   :  { %v1594_v63 = vpop.f32.mrf.mxu3 }
 0x2f7   :  { %v1630_v15 = vpop.f32.mrf.mxu2  ;;  %v492_v23 = vadd.f32 %v1594_v63, %v401_v13 }
 0x2f8   :  { %v1596_v2 = vpop.f32.mrf.mxu0 }
 0x2f9   :  { %v582_v60 = vadd.f32 %v1596_v2, %v491_v56  ;;  %v583_v20 = vadd.f32 %v1630_v15, %v492_v23 }
 0x2fe   :  { %v551_v12 = vpop.f32.mrf.mxu3 }
 0x2ff   :  { %v581_v44 = vadd.f32 %v551_v12, %v490_v40 }
 0x300   :  { %v1632_v49 = vpop.f32.mrf.mxu0 }
 0x301   :  { %v619_v45 = vpop.f32.mrf.mxu1  ;;  %v585_v12 = vadd.f32 %v1632_v49, %v494_v41  ;;  %v854_v49 = vld [vmem:[%s1715_s4] sm:$0x3] }
 0x302   :  { %v671_v10 = vadd.f32 %v619_v45, %v580_v24  ;;  %v856_v19 = vperm.slane %v854_v49, 0  ;;  %v857_v28 = vperm.slane %v854_v49, 1 }
 0x306   :  { %v554_v17 = vpop.f32.mrf.mxu3 }
 0x307   :  { %v642_v27 = vpop.f32.mrf.mxu2  ;;  %v584_v3 = vadd.f32 %v554_v17, %v493_v59 }
 0x308   :  { %v672_v51 = vadd.f32 %v642_v27, %v581_v44 }
 0x309   :  { %v622_v29 = vpop.f32.mrf.mxu1 }
 0x30a   :  { %v710_v36 = vpop.f32.mrf.mxu0  ;;  %v674_v4 = vadd.f32 %v622_v29, %v583_v20 }
 0x30b   :  { %v762_v31 = vadd.f32 %v710_v36, %v671_v10 }
 0x30d   :  { %1078 = vtanh.f32 %v762_v31 }
 0x30e   :  { %v665_v52 = vpop.f32.mrf.mxu3 }
 0x30f   :  { %v645_v46 = vpop.f32.mrf.mxu2  ;;  %v673_v63 = vadd.f32 %v665_v52, %v582_v60 }
 0x310   :  { %v675_v7 = vadd.f32 %v645_v46, %v584_v3 }
 0x311   :  { %v733_v54 = vpop.f32.mrf.mxu1 }
 0x312   :  { %v763_v57 = vadd.f32 %v733_v54, %v672_v51 }
 0x313   :  { %v1079_v61 = vpop.eup %1078 }
 0x314   :  { %1080 = vtanh.f32 %v763_v57  ;;  %883 = vmatmul.f32.vlgmr.msrb.gmra.mxu3 %v1079_v61  ;;  %952 = vmatmul.f32.vlgmr.msra.gmra.mxu2 %v1079_v61 }
 0x316   :  { %v668_v11 = vpop.f32.mrf.mxu3 }
 0x317   :  { %v756_v6 = vpop.f32.mrf.mxu2  ;;  %v676_v14 = vadd.f32 %v668_v11, %v585_v12 }
 0x318   :  { %v764_v47 = vadd.f32 %v756_v6, %v673_v63  ;;  %v713_v8 = vpop.f32.mrf.mxu0 }
 0x319   :  { %v765_v32 = vadd.f32 %v713_v8, %v674_v4  ;;  %v736_v1 = vpop.f32.mrf.mxu1 }
 0x31a   :  { %v1081_v9 = vpop.eup %1080  ;;  %1082 = vtanh.f32 %v764_v47  ;;  %v766_v2 = vadd.f32 %v736_v1, %v675_v7 }
 0x31b   :  { %1084 = vtanh.f32 %v765_v32  ;;  %906 = vmatmul.f32.vlgmr.msrb.gmra.mxu0 %v1081_v9 }
 0x31c   :  { %1086 = vtanh.f32 %v766_v2 }
 0x31f   :  { %v759_v15 = vpop.f32.mrf.mxu2 }
 0x320   :  { %v1083_v34 = vpop.eup %1082  ;;  %v767_v16 = vadd.f32 %v759_v15, %v676_v14 }
 0x321   :  { %v1085_v18 = vpop.eup %1084  ;;  %1045 = vmatmul.msk.f32.vlgmr.msra.gmra.mxu1 %vm860_vm0, %v1083_v34 }
 0x322   :  { %v1087_v45 = vpop.eup %1086  ;;  %1088 = vtanh.f32 %v767_v16  ;;  %886 = vmatmul.f32.gmra.mxu3 %v1085_v18  ;;  %955 = vmatmul.f32.gmra.mxu2 %v1085_v18 }
 0x323   :  { %909 = vmatmul.f32.gmra.mxu0 %v1087_v45 }
 0x328   :  { %v1089_v5 = vpop.eup %1088 }
 0x329   :  { %1046 = vmatmul.msk.f32.gmra.mxu1 %vm860_vm0, %v1089_v5 }
 0x32a   :  { %1047 = vmatmul.msk.f32.vlgmr.msra.gmra.mxu3 %vm860_vm0, %v1083_v34 }
 0x331   :  { %975 = vmatmul.f32.vlgmr.msrb.gmra.mxu1 %v1081_v9 }
 0x332   :  { %1048 = vmatmul.msk.f32.gmra.mxu3 %vm860_vm0, %v1089_v5 }
 0x339   :  { %978 = vmatmul.f32.gmra.mxu1 %v1087_v45 }
 0x397   :  { %v884_v26 = vpop.f32.mrf.mxu3  ;;  %v953_v58 = vpop.f32.mrf.mxu2 }
 0x398   :  { %v885_v62 = vadd.f32 %v884_v26, %v856_v19  ;;  %v907_v21 = vpop.f32.mrf.mxu0  ;;  %v954_v29 = vadd.f32 %v953_v58, %v857_v28 }
 0x39a   :  { %v908_v37 = vadd.f32 %v907_v21, %v885_v62 }
 0x39e   :  { %v930_v22 = vpop.f32.mrf.mxu1 }
 0x39f   :  { %v931_v53 = vadd.f32 %v930_v22, %v908_v37 }
 0x3a0   :  { %v910_v17 = vpop.f32.mrf.mxu0 }
 0x3a1   :  { %1005 = vst [vmem:[%s1716_s5] sm:$0xff] %v931_v53 }
 0x3a5   :  { %v887_v55 = vpop.f32.mrf.mxu3  ;;  %v956_v31 = vpop.f32.mrf.mxu2 }
 0x3a6   :  { %v888_v0 = vadd.f32 %v887_v55, %v856_v19  ;;  %v933_v24 = vpop.f32.mrf.mxu1  ;;  %v957_v38 = vadd.f32 %v956_v31, %v857_v28 }
 0x3a8   :  { %v911_v27 = vadd.f32 %v910_v17, %v888_v0 }
 0x3aa   :  { %v934_v10 = vadd.f32 %v933_v24, %v911_v27 }
 0x3ac   :  { %1008 = vst [vmem:[%s1716_s5 + $0x10] sm:$0x3] %v934_v10 }
 0x3ad   :  { %v999_v33 = vpop.f32.mrf.mxu3 }
 0x3ae   :  { %v976_v30 = vpop.f32.mrf.mxu1 }
 0x3af   :  { %v977_v35 = vadd.f32 %v976_v30, %v954_v29 }
 0x3b1   :  { %v1000_v36 = vadd.f32 %v999_v33, %v977_v35 }
 0x3b3   :  { %1007 = vst.msk [vmem:[%s1716_s5 + $0x8] sm:$0xff] %vm1006_vm3, %v1000_v36 }
 0x3b5   :  { %v1002_v43 = vpop.f32.mrf.mxu3 }
 0x3b6   :  { %v979_v39 = vpop.f32.mrf.mxu1 }
 0x3b7   :  { %v980_v40 = vadd.f32 %v979_v39, %v957_v38 }
 0x3b9   :  { %v1003_v44 = vadd.f32 %v1002_v43, %v980_v40 }
 0x3bb   :  { %1010 = vst.msk [vmem:[%s1716_s5 + $0x18] sm:$0x3] %vm1009_vm4, %v1003_v44 }

// kernel: squeeze.7
= control target key start
LH: loop header
LB: loop body
LE: loop exit
PB: predicated region body
PF: predicated region fallthrough
CT: control target
= control target key end

     0   :  { %vm9_vm0 = vcmask 23552   ;;  %s289_s8 = smov 115   ;;  %s290_s13 = smov 125   ;;  %vm3_vm1 = vcmask 39936   ;;  %vm13_vm2 = vcmask 15360   ;;  %vm16_vm3 = vcmask 1048552   ;;  %s439_s0 = inlined_call_operand.vmem [shape: f32[4,33,5,1], index: 0, kind: input, shape index: {}]   ;;  %s440_s1 = inlined_call_operand.vmem [shape: f32[4,165], index: 1, kind: output, shape index: {}]  }
   0x1   :  { %v226_v0 = vld [vmem:[%s439_s0 + $0x17] ss:$40 sm:$0xf]   ;;  %v223_v1 = vld [vmem:[%s439_s0 + $0x19] ss:$40 sm:$0xf]  }
   0x2   :  { %26 = vrot.lane.b32.xlu1 %v226_v0, %s289_s8  ;;  %v224_v2 = vld [vmem:[%s439_s0 + $0x19] ss:$40 sm:$0xf]   ;;  %v227_v4 = vld [vmem:[%s439_s0 + $0x16] ss:$40 sm:$0xf]  }
   0x3   :  { %v10_v3 = vsel %vm9_vm0, %v224_v2, %v223_v1  ;;  %v228_v5 = vld [vmem:[%s439_s0 + $0x15] ss:$40 sm:$0xf]   ;;  %v225_v6 = vld [vmem:[%s439_s0 + $0x18] ss:$40 sm:$0xf]  }
   0x4   :  { %11 = vrot.lane.b32.xlu0 %v10_v3, %s290_s13  ;;  %s291_s20 = smov 105   ;;  %s292_s21 = smov 110   ;;  %v229_v7 = vld [vmem:[%s439_s0 + $0x14] ss:$40 sm:$0xf]   ;;  %vm22_vm4 = vcmask 1023936  }
   0x5   :  { %38 = vrot.lane.b32.xlu2 %v228_v5, %s291_s20  ;;  %s293_s22 = smov 120   ;;  %v231_v8 = vld [vmem:[%s439_s0 + $0x12] ss:$40 sm:$0xf]   ;;  %s294_s29 = smov 100   ;;  %vm28_vm5 = vcmask 982936  }
   0x6   :  { %v230_v9 = vld [vmem:[%s439_s0 + $0x13] ss:$40 sm:$0xf]   ;;  %s295_s30 = smov 90   ;;  %s296_s2 = smov 95   ;;  %vm34_vm6 = vcmask 941936  }
   0x7   :  { %v232_v10 = vld [vmem:[%s439_s0 + $0x11] ss:$40 sm:$0xf]   ;;  %v234_v11 = vld [vmem:[%s439_s0 + $0xf] ss:$40 sm:$0xf]  }
   0x8   :  { %v233_v12 = vld [vmem:[%s439_s0 + $0x10] ss:$40 sm:$0xf]   ;;  %s297_s9 = smov 85   ;;  %s298_s10 = smov 75   ;;  %vm40_vm7 = vcmask 900936  }
   0x9   :  { %s299_s11 = smov 80   ;;  %v235_v13 = vld [vmem:[%s439_s0 + $0xe] ss:$40 sm:$0xf]   ;;  %s300_s18 = smov 70   ;;  %vm46_vm8 = vcmask 859936  }
   0xa   :  { %32 = vrot.lane.b32.xlu1 %v227_v4, %s292_s21  ;;  %v237_v14 = vld [vmem:[%s439_s0 + $0xc] ss:$40 sm:$0xf]   ;;  %v236_v15 = vld [vmem:[%s439_s0 + $0xd] ss:$40 sm:$0xf]  }
   0xb   :  { %s301_s19 = smov 60   ;;  %s302_s20 = smov 65   ;;  %v238_v16 = vld [vmem:[%s439_s0 + $0xb] ss:$40 sm:$0xf]   ;;  %vm52_vm9 = vcmask 818936  }
   0xc   :  { %20 = vrot.lane.b32.xlu0 %v225_v6, %s293_s22  ;;  %v240_v17 = vld [vmem:[%s439_s0 + $0x9] ss:$40 sm:$0xf]   ;;  %v239_v18 = vld [vmem:[%s439_s0 + $0xa] ss:$40 sm:$0xf]  }
   0xd   :  { %44 = vrot.lane.b32.xlu2 %v229_v7, %s294_s29  ;;  %s303_s27 = smov 55   ;;  %s304_s28 = smov 45   ;;  %v241_v19 = vld [vmem:[%s439_s0 + $0x8] ss:$40 sm:$0xf]   ;;  %vm58_vm10 = vcmask 777936  }
   0xe   :  { %s305_s29 = smov 50   ;;  %v243_v20 = vld [vmem:[%s439_s0 + $0x20] ss:$40 sm:$0xf]   ;;  %s306_s7 = smov 40   ;;  %vm64_vm11 = vcmask 736936  }
   0xf   :  { %v242_v21 = vld [vmem:[%s439_s0 + $0x7] ss:$40 sm:$0xf]   ;;  %s307_s8 = smov 32   ;;  %s309_s16 = smov 30   ;;  %vm70_vm12 = vcmask 695936  }
  0x10   :  { %v244_v22 = vld [vmem:[%s439_s0 + $0x6] ss:$40 sm:$0xf]   ;;  %v246_v23 = vld [vmem:[%s439_s0 + $0x5] ss:$40 sm:$0xf]  }
  0x11   :  { %v245_v24 = vld [vmem:[%s439_s0 + $0x1f] ss:$40 sm:$0xf]   ;;  %s310_s17 = smov 25   ;;  %s312_s25 = smov 22   ;;  %vm76_vm13 = vcmask 654936  }
  0x12   :  { %56 = vrot.lane.b32.xlu1 %v231_v8, %s295_s30  ;;  %v247_v25 = vld [vmem:[%s439_s0 + $0x1e] ss:$40 sm:$0xf]   ;;  %v249_v26 = vld [vmem:[%s439_s0 + $0x1d] ss:$40 sm:$0xf]  }
  0x13   :  { %v248_v27 = vld [vmem:[%s439_s0 + $0x4] ss:$40 sm:$0xf]   ;;  %s313_s26 = smov 17   ;;  %s315_s5 = smov 15   ;;  %vm82_vm14 = vcmask 613936  }
  0x14   :  { %50 = vrot.lane.b32.xlu0 %v230_v9, %s296_s2  ;;  %v250_v28 = vld [vmem:[%s439_s0 + $0x3] ss:$40 sm:$0xf]   ;;  %v252_v29 = vld [vmem:[%s439_s0 + $0x2] ss:$40 sm:$0xf]  }
  0x15   :  { %62 = vrot.lane.b32.xlu2 %v232_v10, %s297_s9  ;;  %s308_s9 = smov 35   ;;  %v251_v30 = vld [vmem:[%s439_s0 + $0x1c] ss:$40 sm:$0xf]   ;;  %s316_s6 = smov 10   ;;  %vm88_vm15 = vcmask 572936  }
  0x16   :  { %v253_v31 = vld [vmem:[%s439_s0 + $0x1b] ss:$40 sm:$0xf]   ;;  %v255_v32 = vld [vmem:[%s439_s0 + $0x1a] ss:$40 sm:$0xf]  }
  0x17   :  { %v254_v33 = vld [vmem:[%s439_s0 + $0x1] ss:$40 sm:$0xf]   ;;  %s318_s14 = smov 7   ;;  %s319_s15 = smov 2   ;;  %vm94_vm0 = vcmask 531936  }
  0x18   :  { %v2_v34 = vld [vmem:[%s439_s0] ss:$40 sm:$0xf]  }
  0x19   :  { %4 = vst.msk [vmem:[#allocation0] sm:$0xf] %vm3_vm1, %v2_v34   ;;  %vm100_vm1 = vcmask 490936  }
  0x1a   :  { %74 = vrot.lane.b32.xlu1 %v234_v11, %s298_s10 }
  0x1c   :  { %68 = vrot.lane.b32.xlu0 %v233_v12, %s299_s11 }
  0x1d   :  { %80 = vrot.lane.b32.xlu2 %v235_v13, %s300_s18  ;;  %s311_s18 = smov 27  }
  0x22   :  { %92 = vrot.lane.b32.xlu1 %v237_v14, %s301_s19 }
  0x24   :  { %86 = vrot.lane.b32.xlu0 %v236_v15, %s302_s20 }
  0x25   :  { %98 = vrot.lane.b32.xlu2 %v238_v16, %s303_s27  ;;  %s314_s27 = smov 20  }
  0x2a   :  { %110 = vrot.lane.b32.xlu1 %v240_v17, %s304_s28 }
  0x2c   :  { %104 = vrot.lane.b32.xlu0 %v239_v18, %s305_s29 }
  0x2d   :  { %116 = vrot.lane.b32.xlu2 %v241_v19, %s306_s7  ;;  %s317_s7 = smov 12  }
  0x32   :  { %128 = vrot.lane.b32.xlu1 %v243_v20, %s307_s8 }
  0x34   :  { %122 = vrot.lane.b32.xlu0 %v242_v21, %s308_s9 }
  0x35   :  { %135 = vrot.lane.b32.xlu2 %v244_v22, %s309_s16  ;;  %s320_s16 = smov 5  }
  0x3a   :  { %148 = vrot.lane.b32.xlu1 %v246_v23, %s310_s17 }
  0x3c   :  { %141 = vrot.lane.b32.xlu0 %v245_v24, %s311_s18 }
  0x3d   :  { %154 = vrot.lane.b32.xlu2 %v247_v25, %s312_s25 }
  0x42   :  { %167 = vrot.lane.b32.xlu1 %v249_v26, %s313_s26 }
  0x44   :  { %161 = vrot.lane.b32.xlu0 %v248_v27, %s314_s27 }
  0x45   :  { %174 = vrot.lane.b32.xlu2 %v250_v28, %s315_s5 }
  0x4a   :  { %187 = vrot.lane.b32.xlu1 %v252_v29, %s316_s6 }
  0x4c   :  { %180 = vrot.lane.b32.xlu0 %v251_v30, %s317_s7 }
  0x4d   :  { %193 = vrot.lane.b32.xlu2 %v253_v31, %s318_s14 }
  0x52   :  { %206 = vrot.lane.b32.xlu1 %v255_v32, %s319_s15 }
  0x54   :  { %200 = vrot.lane.b32.xlu0 %v254_v33, %s320_s16 }
  0x5f   :  { %v39_v35 = vpop.permute.xlu2 %38  }
  0x67   :  { %v45_v36 = vpop.permute.xlu2 %44  }
  0x6f   :  { %v63_v37 = vpop.permute.xlu2 %62  }
  0x74   :  { %v27_v38 = vpop.permute.xlu1 %26  }
  0x76   :  { %v12_v39 = vpop.permute.xlu0 %11  }
  0x77   :  { %15 = vst.msk [vmem:[#allocation0 + $0x8] sm:$0xf] %vm13_vm2, %v12_v39   ;;  %v81_v40 = vpop.permute.xlu2 %80   ;;  %vm106_vm2 = vcmask 449936  }
  0x78   :  { %17 = vst.msk [vmem:[#allocation0] sm:$0xf] %vm16_vm3, %v12_v39   ;;  %vm112_vm3 = vcmask 408936  }
  0x7c   :  { %v33_v41 = vpop.permute.xlu1 %32  }
  0x7e   :  { %v21_v42 = vpop.permute.xlu0 %20  }
  0x7f   :  { %23 = vst.msk [vmem:[#allocation0] sm:$0xf] %vm22_vm4, %v21_v42   ;;  %v99_v43 = vpop.permute.xlu2 %98   ;;  %vm118_vm4 = vcmask 367936  }
  0x80   :  { %29 = vst.msk [vmem:[#allocation0] sm:$0xf] %vm28_vm5, %v27_v38   ;;  %vm130_vm5 = vcmask 302336  }
  0x81   :  { %35 = vst.msk [vmem:[#allocation0] sm:$0xf] %vm34_vm6, %v33_v41   ;;  %vm124_vm6 = vcmask 326936  }
  0x82   :  { %41 = vst.msk [vmem:[#allocation0] sm:$0xf] %vm40_vm7, %v39_v35   ;;  %vm137_vm7 = vcmask 285936  }
  0x83   :  { %47 = vst.msk [vmem:[#allocation0] sm:$0xf] %vm46_vm8, %v45_v36   ;;  %vm150_vm8 = vcmask 244936  }
  0x84   :  { %v57_v44 = vpop.permute.xlu1 %56  }
  0x86   :  { %v51_v45 = vpop.permute.xlu0 %50  }
  0x87   :  { %53 = vst.msk [vmem:[#allocation0] sm:$0xf] %vm52_vm9, %v51_v45   ;;  %v117_v46 = vpop.permute.xlu2 %116   ;;  %vm143_vm9 = vcmask 261336  }
  0x88   :  { %59 = vst.msk [vmem:[#allocation0] sm:$0xf] %vm58_vm10, %v57_v44   ;;  %vm156_vm10 = vcmask 220336  }
  0x89   :  { %65 = vst.msk [vmem:[#allocation0] sm:$0xf] %vm64_vm11, %v63_v37   ;;  %vm169_vm11 = vcmask 179336  }
  0x8c   :  { %v75_v47 = vpop.permute.xlu1 %74  }
  0x8e   :  { %v69_v48 = vpop.permute.xlu0 %68  }
  0x8f   :  { %71 = vst.msk [vmem:[#allocation0] sm:$0xf] %vm70_vm12, %v69_v48   ;;  %v136_v49 = vpop.permute.xlu2 %135   ;;  %vm163_vm12 = vcmask 203936  }
  0x90   :  { %77 = vst.msk [vmem:[#allocation0] sm:$0xf] %vm76_vm13, %v75_v47   ;;  %vm176_vm13 = vcmask 162936  }
  0x91   :  { %83 = vst.msk [vmem:[#allocation0] sm:$0xf] %vm82_vm14, %v81_v40   ;;  %vm189_vm14 = vcmask 121936  }
  0x94   :  { %v93_v50 = vpop.permute.xlu1 %92  }
  0x96   :  { %v87_v51 = vpop.permute.xlu0 %86  }
  0x97   :  { %89 = vst.msk [vmem:[#allocation0] sm:$0xf] %vm88_vm15, %v87_v51   ;;  %v155_v52 = vpop.permute.xlu2 %154   ;;  %vm182_vm15 = vcmask 138336  }
  0x98   :  { %95 = vst.msk [vmem:[#allocation0] sm:$0xf] %vm94_vm0, %v93_v50   ;;  %vm195_vm0 = vcmask 97336  }
  0x99   :  { %101 = vst.msk [vmem:[#allocation0] sm:$0xf] %vm100_vm1, %v99_v43   ;;  %vm208_vm1 = vcmask 56336  }
  0x9c   :  { %v111_v53 = vpop.permute.xlu1 %110  }
  0x9e   :  { %v105_v54 = vpop.permute.xlu0 %104  }
  0x9f   :  { %107 = vst.msk [vmem:[#allocation0] sm:$0xf] %vm106_vm2, %v105_v54   ;;  %v175_v55 = vpop.permute.xlu2 %174   ;;  %vm202_vm2 = vcmask 80936  }
  0xa0   :  { %113 = vst.msk [vmem:[#allocation0] sm:$0xf] %vm112_vm3, %v111_v53  }
  0xa1   :  { %119 = vst.msk [vmem:[#allocation0] sm:$0xf] %vm118_vm4, %v117_v46  }
  0xa4   :  { %v129_v56 = vpop.permute.xlu1 %128  }
  0xa5   :  { %132 = vst.msk [vmem:[#allocation0 + $0x8] sm:$0xf] %vm130_vm5, %v129_v56  }
  0xa6   :  { %v123_v57 = vpop.permute.xlu0 %122  }
  0xa7   :  { %125 = vst.msk [vmem:[#allocation0] sm:$0xf] %vm124_vm6, %v123_v57   ;;  %v194_v58 = vpop.permute.xlu2 %193  }
  0xa8   :  { %138 = vst.msk [vmem:[#allocation0] sm:$0xf] %vm137_vm7, %v136_v49  }
  0xac   :  { %v149_v59 = vpop.permute.xlu1 %148  }
  0xad   :  { %151 = vst.msk [vmem:[#allocation0] sm:$0xf] %vm150_vm8, %v149_v59  }
  0xae   :  { %v142_v60 = vpop.permute.xlu0 %141  }
  0xaf   :  { %145 = vst.msk [vmem:[#allocation0 + $0x8] sm:$0xf] %vm143_vm9, %v142_v60  }
  0xb0   :  { %158 = vst.msk [vmem:[#allocation0 + $0x8] sm:$0xf] %vm156_vm10, %v155_v52  }
  0xb4   :  { %v168_v61 = vpop.permute.xlu1 %167  }
  0xb5   :  { %171 = vst.msk [vmem:[#allocation0 + $0x8] sm:$0xf] %vm169_vm11, %v168_v61  }
  0xb6   :  { %v162_v62 = vpop.permute.xlu0 %161  }
  0xb7   :  { %164 = vst.msk [vmem:[#allocation0] sm:$0xf] %vm163_vm12, %v162_v62  }
  0xb8   :  { %177 = vst.msk [vmem:[#allocation0] sm:$0xf] %vm176_vm13, %v175_v55  }
  0xbc   :  { %v188_v63 = vpop.permute.xlu1 %187  }
  0xbd   :  { %190 = vst.msk [vmem:[#allocation0] sm:$0xf] %vm189_vm14, %v188_v63  }
  0xbe   :  { %v181_v0 = vpop.permute.xlu0 %180  }
  0xbf   :  { %184 = vst.msk [vmem:[#allocation0 + $0x8] sm:$0xf] %vm182_vm15, %v181_v0  }
  0xc0   :  { %197 = vst.msk [vmem:[#allocation0 + $0x8] sm:$0xf] %vm195_vm0, %v194_v58  }
  0xc4   :  { %v207_v1 = vpop.permute.xlu1 %206  }
  0xc5   :  { %210 = vst.msk [vmem:[#allocation0 + $0x8] sm:$0xf] %vm208_vm1, %v207_v1  }
  0xc6   :  { %v201_v2 = vpop.permute.xlu0 %200  }
  0xc7   :  { %203 = vst.msk [vmem:[#allocation0] sm:$0xf] %vm202_vm2, %v201_v2  }
  0xcc   :  { %v218_v3 = vld [vmem:[#allocation0 + $0x8] sm:$0xf] }
  0xcd   :  { %256 = vst [vmem:[%s440_s1 + $0x4] sm:$0xf] %v218_v3 }
  0xce   :  { %v213_v4 = vld [vmem:[#allocation0] sm:$0xf] }
  0xcf   :  { %216 = vst [vmem:[%s440_s1] sm:$0xf] %v213_v4 }

// kernel: reverse.1
= control target key start
LH: loop header
LB: loop body
LE: loop exit
PB: predicated region body
PF: predicated region fallthrough
CT: control target
= control target key end

     0   :  { %v2_v0 = vlaneseq  ;;  %s160_s0 = inlined_call_operand.vmem [shape: f32[4,5,31], index: 0, kind: input, shape index: {}]   ;;  %s161_s1 = inlined_call_operand.vmem [shape: f32[4,5,31], index: 1, kind: output, shape index: {}]  }
   0x1   :  { %v43_v2 = vld [vmem:[%s160_s0 + $0x10] sm:$0xff]  ;;  %v39_v3 = vld [vmem:[%s160_s0] sm:$0xff]  ;;  %v45_v4 = vld [vmem:[%s160_s0 + $0x18] sm:$0xff] }
   0x2   :  { %v3_v1 = vsub.s32 30, %v2_v0  ;;  %v41_v5 = vld [vmem:[%s160_s0 + $0x8] sm:$0xff] }
   0x4   :  { %4 = vset.pattern.permute.xlu0 %v3_v1  ;;  %125 = vset.pattern.permute.xlu1 %v3_v1 }
   0x5   :  { %63 = vperm.xlu1 %125, %v43_v2   ;;  %51 = vperm.xlu0 %4, %v39_v3  }
   0xd   :  { %69 = vperm.xlu1 %125, %v45_v4   ;;  %57 = vperm.xlu0 %4, %v41_v5  }
  0x77   :  { %v64_v6 = vpop.permute.xlu1 %63  ;;  %v52_v7 = vpop.permute.xlu0 %51 }
  0x78   :  { %111 = vst [vmem:[%s161_s1 + $0x10] sm:$0xff] %v64_v6 }
  0x79   :  { %107 = vst [vmem:[%s161_s1] sm:$0xff] %v52_v7 }
  0x7f   :  { %v70_v8 = vpop.permute.xlu1 %69  ;;  %v58_v9 = vpop.permute.xlu0 %57 }
  0x80   :  { %113 = vst [vmem:[%s161_s1 + $0x18] sm:$0xff] %v70_v8 }
  0x81   :  { %109 = vst [vmem:[%s161_s1 + $0x8] sm:$0xff] %v58_v9 }

// kernel: bsrnn_forward.13
= control target key start
LH: loop header
LB: loop body
LE: loop exit
PB: predicated region body
PF: predicated region fallthrough
CT: control target
= control target key end

     0   :  { %vm27_vm0 = vcmask 1043456   ;;  %vm28_vm1 = vcmask 302084   ;;  %s131_s0 = inlined_call_operand.vmem [shape: f32[4,165], index: 0, kind: input, shape index: {}]   ;;  %s132_s1 = inlined_call_operand.vmem [shape: f32[4,165], index: 1, kind: input, shape index: {}]   ;;  %s133_s2 = inlined_call_operand.vmem [shape: f32[4,165], index: 2, kind: input, shape index: {}]   ;;  %s134_s3 = inlined_call_operand.vmem [shape: f32[4,165], index: 3, kind: input, shape index: {}]   ;;  %s135_s4 = inlined_call_operand.vmem [shape: f32[4,165], index: 4, kind: output, shape index: {0}]   ;;  %s136_s5 = inlined_call_operand.vmem [shape: f32[4,165], index: 5, kind: output, shape index: {1}]   ;;  %s137_s6 = inlined_call_operand.vmem [shape: f32[4,165], index: 6, kind: output, shape index: {2}]  }
   0x1   :  { %v20_v0 = vld [vmem:[%s131_s0] sm:$0xff]  ;;  %vm112_vm2 = vmor %vm28_vm1, %vm27_vm0 }
   0x2   :  { %v21_v1 = vld [vmem:[%s132_s1] sm:$0xff]  ;;  %v35_v5 = vmul.f32 %v20_v0, %v20_v0 }
   0x3   :  { %v22_v2 = vld [vmem:[%s133_s2] sm:$0xff]  ;;  %v36_v6 = vmul.f32 %v21_v1, %v21_v1 }
   0x4   :  { %v23_v3 = vld [vmem:[%s134_s3] sm:$0xff]  ;;  %v24_v4 = vmul.f32 %v22_v2, %v20_v0  ;;  %v32_v7 = vmul.f32 %v22_v2, %v21_v1 }
   0x5   :  { %v25_v8 = vmul.f32 %v23_v3, %v21_v1  ;;  %v31_v9 = vmul.f32 %v23_v3, %v20_v0  ;;  %v37_v11 = vadd.f32 %v36_v6, %v35_v5 }
   0x7   :  { %v26_v12 = vsub.f32 %v24_v4, %v25_v8  ;;  %v33_v13 = vadd.f32 %v32_v7, %v31_v9  ;;  %63 = vrsqrt.f32 %v37_v11  ;;  %vm45_vm3 = vcmp.eq.f32.partialorder %v37_v11, inf }
   0x8   :  { %v48_v20 = vand.u32 2147483648, %v37_v11  ;;  %vm47_vm4 = vcmp.eq.f32.partialorder %v37_v11, 0.0 }
   0x9   :  { %30 = vst.msk [vmem:[%s135_s4] sm:$0xff] %vm112_vm2, %v26_v12 }
   0xa   :  { %34 = vst.msk [vmem:[%s136_s5] sm:$0xff] %vm112_vm2, %v33_v13 }
   0xd   :  { %v64_v14 = vpop.eup %63 }
   0xe   :  { %v39_v15 = vmul.f32 %v64_v14, %v37_v11 }
  0x10   :  { %v40_v16 = vmul.f32 %v64_v14, %v39_v15 }
  0x12   :  { %v41_v17 = vmul.f32 0.5, %v40_v16 }
  0x14   :  { %v42_v18 = vsub.f32 1.5, %v41_v17 }
  0x16   :  { %v43_v19 = vmul.f32 %v64_v14, %v42_v18 }
  0x18   :  { %v44_v21 = vmul.f32 %v43_v19, %v37_v11 }
  0x1a   :  { %v46_v22 = vsel %vm45_vm3, %v37_v11, %v44_v21 }
  0x1b   :  { %v49_v23 = vsel %vm47_vm4, %v48_v20, %v46_v22 }
  0x1c   :  { %50 = vst.msk [vmem:[%s137_s6] sm:$0xff] %vm112_vm2, %v49_v23 }

</bundles_post_ra>
